<compile_context>
chip_gen: v7x
topology: tpu7x:2x2x1
jax: 0.10.0
libtpu: 0.0.40
codegen_flags: <defaults>
</compile_context>

<pallas_src>
import math

import numpy as np
import jax
import jax.numpy as jnp
from jax import lax
from jax.experimental import pallas as pl
from jax.experimental.pallas import tpu as pltpu

WINDOW_SIZE = 11
SIGMA = 1.5
C1 = 0.01 ** 2
C2 = 0.03 ** 2
_HIGHEST = jax.lax.Precision.HIGHEST


def _gaussian_1d(window_size=WINDOW_SIZE, sigma=SIGMA):
    """Identical math to the PyTorch gaussian() (note: centered at ws/2)."""
    g = np.array(
        [math.exp(-((x - window_size / 2) ** 2) / (2.0 * sigma ** 2))
         for x in range(window_size)],
        dtype=np.float32,
    )
    return (g / g.sum()).astype(np.float32)


def _gaussian_window_2d(window_size=WINDOW_SIZE, sigma=SIGMA):
    g = _gaussian_1d(window_size, sigma)
    return np.outer(g, g).astype(np.float32)


def _banded(n, g1d):
    """B[r, c] = g[c - r + pad] inside the band; zeros outside == zero 'same' pad."""
    ws = g1d.shape[0]
    pad = ws // 2
    m = np.zeros((n, n), dtype=np.float32)
    for r in range(n):
        for i in range(ws):
            c = r + i - pad
            if 0 <= c < n:
                m[r, c] = g1d[i]
    return m


def _choose_planes_per_block(n_planes, H, W):
    """Largest divisor of n_planes that keeps the VMEM working set small."""
    if H % 8 != 0:
        # Keep the in-kernel (P, H, W) -> (P*H, W) reshape a trivial squeeze.
        return 1
    bytes_per_plane = H * W * 4
    max_by_vmem = max(1, (1 << 20) // bytes_per_plane)  # ~1 MiB per input block
    max_by_band = max(1, 512 // H)                      # (P*H)^2 f32 band <= 1 MiB
    cap = max(1, min(n_planes, max_by_vmem, max_by_band))
    best = 1
    for d in range(1, cap + 1):
        if n_planes % d == 0:
            best = d
    return best


def _make_ssim_kernel(P, H, W):
    PH = P * H

    def kernel(x1_ref, x2_ref, gvb_ref, gh_ref, out_ref):
        # (P, H, W) -> (P*H, W): planes stacked along sublanes.
        a = x1_ref[...].reshape(PH, W)
        b = x2_ref[...].reshape(PH, W)
        gvb = gvb_ref[...]   # (PH, PH) block-diagonal vertical Gaussian band
        gh = gh_ref[...]     # (W, W)   horizontal Gaussian band

        def conv(x):
            # Horizontal then vertical separable pass, both on the MXU in f32.
            t = jnp.dot(x, gh, precision=_HIGHEST,
                        preferred_element_type=jnp.float32)
            return jnp.dot(gvb, t, precision=_HIGHEST,
                           preferred_element_type=jnp.float32)

        mu1 = conv(a)
        mu2 = conv(b)
        s11 = conv(a * a)
        s22 = conv(b * b)
        s12 = conv(a * b)

        mu1_sq = mu1 * mu1
        mu2_sq = mu2 * mu2
        mu1_mu2 = mu1 * mu2
        sigma1_sq = s11 - mu1_sq
        sigma2_sq = s22 - mu2_sq
        sigma12 = s12 - mu1_mu2

        ssim_map = ((2.0 * mu1_mu2 + C1) * (2.0 * sigma12 + C2)) / (
            (mu1_sq + mu2_sq + C1) * (sigma1_sq + sigma2_sq + C2))

        # Per-grid-step partial sum -> own output block (grid axis is parallel).
        out_ref[...] = jnp.full((1, 8, 128), jnp.sum(ssim_map), jnp.float32)

    return kernel


def ssim_pallas(img1, img2, window_size=WINDOW_SIZE, size_average=True):
    # TODO(synk): size_average=False branch not implemented.
    assert size_average, "only size_average=True (module default) is implemented"
    assert img1.shape == img2.shape
    N, C, H, W = img1.shape
    n_planes = N * C

    g1d = _gaussian_1d(window_size)
    P = _choose_planes_per_block(n_planes, H, W)
    G = n_planes // P

    gv = _banded(H, g1d)                                   # (H, H)  vertical
    gh = _banded(W, g1d).T.copy()                          # (W, W)  horizontal
    gvb = np.kron(np.eye(P, dtype=np.float32), gv)         # (P*H, P*H) block-diag

    x1 = img1.astype(jnp.float32).reshape(n_planes, H, W)
    x2 = img2.astype(jnp.float32).reshape(n_planes, H, W)

    kernel = _make_ssim_kernel(P, H, W)

    partials = pl.pallas_call(
        kernel,
        out_shape=jax.ShapeDtypeStruct((G, 8, 128), jnp.float32),
        grid_spec=pltpu.PrefetchScalarGridSpec(
            num_scalar_prefetch=0,
            grid=(G,),
            in_specs=[
                pl.BlockSpec((P, H, W), lambda g: (g, 0, 0)),
                pl.BlockSpec((P, H, W), lambda g: (g, 0, 0)),
                pl.BlockSpec((P * H, P * H), lambda g: (0, 0)),
                pl.BlockSpec((W, W), lambda g: (0, 0)),
            ],
            out_specs=pl.BlockSpec((1, 8, 128), lambda g: (g, 0, 0)),
        ),
        compiler_params=pltpu.CompilerParams(
            dimension_semantics=("parallel",)),
    )(x1, x2, jnp.asarray(gvb), jnp.asarray(gh))

    total = jnp.sum(partials[:, 0, 0])
    return total / jnp.float32(n_planes * H * W)


def ssim_reference(img1, img2, window_size=WINDOW_SIZE):
    """Plain-JAX reference mirroring the PyTorch _ssim (NCHW depthwise conv)."""
    N, C, H, W = img1.shape
    pad = window_size // 2
    win2d = jnp.asarray(_gaussian_window_2d(window_size))
    kernel = jnp.broadcast_to(win2d, (C, 1, window_size, window_size))

    def conv(x):
        return lax.conv_general_dilated(
            x, kernel, window_strides=(1, 1),
            padding=[(pad, pad), (pad, pad)],
            dimension_numbers=("NCHW", "OIHW", "NCHW"),
            feature_group_count=C,
            precision=_HIGHEST)

    img1 = img1.astype(jnp.float32)
    img2 = img2.astype(jnp.float32)
    mu1 = conv(img1)
    mu2 = conv(img2)
    mu1_sq = mu1 ** 2
    mu2_sq = mu2 ** 2
    mu1_mu2 = mu1 * mu2
    sigma1_sq = conv(img1 * img1) - mu1_sq
    sigma2_sq = conv(img2 * img2) - mu2_sq
    sigma12 = conv(img1 * img2) - mu1_mu2
    ssim_map = ((2 * mu1_mu2 + C1) * (2 * sigma12 + C2)) / (
        (mu1_sq + mu2_sq + C1) * (sigma1_sq + sigma2_sq + C2))
    return ssim_map.mean()


if __name__ == "__main__":
    key = jax.random.PRNGKey(0)
    k1, k2 = jax.random.split(key)
    img1 = jax.random.uniform(k1, (2, 4, 16, 16), dtype=jnp.float32)
    img2 = jax.random.uniform(k2, (2, 4, 16, 16), dtype=jnp.float32)

    out = jax.block_until_ready(ssim_pallas(img1, img2))
    ref = jax.block_until_ready(ssim_reference(img1, img2))
    assert np.allclose(np.asarray(out), np.asarray(ref), rtol=1e-4, atol=1e-5), (
        float(out), float(ref))
    print("KERNEL_OK")
</pallas_src>

<mosaic_0001>
module attributes {stable_mosaic.version = 11 : i64} {
  func.func @kernel(%arg0: i32, %arg1: memref<8x16x16xf32, #tpu.memory_space<vmem>>, %arg2: memref<8x16x16xf32, #tpu.memory_space<vmem>>, %arg3: memref<128x128xf32, #tpu.memory_space<vmem>>, %arg4: memref<16x16xf32, #tpu.memory_space<vmem>>, %arg5: memref<1x8x128xf32, #tpu.memory_space<vmem>>) attributes {dimension_semantics = [#tpu.dimension_semantics<parallel>], iteration_bounds = array<i64: 1>, scalar_prefetch = 0 : i64, scratch_operands = 0 : i64, tpu.core_type = #tpu.core_type<tc>, window_params = [{transform_indices = @transform_0, window_bounds = array<i64: 8, 16, 16>}, {transform_indices = @transform_1, window_bounds = array<i64: 8, 16, 16>}, {pipeline_mode = #tpu.pipeline_mode<synchronous>, transform_indices = @transform_2, window_bounds = array<i64: 128, 128>}, {pipeline_mode = #tpu.pipeline_mode<synchronous>, transform_indices = @transform_3, window_bounds = array<i64: 16, 16>}, {transform_indices = @transform_4, window_bounds = array<i64: 1, 8, 128>}]} {
    %c0 = arith.constant 0 : index
    %c0_0 = arith.constant 0 : index
    %c0_1 = arith.constant 0 : index
    %0 = vector.load %arg1[%c0, %c0_0, %c0_1] : memref<8x16x16xf32, #tpu.memory_space<vmem>>, vector<8x16x16xf32>
    %1 = vector.shape_cast %0 : vector<8x16x16xf32> to vector<128x16xf32>
    %c0_2 = arith.constant 0 : index
    %c0_3 = arith.constant 0 : index
    %c0_4 = arith.constant 0 : index
    %2 = vector.load %arg2[%c0_2, %c0_3, %c0_4] : memref<8x16x16xf32, #tpu.memory_space<vmem>>, vector<8x16x16xf32>
    %3 = vector.shape_cast %2 : vector<8x16x16xf32> to vector<128x16xf32>
    %c0_5 = arith.constant 0 : index
    %c0_6 = arith.constant 0 : index
    %4 = vector.load %arg3[%c0_5, %c0_6] : memref<128x128xf32, #tpu.memory_space<vmem>>, vector<128x128xf32>
    %c0_7 = arith.constant 0 : index
    %c0_8 = arith.constant 0 : index
    %5 = vector.load %arg4[%c0_7, %c0_8] : memref<16x16xf32, #tpu.memory_space<vmem>>, vector<16x16xf32>
    %cst = arith.constant dense<0.000000e+00> : vector<128x16xf32>
    %6 = tpu.matmul %1, %5, %cst {dimension_numbers = #tpu.dot_dimension_numbers<[1], [0], [0], [1], [0, 0, 1, 1], [], []>, precision = #tpu.contract_precision<fp32>} : vector<128x16xf32>, vector<16x16xf32>, vector<128x16xf32> -> vector<128x16xf32>
    %cst_9 = arith.constant dense<0.000000e+00> : vector<128x16xf32>
    %7 = tpu.matmul %4, %6, %cst_9 {dimension_numbers = #tpu.dot_dimension_numbers<[1], [0], [0], [1], [0, 0, 1, 1], [], []>, precision = #tpu.contract_precision<fp32>} : vector<128x128xf32>, vector<128x16xf32>, vector<128x16xf32> -> vector<128x16xf32>
    %cst_10 = arith.constant dense<0.000000e+00> : vector<128x16xf32>
    %8 = tpu.matmul %3, %5, %cst_10 {dimension_numbers = #tpu.dot_dimension_numbers<[1], [0], [0], [1], [0, 0, 1, 1], [], []>, precision = #tpu.contract_precision<fp32>} : vector<128x16xf32>, vector<16x16xf32>, vector<128x16xf32> -> vector<128x16xf32>
    %cst_11 = arith.constant dense<0.000000e+00> : vector<128x16xf32>
    %9 = tpu.matmul %4, %8, %cst_11 {dimension_numbers = #tpu.dot_dimension_numbers<[1], [0], [0], [1], [0, 0, 1, 1], [], []>, precision = #tpu.contract_precision<fp32>} : vector<128x128xf32>, vector<128x16xf32>, vector<128x16xf32> -> vector<128x16xf32>
    %10 = arith.mulf %1, %1 : vector<128x16xf32>
    %cst_12 = arith.constant dense<0.000000e+00> : vector<128x16xf32>
    %11 = tpu.matmul %10, %5, %cst_12 {dimension_numbers = #tpu.dot_dimension_numbers<[1], [0], [0], [1], [0, 0, 1, 1], [], []>, precision = #tpu.contract_precision<fp32>} : vector<128x16xf32>, vector<16x16xf32>, vector<128x16xf32> -> vector<128x16xf32>
    %cst_13 = arith.constant dense<0.000000e+00> : vector<128x16xf32>
    %12 = tpu.matmul %4, %11, %cst_13 {dimension_numbers = #tpu.dot_dimension_numbers<[1], [0], [0], [1], [0, 0, 1, 1], [], []>, precision = #tpu.contract_precision<fp32>} : vector<128x128xf32>, vector<128x16xf32>, vector<128x16xf32> -> vector<128x16xf32>
    %13 = arith.mulf %3, %3 : vector<128x16xf32>
    %cst_14 = arith.constant dense<0.000000e+00> : vector<128x16xf32>
    %14 = tpu.matmul %13, %5, %cst_14 {dimension_numbers = #tpu.dot_dimension_numbers<[1], [0], [0], [1], [0, 0, 1, 1], [], []>, precision = #tpu.contract_precision<fp32>} : vector<128x16xf32>, vector<16x16xf32>, vector<128x16xf32> -> vector<128x16xf32>
    %cst_15 = arith.constant dense<0.000000e+00> : vector<128x16xf32>
    %15 = tpu.matmul %4, %14, %cst_15 {dimension_numbers = #tpu.dot_dimension_numbers<[1], [0], [0], [1], [0, 0, 1, 1], [], []>, precision = #tpu.contract_precision<fp32>} : vector<128x128xf32>, vector<128x16xf32>, vector<128x16xf32> -> vector<128x16xf32>
    %16 = arith.mulf %1, %3 : vector<128x16xf32>
    %cst_16 = arith.constant dense<0.000000e+00> : vector<128x16xf32>
    %17 = tpu.matmul %16, %5, %cst_16 {dimension_numbers = #tpu.dot_dimension_numbers<[1], [0], [0], [1], [0, 0, 1, 1], [], []>, precision = #tpu.contract_precision<fp32>} : vector<128x16xf32>, vector<16x16xf32>, vector<128x16xf32> -> vector<128x16xf32>
    %cst_17 = arith.constant dense<0.000000e+00> : vector<128x16xf32>
    %18 = tpu.matmul %4, %17, %cst_17 {dimension_numbers = #tpu.dot_dimension_numbers<[1], [0], [0], [1], [0, 0, 1, 1], [], []>, precision = #tpu.contract_precision<fp32>} : vector<128x128xf32>, vector<128x16xf32>, vector<128x16xf32> -> vector<128x16xf32>
    %19 = arith.mulf %7, %7 : vector<128x16xf32>
    %20 = arith.mulf %9, %9 : vector<128x16xf32>
    %21 = arith.mulf %7, %9 : vector<128x16xf32>
    %22 = arith.subf %12, %19 : vector<128x16xf32>
    %23 = arith.subf %15, %20 : vector<128x16xf32>
    %24 = arith.subf %18, %21 : vector<128x16xf32>
    %cst_18 = arith.constant 2.000000e+00 : f32
    %25 = vector.broadcast %cst_18 : f32 to vector<128x16xf32>
    %26 = arith.mulf %25, %21 : vector<128x16xf32>
    %cst_19 = arith.constant 9.99999974E-5 : f32
    %27 = vector.broadcast %cst_19 : f32 to vector<128x16xf32>
    %28 = arith.addf %26, %27 : vector<128x16xf32>
    %cst_20 = arith.constant 2.000000e+00 : f32
    %29 = vector.broadcast %cst_20 : f32 to vector<128x16xf32>
    %30 = arith.mulf %29, %24 : vector<128x16xf32>
    %cst_21 = arith.constant 8.99999984E-4 : f32
    %31 = vector.broadcast %cst_21 : f32 to vector<128x16xf32>
    %32 = arith.addf %30, %31 : vector<128x16xf32>
    %33 = arith.mulf %28, %32 : vector<128x16xf32>
    %34 = arith.addf %19, %20 : vector<128x16xf32>
    %cst_22 = arith.constant 9.99999974E-5 : f32
    %35 = vector.broadcast %cst_22 : f32 to vector<128x16xf32>
    %36 = arith.addf %34, %35 : vector<128x16xf32>
    %37 = arith.addf %22, %23 : vector<128x16xf32>
    %cst_23 = arith.constant 8.99999984E-4 : f32
    %38 = vector.broadcast %cst_23 : f32 to vector<128x16xf32>
    %39 = arith.addf %37, %38 : vector<128x16xf32>
    %40 = arith.mulf %36, %39 : vector<128x16xf32>
    %41 = arith.divf %33, %40 : vector<128x16xf32>
    %42 = vector.shape_cast %41 : vector<128x16xf32> to vector<1x128x16xf32>
    %cst_24 = arith.constant dense<0.000000e+00> : vector<1xf32>
    %43 = vector.multi_reduction <add>, %42, %cst_24 [1, 2] : vector<1x128x16xf32> to vector<1xf32>
    %44 = vector.shape_cast %43 : vector<1xf32> to vector<1x1x1xf32>
    %45 = vector.extract %44[0, 0, 0] : f32 from vector<1x1x1xf32>
    %46 = vector.broadcast %45 : f32 to vector<1x8x128xf32>
    %c0_25 = arith.constant 0 : index
    %c0_26 = arith.constant 0 : index
    %c0_27 = arith.constant 0 : index
    %47 = vector.load %arg5[%c0_25, %c0_26, %c0_27] : memref<1x8x128xf32, #tpu.memory_space<vmem>>, vector<1x8x128xf32>
    tpu.vector_store %arg5[%c0_25, %c0_26, %c0_27], %46 {strides = array<i32>} : memref<1x8x128xf32, #tpu.memory_space<vmem>>, vector<1x8x128xf32>,
    return
  }
  func.func @transform_0(%arg0: i32) -> (i32, i32, i32) {
    %c0_i32 = arith.constant 0 : i32
    %c0_i32_0 = arith.constant 0 : i32
    %c0_i32_1 = arith.constant 0 : i32
    return %arg0, %c0_i32, %c0_i32_0 : i32, i32, i32
  }
  func.func @transform_1(%arg0: i32) -> (i32, i32, i32) {
    %c0_i32 = arith.constant 0 : i32
    %c0_i32_0 = arith.constant 0 : i32
    %c0_i32_1 = arith.constant 0 : i32
    return %arg0, %c0_i32, %c0_i32_0 : i32, i32, i32
  }
  func.func @transform_2(%arg0: i32) -> (i32, i32) {
    %c0_i32 = arith.constant 0 : i32
    %c0_i32_0 = arith.constant 0 : i32
    %c0_i32_1 = arith.constant 0 : i32
    return %c0_i32, %c0_i32_0 : i32, i32
  }
  func.func @transform_3(%arg0: i32) -> (i32, i32) {
    %c0_i32 = arith.constant 0 : i32
    %c0_i32_0 = arith.constant 0 : i32
    %c0_i32_1 = arith.constant 0 : i32
    return %c0_i32, %c0_i32_0 : i32, i32
  }
  func.func @transform_4(%arg0: i32) -> (i32, i32, i32) {
    %c0_i32 = arith.constant 0 : i32
    %c0_i32_0 = arith.constant 0 : i32
    %c0_i32_1 = arith.constant 0 : i32
    return %arg0, %c0_i32, %c0_i32_0 : i32, i32, i32
  }
}

</mosaic_0001>

<bundles_post_ra>
// kernel: tpu_custom_call.1
= control target key start
LH: loop header
LB: loop body
LE: loop exit
PB: predicated region body
PF: predicated region fallthrough
CT: control target
= control target key end

     0   :  { %9 = vsyncpa [#allocation3], 0  ;;  %s22601_s0 = inlined_call_operand.hbm [shape: f32[8,16,16], index: 0, kind: input, shape index: {}]   ;;  %s22602_s1 = inlined_call_operand.hbm [shape: f32[8,16,16], index: 1, kind: input, shape index: {}]   ;;  %s22603_s2 = inlined_call_operand.hbm [shape: f32[128,128], index: 2, kind: input, shape index: {}]   ;;  %s22604_s3 = inlined_call_operand.hbm [shape: f32[16,16], index: 3, kind: input, shape index: {}]   ;;  %s22605_s4 = inlined_call_operand.hbm [shape: f32[1,8,128], index: 4, kind: output, shape index: {}]  }
   0x1   :  { %10 = vsyncpa [#allocation6], 0 }
   0x2   :  { %11 = vsyncpa [#allocation9], 0 }
   0x3   :  { %12 = vsyncpa [#allocation4], 0  ;;  %s18830_s15 = smov [#allocation5]   ;;  %s18831_s17 = smov [#allocation2]  }
   0x4   :  { %s30_s16 = sshll.u32 %s18830_s15, 4  ;;  %s18_s18 = sshll.u32 %s18831_s17, 4  ;;  %s31_s16 = int_to_ptr.vmem [resolvable:$true] %s30_s16  ;;  %s18862_s18 = int_to_ptr.vmem [resolvable:$true] %s18_s18 }
   0x5   :  { %s18712_s21 = scalar_lea.hbm %s22602_s1, 2048 }
   0x6   :  { %p18713_p0 = scmp.ne.s32.totalorder %s22602_s1, %s18712_s21  ;;  %p18716_p1 = scmp.lt.u32.totalorder %s18712_s21, %s22602_s1 }
   0x8   :  { %p18718_p2 = pnand %p18716_p1, %p18713_p0 }
   0xa   :  { %18721 = shalt.err (!%p18718_p2)
}
   0xb   :  { %s18722_s26 = scalar_lea.vmem %s31_s16, 2048  ;;  %p18727_p4 = scmp.lt.s32.totalorder %s31_s16, %s31_s16 }
   0xc   :  { %p18723_p3 = scmp.ne.s32.totalorder %s31_s16, %s18722_s26  ;;  %p18728_p5 = scmp.lt.s32.totalorder %s18722_s26, %s18722_s26 }
   0xe   :  { %p18729_p6 = por %p18728_p5, %p18727_p4 }
  0x10   :  { %p18730_p7 = pnand %p18729_p6, %p18723_p3 }
  0x12   :  { %18733 = shalt.err (!%p18730_p7)
}
  0x13   :  { %s18832_s27 = smov 128   ;;  %s18833_s28 = smov 8  }
  0x14   :  { %36 = dma.hbm_to_vmem [thread:$0]  %s22602_s1, 2048, %s31_s16, [#allocation6], %s18832_s27, %s18832_s27, %s18833_s28  }
  0x15   :  { %s18734_s7 = scalar_lea.hbm %s22601_s0, 2048 }
  0x16   :  { %p18735_p8 = scmp.ne.s32.totalorder %s22601_s0, %s18734_s7  ;;  %p18738_p9 = scmp.lt.u32.totalorder %s18734_s7, %s22601_s0 }
  0x18   :  { %p18740_p10 = pnand %p18738_p9, %p18735_p8 }
  0x1a   :  { %18743 = shalt.err (!%p18740_p10)
}
  0x1b   :  { %s18744_s12 = scalar_lea.vmem %s18862_s18, 2048  ;;  %p18749_p12 = scmp.lt.s32.totalorder %s18862_s18, %s18862_s18 }
  0x1c   :  { %p18745_p11 = scmp.ne.s32.totalorder %s18862_s18, %s18744_s12  ;;  %p18750_p13 = scmp.lt.s32.totalorder %s18744_s12, %s18744_s12 }
  0x1e   :  { %p18751_p0 = por %p18750_p13, %p18749_p12 }
  0x20   :  { %p18752_p1 = pnand %p18751_p0, %p18745_p11 }
  0x22   :  { %18755 = shalt.err (!%p18752_p1)
}
  0x23   :  { %24 = dma.hbm_to_vmem [thread:$0]  %s22601_s0, 2048, %s18862_s18, [#allocation3], %s18832_s27, %s18832_s27, %s18833_s28  }
  0x24   :  { %s18834_s14 = smov [#allocation7]   ;;  %s18835_s16 = smov [#allocation8]  }
  0x25   :  { %s42_s15 = sshll.u32 %s18834_s14, 4  ;;  %s54_s17 = sshll.u32 %s18835_s16, 4  ;;  %s43_s15 = int_to_ptr.vmem [resolvable:$true] %s42_s15  ;;  %s18899_s17 = int_to_ptr.vmem [resolvable:$true] %s54_s17 }
  0x26   :  { %s18756_s21 = scalar_lea.hbm %s22603_s2, 2048 }
  0x27   :  { %p18757_p2 = scmp.ne.s32.totalorder %s22603_s2, %s18756_s21  ;;  %p18760_p3 = scmp.lt.u32.totalorder %s18756_s21, %s22603_s2 }
  0x29   :  { %p18762_p4 = pnand %p18760_p3, %p18757_p2 }
  0x2b   :  { %18765 = shalt.err (!%p18762_p4)
}
  0x2c   :  { %s18766_s0 = scalar_lea.vmem %s43_s15, 2048  ;;  %p18771_p6 = scmp.lt.s32.totalorder %s43_s15, %s43_s15 }
  0x2d   :  { %p18767_p5 = scmp.ne.s32.totalorder %s43_s15, %s18766_s0  ;;  %p18772_p7 = scmp.lt.s32.totalorder %s18766_s0, %s18766_s0 }
  0x2f   :  { %p18773_p8 = por %p18772_p7, %p18771_p6 }
  0x31   :  { %p18774_p9 = pnand %p18773_p8, %p18767_p5 }
  0x33   :  { %18777 = shalt.err (!%p18774_p9)
}
  0x34   :  { %48 = dma.hbm_to_vmem [thread:$0]  %s22603_s2, 2048, %s43_s15, [#allocation6], %s18832_s27, %s18832_s27, %s18833_s28  }
  0x35   :  { %s18778_s5 = scalar_lea.hbm %s22604_s3, 256 }
  0x36   :  { %p18779_p10 = scmp.ne.s32.totalorder %s22604_s3, %s18778_s5  ;;  %p18782_p11 = scmp.lt.u32.totalorder %s18778_s5, %s22604_s3 }
  0x38   :  { %p18784_p12 = pnand %p18782_p11, %p18779_p10 }
  0x3a   :  { %18787 = shalt.err (!%p18784_p12)
}
  0x3b   :  { %s18788_s10 = scalar_lea.vmem %s18899_s17, 256  ;;  %p18793_p0 = scmp.lt.s32.totalorder %s18899_s17, %s18899_s17 }
  0x3c   :  { %p18789_p13 = scmp.ne.s32.totalorder %s18899_s17, %s18788_s10  ;;  %p18794_p1 = scmp.lt.s32.totalorder %s18788_s10, %s18788_s10 }
  0x3e   :  { %p18795_p2 = por %p18794_p1, %p18793_p0 }
  0x40   :  { %p18796_p3 = pnand %p18795_p2, %p18789_p13 }
  0x42   :  { %18799 = shalt.err (!%p18796_p3)
}
  0x43   :  { %60 = dma.hbm_to_vmem [thread:$0]  %s22604_s3, 256, %s18899_s17, [#allocation9], %s18832_s27, %s18832_s27, %s18833_s28  }
  0x44   :  { %18822 = dma.done.wait [#allocation3], 2048  }
  0x45   :  { %18823 = vsyncadd [#allocation3], 4294965248 }
  0x46   :  { %18824 = dma.done.wait [#allocation6], 4096  }
  0x47   :  { %18825 = vsyncadd [#allocation6], 4294963200 }
  0x48   :  { %18826 = dma.done.wait [#allocation9], 256  }
  0x49   :  { %18827 = vsyncadd [#allocation9], 4294967040  ;;  %vm123_vm0 = vcmask 130048   ;;  %v121_v0 = vld [vmem:[#allocation8] sm:$0xff]  ;;  %v122_v1 = vld [vmem:[#allocation8 + $0x8] sm:$0xff]  ;;  %s18836_s3 = smov [#allocation10]  }
  0x4a   :  { %v18936_v2 = vld [vmem:[#allocation2] sm:$0xff]  ;;  %v173_v3 = vand.u32 4294901760, %v121_v0  ;;  %v176_v4 = vand.u32 4294901760, %v122_v1  ;;  %v18940_v6 = vld [vmem:[#allocation2 + $0x8] sm:$0xff]  ;;  %v18948_v10 = vld [vmem:[#allocation2 + $0x10] sm:$0xff]  ;;  %s12698_s27 = sshll.u32 %s18836_s3, 4  ;;  %s12699_s27 = int_to_ptr.vmem [resolvable:$true] %s12698_s27 }
  0x4b   :  { %v125_v5 = vsel %vm123_vm0, %v18936_v2, 0  ;;  %v18944_v8 = vld [vmem:[#allocation5 + $0x8] sm:$0xff]  ;;  %v128_v9 = vsel %vm123_vm0, %v18940_v6, 0  ;;  %v18965_v17 = vld [vmem:[#allocation2 + $0x18] sm:$0xff]  ;;  %v18967_v18 = vld [vmem:[#allocation2 + $0x20] sm:$0xff]  ;;  %v131_v20 = vsel %vm123_vm0, %v18948_v10, 0  ;;  %p18805_p5 = scmp.lt.s32.totalorder %s12699_s27, %s12699_s27 }
  0x4c   :  { %v18942_v7 = vand.u32 4294901760, %v125_v5  ;;  %v18950_v11 = vpack.c.bf16 %v176_v4, %v173_v3  ;;  %v18952_v12 = vand.u32 4294901760, %v128_v9  ;;  %v18956_v13 = vmul.f32 %v18944_v8, %v18940_v6  ;;  %v18979_v24 = vld [vmem:[#allocation2 + $0x28] sm:$0xff]  ;;  %v19009_v37 = vld [vmem:[#allocation2 + $0x30] sm:$0xff]  ;;  %v19011_v38 = vld [vmem:[#allocation2 + $0x38] sm:$0xff]  ;;  %s18800_s12 = scalar_lea.vmem %s12699_s27, 128 }
  0x4d   :  { %v18961_v15 = vsub.f32 %v121_v0, %v173_v3  ;;  %v18963_v16 = vsub.f32 %v122_v1, %v176_v4  ;;  %v18982_v26 = vand.u32 4294901760, %v131_v20  ;;  %v134_v27 = vsel %vm123_vm0, %v18965_v17, 0  ;;  %v19022_v47 = vld [vmem:[#allocation2 + $0x40] sm:$0xff]  ;;  %v19024_v48 = vld [vmem:[#allocation2 + $0x48] sm:$0xff]  ;;  %v19052_v61 = vld [vmem:[#allocation2 + $0x50] sm:$0xff]  ;;  %p18801_p4 = scmp.ne.s32.totalorder %s12699_s27, %s18800_s12  ;;  %p18806_p6 = scmp.lt.s32.totalorder %s18800_s12, %s18800_s12 }
  0x4e   :  { %23070 = vst [vmem:[#allocation15_spill] sm:$0xff] %v18956_v13  ;;  %v18959_v14 = vsub.f32 %v125_v5, %v18942_v7  ;;  %16730 = vmatprep.subr.bf16.mxu0 %v18950_v11  ;;  %v18971_v19 = vsub.f32 %v128_v9, %v18952_v12  ;;  %v137_v28 = vsel %vm123_vm0, %v18967_v18, 0  ;;  %v18997_v32 = vand.u32 4294901760, %v134_v27 }
  0x4f   :  { %16732 = vmatpush3.bf16.msra.mxu0 %v18950_v11  ;;  %v22617_v22 = vand.u32 4294901760, %v18961_v15  ;;  %v22616_v23 = vand.u32 4294901760, %v18963_v16  ;;  %v19003_v34 = vsub.f32 %v131_v20, %v18982_v26  ;;  %v19005_v35 = vand.u32 4294901760, %v137_v28  ;;  %v19069_v20 = vld [vmem:[#allocation2 + $0x58] sm:$0xff]  ;;  %p18807_p7 = por %p18806_p6, %p18805_p5 }
  0x50   :  { %v22615_v21 = vand.u32 4294901760, %v18959_v14  ;;  %v22613_v25 = vand.u32 4294901760, %v18971_v19  ;;  %v140_v36 = vsel %vm123_vm0, %v18979_v24, 0  ;;  %v19014_v42 = vsub.f32 %v134_v27, %v18997_v32  ;;  %v19071_v27 = vld [vmem:[#allocation2 + $0x60] sm:$0xff] }
  0x51   :  { %v403_v30 = vsub.f32 %v18961_v15, %v22617_v22  ;;  %v410_v31 = vsub.f32 %v18963_v16, %v22616_v23  ;;  %v22611_v44 = vand.u32 4294901760, %v19003_v34  ;;  %v19018_v45 = vsub.f32 %v137_v28, %v19005_v35  ;;  %p18808_p8 = pnand %p18807_p7, %p18801_p4 }
  0x52   :  { %v242_v29 = vsub.f32 %v18959_v14, %v22615_v21  ;;  %v252_v33 = vsub.f32 %v18971_v19, %v22613_v25  ;;  %v19020_v46 = vand.u32 4294901760, %v140_v36  ;;  %v22610_v50 = vand.u32 4294901760, %v19014_v42 }
  0x53   :  { %v404_v40 = vand.u32 4294901760, %v403_v30  ;;  %v411_v41 = vand.u32 4294901760, %v410_v31  ;;  %v143_v51 = vsel %vm123_vm0, %v19009_v37, 0  ;;  %v146_v52 = vsel %vm123_vm0, %v19011_v38, 0 }
  0x54   :  { %v243_v39 = vand.u32 4294901760, %v242_v29  ;;  %v253_v43 = vand.u32 4294901760, %v252_v33  ;;  %v262_v53 = vsub.f32 %v19003_v34, %v22611_v44  ;;  %v22609_v54 = vand.u32 4294901760, %v19018_v45 }
  0x55   :  { %v19026_v49 = vpack.c.bf16 %v411_v41, %v404_v40  ;;  %v19038_v55 = vsub.f32 %v140_v36, %v19020_v46  ;;  %v19040_v56 = vand.u32 4294901760, %v143_v51  ;;  %v272_v57 = vsub.f32 %v19014_v42, %v22610_v50  ;;  %v19088_v41 = vld [vmem:[#allocation2 + $0x68] sm:$0xff] }
  0x56   :  { %14213 = vmatprep.mubr.f32.mxu0 %v243_v39  ;;  %v19046_v58 = vand.u32 4294901760, %v146_v52  ;;  %v149_v59 = vsel %vm123_vm0, %v19022_v47, 0  ;;  %v152_v60 = vsel %vm123_vm0, %v19024_v48, 0  ;;  %v263_v62 = vand.u32 4294901760, %v262_v53  ;;  %23072 = vst [vmem:[#allocation17_spill] sm:$0xff] %v19088_v41 }
  0x57   :  { %23071 = vst [vmem:[#allocation16_spill] sm:$0xff] %v19026_v49  ;;  %14214 = vmatmul.mubr.f32.vlgmr.msra.gmra.mrb[0].mxu0 %v253_v43  ;;  %16734 = vmatprep.subr.bf16.mxu0 %v19026_v49  ;;  %v282_v63 = vsub.f32 %v19018_v45, %v22609_v54  ;;  %v22607_v0 = vand.u32 4294901760, %v19038_v55  ;;  %v19060_v1 = vsub.f32 %v143_v51, %v19040_v56  ;;  %v273_v3 = vand.u32 4294901760, %v272_v57 }
  0x58   :  { %16736 = vmatpush3.bf16.msra.mxu0 %v19026_v49  ;;  %v19063_v4 = vsub.f32 %v146_v52, %v19046_v58  ;;  %v19065_v5 = vand.u32 4294901760, %v149_v59  ;;  %v19067_v9 = vand.u32 4294901760, %v152_v60  ;;  %14216 = vmatprep.mubr.f32.mxu0 %v263_v62  ;;  %v155_v31 = vsel %vm123_vm0, %v19052_v61, 0 }
  0x59   :  { %v283_v28 = vand.u32 4294901760, %v282_v63  ;;  %v292_v29 = vsub.f32 %v19038_v55, %v22607_v0  ;;  %v22606_v30 = vand.u32 4294901760, %v19060_v1  ;;  %v19086_v40 = vand.u32 4294901760, %v155_v31  ;;  %v19105_v63 = vld [vmem:[#allocation2 + $0x70] sm:$0xff] }
  0x5a   :  { %v22608_v33 = vand.u32 4294901760, %v19063_v4  ;;  %v19081_v36 = vsub.f32 %v149_v59, %v19065_v5  ;;  %v19084_v39 = vsub.f32 %v152_v60, %v19067_v9  ;;  %v158_v52 = vsel %vm123_vm0, %v19069_v20, 0  ;;  %23073 = vst [vmem:[#allocation18_spill] sm:$0xff] %v19105_v63 }
  0x5b   :  { %14217 = vmatmul.mubr.f32.gmra.mrb[2].mxu0 %v273_v3  ;;  %v293_v43 = vand.u32 4294901760, %v292_v29  ;;  %v302_v51 = vsub.f32 %v19060_v1, %v22606_v30  ;;  %v161_v53 = vsel %vm123_vm0, %v19071_v27, 0  ;;  %v19103_v62 = vsub.f32 %v155_v31, %v19086_v40 }
  0x5c   :  { %14219 = vmatprep.mubr.f32.mxu0 %v283_v28  ;;  %v312_v57 = vsub.f32 %v19063_v4, %v22608_v33  ;;  %v22612_v59 = vand.u32 4294901760, %v19081_v36  ;;  %v22614_v60 = vand.u32 4294901760, %v19084_v39  ;;  %v19107_v28 = vand.u32 4294901760, %v158_v52 }
  0x5d   :  { %v303_v3 = vand.u32 4294901760, %v302_v51  ;;  %v19109_v29 = vand.u32 4294901760, %v161_v53  ;;  %v164_v30 = vsel %vm123_vm0, %v19088_v41, 0  ;;  %v22618_v54 = vand.u32 4294901760, %v19103_v62  ;;  %v19120_v51 = vld [vmem:[#allocation2 + $0x78] sm:$0xff] }
  0x5e   :  { %v313_v0 = vand.u32 4294901760, %v312_v57  ;;  %v322_v33 = vsub.f32 %v19081_v36, %v22612_v59  ;;  %v332_v31 = vsub.f32 %v19084_v39, %v22614_v60  ;;  %23074 = vst [vmem:[#allocation19_spill] sm:$0xff] %v19120_v51  ;;  %v19123_v50 = vsub.f32 %v158_v52, %v19107_v28 }
  0x5f   :  { %14220 = vmatmul.mubr.f32.gmra.mrb[4].mxu0 %v293_v43  ;;  %v19126_v44 = vsub.f32 %v161_v53, %v19109_v29  ;;  %v19128_v43 = vand.u32 4294901760, %v164_v30  ;;  %v167_v57 = vsel %vm123_vm0, %v19105_v63, 0  ;;  %v342_v60 = vsub.f32 %v19103_v62, %v22618_v54 }
  0x60   :  { %14222 = vmatprep.mubr.f32.mxu0 %v303_v3  ;;  %v323_v59 = vand.u32 4294901760, %v322_v33  ;;  %v333_v25 = vand.u32 4294901760, %v332_v31  ;;  %v19135_v21 = vand.u32 4294901760, %v167_v57  ;;  %v22621_v3 = vand.u32 4294901760, %v19123_v50 }
  0x61   :  { %v22622_v52 = vand.u32 4294901760, %v19126_v44  ;;  %v19140_v53 = vsub.f32 %v164_v30, %v19128_v43  ;;  %v170_v23 = vsel %vm123_vm0, %v19120_v51, 0  ;;  %v343_v22 = vand.u32 4294901760, %v342_v60 }
  0x62   :  { %v19145_v33 = vsub.f32 %v167_v57, %v19135_v21  ;;  %v19147_v31 = vand.u32 4294901760, %v170_v23  ;;  %v19151_v54 = vpack.c.bf16 %v18963_v16, %v18961_v15  ;;  %v352_v30 = vsub.f32 %v19123_v50, %v22621_v3 }
  0x63   :  { %14223 = vmatmul.mubr.f32.gmra.mrb[6].mxu0 %v313_v0  ;;  %v362_v13 = vsub.f32 %v19126_v44, %v22622_v52  ;;  %v371_v0 = vand.u32 4294901760, %v19140_v53  ;;  %v23076_v60 = vand.u32 4294901760, %v18961_v15  ;;  %v23077_v57 = vand.u32 4294901760, %v18963_v16 }
  0x64   :  { %23075 = vst [vmem:[#allocation20_spill] sm:$0xff] %v19151_v54  ;;  %14225 = vmatprep.mubr.f32.mxu0 %v323_v59  ;;  %v381_v63 = vand.u32 4294901760, %v19145_v33  ;;  %v19168_v59 = vsub.f32 %v170_v23, %v19147_v31  ;;  %16738 = vmatprep.subr.bf16.mxu0 %v19151_v54  ;;  %v353_v3 = vand.u32 4294901760, %v352_v30 }
  0x65   :  { %v19164_v51 = vpack.c.bf16 %v23077_v57, %v23076_v60  ;;  %v372_v52 = vsub.f32 %v19140_v53, %v371_v0  ;;  %v363_v15 = vand.u32 4294901760, %v362_v13  ;;  %v23079_v13 = vand.u32 4294901760, %v18959_v14 }
  0x66   :  { %v391_v41 = vand.u32 4294901760, %v19168_v59  ;;  %v382_v16 = vsub.f32 %v19145_v33, %v381_v63  ;;  %v23083_v57 = vand.u32 4294901760, %v19018_v45 }
  0x67   :  { %23078 = vst [vmem:[#allocation21_spill] sm:$0xff] %v19164_v51  ;;  %14226 = vmatmul.mubr.f32.gmra.mrb[8].mxu0 %v333_v25  ;;  %v373_v60 = vand.u32 4294901760, %v372_v52  ;;  %v23082_v52 = vand.u32 4294901760, %v19014_v42 }
  0x68   :  { %14228 = vmatprep.mubr.f32.mxu0 %v343_v22  ;;  %v392_v23 = vsub.f32 %v19168_v59, %v391_v41  ;;  %v383_v25 = vand.u32 4294901760, %v382_v16  ;;  %v23080_v22 = vand.u32 4294901760, %v18971_v19  ;;  %v23088_v16 = vand.u32 4294901760, %v19084_v39 }
  0x6a   :  { %v393_v30 = vand.u32 4294901760, %v392_v23 }
  0x6b   :  { %14229 = vmatmul.mubr.f32.gmra.mrb[10].mxu0 %v353_v3  ;;  %v23081_v3 = vand.u32 4294901760, %v19003_v34 }
  0x6c   :  { %14231 = vmatprep.mubr.f32.mxu0 %v363_v15  ;;  %v23084_v15 = vand.u32 4294901760, %v19038_v55 }
  0x6f   :  { %14232 = vmatmul.mubr.f32.gmra.mrb[12].mxu0 %v373_v60 }
  0x70   :  { %14234 = vmatprep.mubr.f32.mxu0 %v383_v25 }
  0x73   :  { %14235 = vmatmul.mubr.f32.gmra.mrb[14].mxu0 %v393_v30 }
  0x74   :  { %14241 = vmatprep.mubr.f32.mxu0 %v18942_v7 }
  0x77   :  { %14242 = vmatmul.mubr.f32.vlgmr.msra.gmra.mrb[0].mxu0 %v18952_v12 }
  0x78   :  { %16740 = vmatpush3.bf16.msra.mxu0 %v19151_v54  ;;  %14244 = vmatprep.mubr.f32.mxu0 %v18982_v26 }
  0x79   :  { %16742 = vmatprep.subr.bf16.mxu0 %v18950_v11 }
  0x7b   :  { %14245 = vmatmul.mubr.f32.gmra.mrb[2].mxu0 %v18997_v32 }
  0x7c   :  { %14247 = vmatprep.mubr.f32.mxu0 %v19005_v35 }
  0x7f   :  { %14248 = vmatmul.mubr.f32.gmra.mrb[4].mxu0 %v19020_v46 }
  0x80   :  { %14250 = vmatprep.mubr.f32.mxu0 %v19040_v56 }
  0x83   :  { %14251 = vmatmul.mubr.f32.gmra.mrb[6].mxu0 %v19046_v58 }
  0x84   :  { %14253 = vmatprep.mubr.f32.mxu0 %v19065_v5 }
  0x87   :  { %14254 = vmatmul.mubr.f32.gmra.mrb[8].mxu0 %v19067_v9 }
  0x88   :  { %14256 = vmatprep.mubr.f32.mxu0 %v19086_v40 }
  0x8b   :  { %14257 = vmatmul.mubr.f32.gmra.mrb[10].mxu0 %v19107_v28 }
  0x8c   :  { %14259 = vmatprep.mubr.f32.mxu0 %v19109_v29 }
  0x8f   :  { %14260 = vmatmul.mubr.f32.gmra.mrb[12].mxu0 %v19128_v43 }
  0x90   :  { %14262 = vmatprep.mubr.f32.mxu0 %v19135_v21 }
  0x93   :  { %14263 = vmatmul.mubr.f32.gmra.mrb[14].mxu0 %v19147_v31 }
  0x94   :  { %14269 = vmatprep.mubr.f32.mxu0 %v18959_v14  ;;  %v23085_v14 = vand.u32 4294901760, %v19060_v1 }
  0x97   :  { %14270 = vmatmul.mubr.f32.vlgmr.msra.gmra.mrb[0].mxu0 %v18971_v19  ;;  %v23086_v19 = vand.u32 4294901760, %v19063_v4 }
  0x98   :  { %16744 = vmatpush3.bf16.msra.mxu0 %v18950_v11  ;;  %14272 = vmatprep.mubr.f32.mxu0 %v19003_v34  ;;  %v23087_v34 = vand.u32 4294901760, %v19081_v36 }
  0x99   :  { %16746 = vmatprep.subr.bf16.mxu0 %v19164_v51 }
  0x9b   :  { %14273 = vmatmul.mubr.f32.gmra.mrb[2].mxu0 %v19014_v42  ;;  %v23089_v42 = vand.u32 4294901760, %v19103_v62 }
  0x9c   :  { %14275 = vmatprep.mubr.f32.mxu0 %v19018_v45  ;;  %v23090_v45 = vand.u32 4294901760, %v19123_v50 }
  0x9f   :  { %14276 = vmatmul.mubr.f32.gmra.mrb[4].mxu0 %v19038_v55  ;;  %v23091_v55 = vand.u32 4294901760, %v19126_v44 }
  0xa0   :  { %14278 = vmatprep.mubr.f32.mxu0 %v19060_v1  ;;  %v91_v1 = vld [vmem:[#allocation5 + $0x10] sm:$0xff] }
  0xa3   :  { %14279 = vmatmul.mubr.f32.gmra.mrb[6].mxu0 %v19063_v4  ;;  %v92_v4 = vld [vmem:[#allocation5 + $0x18] sm:$0xff] }
  0xa4   :  { %14281 = vmatprep.mubr.f32.mxu0 %v19081_v36  ;;  %v93_v36 = vld [vmem:[#allocation5 + $0x20] sm:$0xff] }
  0xa7   :  { %14282 = vmatmul.mubr.f32.gmra.mrb[8].mxu0 %v19084_v39  ;;  %v94_v39 = vld [vmem:[#allocation5 + $0x28] sm:$0xff] }
  0xa8   :  { %14284 = vmatprep.mubr.f32.mxu0 %v19103_v62 }
  0xab   :  { %14285 = vmatmul.mubr.f32.gmra.mrb[10].mxu0 %v19123_v50 }
  0xac   :  { %14287 = vmatprep.mubr.f32.mxu0 %v19126_v44  ;;  %v89_v44 = vld [vmem:[#allocation5] sm:$0xff] }
  0xad   :  { %v2563_v50 = vsel %vm123_vm0, %v89_v44, 0 }
  0xaf   :  { %14288 = vmatmul.mubr.f32.gmra.mrb[12].mxu0 %v19140_v53 }
  0xb0   :  { %14290 = vmatprep.mubr.f32.mxu0 %v19145_v33 }
  0xb3   :  { %14291 = vmatmul.mubr.f32.gmra.mrb[14].mxu0 %v19168_v59  ;;  %v96_v59 = vld [vmem:[#allocation5 + $0x38] sm:$0xff] }
  0xb4   :  { %14297 = vmatprep.mubr.f32.mxu0 %v23079_v13 }
  0xb7   :  { %14298 = vmatmul.mubr.f32.vlgmr.msra.gmra.mrb[0].mxu0 %v23080_v22 }
  0xb8   :  { %16748 = vmatpush3.bf16.msra.mxu0 %v19164_v51  ;;  %14300 = vmatprep.mubr.f32.mxu0 %v23081_v3 }
  0xb9   :  { %16750 = vmatprep.subr.bf16.mxu0 %v18950_v11 }
  0xbb   :  { %14301 = vmatmul.mubr.f32.gmra.mrb[2].mxu0 %v23082_v52  ;;  %v98_v52 = vld [vmem:[#allocation5 + $0x48] sm:$0xff] }
  0xbc   :  { %14303 = vmatprep.mubr.f32.mxu0 %v23083_v57  ;;  %v2590_v44 = vsel %vm123_vm0, %v98_v52, 0 }
  0xbf   :  { %14304 = vmatmul.mubr.f32.gmra.mrb[4].mxu0 %v23084_v15 }
  0xc0   :  { %14306 = vmatprep.mubr.f32.mxu0 %v23085_v14 }
  0xc3   :  { %14307 = vmatmul.mubr.f32.gmra.mrb[6].mxu0 %v23086_v19 }
  0xc4   :  { %14309 = vmatprep.mubr.f32.mxu0 %v23087_v34 }
  0xc7   :  { %14310 = vmatmul.mubr.f32.gmra.mrb[8].mxu0 %v23088_v16 }
  0xc8   :  { %14312 = vmatprep.mubr.f32.mxu0 %v23089_v42 }
  0xcb   :  { %14313 = vmatmul.mubr.f32.gmra.mrb[10].mxu0 %v23090_v45 }
  0xcc   :  { %14315 = vmatprep.mubr.f32.mxu0 %v23091_v55 }
  0xcf   :  { %14316 = vmatmul.mubr.f32.gmra.mrb[12].mxu0 %v371_v0 }
  0xd0   :  { %14318 = vmatprep.mubr.f32.mxu0 %v381_v63 }
  0xd3   :  { %14319 = vmatmul.mubr.f32.gmra.mrb[14].mxu0 %v391_v41  ;;  %v95_v41 = vld [vmem:[#allocation5 + $0x30] sm:$0xff] }
  0xd4   :  { %14325 = vmatprep.mubr.f32.mxu0 %v18942_v7  ;;  %v2581_v63 = vsel %vm123_vm0, %v95_v41, 0 }
  0xd5   :  { %v19312_v23 = vand.u32 4294901760, %v2581_v63 }
  0xd7   :  { %14326 = vmatmul.mubr.f32.vlgmr.msra.gmra.mrb[0].mxu0 %v18952_v12  ;;  %v19333_v15 = vsub.f32 %v2581_v63, %v19312_v23 }
  0xd8   :  { %16752 = vmatpush3.bf16.msra.mxu0 %v18950_v11  ;;  %14328 = vmatprep.mubr.f32.mxu0 %v18982_v26 }
  0xd9   :  { %16946 = vmatprep.subr.bf16.mxu0 %v18950_v11 }
  0xdb   :  { %14329 = vmatmul.mubr.f32.gmra.mrb[2].mxu0 %v18997_v32 }
  0xdc   :  { %14331 = vmatprep.mubr.f32.mxu0 %v19005_v35 }
  0xdf   :  { %14332 = vmatmul.mubr.f32.gmra.mrb[4].mxu0 %v19020_v46 }
  0xe0   :  { %14334 = vmatprep.mubr.f32.mxu0 %v19040_v56 }
  0xe3   :  { %14335 = vmatmul.mubr.f32.gmra.mrb[6].mxu0 %v19046_v58 }
  0xe4   :  { %14337 = vmatprep.mubr.f32.mxu0 %v19065_v5 }
  0xe7   :  { %14338 = vmatmul.mubr.f32.gmra.mrb[8].mxu0 %v19067_v9 }
  0xe8   :  { %14340 = vmatprep.mubr.f32.mxu0 %v19086_v40 }
  0xeb   :  { %14341 = vmatmul.mubr.f32.gmra.mrb[10].mxu0 %v19107_v28 }
  0xec   :  { %14343 = vmatprep.mubr.f32.mxu0 %v19109_v29 }
  0xef   :  { %14344 = vmatmul.mubr.f32.gmra.mrb[12].mxu0 %v19128_v43 }
  0xf0   :  { %14346 = vmatprep.mubr.f32.mxu0 %v19135_v21 }
  0xf3   :  { %14347 = vmatmul.mubr.f32.gmra.mrb[14].mxu0 %v19147_v31 }
  0xf4   :  { %14353 = vmatprep.mubr.f32.mxu0 %v18942_v7  ;;  %v19279_v7 = vand.u32 4294901760, %v2563_v50 }
  0xf7   :  { %14354 = vmatmul.mubr.f32.vlgmr.msra.gmra.mrb[0].mxu0 %v18952_v12  ;;  %v2566_v12 = vsel %vm123_vm0, %v18944_v8, 0  ;;  %v2575_v8 = vsel %vm123_vm0, %v93_v36, 0 }
  0xf8   :  { %16948 = vmatpush3.bf16.msra.mxu0 %v18950_v11  ;;  %14356 = vmatprep.mubr.f32.mxu0 %v18982_v26  ;;  %v2569_v26 = vsel %vm123_vm0, %v91_v1, 0  ;;  %v19308_v0 = vand.u32 4294901760, %v2575_v8 }
  0xf9   :  { %16950 = vmatprep.subr.bf16.mxu0 %v19026_v49 }
  0xfa   :  { %v19326_v3 = vsub.f32 %v2575_v8, %v19308_v0 }
  0xfb   :  { %14357 = vmatmul.mubr.f32.gmra.mrb[2].mxu0 %v18997_v32  ;;  %v19285_v32 = vand.u32 4294901760, %v2566_v12 }
  0xfc   :  { %14359 = vmatprep.mubr.f32.mxu0 %v19005_v35  ;;  %v19289_v35 = vsub.f32 %v2563_v50, %v19279_v7  ;;  %v22626_v55 = vand.u32 4294901760, %v19326_v3  ;;  %v100_v50 = vld [vmem:[#allocation5 + $0x58] sm:$0xff] }
  0xfd   :  { %v19297_v62 = vsub.f32 %v2566_v12, %v19285_v32  ;;  %v22624_v12 = vand.u32 4294901760, %v19333_v15 }
  0xfe   :  { %v2679_v53 = vand.u32 4294901760, %v19289_v35  ;;  %v2720_v8 = vsub.f32 %v19326_v3, %v22626_v55 }
  0xff   :  { %14360 = vmatmul.mubr.f32.gmra.mrb[4].mxu0 %v19020_v46  ;;  %v19291_v46 = vand.u32 4294901760, %v2569_v26  ;;  %v22634_v25 = vand.u32 4294901760, %v19297_v62 }
 0x100   :  { %14362 = vmatprep.mubr.f32.mxu0 %v19040_v56  ;;  %v2572_v56 = vsel %vm123_vm0, %v92_v4, 0  ;;  %v2680_v13 = vsub.f32 %v19289_v35, %v2679_v53 }
 0x101   :  { %v19306_v33 = vsub.f32 %v2569_v26, %v19291_v46  ;;  %v2690_v19 = vsub.f32 %v19297_v62, %v22634_v25 }
 0x102   :  { %v2681_v42 = vand.u32 4294901760, %v2680_v13 }
 0x103   :  { %14363 = vmatmul.mubr.f32.gmra.mrb[6].mxu0 %v19046_v58  ;;  %v19299_v58 = vand.u32 4294901760, %v2572_v56  ;;  %v22630_v22 = vand.u32 4294901760, %v19306_v33  ;;  %v2691_v4 = vand.u32 4294901760, %v2690_v19 }
 0x104   :  { %14365 = vmatprep.mubr.f32.mxu0 %v19065_v5  ;;  %v2578_v5 = vsel %vm123_vm0, %v94_v39, 0  ;;  %v19363_v39 = vand.u32 4294901760, %v2590_v44 }
 0x105   :  { %v19310_v60 = vand.u32 4294901760, %v2578_v5  ;;  %v19317_v30 = vsub.f32 %v2572_v56, %v19299_v58  ;;  %v2700_v45 = vsub.f32 %v19306_v33, %v22630_v22 }
 0x106   :  { %v19381_v19 = vsub.f32 %v2590_v44, %v19363_v39 }
 0x107   :  { %14366 = vmatmul.mubr.f32.gmra.mrb[8].mxu0 %v19067_v9  ;;  %v97_v9 = vld [vmem:[#allocation5 + $0x40] sm:$0xff]  ;;  %v19330_v57 = vsub.f32 %v2578_v5, %v19310_v60  ;;  %v22629_v34 = vand.u32 4294901760, %v19317_v30  ;;  %v2701_v41 = vand.u32 4294901760, %v2700_v45  ;;  %v2721_v45 = vand.u32 4294901760, %v2720_v8 }
 0x108   :  { %14368 = vmatprep.mubr.f32.mxu0 %v19086_v40  ;;  %v2584_v40 = vsel %vm123_vm0, %v96_v59, 0  ;;  %v102_v59 = vld [vmem:[#allocation5 + $0x68] sm:$0xff] }
 0x109   :  { %v19335_v14 = vand.u32 4294901760, %v2584_v40  ;;  %v22625_v1 = vand.u32 4294901760, %v19330_v57  ;;  %v2710_v36 = vsub.f32 %v19317_v30, %v22629_v34 }
 0x10b   :  { %14369 = vmatmul.mubr.f32.gmra.mrb[10].mxu0 %v19107_v28  ;;  %v2587_v28 = vsel %vm123_vm0, %v97_v9, 0  ;;  %v19354_v26 = vsub.f32 %v2584_v40, %v19335_v14  ;;  %v2730_v9 = vsub.f32 %v19330_v57, %v22625_v1  ;;  %v2740_v40 = vsub.f32 %v19333_v15, %v22624_v12 }
 0x10c   :  { %14371 = vmatprep.mubr.f32.mxu0 %v19109_v29  ;;  %v99_v29 = vld [vmem:[#allocation5 + $0x50] sm:$0xff]  ;;  %v19342_v16 = vand.u32 4294901760, %v2587_v28  ;;  %v2711_v52 = vand.u32 4294901760, %v2710_v36  ;;  %v2602_v12 = vsel %vm123_vm0, %v102_v59, 0  ;;  %v104_v36 = vld [vmem:[#allocation5 + $0x78] sm:$0xff] }
 0x10d   :  { %v22627_v13 = vand.u32 4294901760, %v19354_v26  ;;  %v2731_v44 = vand.u32 4294901760, %v2730_v9  ;;  %v2741_v1 = vand.u32 4294901760, %v2740_v40  ;;  %v19404_v59 = vand.u32 4294901760, %v2602_v12 }
 0x10e   :  { %v19361_v56 = vsub.f32 %v2587_v28, %v19342_v16  ;;  %v103_v28 = vld [vmem:[#allocation5 + $0x70] sm:$0xff] }
 0x10f   :  { %14372 = vmatmul.mubr.f32.gmra.mrb[12].mxu0 %v19128_v43  ;;  %v2593_v43 = vsel %vm123_vm0, %v99_v29, 0  ;;  %v2750_v55 = vsub.f32 %v19354_v26, %v22627_v13  ;;  %v19418_v34 = vsub.f32 %v2602_v12, %v19404_v59 }
 0x110   :  { %14374 = vmatprep.mubr.f32.mxu0 %v19135_v21  ;;  %v101_v21 = vld [vmem:[#allocation5 + $0x60] sm:$0xff]  ;;  %v19368_v5 = vand.u32 4294901760, %v2593_v43  ;;  %v22628_v29 = vand.u32 4294901760, %v19361_v56 }
 0x111   :  { %v2599_v63 = vsel %vm123_vm0, %v101_v21, 0  ;;  %v2751_v13 = vand.u32 4294901760, %v2750_v55 }
 0x112   :  { %v19389_v21 = vand.u32 4294901760, %v2599_v63 }
 0x113   :  { %14375 = vmatmul.mubr.f32.gmra.mrb[14].mxu0 %v19147_v31  ;;  %v2596_v31 = vsel %vm123_vm0, %v100_v50, 0  ;;  %v19387_v50 = vsub.f32 %v2593_v43, %v19368_v5  ;;  %v2760_v43 = vsub.f32 %v19361_v56, %v22628_v29 }
 0x114   :  { %14717 = vmatprep.mubr.f32.mxu0 %v2681_v42  ;;  %v19383_v42 = vand.u32 4294901760, %v2596_v31  ;;  %v19408_v40 = vsub.f32 %v2599_v63, %v19389_v21 }
 0x115   :  { %v22632_v9 = vand.u32 4294901760, %v19387_v50  ;;  %v2761_v63 = vand.u32 4294901760, %v2760_v43 }
 0x116   :  { %v19402_v8 = vsub.f32 %v2596_v31, %v19383_v42  ;;  %v2799_v55 = vand.u32 4294901760, %v19408_v40 }
 0x117   :  { %14718 = vmatmul.mubr.f32.vlgmr.msra.gmra.mrb[16].mxu0 %v2691_v4  ;;  %v2605_v4 = vsel %vm123_vm0, %v103_v28, 0  ;;  %v2780_v22 = vsub.f32 %v19387_v50, %v22632_v9 }
 0x118   :  { %16952 = vmatpush3.bf16.msra.mxu0 %v19026_v49  ;;  %14720 = vmatprep.mubr.f32.mxu0 %v2701_v41  ;;  %v22631_v41 = vand.u32 4294901760, %v19381_v19  ;;  %v19410_v28 = vand.u32 4294901760, %v2605_v4  ;;  %v22633_v31 = vand.u32 4294901760, %v19402_v8  ;;  %v2800_v9 = vsub.f32 %v19408_v40, %v2799_v55 }
 0x119   :  { %16954 = vmatprep.subr.bf16.mxu0 %v19151_v54  ;;  %v2781_v43 = vand.u32 4294901760, %v2780_v22 }
 0x11a   :  { %v2770_v29 = vsub.f32 %v19381_v19, %v22631_v41  ;;  %v2790_v12 = vsub.f32 %v19402_v8, %v22633_v31  ;;  %v2809_v41 = vand.u32 4294901760, %v19418_v34  ;;  %v2801_v25 = vand.u32 4294901760, %v2800_v9 }
 0x11b   :  { %14721 = vmatmul.mubr.f32.gmra.mrb[18].mxu0 %v2711_v52  ;;  %v2608_v52 = vsel %vm123_vm0, %v104_v36, 0  ;;  %v19427_v36 = vsub.f32 %v2605_v4, %v19410_v28 }
 0x11c   :  { %14723 = vmatprep.mubr.f32.mxu0 %v2721_v45  ;;  %v19420_v45 = vand.u32 4294901760, %v2608_v52 }
 0x11d   :  { %v2819_v4 = vand.u32 4294901760, %v19427_v36 }
 0x11f   :  { %14724 = vmatmul.mubr.f32.gmra.mrb[20].mxu0 %v2731_v44  ;;  %v2771_v44 = vand.u32 4294901760, %v2770_v29  ;;  %v2810_v29 = vsub.f32 %v19418_v34, %v2809_v41  ;;  %v2820_v22 = vsub.f32 %v19427_v36, %v2819_v4 }
 0x120   :  { %14726 = vmatprep.mubr.f32.mxu0 %v2741_v1  ;;  %v19434_v1 = vsub.f32 %v2608_v52, %v19420_v45 }
 0x121   :  { %v2811_v52 = vand.u32 4294901760, %v2810_v29 }
 0x122   :  { %v2829_v31 = vand.u32 4294901760, %v19434_v1 }
 0x123   :  { %14727 = vmatmul.mubr.f32.gmra.mrb[22].mxu0 %v2751_v13  ;;  %v2791_v13 = vand.u32 4294901760, %v2790_v12 }
 0x124   :  { %14729 = vmatprep.mubr.f32.mxu0 %v2761_v63  ;;  %v2830_v63 = vsub.f32 %v19434_v1, %v2829_v31 }
 0x126   :  { %v2831_v12 = vand.u32 4294901760, %v2830_v63  ;;  %v23097_v63 = vand.u32 4294901760, %v19306_v33 }
 0x127   :  { %14730 = vmatmul.mubr.f32.gmra.mrb[24].mxu0 %v2771_v44  ;;  %v2821_v44 = vand.u32 4294901760, %v2820_v22 }
 0x128   :  { %14732 = vmatprep.mubr.f32.mxu0 %v2781_v43 }
 0x12b   :  { %14733 = vmatmul.mubr.f32.gmra.mrb[26].mxu0 %v2791_v13 }
 0x12c   :  { %14735 = vmatprep.mubr.f32.mxu0 %v2801_v25  ;;  %v105_v25 = vld [vmem:[#allocation7] sm:$0xff] }
 0x12d   :  { %v19479_v9 = vand.u32 4294901760, %v105_v25 }
 0x12f   :  { %14736 = vmatmul.mubr.f32.gmra.mrb[28].mxu0 %v2811_v52  ;;  %23092 = vst [vmem:[#allocation22_spill] sm:$0xff] %v19479_v9  ;;  %v19483_v43 = vsub.f32 %v105_v25, %v19479_v9  ;;  %v23096_v52 = vand.u32 4294901760, %v19297_v62  ;;  %v23100_v25 = vand.u32 4294901760, %v19330_v57 }
 0x130   :  { %14738 = vmatprep.mubr.f32.mxu0 %v2821_v44  ;;  %v23098_v44 = vand.u32 4294901760, %v19317_v30 }
 0x131   :  { %23093 = vst [vmem:[#allocation23_spill] sm:$0xff] %v19483_v43  ;;  %v19487_v13 = vand.u32 4294901760, %v19483_v43 }
 0x133   :  { %14739 = vmatmul.mubr.f32.gmra.mrb[30].mxu0 %v2831_v12  ;;  %23094 = vst [vmem:[#allocation24_spill] sm:$0xff] %v19487_v13  ;;  %v1360_v29 = vsub.f32 %v19483_v43, %v19487_v13  ;;  %v23099_v12 = vand.u32 4294901760, %v19326_v3  ;;  %v108_v13 = vld [vmem:[#allocation7 + $0x18] sm:$0xff] }
 0x134   :  { %14745 = vmatprep.mubr.f32.mxu0 %v19279_v7 }
 0x135   :  { %v19493_v22 = vand.u32 4294901760, %v1360_v29 }
 0x137   :  { %14746 = vmatmul.mubr.f32.vlgmr.msra.gmra.mrb[16].mxu0 %v19285_v32  ;;  %23095 = vst [vmem:[#allocation25_spill] sm:$0xff] %v19493_v22  ;;  %14409 = vmatprep.mubr.f32.mxu1 %v19493_v22 }
 0x138   :  { %16956 = vmatpush3.bf16.msra.mxu0 %v19151_v54  ;;  %14748 = vmatprep.mubr.f32.mxu0 %v19291_v46 }
 0x139   :  { %16958 = vmatprep.subr.bf16.mxu0 %v18950_v11 }
 0x13b   :  { %14749 = vmatmul.mubr.f32.gmra.mrb[18].mxu0 %v19299_v58 }
 0x13c   :  { %14751 = vmatprep.mubr.f32.mxu0 %v19308_v0 }
 0x13f   :  { %14752 = vmatmul.mubr.f32.gmra.mrb[20].mxu0 %v19310_v60 }
 0x140   :  { %14754 = vmatprep.mubr.f32.mxu0 %v19312_v23 }
 0x143   :  { %14755 = vmatmul.mubr.f32.gmra.mrb[22].mxu0 %v19335_v14 }
 0x144   :  { %14757 = vmatprep.mubr.f32.mxu0 %v19342_v16 }
 0x147   :  { %14758 = vmatmul.mubr.f32.gmra.mrb[24].mxu0 %v19363_v39 }
 0x148   :  { %14760 = vmatprep.mubr.f32.mxu0 %v19368_v5 }
 0x14b   :  { %14761 = vmatmul.mubr.f32.gmra.mrb[26].mxu0 %v19383_v42 }
 0x14c   :  { %14763 = vmatprep.mubr.f32.mxu0 %v19389_v21 }
 0x14f   :  { %14764 = vmatmul.mubr.f32.gmra.mrb[28].mxu0 %v19404_v59 }
 0x150   :  { %14766 = vmatprep.mubr.f32.mxu0 %v19410_v28 }
 0x153   :  { %14767 = vmatmul.mubr.f32.gmra.mrb[30].mxu0 %v19420_v45 }
 0x154   :  { %14773 = vmatprep.mubr.f32.mxu0 %v19289_v35  ;;  %v23101_v35 = vand.u32 4294901760, %v19333_v15 }
 0x157   :  { %14774 = vmatmul.mubr.f32.vlgmr.msra.gmra.mrb[16].mxu0 %v19297_v62  ;;  %v23102_v62 = vand.u32 4294901760, %v19354_v26 }
 0x158   :  { %16960 = vmatpush3.bf16.msra.mxu0 %v18950_v11  ;;  %14776 = vmatprep.mubr.f32.mxu0 %v19306_v33  ;;  %v23104_v33 = vand.u32 4294901760, %v19381_v19 }
 0x159   :  { %16962 = vmatprep.subr.bf16.mxu0 %v19164_v51 }
 0x15b   :  { %14777 = vmatmul.mubr.f32.gmra.mrb[18].mxu0 %v19317_v30  ;;  %v23105_v30 = vand.u32 4294901760, %v19387_v50 }
 0x15c   :  { %14779 = vmatprep.mubr.f32.mxu0 %v19326_v3  ;;  %v23106_v3 = vand.u32 4294901760, %v19402_v8 }
 0x15f   :  { %14780 = vmatmul.mubr.f32.gmra.mrb[20].mxu0 %v19330_v57  ;;  %v5000_v57 = vmul.f32 %v18936_v2, %v18936_v2  ;;  %v5002_v2 = vmul.f32 %v18948_v10, %v18948_v10 }
 0x160   :  { %14782 = vmatprep.mubr.f32.mxu0 %v19333_v15  ;;  %v5001_v15 = vmul.f32 %v18940_v6, %v18940_v6 }
 0x161   :  { %v5023_v10 = vsel %vm123_vm0, %v5002_v2, 0  ;;  %v106_v2 = vld [vmem:[#allocation7 + $0x8] sm:$0xff] }
 0x163   :  { %14783 = vmatmul.mubr.f32.gmra.mrb[22].mxu0 %v19354_v26 }
 0x164   :  { %14785 = vmatprep.mubr.f32.mxu0 %v19361_v56 }
 0x167   :  { %14786 = vmatmul.mubr.f32.gmra.mrb[24].mxu0 %v19381_v19 }
 0x168   :  { %14788 = vmatprep.mubr.f32.mxu0 %v19387_v50  ;;  %v5003_v50 = vmul.f32 %v18965_v17, %v18965_v17  ;;  %v5007_v17 = vmul.f32 %v19011_v38, %v19011_v38  ;;  %v5011_v38 = vmul.f32 %v19069_v20, %v19069_v20 }
 0x16b   :  { %14789 = vmatmul.mubr.f32.gmra.mrb[26].mxu0 %v19402_v8  ;;  %v5005_v8 = vmul.f32 %v18979_v24, %v18979_v24 }
 0x16c   :  { %14791 = vmatprep.mubr.f32.mxu0 %v19408_v40 }
 0x16d   :  { %v5032_v29 = vsel %vm123_vm0, %v5005_v8, 0 }
 0x16e   :  { %v19609_v20 = vand.u32 4294901760, %v5032_v29 }
 0x16f   :  { %14792 = vmatmul.mubr.f32.gmra.mrb[28].mxu0 %v19418_v34  ;;  %v5017_v34 = vsel %vm123_vm0, %v5000_v57, 0 }
 0x170   :  { %14794 = vmatprep.mubr.f32.mxu0 %v19427_v36  ;;  %v19552_v26 = vand.u32 4294901760, %v5017_v34  ;;  %v5008_v36 = vmul.f32 %v19022_v47, %v19022_v47 }
 0x172   :  { %v19562_v6 = vsub.f32 %v5017_v34, %v19552_v26 }
 0x173   :  { %14795 = vmatmul.mubr.f32.gmra.mrb[30].mxu0 %v19434_v1  ;;  %v5009_v1 = vmul.f32 %v19024_v48, %v19024_v48 }
 0x174   :  { %14801 = vmatprep.mubr.f32.mxu0 %v2679_v53  ;;  %v23103_v53 = vand.u32 4294901760, %v19361_v56  ;;  %v5020_v56 = vsel %vm123_vm0, %v5001_v15, 0  ;;  %23107 = vst [vmem:[#allocation26_spill] sm:$0xff] %v19562_v6  ;;  %v22636_v40 = vand.u32 4294901760, %v19562_v6 }
 0x175   :  { %v19558_v19 = vand.u32 4294901760, %v5020_v56 }
 0x177   :  { %14802 = vmatmul.mubr.f32.vlgmr.msra.gmra.mrb[16].mxu0 %v23096_v52  ;;  %v23109_v52 = vld [vmem:[#allocation17_spill] sm:$0xff] }
 0x178   :  { %16964 = vmatpush3.bf16.msra.mxu0 %v19164_v51  ;;  %14804 = vmatprep.mubr.f32.mxu0 %v23097_v63  ;;  %v5013_v63 = vmul.f32 %v23109_v52, %v23109_v52 }
 0x179   :  { %16966 = vmatprep.subr.bf16.mxu0 %v18950_v11 }
 0x17b   :  { %14805 = vmatmul.mubr.f32.gmra.mrb[18].mxu0 %v23098_v44 }
 0x17c   :  { %14807 = vmatprep.mubr.f32.mxu0 %v23099_v12  ;;  %v5038_v12 = vsel %vm123_vm0, %v5007_v17, 0 }
 0x17f   :  { %14808 = vmatmul.mubr.f32.gmra.mrb[20].mxu0 %v23100_v25  ;;  %v19616_v25 = vsub.f32 %v19562_v6, %v22636_v40 }
 0x180   :  { %14810 = vmatprep.mubr.f32.mxu0 %v23101_v35 }
 0x183   :  { %14811 = vmatmul.mubr.f32.gmra.mrb[22].mxu0 %v23102_v62  ;;  %v5050_v62 = vsel %vm123_vm0, %v5011_v38, 0 }
 0x184   :  { %14813 = vmatprep.mubr.f32.mxu0 %v23103_v53  ;;  %v19647_v8 = vand.u32 4294901760, %v5050_v62 }
 0x187   :  { %14814 = vmatmul.mubr.f32.gmra.mrb[24].mxu0 %v23104_v33  ;;  %v19626_v33 = vand.u32 4294901760, %v5038_v12 }
 0x188   :  { %14816 = vmatprep.mubr.f32.mxu0 %v23105_v30 }
 0x18b   :  { %14817 = vmatmul.mubr.f32.gmra.mrb[26].mxu0 %v23106_v3  ;;  %v5056_v3 = vsel %vm123_vm0, %v5013_v63, 0 }
 0x18c   :  { %14819 = vmatprep.mubr.f32.mxu0 %v2799_v55  ;;  %v5006_v55 = vmul.f32 %v19009_v37, %v19009_v37  ;;  %v5010_v37 = vmul.f32 %v19052_v61, %v19052_v61 }
 0x18e   :  { %v5035_v44 = vsel %vm123_vm0, %v5006_v55, 0 }
 0x18f   :  { %14820 = vmatmul.mubr.f32.gmra.mrb[28].mxu0 %v2809_v41  ;;  %v5004_v41 = vmul.f32 %v18967_v18, %v18967_v18  ;;  %v5026_v18 = vsel %vm123_vm0, %v5003_v50, 0  ;;  %v19624_v53 = vand.u32 4294901760, %v5035_v44  ;;  %v19643_v50 = vsub.f32 %v5032_v29, %v19609_v20 }
 0x190   :  { %14822 = vmatprep.mubr.f32.mxu0 %v2819_v4  ;;  %v19588_v4 = vand.u32 4294901760, %v5023_v10  ;;  %v19600_v47 = vand.u32 4294901760, %v5026_v18  ;;  %v19668_v29 = vand.u32 4294901760, %v106_v2 }
 0x191   :  { %v5029_v24 = vsel %vm123_vm0, %v5004_v41, 0  ;;  %23113 = vst [vmem:[#allocation30_spill] sm:$0xff] %v19643_v50  ;;  %v22642_v63 = vand.u32 4294901760, %v19643_v50 }
 0x192   :  { %v19602_v48 = vand.u32 4294901760, %v5029_v24  ;;  %v19620_v35 = vsub.f32 %v5023_v10, %v19588_v4  ;;  %v19632_v57 = vsub.f32 %v5026_v18, %v19600_v47  ;;  %23118 = vst [vmem:[#allocation33_spill] sm:$0xff] %v19668_v29  ;;  %v19705_v40 = vsub.f32 %v106_v2, %v19668_v29 }
 0x193   :  { %14823 = vmatmul.mubr.f32.gmra.mrb[30].mxu0 %v2829_v31  ;;  %v19575_v31 = vsub.f32 %v5020_v56, %v19558_v19 }
 0x194   :  { %14829 = vmatprep.mubr.f32.mxu0 %v19279_v7  ;;  %23110 = vst [vmem:[#allocation17_spill] sm:$0xff] %v19620_v35  ;;  %23111 = vst [vmem:[#allocation28_spill] sm:$0xff] %v19632_v57  ;;  %v19635_v15 = vsub.f32 %v5029_v24, %v19602_v48  ;;  %v22637_v24 = vand.u32 4294901760, %v19620_v35 }
 0x195   :  { %23108 = vst [vmem:[#allocation27_spill] sm:$0xff] %v19575_v31  ;;  %v22635_v61 = vand.u32 4294901760, %v19575_v31 }
 0x196   :  { %23112 = vst [vmem:[#allocation29_spill] sm:$0xff] %v19635_v15  ;;  %v22639_v38 = vand.u32 4294901760, %v19635_v15 }
 0x197   :  { %14830 = vmatmul.mubr.f32.vlgmr.msra.gmra.mrb[16].mxu0 %v19285_v32  ;;  %v19655_v17 = vsub.f32 %v19575_v31, %v22635_v61  ;;  %v23125_v61 = vld [vmem:[#allocation19_spill] sm:$0xff] }
 0x198   :  { %16968 = vmatpush3.bf16.msra.mxu0 %v18950_v11  ;;  %14832 = vmatprep.mubr.f32.mxu0 %v19291_v46  ;;  %23126 = vst [vmem:[#allocation19_spill] sm:$0xff] %v19705_v40  ;;  %v19721_v2 = vsub.f32 %v19635_v15, %v22639_v38 }
 0x199   :  { %17162 = vmatprep.subr.bf16.mxu0 %v18950_v11 }
 0x19b   :  { %14833 = vmatmul.mubr.f32.gmra.mrb[18].mxu0 %v19299_v58 }
 0x19c   :  { %14835 = vmatprep.mubr.f32.mxu0 %v19308_v0 }
 0x19f   :  { %14836 = vmatmul.mubr.f32.gmra.mrb[20].mxu0 %v19310_v60 }
 0x1a0   :  { %14838 = vmatprep.mubr.f32.mxu0 %v19312_v23 }
 0x1a3   :  { %14839 = vmatmul.mubr.f32.gmra.mrb[22].mxu0 %v19335_v14 }
 0x1a4   :  { %14841 = vmatprep.mubr.f32.mxu0 %v19342_v16 }
 0x1a7   :  { %14842 = vmatmul.mubr.f32.gmra.mrb[24].mxu0 %v19363_v39 }
 0x1a8   :  { %14844 = vmatprep.mubr.f32.mxu0 %v19368_v5 }
 0x1ab   :  { %14845 = vmatmul.mubr.f32.gmra.mrb[26].mxu0 %v19383_v42 }
 0x1ac   :  { %14847 = vmatprep.mubr.f32.mxu0 %v19389_v21 }
 0x1af   :  { %14848 = vmatmul.mubr.f32.gmra.mrb[28].mxu0 %v19404_v59 }
 0x1b0   :  { %14850 = vmatprep.mubr.f32.mxu0 %v19410_v28 }
 0x1b3   :  { %14851 = vmatmul.mubr.f32.gmra.mrb[30].mxu0 %v19420_v45 }
 0x1b4   :  { %14857 = vmatprep.mubr.f32.mxu0 %v19279_v7  ;;  %v5012_v7 = vmul.f32 %v19071_v27, %v19071_v27  ;;  %v5041_v27 = vsel %vm123_vm0, %v5008_v36, 0  ;;  %v19663_v36 = vsub.f32 %v5035_v44, %v19624_v53 }
 0x1b5   :  { %v19637_v34 = vand.u32 4294901760, %v5041_v27 }
 0x1b6   :  { %v5053_v30 = vsel %vm123_vm0, %v5012_v7, 0  ;;  %23116 = vst [vmem:[#allocation31_spill] sm:$0xff] %v19663_v36 }
 0x1b7   :  { %14858 = vmatmul.mubr.f32.vlgmr.msra.gmra.mrb[16].mxu0 %v19285_v32  ;;  %v5044_v32 = vsel %vm123_vm0, %v5009_v1, 0  ;;  %v19657_v18 = vand.u32 4294901760, %v5053_v30  ;;  %v19666_v1 = vsub.f32 %v5038_v12, %v19626_v33  ;;  %v19674_v7 = vsub.f32 %v5041_v27, %v19637_v34 }
 0x1b8   :  { %17164 = vmatpush3.bf16.msra.mxu0 %v18950_v11  ;;  %14860 = vmatprep.mubr.f32.mxu0 %v19291_v46  ;;  %v5047_v46 = vsel %vm123_vm0, %v5010_v37, 0  ;;  %v19639_v56 = vand.u32 4294901760, %v5044_v32  ;;  %v22638_v37 = vand.u32 4294901760, %v19632_v57  ;;  %v19685_v12 = vsub.f32 %v5050_v62, %v19647_v8 }
 0x1b9   :  { %17166 = vmatprep.subr.bf16.mxu0 %v19026_v49  ;;  %v19645_v41 = vand.u32 4294901760, %v5047_v46  ;;  %23117 = vst [vmem:[#allocation32_spill] sm:$0xff] %v19666_v1  ;;  %23119 = vst [vmem:[#allocation34_spill] sm:$0xff] %v19674_v7  ;;  %v19690_v27 = vsub.f32 %v5053_v30, %v19657_v18  ;;  %v22643_v62 = vand.u32 4294901760, %v19663_v36  ;;  %v107_v30 = vld [vmem:[#allocation7 + $0x10] sm:$0xff] }
 0x1ba   :  { %v19677_v52 = vsub.f32 %v5044_v32, %v19639_v56  ;;  %23122 = vst [vmem:[#allocation37_spill] sm:$0xff] %v19685_v12 }
 0x1bb   :  { %14861 = vmatmul.mubr.f32.gmra.mrb[18].mxu0 %v19299_v58  ;;  %v23114_v58 = vld [vmem:[#allocation18_spill] sm:$0xff]  ;;  %v19682_v44 = vsub.f32 %v5047_v46, %v19645_v41  ;;  %23123 = vst [vmem:[#allocation38_spill] sm:$0xff] %v19690_v27  ;;  %v19700_v46 = vsub.f32 %v19620_v35, %v22637_v24  ;;  %v19739_v22 = vsub.f32 %v19663_v36, %v22643_v62  ;;  %v19747_v24 = vand.u32 4294901760, %v19705_v40 }
 0x1bc   :  { %14863 = vmatprep.mubr.f32.mxu0 %v19308_v0  ;;  %v5014_v10 = vmul.f32 %v23114_v58, %v23114_v58  ;;  %v19659_v0 = vand.u32 4294901760, %v5056_v3  ;;  %23120 = vst [vmem:[#allocation35_spill] sm:$0xff] %v19677_v52  ;;  %v23132_v62 = vand.u32 4294901760, %v19677_v52  ;;  %v19796_v36 = vand.u32 4294901760, %v108_v13 }
 0x1bd   :  { %23121 = vst [vmem:[#allocation36_spill] sm:$0xff] %v19682_v44  ;;  %23130 = vst [vmem:[#allocation42_spill] sm:$0xff] %v19747_v24 }
 0x1be   :  { %23115 = vst [vmem:[#allocation18_spill] sm:$0xff] %v19659_v0  ;;  %v19693_v32 = vsub.f32 %v5056_v3, %v19659_v0  ;;  %v19711_v3 = vsub.f32 %v19632_v57, %v22638_v37  ;;  %v19759_v55 = vsub.f32 %v19677_v52, %v23132_v62  ;;  %v23137_v52 = vand.u32 4294901760, %v19690_v27  ;;  %23140 = vst [vmem:[#allocation46_spill] sm:$0xff] %v19796_v36 }
 0x1bf   :  { %14864 = vmatmul.mubr.f32.gmra.mrb[20].mxu0 %v19310_v60  ;;  %v5059_v60 = vsel %vm123_vm0, %v5014_v10, 0  ;;  %v19732_v10 = vand.u32 4294901760, %v107_v30 }
 0x1c0   :  { %14866 = vmatprep.mubr.f32.mxu0 %v19312_v23  ;;  %23124 = vst [vmem:[#allocation39_spill] sm:$0xff] %v19693_v32  ;;  %v5015_v23 = vmul.f32 %v23125_v61, %v23125_v61  ;;  %v19715_v58 = vand.u32 4294901760, %v5059_v60  ;;  %v23134_v61 = vand.u32 4294901760, %v19682_v44 }
 0x1c1   :  { %23128 = vst [vmem:[#allocation41_spill] sm:$0xff] %v19732_v10 }
 0x1c2   :  { %23127 = vst [vmem:[#allocation40_spill] sm:$0xff] %v19715_v58  ;;  %v19769_v43 = vsub.f32 %v19682_v44, %v23134_v61  ;;  %v19790_v61 = vsub.f32 %v107_v30, %v19732_v10 }
 0x1c3   :  { %14867 = vmatmul.mubr.f32.gmra.mrb[22].mxu0 %v19335_v14  ;;  %v19726_v14 = vsub.f32 %v19643_v50, %v22642_v63  ;;  %v23129_v63 = vand.u32 4294901760, %v19666_v1 }
 0x1c4   :  { %14869 = vmatprep.mubr.f32.mxu0 %v19342_v16  ;;  %v5062_v16 = vsel %vm123_vm0, %v5015_v23, 0  ;;  %v23131_v23 = vand.u32 4294901760, %v19674_v7  ;;  %23139 = vst [vmem:[#allocation45_spill] sm:$0xff] %v19790_v61 }
 0x1c5   :  { %v19744_v37 = vsub.f32 %v19666_v1, %v23129_v63  ;;  %v19762_v63 = vsub.f32 %v5059_v60, %v19715_v58  ;;  %v19776_v62 = vand.u32 4294901760, %v5062_v16  ;;  %v1370_v60 = vsub.f32 %v19705_v40, %v19747_v24  ;;  %v109_v40 = vld [vmem:[#allocation7 + $0x20] sm:$0xff] }
 0x1c6   :  { %v19754_v38 = vsub.f32 %v19674_v7, %v23131_v23  ;;  %v23135_v23 = vand.u32 4294901760, %v19685_v12 }
 0x1c7   :  { %14870 = vmatmul.mubr.f32.gmra.mrb[24].mxu0 %v19363_v39  ;;  %23133 = vst [vmem:[#allocation43_spill] sm:$0xff] %v19762_v63  ;;  %23136 = vst [vmem:[#allocation44_spill] sm:$0xff] %v19776_v62  ;;  %v23138_v39 = vand.u32 4294901760, %v19693_v32  ;;  %v19806_v24 = vsub.f32 %v5062_v16, %v19776_v62  ;;  %v19815_v57 = vand.u32 4294901760, %v1370_v60  ;;  %v110_v16 = vld [vmem:[#allocation7 + $0x28] sm:$0xff] }
 0x1c8   :  { %14872 = vmatprep.mubr.f32.mxu0 %v19368_v5  ;;  %v19774_v7 = vsub.f32 %v19685_v12, %v23135_v23  ;;  %v19782_v5 = vsub.f32 %v19690_v27, %v23137_v52  ;;  %v19818_v23 = vsub.f32 %v108_v13, %v19796_v36 }
 0x1c9   :  { %v19787_v1 = vsub.f32 %v19693_v32, %v23138_v39  ;;  %23141 = vst [vmem:[#allocation47_spill] sm:$0xff] %v19806_v24  ;;  %v19811_v32 = vand.u32 4294901760, %v19790_v61  ;;  %23144 = vst [vmem:[#allocation50_spill] sm:$0xff] %v19815_v57  ;;  %v23146_v39 = vand.u32 4294901760, %v19762_v63 }
 0x1ca   :  { %v14355_v44 = vpop.f32.mrb[0].mxu0  ;;  %23145 = vst [vmem:[#allocation51_spill] sm:$0xff] %v19818_v23 }
 0x1cb   :  { %v1280_v52 = vand.u32 4294901760, %v14355_v44  ;;  %v1182_v27 = vpop.f32.mrb[1].mxu0  ;;  %14873 = vmatmul.mubr.f32.gmra.mrb[26].mxu0 %v19383_v42  ;;  %23142 = vst [vmem:[#allocation48_spill] sm:$0xff] %v19811_v32  ;;  %v19824_v42 = vsub.f32 %v19762_v63, %v23146_v39  ;;  %v19836_v39 = vand.u32 4294901760, %v110_v16 }
 0x1cc   :  { %v1277_v50 = vand.u32 4294901760, %v1182_v27  ;;  %14875 = vmatprep.mubr.f32.mxu0 %v19389_v21 }
 0x1cd   :  { %v1526_v15 = vsub.f32 %v14355_v44, %v1280_v52  ;;  %23149 = vst [vmem:[#allocation54_spill] sm:$0xff] %v19836_v39 }
 0x1ce   :  { %v19813_v30 = vpack.c.bf16 %v1280_v52, %v1277_v50  ;;  %v1519_v51 = vsub.f32 %v1182_v27, %v1277_v50  ;;  %v14358_v21 = vpop.f32.mrb[2].mxu0  ;;  %v19826_v52 = vand.u32 4294901760, %v109_v40 }
 0x1cf   :  { %v1527_v12 = vand.u32 4294901760, %v1526_v15  ;;  %v1286_v35 = vand.u32 4294901760, %v14358_v21  ;;  %v1194_v44 = vpop.f32.mrb[3].mxu0  ;;  %14876 = vmatmul.mubr.f32.gmra.mrb[28].mxu0 %v19404_v59 }
 0x1d0   :  { %23143 = vst [vmem:[#allocation49_spill] sm:$0xff] %v19813_v30  ;;  %23147 = vst [vmem:[#allocation52_spill] sm:$0xff] %v19826_v52  ;;  %v1520_v50 = vand.u32 4294901760, %v1519_v51  ;;  %v1283_v27 = vand.u32 4294901760, %v1194_v44  ;;  %16754 = vmatprep.subr.bf16.mxu1 %v19813_v30  ;;  %14878 = vmatprep.mubr.f32.mxu0 %v19410_v28  ;;  %v19831_v60 = vpack.c.bf16 %v1526_v15, %v1519_v51 }
 0x1d1   :  { %v1528_v31 = vsub.f32 %v1526_v15, %v1527_v12  ;;  %v1540_v6 = vsub.f32 %v14358_v21, %v1286_v35  ;;  %16756 = vmatpush3.bf16.msra.mxu1 %v19813_v30  ;;  %v19844_v21 = vand.u32 4294901760, %v19818_v23 }
 0x1d2   :  { %23148 = vst [vmem:[#allocation53_spill] sm:$0xff] %v19831_v60  ;;  %v1521_v63 = vsub.f32 %v1519_v51, %v1520_v50  ;;  %v19838_v36 = vpack.c.bf16 %v1286_v35, %v1283_v27  ;;  %v1533_v62 = vsub.f32 %v1194_v44, %v1283_v27  ;;  %v14361_v10 = vpop.f32.mrb[4].mxu0  ;;  %v19840_v58 = vpack.c.bf16 %v1527_v12, %v1520_v50 }
 0x1d3   :  { %v1541_v28 = vand.u32 4294901760, %v1540_v6  ;;  %v1292_v13 = vand.u32 4294901760, %v14361_v10  ;;  %v1206_v29 = vpop.f32.mrb[5].mxu0  ;;  %14879 = vmatmul.mubr.f32.gmra.mrb[30].mxu0 %v19420_v45  ;;  %v1529_v15 = vand.u32 4294901760, %v1528_v31  ;;  %23152 = vst [vmem:[#allocation57_spill] sm:$0xff] %v19844_v21  ;;  %v23153_v51 = vand.u32 4294901760, %v19616_v25 }
 0x1d4   :  { %23150 = vst [vmem:[#allocation55_spill] sm:$0xff] %v19838_v36  ;;  %23151 = vst [vmem:[#allocation56_spill] sm:$0xff] %v19840_v58  ;;  %v1534_v30 = vand.u32 4294901760, %v1533_v62  ;;  %v1289_v59 = vand.u32 4294901760, %v1206_v29  ;;  %16758 = vmatprep.subr.bf16.mxu1 %v19838_v36  ;;  %v1522_v35 = vand.u32 4294901760, %v1521_v63  ;;  %v19849_v44 = vpack.c.bf16 %v1540_v6, %v1533_v62 }
 0x1d5   :  { %15221 = vmatprep.mubr.f32.mxu0 %v23153_v51  ;;  %v1542_v12 = vsub.f32 %v1540_v6, %v1541_v28  ;;  %v1554_v50 = vsub.f32 %v14361_v10, %v1292_v13  ;;  %16760 = vmatpush3.bf16.msra.mxu1 %v19838_v36  ;;  %v23155_v45 = vand.u32 4294901760, %v19806_v24  ;;  %v19858_v27 = vsub.f32 %v109_v40, %v19826_v52 }
 0x1d6   :  { %23154 = vst [vmem:[#allocation58_spill] sm:$0xff] %v19849_v44  ;;  %v1535_v58 = vsub.f32 %v1533_v62, %v1534_v30  ;;  %v19860_v0 = vpack.c.bf16 %v1292_v13, %v1289_v59  ;;  %v1547_v25 = vsub.f32 %v1206_v29, %v1289_v59  ;;  %v14364_v51 = vpop.f32.mrb[6].mxu0  ;;  %v19862_v63 = vpack.c.bf16 %v1529_v15, %v1522_v35 }
 0x1d7   :  { %v19855_v31 = vsub.f32 %v19806_v24, %v23155_v45  ;;  %23156 = vst [vmem:[#allocation59_spill] sm:$0xff] %v19858_v27  ;;  %v1555_v44 = vand.u32 4294901760, %v1554_v50  ;;  %v1298_v6 = vand.u32 4294901760, %v14364_v51  ;;  %v1218_v10 = vpop.f32.mrb[7].mxu0  ;;  %v23158_v36 = vand.u32 4294901760, %v19655_v17 }
 0x1d8   :  { %23157 = vst [vmem:[#allocation60_spill] sm:$0xff] %v19860_v0  ;;  %v1543_v60 = vand.u32 4294901760, %v1542_v12  ;;  %v19866_v9 = vpack.c.bf16 %v1541_v28, %v1534_v30  ;;  %v1548_v45 = vand.u32 4294901760, %v1547_v25  ;;  %v1295_v24 = vand.u32 4294901760, %v1218_v10  ;;  %16762 = vmatprep.subr.bf16.mxu1 %v19860_v0  ;;  %v19884_v12 = vld [vmem:[#allocation7 + $0x30] sm:$0xff] }
 0x1d9   :  { %15222 = vmatmul.mubr.f32.vlgmr.msra.gmra.mrb[32].mxu0 %v23158_v36  ;;  %v1536_v40 = vand.u32 4294901760, %v1535_v58  ;;  %v19870_v29 = vpack.c.bf16 %v1554_v50, %v1547_v25  ;;  %v1556_v62 = vsub.f32 %v1554_v50, %v1555_v44  ;;  %v1568_v13 = vsub.f32 %v14364_v51, %v1298_v6  ;;  %16764 = vmatpush3.bf16.msra.mxu1 %v19860_v0 }
 0x1da   :  { %23159 = vst [vmem:[#allocation61_spill] sm:$0xff] %v19866_v9  ;;  %17168 = vmatpush3.bf16.msra.mxu0 %v19026_v49  ;;  %v23160_v59 = vand.u32 4294901760, %v19700_v46  ;;  %v19877_v36 = vsub.f32 %v110_v16, %v19836_v39  ;;  %v1549_v30 = vsub.f32 %v1547_v25, %v1548_v45  ;;  %v19879_v28 = vpack.c.bf16 %v1298_v6, %v1295_v24  ;;  %v14367_v35 = vpop.f32.mrb[8].mxu0 }
 0x1db   :  { %v1561_v15 = vsub.f32 %v1218_v10, %v1295_v24  ;;  %v19881_v58 = vpack.c.bf16 %v1543_v60, %v1536_v40  ;;  %17170 = vmatprep.subr.bf16.mxu0 %v19151_v54  ;;  %v1569_v50 = vand.u32 4294901760, %v1568_v13  ;;  %v1304_v51 = vand.u32 4294901760, %v14367_v35  ;;  %v1230_v46 = vpop.f32.mrb[9].mxu0 }
 0x1dc   :  { %15224 = vmatprep.mubr.f32.mxu0 %v23160_v59  ;;  %23161 = vst [vmem:[#allocation62_spill] sm:$0xff] %v19877_v36  ;;  %23162 = vst [vmem:[#allocation63_spill] sm:$0xff] %v19879_v28  ;;  %v23163_v59 = vand.u32 4294901760, %v19711_v3  ;;  %v1557_v17 = vand.u32 4294901760, %v1556_v62  ;;  %v19888_v16 = vpack.c.bf16 %v1555_v44, %v1548_v45  ;;  %v1301_v6 = vand.u32 4294901760, %v1230_v46  ;;  %16766 = vmatprep.subr.bf16.mxu1 %v19879_v28 }
 0x1dd   :  { %v1562_v25 = vand.u32 4294901760, %v1561_v15  ;;  %v23165_v24 = vand.u32 4294901760, %v19721_v2  ;;  %v1550_v60 = vand.u32 4294901760, %v1549_v30  ;;  %v19893_v10 = vpack.c.bf16 %v1568_v13, %v1561_v15  ;;  %16768 = vmatpush3.bf16.msra.mxu1 %v19879_v28 }
 0x1de   :  { %15225 = vmatmul.mubr.f32.gmra.mrb[34].mxu0 %v23163_v59  ;;  %23164 = vst [vmem:[#allocation64_spill] sm:$0xff] %v19888_v16  ;;  %v1570_v40 = vsub.f32 %v1568_v13, %v1569_v50  ;;  %v1582_v49 = vsub.f32 %v14367_v35, %v1304_v51  ;;  %v23167_v3 = vsub.f32 %v19790_v61, %v19811_v32  ;;  %v19902_v44 = vand.u32 4294901760, %v19884_v12 }
 0x1df   :  { %15227 = vmatprep.mubr.f32.mxu0 %v23165_v24  ;;  %23166 = vst [vmem:[#allocation65_spill] sm:$0xff] %v19893_v10  ;;  %v1563_v45 = vsub.f32 %v1561_v15, %v1562_v25  ;;  %v19904_v59 = vpack.c.bf16 %v1304_v51, %v1301_v6  ;;  %v1575_v2 = vsub.f32 %v1230_v46, %v1301_v6  ;;  %v14370_v24 = vpop.f32.mrb[10].mxu0  ;;  %v23171_v9 = vand.u32 4294901760, %v19726_v14 }
 0x1e0   :  { %v19899_v62 = vand.u32 4294901760, %v23167_v3  ;;  %23169 = vst [vmem:[#allocation67_spill] sm:$0xff] %v19902_v44  ;;  %v19906_v30 = vpack.c.bf16 %v1557_v17, %v1550_v60  ;;  %v1583_v16 = vand.u32 4294901760, %v1582_v49  ;;  %v1310_v13 = vand.u32 4294901760, %v14370_v24  ;;  %v1242_v35 = vpop.f32.mrb[11].mxu0 }
 0x1e1   :  { %23170 = vst [vmem:[#allocation68_spill] sm:$0xff] %v19904_v59  ;;  %v1571_v28 = vand.u32 4294901760, %v1570_v40  ;;  %v19910_v32 = vpack.c.bf16 %v1569_v50, %v1562_v25  ;;  %v1576_v3 = vand.u32 4294901760, %v1575_v2  ;;  %v1307_v0 = vand.u32 4294901760, %v1242_v35  ;;  %16770 = vmatprep.subr.bf16.mxu1 %v19904_v59 }
 0x1e2   :  { %23168 = vst [vmem:[#allocation66_spill] sm:$0xff] %v19899_v62  ;;  %15228 = vmatmul.mubr.f32.gmra.mrb[36].mxu0 %v23171_v9  ;;  %v23173_v15 = vand.u32 4294901760, %v19739_v22  ;;  %v1564_v51 = vand.u32 4294901760, %v1563_v45  ;;  %v19915_v46 = vpack.c.bf16 %v1582_v49, %v1575_v2  ;;  %v1584_v17 = vsub.f32 %v1582_v49, %v1583_v16  ;;  %16772 = vmatpush3.bf16.msra.mxu1 %v19904_v59  ;;  %v14373_v40 = vpop.f32.mrb[12].mxu0  ;;  %v112_v45 = vld [vmem:[#allocation7 + $0x38] sm:$0xff] }
 0x1e3   :  { %23172 = vst [vmem:[#allocation69_spill] sm:$0xff] %v19910_v32  ;;  %v1596_v6 = vsub.f32 %v14370_v24, %v1310_v13  ;;  %v19921_v14 = vand.u32 4294901760, %v19858_v27  ;;  %v1577_v50 = vsub.f32 %v1575_v2, %v1576_v3  ;;  %v19923_v25 = vpack.c.bf16 %v1310_v13, %v1307_v0  ;;  %v1254_v49 = vpop.f32.mrb[13].mxu0 }
 0x1e4   :  { %15230 = vmatprep.mubr.f32.mxu0 %v23173_v15  ;;  %23174 = vst [vmem:[#allocation70_spill] sm:$0xff] %v19915_v46  ;;  %v1589_v60 = vsub.f32 %v1242_v35, %v1307_v0  ;;  %v19925_v22 = vpack.c.bf16 %v1571_v28, %v1564_v51  ;;  %v1316_v32 = vand.u32 4294901760, %v14373_v40  ;;  %v23177_v24 = vand.u32 4294901760, %v19744_v37 }
 0x1e5   :  { %23175 = vst [vmem:[#allocation71_spill] sm:$0xff] %v19921_v14  ;;  %23176 = vst [vmem:[#allocation72_spill] sm:$0xff] %v19923_v25  ;;  %v1597_v15 = vand.u32 4294901760, %v1596_v6  ;;  %v1585_v59 = vand.u32 4294901760, %v1584_v17  ;;  %v19929_v61 = vpack.c.bf16 %v1583_v16, %v1576_v3  ;;  %v1313_v46 = vand.u32 4294901760, %v1254_v49  ;;  %16774 = vmatprep.subr.bf16.mxu1 %v19923_v25 }
 0x1e6   :  { %15231 = vmatmul.mubr.f32.gmra.mrb[38].mxu0 %v23177_v24  ;;  %v1590_v9 = vand.u32 4294901760, %v1589_v60  ;;  %v23179_v2 = vand.u32 4294901760, %v19754_v38  ;;  %v1578_v0 = vand.u32 4294901760, %v1577_v50  ;;  %v19934_v28 = vpack.c.bf16 %v1596_v6, %v1589_v60  ;;  %16776 = vmatpush3.bf16.msra.mxu1 %v19923_v25  ;;  %v14376_v24 = vpop.f32.mrb[14].mxu0  ;;  %v113_v38 = vld [vmem:[#allocation7 + $0x40] sm:$0xff] }
 0x1e7   :  { %23178 = vst [vmem:[#allocation73_spill] sm:$0xff] %v19929_v61  ;;  %v1598_v13 = vsub.f32 %v1596_v6, %v1597_v15  ;;  %v1610_v35 = vsub.f32 %v14373_v40, %v1316_v32  ;;  %v19938_v37 = vand.u32 4294901760, %v19877_v36  ;;  %v19940_v51 = vand.u32 4294901760, %v112_v45 }
 0x1e8   :  { %15233 = vmatprep.mubr.f32.mxu0 %v23179_v2  ;;  %23180 = vst [vmem:[#allocation74_spill] sm:$0xff] %v19934_v28  ;;  %v1591_v16 = vsub.f32 %v1589_v60, %v1590_v9  ;;  %v19942_v3 = vpack.c.bf16 %v1316_v32, %v1313_v46  ;;  %v1603_v17 = vsub.f32 %v1254_v49, %v1313_v46  ;;  %v1322_v2 = vand.u32 4294901760, %v14376_v24  ;;  %v1266_v28 = vpop.f32.mrb[15].mxu0 }
 0x1e9   :  { %23181 = vst [vmem:[#allocation75_spill] sm:$0xff] %v19938_v37  ;;  %23182 = vst [vmem:[#allocation76_spill] sm:$0xff] %v19940_v51  ;;  %v19944_v61 = vpack.c.bf16 %v1585_v59, %v1578_v0  ;;  %v1611_v50 = vand.u32 4294901760, %v1610_v35  ;;  %v23184_v6 = vand.u32 4294901760, %v19759_v55  ;;  %v1599_v40 = vand.u32 4294901760, %v1598_v13 }
 0x1ea   :  { %23183 = vst [vmem:[#allocation77_spill] sm:$0xff] %v19942_v3  ;;  %v19948_v25 = vpack.c.bf16 %v1597_v15, %v1590_v9  ;;  %v1604_v10 = vand.u32 4294901760, %v1603_v17  ;;  %v1319_v39 = vand.u32 4294901760, %v1266_v28  ;;  %16778 = vmatprep.subr.bf16.mxu1 %v19942_v3  ;;  %v23186_v32 = vand.u32 4294901760, %v19769_v43  ;;  %v114_v15 = vld [vmem:[#allocation7 + $0x48] sm:$0xff] }
 0x1eb   :  { %15234 = vmatmul.mubr.f32.gmra.mrb[40].mxu0 %v23184_v6  ;;  %v1592_v46 = vand.u32 4294901760, %v1591_v16  ;;  %v19953_v59 = vpack.c.bf16 %v1610_v35, %v1603_v17  ;;  %v1612_v60 = vsub.f32 %v1610_v35, %v1611_v50  ;;  %v1624_v49 = vsub.f32 %v14376_v24, %v1322_v2  ;;  %16780 = vmatpush3.bf16.msra.mxu1 %v19942_v3  ;;  %v115_v16 = vld [vmem:[#allocation7 + $0x50] sm:$0xff] }
 0x1ec   :  { %23185 = vst [vmem:[#allocation78_spill] sm:$0xff] %v19948_v25  ;;  %15236 = vmatprep.mubr.f32.mxu0 %v23186_v32  ;;  %v19958_v55 = vsub.f32 %v19884_v12, %v19902_v44  ;;  %v19960_v9 = vand.u32 4294901760, %v113_v38  ;;  %v1605_v0 = vsub.f32 %v1603_v17, %v1604_v10  ;;  %v19962_v13 = vpack.c.bf16 %v1322_v2, %v1319_v39 }
 0x1ed   :  { %v1617_v6 = vsub.f32 %v1266_v28, %v1319_v39  ;;  %v19964_v43 = vpack.c.bf16 %v1599_v40, %v1592_v46  ;;  %v1625_v32 = vand.u32 4294901760, %v1624_v49  ;;  %v23189_v35 = vand.u32 4294901760, %v19774_v7 }
 0x1ee   :  { %23187 = vst [vmem:[#allocation79_spill] sm:$0xff] %v19958_v55  ;;  %23188 = vst [vmem:[#allocation80_spill] sm:$0xff] %v19960_v9  ;;  %v19969_v24 = vsub.f32 %v112_v45, %v19940_v51  ;;  %v1613_v25 = vand.u32 4294901760, %v1612_v60  ;;  %v19971_v12 = vpack.c.bf16 %v1611_v50, %v1604_v10  ;;  %16782 = vmatprep.subr.bf16.mxu1 %v19962_v13  ;;  %v23192_v17 = vand.u32 4294901760, %v19782_v5  ;;  %v116_v50 = vld [vmem:[#allocation7 + $0x58] sm:$0xff] }
 0x1ef   :  { %15237 = vmatmul.mubr.f32.gmra.mrb[42].mxu0 %v23189_v35  ;;  %v1618_v3 = vand.u32 4294901760, %v1617_v6  ;;  %v19976_v39 = vand.u32 4294901760, %v114_v15  ;;  %v1606_v28 = vand.u32 4294901760, %v1605_v0  ;;  %v19978_v2 = vpack.c.bf16 %v1624_v49, %v1617_v6  ;;  %16784 = vmatpush3.bf16.msra.mxu1 %v19962_v13 }
 0x1f0   :  { %23190 = vst [vmem:[#allocation81_spill] sm:$0xff] %v19969_v24  ;;  %23191 = vst [vmem:[#allocation82_spill] sm:$0xff] %v19971_v12  ;;  %15239 = vmatprep.mubr.f32.mxu0 %v23192_v17  ;;  %v1626_v40 = vsub.f32 %v1624_v49, %v1625_v32  ;;  %v1400_v7 = vsub.f32 %v19858_v27, %v19921_v14  ;;  %v19984_v10 = vsub.f32 %v113_v38, %v19960_v9  ;;  %v117_v49 = vld [vmem:[#allocation7 + $0x60] sm:$0xff] }
 0x1f1   :  { %23193 = vst [vmem:[#allocation83_spill] sm:$0xff] %v19976_v39  ;;  %v19986_v45 = vand.u32 4294901760, %v115_v16  ;;  %v1619_v46 = vsub.f32 %v1617_v6, %v1618_v3  ;;  %16786 = vmatprep.subr.bf16.mxu1 %v19862_v63  ;;  %v19990_v5 = vand.u32 4294901760, %v19958_v55  ;;  %v19992_v60 = vpack.c.bf16 %v1613_v25, %v1606_v28 }
 0x1f2   :  { %23194 = vst [vmem:[#allocation84_spill] sm:$0xff] %v19984_v10  ;;  %v19994_v0 = vpack.c.bf16 %v1625_v32, %v1618_v3  ;;  %v23198_v35 = vand.u32 4294901760, %v19787_v1  ;;  %v5285_v38 = vand.u32 4294901760, %v19855_v31  ;;  %v23199_v17 = vsub.f32 %v19818_v23, %v19844_v21  ;;  %14410 = vmatmul.mubr.f32.vlgmr.msra.gmra.mrb[0].mxu1 %v19815_v57 }
 0x1f3   :  { %23195 = vst [vmem:[#allocation85_spill] sm:$0xff] %v19986_v45  ;;  %23196 = vst [vmem:[#allocation86_spill] sm:$0xff] %v19990_v5  ;;  %v20005_v6 = vand.u32 4294901760, %v19969_v24  ;;  %v1627_v14 = vand.u32 4294901760, %v1626_v40  ;;  %v23202_v25 = vand.u32 4294901760, %v19824_v42  ;;  %v1410_v1 = vsub.f32 %v19877_v36, %v19938_v37  ;;  %16788 = vmatpush3.bf16.msra.mxu1 %v19862_v63  ;;  %14412 = vmatprep.mubr.f32.mxu1 %v19899_v62  ;;  %v119_v63 = vld [vmem:[#allocation7 + $0x70] sm:$0xff] }
 0x1f4   :  { %23197 = vst [vmem:[#allocation87_spill] sm:$0xff] %v19994_v0  ;;  %15240 = vmatmul.mubr.f32.gmra.mrb[44].mxu0 %v23198_v35  ;;  %v20002_v12 = vand.u32 4294901760, %v23199_v17  ;;  %v20013_v3 = vsub.f32 %v114_v15, %v19976_v39  ;;  %v20015_v31 = vand.u32 4294901760, %v116_v50  ;;  %v1620_v32 = vand.u32 4294901760, %v1619_v46  ;;  %v118_v17 = vld [vmem:[#allocation7 + $0x68] sm:$0xff]  ;;  %16790 = vmatprep.subr.bf16.mxu1 %v19881_v58 }
 0x1f5   :  { %23201 = vst [vmem:[#allocation89_spill] sm:$0xff] %v20005_v6  ;;  %15242 = vmatprep.mubr.f32.mxu0 %v23202_v25  ;;  %v20019_v28 = vand.u32 4294901760, %v1400_v7  ;;  %v20022_v40 = vand.u32 4294901760, %v19984_v10  ;;  %v20025_v42 = vsub.f32 %v115_v16, %v19986_v45  ;;  %v20027_v35 = vand.u32 4294901760, %v117_v49 }
 0x1f6   :  { %23200 = vst [vmem:[#allocation88_spill] sm:$0xff] %v20002_v12  ;;  %23203 = vst [vmem:[#allocation90_spill] sm:$0xff] %v20013_v3  ;;  %v1420_v15 = vsub.f32 %v19958_v55, %v19990_v5  ;;  %v20032_v46 = vpack.c.bf16 %v1627_v14, %v1620_v32  ;;  %v1430_v7 = vsub.f32 %v19969_v24, %v20005_v6  ;;  %14413 = vmatmul.mubr.f32.gmra.mrb[2].mxu1 %v20002_v12  ;;  %v120_v12 = vld [vmem:[#allocation7 + $0x78] sm:$0xff] }
 0x1f7   :  { %23204 = vst [vmem:[#allocation91_spill] sm:$0xff] %v20015_v31  ;;  %23205 = vst [vmem:[#allocation92_spill] sm:$0xff] %v20019_v28  ;;  %v20038_v16 = vand.u32 4294901760, %v1410_v1  ;;  %v20041_v25 = vand.u32 4294901760, %v20013_v3  ;;  %v20044_v62 = vsub.f32 %v116_v50, %v20015_v31  ;;  %v20046_v57 = vand.u32 4294901760, %v118_v17  ;;  %16792 = vmatpush3.bf16.msra.mxu1 %v19881_v58  ;;  %14415 = vmatprep.mubr.f32.mxu1 %v20019_v28 }
 0x1f8   :  { %23206 = vst [vmem:[#allocation93_spill] sm:$0xff] %v20022_v40  ;;  %23207 = vst [vmem:[#allocation94_spill] sm:$0xff] %v20025_v42  ;;  %15243 = vmatmul.mubr.f32.gmra.mrb[46].mxu0 %v5285_v38  ;;  %v1440_v14 = vsub.f32 %v19984_v10, %v20022_v40  ;;  %v20053_v38 = vand.u32 4294901760, %v20025_v42  ;;  %v20056_v1 = vsub.f32 %v117_v49, %v20027_v35  ;;  %v20058_v32 = vand.u32 4294901760, %v119_v63 }
 0x1f9   :  { %23208 = vst [vmem:[#allocation95_spill] sm:$0xff] %v20027_v35  ;;  %15249 = vmatprep.mubr.f32.mxu0 %v19552_v26  ;;  %23209 = vst [vmem:[#allocation96_spill] sm:$0xff] %v20038_v16  ;;  %16794 = vmatprep.subr.bf16.mxu1 %v19906_v30  ;;  %v20061_v50 = vand.u32 4294901760, %v1420_v15  ;;  %v20064_v58 = vand.u32 4294901760, %v1430_v7  ;;  %v1450_v28 = vsub.f32 %v20013_v3, %v20041_v25  ;;  %v20071_v49 = vand.u32 4294901760, %v20044_v62 }
 0x1fa   :  { %23210 = vst [vmem:[#allocation97_spill] sm:$0xff] %v20041_v25  ;;  %23211 = vst [vmem:[#allocation98_spill] sm:$0xff] %v20044_v62  ;;  %14416 = vmatmul.mubr.f32.gmra.mrb[4].mxu1 %v20038_v16  ;;  %v20074_v0 = vsub.f32 %v118_v17, %v20046_v57  ;;  %v20076_v40 = vand.u32 4294901760, %v120_v12  ;;  %v20080_v15 = vand.u32 4294901760, %v1440_v14  ;;  %v1460_v7 = vsub.f32 %v20025_v42, %v20053_v38 }
 0x1fb   :  { %23212 = vst [vmem:[#allocation99_spill] sm:$0xff] %v20046_v57  ;;  %23213 = vst [vmem:[#allocation100_spill] sm:$0xff] %v20053_v38  ;;  %16796 = vmatpush3.bf16.msra.mxu1 %v19906_v30  ;;  %v20085_v16 = vand.u32 4294901760, %v20056_v1  ;;  %14418 = vmatprep.mubr.f32.mxu1 %v20061_v50  ;;  %v20096_v30 = vand.u32 4294901760, %v1450_v28  ;;  %v1470_v17 = vsub.f32 %v20044_v62, %v20071_v49 }
 0x1fc   :  { %23214 = vst [vmem:[#allocation101_spill] sm:$0xff] %v20056_v1  ;;  %23215 = vst [vmem:[#allocation102_spill] sm:$0xff] %v20058_v32  ;;  %15250 = vmatmul.mubr.f32.vlgmr.msra.gmra.mrb[32].mxu0 %v19558_v19  ;;  %16798 = vmatprep.subr.bf16.mxu1 %v19925_v22  ;;  %v20104_v14 = vsub.f32 %v120_v12, %v20076_v40 }
 0x1fd   :  { %23216 = vst [vmem:[#allocation103_spill] sm:$0xff] %v20061_v50  ;;  %23217 = vst [vmem:[#allocation104_spill] sm:$0xff] %v20064_v58  ;;  %17172 = vmatpush3.bf16.msra.mxu0 %v19151_v54  ;;  %15252 = vmatprep.mubr.f32.mxu0 %v19588_v4  ;;  %v20088_v54 = vsub.f32 %v119_v63, %v20058_v32  ;;  %v20101_v63 = vand.u32 4294901760, %v20074_v0  ;;  %v20108_v50 = vand.u32 4294901760, %v1460_v7  ;;  %v20119_v12 = vand.u32 4294901760, %v1470_v17 }
 0x1fe   :  { %23218 = vst [vmem:[#allocation105_spill] sm:$0xff] %v20071_v49  ;;  %23219 = vst [vmem:[#allocation106_spill] sm:$0xff] %v20074_v0  ;;  %17174 = vmatprep.subr.bf16.mxu0 %v18950_v11  ;;  %14419 = vmatmul.mubr.f32.gmra.mrb[6].mxu1 %v20064_v58  ;;  %v1480_v58 = vsub.f32 %v20056_v1, %v20085_v16  ;;  %v20124_v7 = vand.u32 4294901760, %v20104_v14 }
 0x1ff   :  { %23220 = vst [vmem:[#allocation107_spill] sm:$0xff] %v20076_v40  ;;  %23221 = vst [vmem:[#allocation108_spill] sm:$0xff] %v20080_v15  ;;  %16800 = vmatpush3.bf16.msra.mxu1 %v19925_v22  ;;  %14421 = vmatprep.mubr.f32.mxu1 %v20080_v15  ;;  %v20113_v28 = vand.u32 4294901760, %v20088_v54  ;;  %v1490_v22 = vsub.f32 %v20074_v0, %v20101_v63 }
 0x200   :  { %23222 = vst [vmem:[#allocation109_spill] sm:$0xff] %v20085_v16  ;;  %23223 = vst [vmem:[#allocation110_spill] sm:$0xff] %v20088_v54  ;;  %15253 = vmatmul.mubr.f32.gmra.mrb[34].mxu0 %v19600_v47  ;;  %16802 = vmatprep.subr.bf16.mxu1 %v19944_v61  ;;  %v20128_v15 = vand.u32 4294901760, %v1480_v58 }
 0x201   :  { %15255 = vmatprep.mubr.f32.mxu0 %v19602_v48  ;;  %23224 = vst [vmem:[#allocation111_spill] sm:$0xff] %v20096_v30  ;;  %23225 = vst [vmem:[#allocation112_spill] sm:$0xff] %v20101_v63  ;;  %v1500_v16 = vsub.f32 %v20088_v54, %v20113_v28  ;;  %v20136_v17 = vand.u32 4294901760, %v1490_v22  ;;  %v23237_v22 = vld [vmem:[#allocation18_spill] sm:$0xff] }
 0x202   :  { %23226 = vst [vmem:[#allocation113_spill] sm:$0xff] %v20104_v14  ;;  %23227 = vst [vmem:[#allocation114_spill] sm:$0xff] %v20108_v50  ;;  %14422 = vmatmul.mubr.f32.gmra.mrb[8].mxu1 %v20096_v30  ;;  %v23246_v30 = vld [vmem:[#allocation54_spill] sm:$0xff] }
 0x203   :  { %23228 = vst [vmem:[#allocation115_spill] sm:$0xff] %v20113_v28  ;;  %23229 = vst [vmem:[#allocation116_spill] sm:$0xff] %v20119_v12  ;;  %16804 = vmatpush3.bf16.msra.mxu1 %v19944_v61  ;;  %14424 = vmatprep.mubr.f32.mxu1 %v20108_v50  ;;  %v1510_v61 = vsub.f32 %v20104_v14, %v20124_v7  ;;  %v20142_v58 = vand.u32 4294901760, %v1500_v16  ;;  %v23236_v16 = vld [vmem:[#allocation53_spill] sm:$0xff]  ;;  %v23245_v50 = vld [vmem:[#allocation27_spill] sm:$0xff] }
 0x204   :  { %15256 = vmatmul.mubr.f32.gmra.mrb[36].mxu0 %v19609_v20  ;;  %23230 = vst [vmem:[#allocation117_spill] sm:$0xff] %v20124_v7  ;;  %23231 = vst [vmem:[#allocation118_spill] sm:$0xff] %v20128_v15  ;;  %16806 = vmatprep.subr.bf16.mxu1 %v19964_v43 }
 0x205   :  { %15258 = vmatprep.mubr.f32.mxu0 %v19624_v53  ;;  %23232 = vst [vmem:[#allocation119_spill] sm:$0xff] %v20136_v17  ;;  %23233 = vst [vmem:[#allocation120_spill] sm:$0xff] %v20142_v58 }
 0x206   :  { %14425 = vmatmul.mubr.f32.gmra.mrb[10].mxu1 %v20119_v12  ;;  %v20148_v12 = vand.u32 4294901760, %v1510_v61  ;;  %v23238_v61 = vld [vmem:[#allocation33_spill] sm:$0xff] }
 0x207   :  { %16808 = vmatpush3.bf16.msra.mxu1 %v19964_v43  ;;  %14427 = vmatprep.mubr.f32.mxu1 %v20128_v15  ;;  %v23235_v43 = vld [vmem:[#allocation22_spill] sm:$0xff] }
 0x208   :  { %15259 = vmatmul.mubr.f32.gmra.mrb[38].mxu0 %v19626_v33  ;;  %16810 = vmatprep.subr.bf16.mxu1 %v19992_v60  ;;  %23234 = vst [vmem:[#allocation121_spill] sm:$0xff] %v20148_v12  ;;  %v23243_v15 = vld [vmem:[#allocation46_spill] sm:$0xff] }
 0x209   :  { %15261 = vmatprep.mubr.f32.mxu0 %v19637_v34 }
 0x20a   :  { %14428 = vmatmul.mubr.f32.gmra.mrb[12].mxu1 %v20136_v17  ;;  %v23241_v17 = vld [vmem:[#allocation58_spill] sm:$0xff] }
 0x20b   :  { %16812 = vmatpush3.bf16.msra.mxu1 %v19992_v60  ;;  %14430 = vmatprep.mubr.f32.mxu1 %v20142_v58  ;;  %v23239_v60 = vld [vmem:[#allocation40_spill] sm:$0xff]  ;;  %v23240_v58 = vld [vmem:[#allocation41_spill] sm:$0xff] }
 0x20c   :  { %15262 = vmatmul.mubr.f32.gmra.mrb[40].mxu0 %v19639_v56  ;;  %16814 = vmatprep.subr.bf16.mxu1 %v20032_v46 }
 0x20d   :  { %15264 = vmatprep.mubr.f32.mxu0 %v19645_v41 }
 0x20e   :  { %14431 = vmatmul.mubr.f32.gmra.mrb[14].mxu1 %v20148_v12  ;;  %v23242_v12 = vld [vmem:[#allocation44_spill] sm:$0xff] }
 0x20f   :  { %16816 = vmatpush3.bf16.msra.mxu1 %v20032_v46  ;;  %14465 = vmatprep.mubr.f32.mxu1 %v23235_v43  ;;  %v23244_v46 = vld [vmem:[#allocation26_spill] sm:$0xff] }
 0x210   :  { %15265 = vmatmul.mubr.f32.gmra.mrb[42].mxu0 %v19647_v8  ;;  %16818 = vmatprep.subr.bf16.mxu1 %v23236_v16 }
 0x211   :  { %15267 = vmatprep.mubr.f32.mxu0 %v19657_v18 }
 0x212   :  { %14466 = vmatmul.mubr.f32.vlgmr.msra.gmra.mrb[0].mxu1 %v23238_v61 }
 0x213   :  { %16820 = vmatpush3.bf16.msra.mxu1 %v23236_v16  ;;  %14468 = vmatprep.mubr.f32.mxu1 %v23240_v58  ;;  %v23247_v16 = vld [vmem:[#allocation17_spill] sm:$0xff]  ;;  %v23254_v58 = vld [vmem:[#allocation31_spill] sm:$0xff] }
 0x214   :  { %15268 = vmatmul.mubr.f32.gmra.mrb[44].mxu0 %v23237_v22  ;;  %16822 = vmatprep.subr.bf16.mxu1 %v23241_v17 }
 0x215   :  { %15270 = vmatprep.mubr.f32.mxu0 %v23239_v60  ;;  %v23268_v60 = vld [vmem:[#allocation55_spill] sm:$0xff] }
 0x216   :  { %14469 = vmatmul.mubr.f32.gmra.mrb[2].mxu1 %v23243_v15  ;;  %v23249_v15 = vld [vmem:[#allocation28_spill] sm:$0xff] }
 0x217   :  { %16824 = vmatpush3.bf16.msra.mxu1 %v23241_v17  ;;  %14471 = vmatprep.mubr.f32.mxu1 %v19826_v52  ;;  %v23250_v17 = vld [vmem:[#allocation21_spill] sm:$0xff] }
 0x218   :  { %15271 = vmatmul.mubr.f32.gmra.mrb[46].mxu0 %v23242_v12  ;;  %16826 = vmatprep.subr.bf16.mxu1 %v19870_v29  ;;  %v23248_v12 = vld [vmem:[#allocation65_spill] sm:$0xff] }
 0x219   :  { %15277 = vmatprep.mubr.f32.mxu0 %v23244_v46  ;;  %v23251_v52 = vld [vmem:[#allocation29_spill] sm:$0xff] }
 0x21a   :  { %14472 = vmatmul.mubr.f32.gmra.mrb[4].mxu1 %v23246_v30  ;;  %v23252_v30 = vld [vmem:[#allocation70_spill] sm:$0xff] }
 0x21b   :  { %16828 = vmatpush3.bf16.msra.mxu1 %v19870_v29  ;;  %14474 = vmatprep.mubr.f32.mxu1 %v19902_v44  ;;  %v23253_v29 = vld [vmem:[#allocation30_spill] sm:$0xff] }
 0x21c   :  { %15278 = vmatmul.mubr.f32.vlgmr.msra.gmra.mrb[32].mxu0 %v23245_v50  ;;  %16830 = vmatprep.subr.bf16.mxu1 %v23248_v12  ;;  %v23255_v44 = vld [vmem:[#allocation74_spill] sm:$0xff] }
 0x21d   :  { %17176 = vmatpush3.bf16.msra.mxu0 %v18950_v11  ;;  %15280 = vmatprep.mubr.f32.mxu0 %v23247_v16 }
 0x21e   :  { %17178 = vmatprep.subr.bf16.mxu0 %v23250_v17  ;;  %14475 = vmatmul.mubr.f32.gmra.mrb[6].mxu1 %v19940_v51  ;;  %v23256_v51 = vld [vmem:[#allocation32_spill] sm:$0xff] }
 0x21f   :  { %16832 = vmatpush3.bf16.msra.mxu1 %v23248_v12  ;;  %14477 = vmatprep.mubr.f32.mxu1 %v19960_v9  ;;  %v23257_v12 = vld [vmem:[#allocation34_spill] sm:$0xff]  ;;  %v23265_v9 = vld [vmem:[#allocation19_spill] sm:$0xff] }
 0x220   :  { %15281 = vmatmul.mubr.f32.gmra.mrb[34].mxu0 %v23249_v15  ;;  %16834 = vmatprep.subr.bf16.mxu1 %v23252_v30 }
 0x221   :  { %15283 = vmatprep.mubr.f32.mxu0 %v23251_v52 }
 0x222   :  { %14478 = vmatmul.mubr.f32.gmra.mrb[8].mxu1 %v19976_v39  ;;  %v23258_v39 = vld [vmem:[#allocation35_spill] sm:$0xff] }
 0x223   :  { %16836 = vmatpush3.bf16.msra.mxu1 %v23252_v30  ;;  %14480 = vmatprep.mubr.f32.mxu1 %v19986_v45  ;;  %v23259_v30 = vld [vmem:[#allocation36_spill] sm:$0xff]  ;;  %v23263_v45 = vld [vmem:[#allocation49_spill] sm:$0xff] }
 0x224   :  { %15284 = vmatmul.mubr.f32.gmra.mrb[36].mxu0 %v23253_v29  ;;  %16838 = vmatprep.subr.bf16.mxu1 %v23255_v44 }
 0x225   :  { %15286 = vmatprep.mubr.f32.mxu0 %v23254_v58 }
 0x226   :  { %14481 = vmatmul.mubr.f32.gmra.mrb[10].mxu1 %v20015_v31  ;;  %v23260_v31 = vld [vmem:[#allocation37_spill] sm:$0xff] }
 0x227   :  { %16840 = vmatpush3.bf16.msra.mxu1 %v23255_v44  ;;  %14483 = vmatprep.mubr.f32.mxu1 %v20027_v35  ;;  %v23261_v44 = vld [vmem:[#allocation38_spill] sm:$0xff]  ;;  %v23262_v35 = vld [vmem:[#allocation23_spill] sm:$0xff] }
 0x228   :  { %15287 = vmatmul.mubr.f32.gmra.mrb[38].mxu0 %v23256_v51  ;;  %16842 = vmatprep.subr.bf16.mxu1 %v19953_v59 }
 0x229   :  { %15289 = vmatprep.mubr.f32.mxu0 %v23257_v12 }
 0x22a   :  { %14484 = vmatmul.mubr.f32.gmra.mrb[12].mxu1 %v20046_v57  ;;  %v23264_v57 = vld [vmem:[#allocation39_spill] sm:$0xff] }
 0x22b   :  { %16844 = vmatpush3.bf16.msra.mxu1 %v19953_v59  ;;  %14486 = vmatprep.mubr.f32.mxu1 %v20058_v32  ;;  %v23266_v59 = vld [vmem:[#allocation43_spill] sm:$0xff]  ;;  %v23267_v32 = vld [vmem:[#allocation45_spill] sm:$0xff] }
 0x22c   :  { %15290 = vmatmul.mubr.f32.gmra.mrb[40].mxu0 %v23258_v39  ;;  %16846 = vmatprep.subr.bf16.mxu1 %v19978_v2 }
 0x22d   :  { %15292 = vmatprep.mubr.f32.mxu0 %v23259_v30 }
 0x22e   :  { %14487 = vmatmul.mubr.f32.gmra.mrb[14].mxu1 %v20076_v40  ;;  %v23269_v40 = vld [vmem:[#allocation47_spill] sm:$0xff] }
 0x22f   :  { %16848 = vmatpush3.bf16.msra.mxu1 %v19978_v2  ;;  %14521 = vmatprep.mubr.f32.mxu1 %v23262_v35  ;;  %v23270_v2 = vand.u32 4294901760, %v23244_v46  ;;  %v23272_v35 = vand.u32 4294901760, %v23245_v50  ;;  %v23274_v46 = vld [vmem:[#allocation63_spill] sm:$0xff]  ;;  %v23277_v50 = vld [vmem:[#allocation68_spill] sm:$0xff] }
 0x230   :  { %15293 = vmatmul.mubr.f32.gmra.mrb[42].mxu0 %v23260_v31  ;;  %16850 = vmatprep.subr.bf16.mxu1 %v23263_v45 }
 0x231   :  { %15295 = vmatprep.mubr.f32.mxu0 %v23261_v44 }
 0x232   :  { %14522 = vmatmul.mubr.f32.vlgmr.msra.gmra.mrb[0].mxu1 %v23265_v9  ;;  %v23271_v9 = vld [vmem:[#allocation60_spill] sm:$0xff] }
 0x233   :  { %16852 = vmatpush3.bf16.msra.mxu1 %v23263_v45  ;;  %14524 = vmatprep.mubr.f32.mxu1 %v23267_v32 }
 0x234   :  { %15296 = vmatmul.mubr.f32.gmra.mrb[44].mxu0 %v23264_v57  ;;  %16854 = vmatprep.subr.bf16.mxu1 %v23268_v60 }
 0x235   :  { %15298 = vmatprep.mubr.f32.mxu0 %v23266_v59 }
 0x236   :  { %14525 = vmatmul.mubr.f32.gmra.mrb[2].mxu1 %v19818_v23  ;;  %v23273_v23 = vand.u32 4294901760, %v23247_v16  ;;  %v23281_v16 = vand.u32 4294901760, %v23256_v51  ;;  %v23286_v51 = vand.u32 4294901760, %v23260_v31  ;;  %v23293_v31 = vld [vmem:[#allocation48_spill] sm:$0xff] }
 0x237   :  { %16856 = vmatpush3.bf16.msra.mxu1 %v23268_v60  ;;  %14527 = vmatprep.mubr.f32.mxu1 %v19858_v27  ;;  %v23340_v27 = vld [vmem:[#allocation99_spill] sm:$0xff] }
 0x238   :  { %15299 = vmatmul.mubr.f32.gmra.mrb[46].mxu0 %v23269_v40  ;;  %16858 = vmatprep.subr.bf16.mxu1 %v23271_v9 }
 0x239   :  { %15305 = vmatprep.mubr.f32.mxu0 %v23270_v2  ;;  %v23275_v2 = vand.u32 4294901760, %v23249_v15  ;;  %v23279_v15 = vand.u32 4294901760, %v23254_v58  ;;  %v23283_v58 = vld [vmem:[#allocation77_spill] sm:$0xff] }
 0x23a   :  { %14528 = vmatmul.mubr.f32.gmra.mrb[4].mxu1 %v19877_v36 }
 0x23b   :  { %16860 = vmatpush3.bf16.msra.mxu1 %v23271_v9  ;;  %14530 = vmatprep.mubr.f32.mxu1 %v19958_v55  ;;  %v18679_v55 = vld [vmem:[#allocation5 + $0x68] sm:$0xff] }
 0x23c   :  { %15306 = vmatmul.mubr.f32.vlgmr.msra.gmra.mrb[32].mxu0 %v23272_v35  ;;  %16862 = vmatprep.subr.bf16.mxu1 %v23274_v46  ;;  %v23276_v35 = vand.u32 4294901760, %v23251_v52  ;;  %v23280_v52 = vld [vmem:[#allocation72_spill] sm:$0xff] }
 0x23d   :  { %17180 = vmatpush3.bf16.msra.mxu0 %v23250_v17  ;;  %15308 = vmatprep.mubr.f32.mxu0 %v23273_v23  ;;  %v23278_v23 = vand.u32 4294901760, %v23253_v29  ;;  %v23284_v29 = vand.u32 4294901760, %v23258_v39  ;;  %v23288_v39 = vld [vmem:[#allocation24_spill] sm:$0xff] }
 0x23e   :  { %17182 = vmatprep.subr.bf16.mxu0 %v18950_v11  ;;  %14531 = vmatmul.mubr.f32.gmra.mrb[6].mxu1 %v19969_v24 }
 0x23f   :  { %16864 = vmatpush3.bf16.msra.mxu1 %v23274_v46  ;;  %14533 = vmatprep.mubr.f32.mxu1 %v19984_v10 }
 0x240   :  { %15309 = vmatmul.mubr.f32.gmra.mrb[34].mxu0 %v23275_v2  ;;  %16866 = vmatprep.subr.bf16.mxu1 %v23277_v50  ;;  %v23282_v2 = vand.u32 4294901760, %v23257_v12  ;;  %v23287_v12 = vand.u32 4294901760, %v23261_v44  ;;  %v23294_v44 = vld [vmem:[#allocation61_spill] sm:$0xff] }
 0x241   :  { %15311 = vmatprep.mubr.f32.mxu0 %v23276_v35  ;;  %v23285_v35 = vand.u32 4294901760, %v23259_v30  ;;  %v23289_v30 = vld [vmem:[#allocation56_spill] sm:$0xff] }
 0x242   :  { %14534 = vmatmul.mubr.f32.gmra.mrb[8].mxu1 %v20013_v3  ;;  %v23330_v3 = vld [vmem:[#allocation91_spill] sm:$0xff] }
 0x243   :  { %16868 = vmatpush3.bf16.msra.mxu1 %v23277_v50  ;;  %14536 = vmatprep.mubr.f32.mxu1 %v20025_v42  ;;  %v23321_v42 = vld [vmem:[#allocation83_spill] sm:$0xff] }
 0x244   :  { %15312 = vmatmul.mubr.f32.gmra.mrb[36].mxu0 %v23278_v23  ;;  %16870 = vmatprep.subr.bf16.mxu1 %v23280_v52  ;;  %v23290_v23 = vand.u32 4294901760, %v23264_v57  ;;  %v23296_v57 = vld [vmem:[#allocation71_spill] sm:$0xff] }
 0x245   :  { %15314 = vmatprep.mubr.f32.mxu0 %v23279_v15  ;;  %v23291_v15 = vld [vmem:[#allocation42_spill] sm:$0xff] }
 0x246   :  { %14537 = vmatmul.mubr.f32.gmra.mrb[10].mxu1 %v20044_v62 }
 0x247   :  { %16872 = vmatpush3.bf16.msra.mxu1 %v23280_v52  ;;  %14539 = vmatprep.mubr.f32.mxu1 %v20056_v1  ;;  %v23324_v1 = vld [vmem:[#allocation85_spill] sm:$0xff] }
 0x248   :  { %15315 = vmatmul.mubr.f32.gmra.mrb[38].mxu0 %v23281_v16  ;;  %16874 = vmatprep.subr.bf16.mxu1 %v23283_v58  ;;  %v23292_v16 = vand.u32 4294901760, %v23266_v59  ;;  %v23299_v59 = vld [vmem:[#allocation93_spill] sm:$0xff] }
 0x249   :  { %15317 = vmatprep.mubr.f32.mxu0 %v23282_v2  ;;  %v23295_v2 = vand.u32 4294901760, %v23269_v40  ;;  %v23298_v40 = vld [vmem:[#allocation69_spill] sm:$0xff] }
 0x24a   :  { %14540 = vmatmul.mubr.f32.gmra.mrb[12].mxu1 %v20074_v0 }
 0x24b   :  { %16876 = vmatpush3.bf16.msra.mxu1 %v23283_v58  ;;  %14542 = vmatprep.mubr.f32.mxu1 %v20088_v54 }
 0x24c   :  { %15318 = vmatmul.mubr.f32.gmra.mrb[40].mxu0 %v23284_v29  ;;  %16878 = vmatprep.subr.bf16.mxu1 %v19962_v13  ;;  %v23297_v29 = vld [vmem:[#allocation64_spill] sm:$0xff] }
 0x24d   :  { %15320 = vmatprep.mubr.f32.mxu0 %v23285_v35  ;;  %v23300_v35 = vld [vmem:[#allocation73_spill] sm:$0xff] }
 0x24e   :  { %14543 = vmatmul.mubr.f32.gmra.mrb[14].mxu1 %v20104_v14 }
 0x24f   :  { %16880 = vmatpush3.bf16.msra.mxu1 %v19962_v13  ;;  %14577 = vmatprep.mubr.f32.mxu1 %v23288_v39  ;;  %v23315_v39 = vld [vmem:[#allocation76_spill] sm:$0xff] }
 0x250   :  { %15321 = vmatmul.mubr.f32.gmra.mrb[42].mxu0 %v23286_v51  ;;  %16882 = vmatprep.subr.bf16.mxu1 %v23289_v30  ;;  %v23301_v51 = vld [vmem:[#allocation78_spill] sm:$0xff] }
 0x251   :  { %15323 = vmatprep.mubr.f32.mxu0 %v23287_v12  ;;  %v23302_v12 = vld [vmem:[#allocation109_spill] sm:$0xff] }
 0x252   :  { %14578 = vmatmul.mubr.f32.vlgmr.msra.gmra.mrb[0].mxu1 %v23291_v15 }
 0x253   :  { %16884 = vmatpush3.bf16.msra.mxu1 %v23289_v30  ;;  %14580 = vmatprep.mubr.f32.mxu1 %v23293_v31  ;;  %v23303_v30 = vld [vmem:[#allocation82_spill] sm:$0xff] }
 0x254   :  { %15324 = vmatmul.mubr.f32.gmra.mrb[44].mxu0 %v23290_v23  ;;  %16886 = vmatprep.subr.bf16.mxu1 %v23294_v44  ;;  %v23304_v23 = vld [vmem:[#allocation87_spill] sm:$0xff] }
 0x255   :  { %15326 = vmatprep.mubr.f32.mxu0 %v23292_v16  ;;  %v18666_v16 = vld [vmem:[#allocation5 + $0x8] sm:$0xff] }
 0x256   :  { %14581 = vmatmul.mubr.f32.gmra.mrb[2].mxu1 %v19844_v21  ;;  %v18676_v21 = vld [vmem:[#allocation5 + $0x50] sm:$0xff] }
 0x257   :  { %16888 = vmatpush3.bf16.msra.mxu1 %v23294_v44  ;;  %14583 = vmatprep.mubr.f32.mxu1 %v23296_v57  ;;  %v7455_v44 = vmul.f32 %v18666_v16, %v18666_v16  ;;  %v23310_v57 = vld [vmem:[#allocation54_spill] sm:$0xff] }
 0x258   :  { %15327 = vmatmul.mubr.f32.gmra.mrb[46].mxu0 %v23295_v2  ;;  %16890 = vmatprep.subr.bf16.mxu1 %v23297_v29  ;;  %v23305_v2 = vld [vmem:[#allocation40_spill] sm:$0xff] }
 0x259   :  { %15333 = vmatprep.mubr.f32.mxu0 %v19552_v26 }
 0x25a   :  { %14584 = vmatmul.mubr.f32.gmra.mrb[4].mxu1 %v19938_v37  ;;  %v18675_v37 = vld [vmem:[#allocation5 + $0x48] sm:$0xff] }
 0x25b   :  { %16892 = vmatpush3.bf16.msra.mxu1 %v23297_v29  ;;  %14586 = vmatprep.mubr.f32.mxu1 %v19990_v5  ;;  %v18667_v29 = vld [vmem:[#allocation5] sm:$0xff] }
 0x25c   :  { %15334 = vmatmul.mubr.f32.vlgmr.msra.gmra.mrb[32].mxu0 %v19558_v19  ;;  %16894 = vmatprep.subr.bf16.mxu1 %v23298_v40  ;;  %v18674_v5 = vld [vmem:[#allocation5 + $0x40] sm:$0xff] }
 0x25d   :  { %17184 = vmatpush3.bf16.msra.mxu0 %v18950_v11  ;;  %15336 = vmatprep.mubr.f32.mxu0 %v19588_v4 }
 0x25e   :  { %17378 = vmatprep.subr.bf16.mxu0 %v18950_v11  ;;  %14587 = vmatmul.mubr.f32.gmra.mrb[6].mxu1 %v20005_v6 }
 0x25f   :  { %16896 = vmatpush3.bf16.msra.mxu1 %v23298_v40  ;;  %14589 = vmatprep.mubr.f32.mxu1 %v23299_v59  ;;  %v7454_v40 = vmul.f32 %v18667_v29, %v18667_v29  ;;  %v18673_v59 = vld [vmem:[#allocation5 + $0x38] sm:$0xff] }
 0x260   :  { %15337 = vmatmul.mubr.f32.gmra.mrb[34].mxu0 %v19600_v47  ;;  %16898 = vmatprep.subr.bf16.mxu1 %v23300_v35  ;;  %v7461_v6 = vmul.f32 %v18673_v59, %v18673_v59 }
 0x261   :  { %15339 = vmatprep.mubr.f32.mxu0 %v19602_v48  ;;  %v7471_v29 = vsel %vm123_vm0, %v7454_v40, 0  ;;  %v7462_v40 = vmul.f32 %v18674_v5, %v18674_v5 }
 0x262   :  { %14590 = vmatmul.mubr.f32.gmra.mrb[8].mxu1 %v20041_v25  ;;  %v23309_v25 = vld [vmem:[#allocation52_spill] sm:$0xff] }
 0x263   :  { %16900 = vmatpush3.bf16.msra.mxu1 %v23300_v35  ;;  %14592 = vmatprep.mubr.f32.mxu1 %v20053_v38  ;;  %v23306_v35 = vld [vmem:[#allocation41_spill] sm:$0xff] }
 0x264   :  { %15340 = vmatmul.mubr.f32.gmra.mrb[36].mxu0 %v19609_v20  ;;  %16902 = vmatprep.subr.bf16.mxu1 %v23301_v51 }
 0x265   :  { %15342 = vmatprep.mubr.f32.mxu0 %v19624_v53 }
 0x266   :  { %14593 = vmatmul.mubr.f32.gmra.mrb[10].mxu1 %v20071_v49  ;;  %v18671_v49 = vld [vmem:[#allocation5 + $0x28] sm:$0xff] }
 0x267   :  { %16904 = vmatpush3.bf16.msra.mxu1 %v23301_v51  ;;  %14595 = vmatprep.mubr.f32.mxu1 %v23302_v12  ;;  %v18668_v51 = vld [vmem:[#allocation5 + $0x10] sm:$0xff]  ;;  %v7459_v38 = vmul.f32 %v18671_v49, %v18671_v49  ;;  %v20342_v49 = vand.u32 4294901760, %v7471_v29 }
 0x268   :  { %15343 = vmatmul.mubr.f32.gmra.mrb[38].mxu0 %v19626_v33  ;;  %16906 = vmatprep.subr.bf16.mxu1 %v23303_v30  ;;  %v23308_v12 = vld [vmem:[#allocation46_spill] sm:$0xff] }
 0x269   :  { %15345 = vmatprep.mubr.f32.mxu0 %v19637_v34  ;;  %v7486_v59 = vsel %vm123_vm0, %v7459_v38, 0  ;;  %v7495_v38 = vsel %vm123_vm0, %v7462_v40, 0  ;;  %v20366_v31 = vsub.f32 %v7471_v29, %v20342_v49  ;;  %v23316_v29 = vld [vmem:[#allocation80_spill] sm:$0xff] }
 0x26a   :  { %14596 = vmatmul.mubr.f32.gmra.mrb[12].mxu1 %v20101_v63  ;;  %v18670_v63 = vld [vmem:[#allocation5 + $0x20] sm:$0xff]  ;;  %v20372_v15 = vand.u32 4294901760, %v7486_v59 }
 0x26b   :  { %16908 = vmatpush3.bf16.msra.mxu1 %v23303_v30  ;;  %14598 = vmatprep.mubr.f32.mxu1 %v20113_v28  ;;  %v7456_v30 = vmul.f32 %v18668_v51, %v18668_v51  ;;  %v23307_v28 = vld [vmem:[#allocation44_spill] sm:$0xff]  ;;  %v7458_v16 = vmul.f32 %v18670_v63, %v18670_v63  ;;  %v18672_v51 = vld [vmem:[#allocation5 + $0x30] sm:$0xff]  ;;  %23312 = vst [vmem:[#allocation53_spill] sm:$0xff] %v20366_v31 }
 0x26c   :  { %15346 = vmatmul.mubr.f32.gmra.mrb[40].mxu0 %v19639_v56  ;;  %16910 = vmatprep.subr.bf16.mxu1 %v23304_v23  ;;  %v20401_v62 = vsub.f32 %v7486_v59, %v20372_v15 }
 0x26d   :  { %15348 = vmatprep.mubr.f32.mxu0 %v19645_v41  ;;  %v7477_v63 = vsel %vm123_vm0, %v7456_v30, 0  ;;  %v23311_v30 = vld [vmem:[#allocation67_spill] sm:$0xff] }
 0x26e   :  { %14599 = vmatmul.mubr.f32.gmra.mrb[14].mxu1 %v20124_v7  ;;  %v20352_v5 = vand.u32 4294901760, %v7477_v63  ;;  %23320 = vst [vmem:[#allocation17_spill] sm:$0xff] %v20401_v62 }
 0x26f   :  { %16912 = vmatpush3.bf16.msra.mxu1 %v23304_v23  ;;  %14633 = vmatprep.mubr.f32.mxu1 %v23235_v43  ;;  %v18669_v23 = vld [vmem:[#allocation5 + $0x18] sm:$0xff] }
 0x270   :  { %15349 = vmatmul.mubr.f32.gmra.mrb[42].mxu0 %v19647_v8  ;;  %16914 = vmatprep.subr.bf16.mxu1 %v23263_v45  ;;  %v7457_v7 = vmul.f32 %v18669_v23, %v18669_v23  ;;  %v7460_v23 = vmul.f32 %v18672_v51, %v18672_v51  ;;  %v7483_v51 = vsel %vm123_vm0, %v7458_v16, 0  ;;  %v20388_v54 = vsub.f32 %v7477_v63, %v20352_v5 }
 0x271   :  { %15351 = vmatprep.mubr.f32.mxu0 %v19657_v18  ;;  %v20360_v16 = vand.u32 4294901760, %v7483_v51 }
 0x272   :  { %14634 = vmatmul.mubr.f32.vlgmr.msra.gmra.mrb[0].mxu1 %v23238_v61  ;;  %23317 = vst [vmem:[#allocation58_spill] sm:$0xff] %v20388_v54 }
 0x273   :  { %16916 = vmatpush3.bf16.msra.mxu1 %v23263_v45  ;;  %14636 = vmatprep.mubr.f32.mxu1 %v23306_v35  ;;  %v7474_v45 = vsel %vm123_vm0, %v7455_v44, 0  ;;  %v7463_v44 = vmul.f32 %v18675_v37, %v18675_v37  ;;  %v20394_v0 = vsub.f32 %v7483_v51, %v20360_v16 }
 0x274   :  { %15352 = vmatmul.mubr.f32.gmra.mrb[44].mxu0 %v23237_v22  ;;  %16918 = vmatprep.subr.bf16.mxu1 %v23268_v60 }
 0x275   :  { %15354 = vmatprep.mubr.f32.mxu0 %v23305_v2  ;;  %23319 = vst [vmem:[#allocation27_spill] sm:$0xff] %v20394_v0  ;;  %v23336_v10 = vand.u32 4294901760, %v20394_v0 }
 0x276   :  { %14637 = vmatmul.mubr.f32.gmra.mrb[2].mxu1 %v23308_v12 }
 0x277   :  { %16920 = vmatpush3.bf16.msra.mxu1 %v23268_v60  ;;  %14639 = vmatprep.mubr.f32.mxu1 %v23309_v25  ;;  %v20344_v60 = vand.u32 4294901760, %v7474_v45  ;;  %v20466_v24 = vsub.f32 %v20394_v0, %v23336_v10 }
 0x278   :  { %15355 = vmatmul.mubr.f32.gmra.mrb[46].mxu0 %v23307_v28  ;;  %16922 = vmatprep.subr.bf16.mxu1 %v23271_v9 }
 0x279   :  { %15361 = vmatprep.mubr.f32.mxu0 %v19552_v26  ;;  %v7480_v26 = vsel %vm123_vm0, %v7457_v7, 0  ;;  %v7492_v7 = vsel %vm123_vm0, %v7461_v6, 0  ;;  %v23314_v6 = vld [vmem:[#allocation16_spill] sm:$0xff] }
 0x27a   :  { %14640 = vmatmul.mubr.f32.gmra.mrb[4].mxu1 %v23310_v57  ;;  %v20354_v37 = vand.u32 4294901760, %v7480_v26 }
 0x27b   :  { %16924 = vmatpush3.bf16.msra.mxu1 %v23271_v9  ;;  %14642 = vmatprep.mubr.f32.mxu1 %v23311_v30  ;;  %v7498_v9 = vsel %vm123_vm0, %v7463_v44, 0  ;;  %v20378_v44 = vand.u32 4294901760, %v7492_v7 }
 0x27c   :  { %15362 = vmatmul.mubr.f32.vlgmr.msra.gmra.mrb[32].mxu0 %v19558_v19  ;;  %v7489_v19 = vsel %vm123_vm0, %v7460_v23, 0  ;;  %16926 = vmatprep.subr.bf16.mxu1 %v23274_v46  ;;  %v20369_v23 = vsub.f32 %v7474_v45, %v20344_v60  ;;  %v20382_v45 = vand.u32 4294901760, %v7495_v38  ;;  %v20384_v14 = vand.u32 4294901760, %v7498_v9 }
 0x27d   :  { %17380 = vmatpush3.bf16.msra.mxu0 %v18950_v11  ;;  %15364 = vmatprep.mubr.f32.mxu0 %v19588_v4  ;;  %v7464_v4 = vmul.f32 %v18676_v21, %v18676_v21  ;;  %v20376_v40 = vand.u32 4294901760, %v7489_v19  ;;  %v18677_v21 = vld [vmem:[#allocation5 + $0x58] sm:$0xff] }
 0x27e   :  { %23313 = vst [vmem:[#allocation18_spill] sm:$0xff] %v20369_v23  ;;  %17382 = vmatprep.subr.bf16.mxu0 %v23314_v6  ;;  %14643 = vmatmul.mubr.f32.gmra.mrb[6].mxu1 %v23315_v39  ;;  %v20415_v59 = vsub.f32 %v7495_v38, %v20382_v45 }
 0x27f   :  { %16928 = vmatpush3.bf16.msra.mxu1 %v23274_v46  ;;  %14645 = vmatprep.mubr.f32.mxu1 %v23316_v29  ;;  %v20406_v63 = vsub.f32 %v7489_v19, %v20376_v40  ;;  %v20418_v46 = vsub.f32 %v7498_v9, %v20384_v14  ;;  %v23331_v19 = vand.u32 4294901760, %v20369_v23  ;;  %v23332_v9 = vld [vmem:[#allocation95_spill] sm:$0xff] }
 0x280   :  { %15365 = vmatmul.mubr.f32.gmra.mrb[34].mxu0 %v19600_v47  ;;  %v7465_v47 = vmul.f32 %v18677_v21, %v18677_v21  ;;  %16930 = vmatprep.subr.bf16.mxu1 %v23277_v50  ;;  %v7501_v21 = vsel %vm123_vm0, %v7464_v4, 0  ;;  %23325 = vst [vmem:[#allocation29_spill] sm:$0xff] %v20415_v59 }
 0x281   :  { %15367 = vmatprep.mubr.f32.mxu0 %v19602_v48  ;;  %v20391_v48 = vsub.f32 %v7480_v26, %v20354_v37  ;;  %23322 = vst [vmem:[#allocation65_spill] sm:$0xff] %v20406_v63  ;;  %v20409_v26 = vsub.f32 %v7492_v7, %v20378_v44  ;;  %23326 = vst [vmem:[#allocation70_spill] sm:$0xff] %v20418_v46  ;;  %v20440_v7 = vsub.f32 %v20369_v23, %v23331_v19  ;;  %v23347_v23 = vld [vmem:[#allocation107_spill] sm:$0xff] }
 0x282   :  { %14646 = vmatmul.mubr.f32.gmra.mrb[8].mxu1 %v23321_v42  ;;  %v7504_v51 = vsel %vm123_vm0, %v7465_v47, 0  ;;  %v7467_v19 = vmul.f32 %v18679_v55, %v18679_v55  ;;  %v23337_v55 = vand.u32 4294901760, %v20401_v62  ;;  %v23345_v10 = vand.u32 4294901760, %v20418_v46 }
 0x283   :  { %23318 = vst [vmem:[#allocation26_spill] sm:$0xff] %v20391_v48  ;;  %23323 = vst [vmem:[#allocation28_spill] sm:$0xff] %v20409_v26  ;;  %16932 = vmatpush3.bf16.msra.mxu1 %v23277_v50  ;;  %14648 = vmatprep.mubr.f32.mxu1 %v23324_v1  ;;  %v23328_v50 = vand.u32 4294901760, %v20366_v31 }
 0x284   :  { %15368 = vmatmul.mubr.f32.gmra.mrb[36].mxu0 %v19609_v20  ;;  %v18678_v20 = vld [vmem:[#allocation5 + $0x60] sm:$0xff]  ;;  %16934 = vmatprep.subr.bf16.mxu1 %v23280_v52  ;;  %v20503_v0 = vsub.f32 %v20418_v46, %v23345_v10 }
 0x285   :  { %15370 = vmatprep.mubr.f32.mxu0 %v19624_v53  ;;  %v7466_v4 = vmul.f32 %v18678_v20, %v18678_v20  ;;  %v20420_v53 = vand.u32 4294901760, %v7501_v21  ;;  %v20430_v38 = vsub.f32 %v20366_v31, %v23328_v50  ;;  %v20433_v20 = vand.u32 4294901760, %v7504_v51 }
 0x286   :  { %14649 = vmatmul.mubr.f32.gmra.mrb[10].mxu1 %v23330_v3 }
 0x287   :  { %23327 = vst [vmem:[#allocation30_spill] sm:$0xff] %v20420_v53  ;;  %23329 = vst [vmem:[#allocation31_spill] sm:$0xff] %v20433_v20  ;;  %v7507_v50 = vsel %vm123_vm0, %v7466_v4, 0  ;;  %16936 = vmatpush3.bf16.msra.mxu1 %v23280_v52  ;;  %14651 = vmatprep.mubr.f32.mxu1 %v23332_v9  ;;  %v23335_v52 = vand.u32 4294901760, %v20391_v48 }
 0x288   :  { %15371 = vmatmul.mubr.f32.gmra.mrb[38].mxu0 %v19626_v33  ;;  %16938 = vmatprep.subr.bf16.mxu1 %v23283_v58  ;;  %v23334_v33 = vand.u32 4294901760, %v20388_v54  ;;  %v20477_v36 = vand.u32 4294901760, %v7507_v50 }
 0x289   :  { %15373 = vmatprep.mubr.f32.mxu0 %v19637_v34  ;;  %v20450_v34 = vsub.f32 %v7501_v21, %v20420_v53  ;;  %v20461_v4 = vsub.f32 %v20391_v48, %v23335_v52  ;;  %v20472_v21 = vsub.f32 %v20401_v62, %v23337_v55  ;;  %v23342_v55 = vand.u32 4294901760, %v20409_v26  ;;  %v23343_v62 = vld [vmem:[#allocation102_spill] sm:$0xff] }
 0x28a   :  { %v20456_v47 = vsub.f32 %v20388_v54, %v23334_v33  ;;  %v20475_v33 = vsub.f32 %v7504_v51, %v20433_v20  ;;  %23339 = vst [vmem:[#allocation34_spill] sm:$0xff] %v20477_v36  ;;  %14652 = vmatmul.mubr.f32.gmra.mrb[12].mxu1 %v23340_v27 }
 0x28b   :  { %23333 = vst [vmem:[#allocation74_spill] sm:$0xff] %v20450_v34  ;;  %v20491_v51 = vsub.f32 %v20409_v26, %v23342_v55  ;;  %16940 = vmatpush3.bf16.msra.mxu1 %v23283_v58  ;;  %14654 = vmatprep.mubr.f32.mxu1 %v23343_v62  ;;  %v14859_v55 = vpop.f32.mrb[16].mxu0  ;;  %v23349_v10 = vand.u32 4294901760, %v20450_v34 }
 0x28c   :  { %15374 = vmatmul.mubr.f32.gmra.mrb[40].mxu0 %v19639_v56  ;;  %23338 = vst [vmem:[#allocation32_spill] sm:$0xff] %v20475_v33  ;;  %v23341_v56 = vand.u32 4294901760, %v20406_v63  ;;  %16942 = vmatprep.subr.bf16.mxu1 %v19962_v13  ;;  %v3718_v48 = vand.u32 4294901760, %v14859_v55  ;;  %v3620_v54 = vpop.f32.mrb[17].mxu0 }
 0x28d   :  { %15376 = vmatprep.mubr.f32.mxu0 %v19645_v41  ;;  %v23344_v41 = vand.u32 4294901760, %v20415_v59  ;;  %v3715_v46 = vand.u32 4294901760, %v3620_v54 }
 0x28e   :  { %v20486_v32 = vsub.f32 %v20406_v63, %v23341_v56  ;;  %v7510_v63 = vsel %vm123_vm0, %v7467_v19, 0  ;;  %v20515_v19 = vsub.f32 %v7507_v50, %v20477_v36  ;;  %14655 = vmatmul.mubr.f32.gmra.mrb[14].mxu1 %v23347_v23  ;;  %v3964_v58 = vsub.f32 %v14859_v55, %v3718_v48  ;;  %v18681_v55 = vld [vmem:[#allocation5 + $0x78] sm:$0xff] }
 0x28f   :  { %v20498_v52 = vsub.f32 %v20415_v59, %v23344_v41  ;;  %v18680_v41 = vld [vmem:[#allocation5 + $0x70] sm:$0xff]  ;;  %v20521_v26 = vand.u32 4294901760, %v7510_v63  ;;  %16944 = vmatpush3.bf16.msra.mxu1 %v19962_v13  ;;  %14689 = vmatprep.mubr.f32.mxu1 %v23235_v43  ;;  %v20530_v56 = vsub.f32 %v20450_v34, %v23349_v10  ;;  %v3957_v17 = vsub.f32 %v3620_v54, %v3715_v46 }
 0x290   :  { %v7468_v59 = vmul.f32 %v18680_v41, %v18680_v41  ;;  %15377 = vmatmul.mubr.f32.gmra.mrb[42].mxu0 %v19647_v8  ;;  %23346 = vst [vmem:[#allocation35_spill] sm:$0xff] %v20515_v19  ;;  %v14862_v41 = vpop.f32.mrb[18].mxu0  ;;  %v20535_v36 = vmul.f32 %v18681_v55, %v18681_v55  ;;  %v3965_v13 = vand.u32 4294901760, %v3964_v58  ;;  %v23351_v50 = vand.u32 4294901760, %v20475_v33 }
 0x291   :  { %15379 = vmatprep.mubr.f32.mxu0 %v19657_v18  ;;  %23348 = vst [vmem:[#allocation36_spill] sm:$0xff] %v20521_v26  ;;  %v20532_v18 = vpack.c.bf16 %v3718_v48, %v3715_v46  ;;  %v3724_v43 = vand.u32 4294901760, %v14862_v41  ;;  %v3632_v20 = vpop.f32.mrb[19].mxu0  ;;  %v3958_v10 = vand.u32 4294901760, %v3957_v17  ;;  %v20547_v46 = vsub.f32 %v7510_v63, %v20521_v26 }
 0x292   :  { %v7513_v31 = vsel %vm123_vm0, %v7468_v59, 0  ;;  %v20541_v8 = vsub.f32 %v20475_v33, %v23351_v50  ;;  %v3721_v54 = vand.u32 4294901760, %v3632_v20  ;;  %14690 = vmatmul.mubr.f32.vlgmr.msra.gmra.mrb[0].mxu1 %v23238_v61  ;;  %v20549_v59 = vpack.c.bf16 %v3964_v58, %v3957_v17  ;;  %v14865_v53 = vpop.f32.mrb[20].mxu0 }
 0x293   :  { %23350 = vst [vmem:[#allocation37_spill] sm:$0xff] %v20532_v18  ;;  %16970 = vmatprep.subr.bf16.mxu1 %v20532_v18  ;;  %23352 = vst [vmem:[#allocation38_spill] sm:$0xff] %v20547_v46  ;;  %v3966_v55 = vsub.f32 %v3964_v58, %v3965_v13  ;;  %v20554_v48 = vand.u32 4294901760, %v7513_v31  ;;  %v3959_v33 = vsub.f32 %v3957_v17, %v3958_v10  ;;  %14692 = vmatprep.mubr.f32.mxu1 %v23306_v35 }
 0x294   :  { %15380 = vmatmul.mubr.f32.gmra.mrb[44].mxu0 %v23237_v22  ;;  %v3978_v22 = vsub.f32 %v14862_v41, %v3724_v43  ;;  %16972 = vmatpush3.bf16.msra.mxu1 %v20532_v18  ;;  %v20556_v34 = vpack.c.bf16 %v3724_v43, %v3721_v54  ;;  %v3971_v61 = vsub.f32 %v3632_v20, %v3721_v54  ;;  %v3730_v58 = vand.u32 4294901760, %v14865_v53  ;;  %v3644_v41 = vpop.f32.mrb[21].mxu0 }
 0x295   :  { %15382 = vmatprep.mubr.f32.mxu0 %v23305_v2  ;;  %v20559_v63 = vpack.c.bf16 %v3965_v13, %v3958_v10  ;;  %v3967_v18 = vand.u32 4294901760, %v3966_v55  ;;  %v23355_v2 = vand.u32 4294901760, %v20515_v19  ;;  %v3727_v43 = vand.u32 4294901760, %v3644_v41 }
 0x296   :  { %23353 = vst [vmem:[#allocation49_spill] sm:$0xff] %v20556_v34  ;;  %v3979_v26 = vand.u32 4294901760, %v3978_v22  ;;  %v3972_v17 = vand.u32 4294901760, %v3971_v61  ;;  %14693 = vmatmul.mubr.f32.gmra.mrb[2].mxu1 %v23308_v12  ;;  %16974 = vmatprep.subr.bf16.mxu1 %v20556_v34  ;;  %v3960_v20 = vand.u32 4294901760, %v3959_v33  ;;  %v20569_v13 = vpack.c.bf16 %v3978_v22, %v3971_v61  ;;  %v14868_v35 = vpop.f32.mrb[22].mxu0 }
 0x297   :  { %23354 = vst [vmem:[#allocation39_spill] sm:$0xff] %v20559_v63  ;;  %v20565_v50 = vsub.f32 %v20515_v19, %v23355_v2  ;;  %v3992_v54 = vsub.f32 %v14865_v53, %v3730_v58  ;;  %v20576_v2 = vsub.f32 %v7513_v31, %v20554_v48  ;;  %v20578_v19 = vpack.c.bf16 %v3730_v58, %v3727_v43 }
 0x298   :  { %15383 = vmatmul.mubr.f32.gmra.mrb[46].mxu0 %v23307_v28  ;;  %23356 = vst [vmem:[#allocation43_spill] sm:$0xff] %v20569_v13  ;;  %v3980_v10 = vsub.f32 %v3978_v22, %v3979_v26  ;;  %16976 = vmatpush3.bf16.msra.mxu1 %v20556_v34  ;;  %v23357_v28 = vand.u32 4294901760, %v20430_v38  ;;  %v3973_v63 = vsub.f32 %v3971_v61, %v3972_v17  ;;  %v3736_v22 = vand.u32 4294901760, %v14868_v35  ;;  %v3656_v34 = vpop.f32.mrb[23].mxu0 }
 0x299   :  { %23358 = vst [vmem:[#allocation55_spill] sm:$0xff] %v20578_v19  ;;  %v3985_v12 = vsub.f32 %v3644_v41, %v3727_v43  ;;  %14695 = vmatprep.mubr.f32.mxu1 %v23309_v25  ;;  %v20581_v33 = vpack.c.bf16 %v3967_v18, %v3960_v20  ;;  %v3993_v53 = vand.u32 4294901760, %v3992_v54  ;;  %v23359_v38 = vand.u32 4294901760, %v20440_v7  ;;  %16978 = vmatprep.subr.bf16.mxu1 %v20578_v19 }
 0x29a   :  { %15725 = vmatprep.mubr.f32.mxu0 %v23357_v28  ;;  %v3981_v28 = vand.u32 4294901760, %v3980_v10  ;;  %v20585_v55 = vpack.c.bf16 %v3979_v26, %v3972_v17  ;;  %v3733_v13 = vand.u32 4294901760, %v3656_v34  ;;  %14696 = vmatmul.mubr.f32.gmra.mrb[4].mxu1 %v23310_v57  ;;  %v3974_v61 = vand.u32 4294901760, %v3973_v63  ;;  %v14871_v10 = vpop.f32.mrb[24].mxu0 }
 0x29b   :  { %v3986_v31 = vand.u32 4294901760, %v3985_v12  ;;  %v20589_v58 = vpack.c.bf16 %v3992_v54, %v3985_v12  ;;  %v3994_v18 = vsub.f32 %v3992_v54, %v3993_v53  ;;  %v4006_v41 = vsub.f32 %v14868_v35, %v3736_v22  ;;  %14698 = vmatprep.mubr.f32.mxu1 %v23311_v30 }
 0x29c   :  { %15726 = vmatmul.mubr.f32.vlgmr.msra.gmra.mrb[48].mxu0 %v23359_v38  ;;  %23360 = vst [vmem:[#allocation47_spill] sm:$0xff] %v20585_v55  ;;  %16980 = vmatpush3.bf16.msra.mxu1 %v20578_v19  ;;  %v23361_v7 = vand.u32 4294901760, %v20547_v46  ;;  %v7516_v17 = vsel %vm123_vm0, %v20535_v36, 0  ;;  %v20600_v20 = vpack.c.bf16 %v3736_v22, %v3733_v13  ;;  %v3999_v63 = vsub.f32 %v3656_v34, %v3733_v13  ;;  %v3668_v55 = vpop.f32.mrb[25].mxu0 }
 0x29d   :  { %17384 = vmatpush3.bf16.msra.mxu0 %v23314_v6  ;;  %v3987_v43 = vsub.f32 %v3985_v12, %v3986_v31  ;;  %v23363_v54 = vand.u32 4294901760, %v20456_v47  ;;  %v4007_v38 = vand.u32 4294901760, %v4006_v41  ;;  %v3742_v6 = vand.u32 4294901760, %v14871_v10  ;;  %v23365_v12 = vld [vmem:[#allocation20_spill] sm:$0xff] }
 0x29e   :  { %v20596_v26 = vsub.f32 %v20547_v46, %v23361_v7  ;;  %23362 = vst [vmem:[#allocation60_spill] sm:$0xff] %v20600_v20  ;;  %v23364_v7 = vand.u32 4294901760, %v20461_v4  ;;  %v20608_v19 = vpack.c.bf16 %v3981_v28, %v3974_v61  ;;  %v3995_v36 = vand.u32 4294901760, %v3994_v18  ;;  %17386 = vmatprep.subr.bf16.mxu0 %v23365_v12  ;;  %14699 = vmatmul.mubr.f32.gmra.mrb[6].mxu1 %v23315_v39  ;;  %v14874_v39 = vpop.f32.mrb[26].mxu0 }
 0x29f   :  { %15728 = vmatprep.mubr.f32.mxu0 %v23363_v54  ;;  %v4000_v34 = vand.u32 4294901760, %v3999_v63  ;;  %v3739_v13 = vand.u32 4294901760, %v3668_v55  ;;  %16982 = vmatprep.subr.bf16.mxu1 %v20600_v20  ;;  %v3988_v47 = vand.u32 4294901760, %v3987_v43  ;;  %v20613_v22 = vpack.c.bf16 %v4006_v41, %v3999_v63  ;;  %v3680_v30 = vpop.f32.mrb[27].mxu0 }
 0x2a0   :  { %15729 = vmatmul.mubr.f32.gmra.mrb[50].mxu0 %v23364_v7  ;;  %v4008_v54 = vsub.f32 %v4006_v41, %v4007_v38  ;;  %v4020_v35 = vsub.f32 %v14871_v10, %v3742_v6  ;;  %16984 = vmatpush3.bf16.msra.mxu1 %v20600_v20  ;;  %v23366_v4 = vand.u32 4294901760, %v20466_v24  ;;  %v20618_v28 = vand.u32 4294901760, %v7516_v17 }
 0x2a1   :  { %v20620_v61 = vpack.c.bf16 %v3993_v53, %v3986_v31  ;;  %v4001_v18 = vsub.f32 %v3999_v63, %v4000_v34  ;;  %v20622_v7 = vpack.c.bf16 %v3742_v6, %v3739_v13  ;;  %v4013_v46 = vsub.f32 %v3668_v55, %v3739_v13  ;;  %14701 = vmatprep.mubr.f32.mxu1 %v23316_v29 }
 0x2a2   :  { %15731 = vmatprep.mubr.f32.mxu0 %v23366_v4  ;;  %v20625_v43 = vpack.c.bf16 %v3995_v36, %v3988_v47  ;;  %v4021_v41 = vand.u32 4294901760, %v4020_v35  ;;  %v3748_v10 = vand.u32 4294901760, %v14874_v39  ;;  %v23369_v20 = vand.u32 4294901760, %v20472_v21  ;;  %14702 = vmatmul.mubr.f32.gmra.mrb[8].mxu1 %v23321_v42 }
 0x2a3   :  { %23367 = vst [vmem:[#allocation63_spill] sm:$0xff] %v20620_v61  ;;  %23368 = vst [vmem:[#allocation68_spill] sm:$0xff] %v20622_v7  ;;  %v4009_v24 = vand.u32 4294901760, %v4008_v54  ;;  %v20629_v4 = vpack.c.bf16 %v4007_v38, %v4000_v34  ;;  %v4014_v53 = vand.u32 4294901760, %v4013_v46  ;;  %v3745_v31 = vand.u32 4294901760, %v3680_v30  ;;  %16986 = vmatprep.subr.bf16.mxu1 %v20622_v7  ;;  %v14877_v54 = vpop.f32.mrb[28].mxu0  ;;  %14704 = vmatprep.mubr.f32.mxu1 %v23324_v1 }
 0x2a4   :  { %15732 = vmatmul.mubr.f32.gmra.mrb[52].mxu0 %v23369_v20  ;;  %v4002_v6 = vand.u32 4294901760, %v4001_v18  ;;  %v20633_v55 = vpack.c.bf16 %v4020_v35, %v4013_v46  ;;  %v4022_v63 = vsub.f32 %v4020_v35, %v4021_v41  ;;  %v4034_v36 = vsub.f32 %v14874_v39, %v3748_v10  ;;  %16988 = vmatpush3.bf16.msra.mxu1 %v20622_v7 }
 0x2a5   :  { %23370 = vst [vmem:[#allocation72_spill] sm:$0xff] %v20629_v4  ;;  %v23371_v13 = vand.u32 4294901760, %v20486_v32  ;;  %v20640_v20 = vsub.f32 %v7516_v17, %v20618_v28  ;;  %v4015_v38 = vsub.f32 %v4013_v46, %v4014_v53  ;;  %v20642_v34 = vpack.c.bf16 %v3748_v10, %v3745_v31  ;;  %v3692_v4 = vpop.f32.mrb[29].mxu0 }
 0x2a6   :  { %v4027_v47 = vsub.f32 %v3680_v30, %v3745_v31  ;;  %v20645_v18 = vpack.c.bf16 %v4009_v24, %v4002_v6  ;;  %v4035_v39 = vand.u32 4294901760, %v4034_v36  ;;  %v3754_v35 = vand.u32 4294901760, %v14877_v54  ;;  %14705 = vmatmul.mubr.f32.gmra.mrb[10].mxu1 %v23330_v3 }
 0x2a7   :  { %15734 = vmatprep.mubr.f32.mxu0 %v23371_v13  ;;  %23372 = vst [vmem:[#allocation77_spill] sm:$0xff] %v20642_v34  ;;  %v23373_v32 = vand.u32 4294901760, %v20491_v51  ;;  %v4023_v13 = vand.u32 4294901760, %v4022_v63  ;;  %v20649_v21 = vpack.c.bf16 %v4021_v41, %v4014_v53  ;;  %v3751_v61 = vand.u32 4294901760, %v3692_v4  ;;  %16990 = vmatprep.subr.bf16.mxu1 %v20642_v34 }
 0x2a8   :  { %v4028_v17 = vand.u32 4294901760, %v4027_v47  ;;  %v4016_v30 = vand.u32 4294901760, %v4015_v38  ;;  %v20653_v46 = vpack.c.bf16 %v4034_v36, %v4027_v47  ;;  %v4036_v10 = vsub.f32 %v4034_v36, %v4035_v39  ;;  %16992 = vmatpush3.bf16.msra.mxu1 %v20642_v34  ;;  %v14880_v38 = vpop.f32.mrb[30].mxu0  ;;  %14707 = vmatprep.mubr.f32.mxu1 %v23332_v9 }
 0x2a9   :  { %15735 = vmatmul.mubr.f32.gmra.mrb[54].mxu0 %v23373_v32  ;;  %23374 = vst [vmem:[#allocation56_spill] sm:$0xff] %v20649_v21  ;;  %v4048_v24 = vsub.f32 %v14877_v54, %v3754_v35  ;;  %v23375_v31 = vand.u32 4294901760, %v20498_v52  ;;  %v23376_v51 = vand.u32 4294901760, %v20576_v2  ;;  %v20662_v63 = vpack.c.bf16 %v3754_v35, %v3751_v61  ;;  %v3704_v34 = vpop.f32.mrb[31].mxu0 }
 0x2aa   :  { %v4029_v6 = vsub.f32 %v4027_v47, %v4028_v17  ;;  %v4041_v32 = vsub.f32 %v3692_v4, %v3751_v61  ;;  %v20665_v36 = vpack.c.bf16 %v4023_v13, %v4016_v30  ;;  %v3760_v21 = vand.u32 4294901760, %v14880_v38  ;;  %14708 = vmatmul.mubr.f32.gmra.mrb[12].mxu1 %v23340_v27 }
 0x2ab   :  { %15737 = vmatprep.mubr.f32.mxu0 %v23375_v31  ;;  %v7728_v41 = vsub.f32 %v20576_v2, %v23376_v51  ;;  %v4049_v54 = vand.u32 4294901760, %v4048_v24  ;;  %v23377_v52 = vand.u32 4294901760, %v20503_v0  ;;  %v4037_v31 = vand.u32 4294901760, %v4036_v10  ;;  %16994 = vmatprep.subr.bf16.mxu1 %v20662_v63 }
 0x2ac   :  { %v20669_v7 = vpack.c.bf16 %v4035_v39, %v4028_v17  ;;  %v4042_v51 = vand.u32 4294901760, %v4041_v32  ;;  %v3757_v53 = vand.u32 4294901760, %v3704_v34  ;;  %v4030_v61 = vand.u32 4294901760, %v4029_v6  ;;  %16996 = vmatpush3.bf16.msra.mxu1 %v20662_v63  ;;  %14710 = vmatprep.mubr.f32.mxu1 %v23343_v62 }
 0x2ad   :  { %15738 = vmatmul.mubr.f32.gmra.mrb[56].mxu0 %v23377_v52  ;;  %v20673_v4 = vpack.c.bf16 %v4048_v24, %v4041_v32  ;;  %v4050_v47 = vsub.f32 %v4048_v24, %v4049_v54  ;;  %v4062_v35 = vsub.f32 %v14880_v38, %v3760_v21  ;;  %v23379_v13 = vand.u32 4294901760, %v20530_v56 }
 0x2ae   :  { %23378 = vst [vmem:[#allocation61_spill] sm:$0xff] %v20669_v7  ;;  %v7709_v0 = vand.u32 4294901760, %v20565_v50  ;;  %v7719_v39 = vand.u32 4294901760, %v20596_v26  ;;  %v4043_v17 = vsub.f32 %v4041_v32, %v4042_v51  ;;  %v20680_v30 = vpack.c.bf16 %v3760_v21, %v3757_v53  ;;  %14711 = vmatmul.mubr.f32.gmra.mrb[14].mxu1 %v23347_v23  ;;  %v23382_v32 = vld [vmem:[#allocation25_spill] sm:$0xff] }
 0x2af   :  { %15740 = vmatprep.mubr.f32.mxu0 %v23379_v13  ;;  %v4055_v10 = vsub.f32 %v3704_v34, %v3757_v53  ;;  %v17021_v6 = vpack.c.bf16 %v4037_v31, %v4030_v61  ;;  %v4063_v52 = vand.u32 4294901760, %v4062_v35  ;;  %v23380_v24 = vand.u32 4294901760, %v20541_v8  ;;  %14913 = vmatprep.mubr.f32.mxu1 %v23382_v32  ;;  %v23434_v32 = vld [vmem:[#allocation62_spill] sm:$0xff] }
 0x2b0   :  { %v23381_v38 = vand.u32 4294901760, %v20640_v20  ;;  %v4051_v13 = vand.u32 4294901760, %v4050_v47  ;;  %v20688_v7 = vpack.c.bf16 %v4049_v54, %v4042_v51  ;;  %16998 = vmatprep.subr.bf16.mxu1 %v20680_v30  ;;  %v7729_v26 = vand.u32 4294901760, %v7728_v41  ;;  %v23383_v47 = vld [vmem:[#allocation50_spill] sm:$0xff] }
 0x2b1   :  { %15741 = vmatmul.mubr.f32.gmra.mrb[58].mxu0 %v23380_v24  ;;  %v4056_v50 = vand.u32 4294901760, %v4055_v10  ;;  %v4044_v21 = vand.u32 4294901760, %v4043_v17  ;;  %v20692_v34 = vpack.c.bf16 %v4062_v35, %v4055_v10  ;;  %v4064_v53 = vsub.f32 %v4062_v35, %v4063_v52  ;;  %17000 = vmatpush3.bf16.msra.mxu1 %v20680_v30  ;;  %v23384_v35 = vld [vmem:[#allocation66_spill] sm:$0xff]  ;;  %v23385_v17 = vld [vmem:[#allocation88_spill] sm:$0xff] }
 0x2b2   :  { %v7738_v56 = vsub.f32 %v20640_v20, %v23381_v38  ;;  %15743 = vmatprep.mubr.f32.mxu0 %v7709_v0  ;;  %17002 = vmatprep.subr.bf16.mxu1 %v20581_v33  ;;  %v23392_v24 = vld [vmem:[#allocation114_spill] sm:$0xff]  ;;  %v23393_v38 = vld [vmem:[#allocation116_spill] sm:$0xff] }
 0x2b3   :  { %v4057_v8 = vsub.f32 %v4055_v10, %v4056_v50  ;;  %v17025_v54 = vpack.c.bf16 %v4051_v13, %v4044_v21  ;;  %v20697_v31 = vpack.c.bf16 %v4063_v52, %v4056_v50  ;;  %v4065_v61 = vand.u32 4294901760, %v4064_v53  ;;  %v23387_v10 = vld [vmem:[#allocation96_spill] sm:$0xff]  ;;  %v23396_v13 = vld [vmem:[#allocation30_spill] sm:$0xff]  ;;  %v23398_v50 = vld [vmem:[#allocation31_spill] sm:$0xff] }
 0x2b4   :  { %v7739_v51 = vand.u32 4294901760, %v7738_v56  ;;  %14914 = vmatmul.mubr.f32.vlgmr.msra.gmra.mrb[16].mxu1 %v23383_v47  ;;  %v23390_v52 = vld [vmem:[#allocation108_spill] sm:$0xff]  ;;  %v23395_v56 = vld [vmem:[#allocation119_spill] sm:$0xff]  ;;  %v23400_v21 = vld [vmem:[#allocation34_spill] sm:$0xff] }
 0x2b5   :  { %15744 = vmatmul.mubr.f32.gmra.mrb[60].mxu0 %v7719_v39  ;;  %v4058_v41 = vand.u32 4294901760, %v4057_v8  ;;  %17004 = vmatpush3.bf16.msra.mxu1 %v20581_v33  ;;  %v23386_v39 = vld [vmem:[#allocation92_spill] sm:$0xff]  ;;  %v23388_v33 = vld [vmem:[#allocation103_spill] sm:$0xff]  ;;  %v23403_v8 = vld [vmem:[#allocation33_spill] sm:$0xff] }
 0x2b6   :  { %15746 = vmatprep.mubr.f32.mxu0 %v7729_v26  ;;  %14916 = vmatprep.mubr.f32.mxu1 %v23384_v35  ;;  %v23399_v26 = vld [vmem:[#allocation121_spill] sm:$0xff]  ;;  %v23402_v53 = vld [vmem:[#allocation36_spill] sm:$0xff]  ;;  %v23429_v35 = vld [vmem:[#allocation51_spill] sm:$0xff] }
 0x2b7   :  { %17006 = vmatprep.subr.bf16.mxu1 %v20608_v19  ;;  %v17029_v0 = vpack.c.bf16 %v4065_v61, %v4058_v41  ;;  %v23406_v61 = vld [vmem:[#allocation46_spill] sm:$0xff]  ;;  %v23407_v41 = vld [vmem:[#allocation53_spill] sm:$0xff] }
 0x2b8   :  { %14917 = vmatmul.mubr.f32.gmra.mrb[18].mxu1 %v23385_v17  ;;  %v23428_v17 = vld [vmem:[#allocation49_spill] sm:$0xff] }
 0x2b9   :  { %15747 = vmatmul.mubr.f32.gmra.mrb[62].mxu0 %v7739_v51  ;;  %17008 = vmatpush3.bf16.msra.mxu1 %v20608_v19  ;;  %v23389_v19 = vld [vmem:[#allocation104_spill] sm:$0xff]  ;;  %v23405_v51 = vld [vmem:[#allocation43_spill] sm:$0xff] }
 0x2ba   :  { %15753 = vmatprep.mubr.f32.mxu0 %v20342_v49  ;;  %14919 = vmatprep.mubr.f32.mxu1 %v23386_v39  ;;  %v23426_v39 = vld [vmem:[#allocation19_spill] sm:$0xff] }
 0x2bb   :  { %17010 = vmatprep.subr.bf16.mxu1 %v20625_v43 }
 0x2bc   :  { %14920 = vmatmul.mubr.f32.gmra.mrb[20].mxu1 %v23387_v10  ;;  %v23425_v10 = vld [vmem:[#allocation38_spill] sm:$0xff] }
 0x2bd   :  { %15754 = vmatmul.mubr.f32.vlgmr.msra.gmra.mrb[48].mxu0 %v20344_v60  ;;  %17012 = vmatpush3.bf16.msra.mxu1 %v20625_v43  ;;  %v23391_v43 = vld [vmem:[#allocation111_spill] sm:$0xff] }
 0x2be   :  { %17388 = vmatpush3.bf16.msra.mxu0 %v23365_v12  ;;  %15756 = vmatprep.mubr.f32.mxu0 %v20352_v5 }
 0x2bf   :  { %17014 = vmatprep.subr.bf16.mxu1 %v20645_v18  ;;  %14922 = vmatprep.mubr.f32.mxu1 %v23388_v33  ;;  %v23424_v33 = vld [vmem:[#allocation37_spill] sm:$0xff] }
 0x2c0   :  { %17390 = vmatprep.subr.bf16.mxu0 %v18950_v11  ;;  %14923 = vmatmul.mubr.f32.gmra.mrb[22].mxu1 %v23389_v19  ;;  %v23423_v19 = vld [vmem:[#allocation23_spill] sm:$0xff] }
 0x2c1   :  { %15757 = vmatmul.mubr.f32.gmra.mrb[50].mxu0 %v20354_v37  ;;  %17016 = vmatpush3.bf16.msra.mxu1 %v20645_v18  ;;  %v23394_v18 = vld [vmem:[#allocation118_spill] sm:$0xff] }
 0x2c2   :  { %15759 = vmatprep.mubr.f32.mxu0 %v20360_v16  ;;  %14925 = vmatprep.mubr.f32.mxu1 %v23390_v52  ;;  %v23421_v52 = vld [vmem:[#allocation32_spill] sm:$0xff] }
 0x2c3   :  { %17018 = vmatprep.subr.bf16.mxu1 %v20665_v36 }
 0x2c4   :  { %14926 = vmatmul.mubr.f32.gmra.mrb[24].mxu1 %v23391_v43  ;;  %v23419_v43 = vld [vmem:[#allocation70_spill] sm:$0xff] }
 0x2c5   :  { %15760 = vmatmul.mubr.f32.gmra.mrb[52].mxu0 %v20372_v15  ;;  %17020 = vmatpush3.bf16.msra.mxu1 %v20665_v36  ;;  %v23397_v36 = vld [vmem:[#allocation120_spill] sm:$0xff] }
 0x2c6   :  { %15762 = vmatprep.mubr.f32.mxu0 %v20376_v40  ;;  %14928 = vmatprep.mubr.f32.mxu1 %v23392_v24  ;;  %v23417_v24 = vld [vmem:[#allocation28_spill] sm:$0xff] }
 0x2c7   :  { %17022 = vmatprep.subr.bf16.mxu1 %v17021_v6 }
 0x2c8   :  { %14929 = vmatmul.mubr.f32.gmra.mrb[26].mxu1 %v23393_v38  ;;  %v23416_v38 = vld [vmem:[#allocation65_spill] sm:$0xff] }
 0x2c9   :  { %15763 = vmatmul.mubr.f32.gmra.mrb[54].mxu0 %v20378_v44  ;;  %17024 = vmatpush3.bf16.msra.mxu1 %v17021_v6  ;;  %v23401_v6 = vld [vmem:[#allocation22_spill] sm:$0xff] }
 0x2ca   :  { %15765 = vmatprep.mubr.f32.mxu0 %v20382_v45  ;;  %14931 = vmatprep.mubr.f32.mxu1 %v23394_v18  ;;  %v23414_v18 = vld [vmem:[#allocation27_spill] sm:$0xff] }
 0x2cb   :  { %17026 = vmatprep.subr.bf16.mxu1 %v17025_v54 }
 0x2cc   :  { %14932 = vmatmul.mubr.f32.gmra.mrb[28].mxu1 %v23395_v56  ;;  %v23413_v56 = vld [vmem:[#allocation76_spill] sm:$0xff] }
 0x2cd   :  { %15766 = vmatmul.mubr.f32.gmra.mrb[56].mxu0 %v20384_v14  ;;  %17028 = vmatpush3.bf16.msra.mxu1 %v17025_v54  ;;  %v23404_v54 = vld [vmem:[#allocation41_spill] sm:$0xff] }
 0x2ce   :  { %15768 = vmatprep.mubr.f32.mxu0 %v23396_v13  ;;  %14934 = vmatprep.mubr.f32.mxu1 %v23397_v36  ;;  %v23411_v36 = vld [vmem:[#allocation26_spill] sm:$0xff] }
 0x2cf   :  { %17030 = vmatprep.subr.bf16.mxu1 %v17029_v0 }
 0x2d0   :  { %14935 = vmatmul.mubr.f32.gmra.mrb[30].mxu1 %v23399_v26  ;;  %v23410_v26 = vld [vmem:[#allocation67_spill] sm:$0xff] }
 0x2d1   :  { %15769 = vmatmul.mubr.f32.gmra.mrb[58].mxu0 %v23398_v50  ;;  %17032 = vmatpush3.bf16.msra.mxu1 %v17029_v0  ;;  %v23408_v0 = vld [vmem:[#allocation18_spill] sm:$0xff] }
 0x2d2   :  { %15771 = vmatprep.mubr.f32.mxu0 %v23400_v21  ;;  %14969 = vmatprep.mubr.f32.mxu1 %v23401_v6  ;;  %v23433_v47 = vand.u32 4294901760, %v23408_v0 }
 0x2d3   :  { %17034 = vmatprep.subr.bf16.mxu1 %v20549_v59 }
 0x2d4   :  { %14970 = vmatmul.mubr.f32.vlgmr.msra.gmra.mrb[16].mxu1 %v23403_v8 }
 0x2d5   :  { %15772 = vmatmul.mubr.f32.gmra.mrb[60].mxu0 %v23402_v53  ;;  %17036 = vmatpush3.bf16.msra.mxu1 %v20549_v59  ;;  %v23409_v59 = vld [vmem:[#allocation58_spill] sm:$0xff] }
 0x2d6   :  { %15774 = vmatprep.mubr.f32.mxu0 %v20554_v48  ;;  %14972 = vmatprep.mubr.f32.mxu1 %v23404_v54 }
 0x2d7   :  { %17038 = vmatprep.subr.bf16.mxu1 %v23405_v51 }
 0x2d8   :  { %14973 = vmatmul.mubr.f32.gmra.mrb[18].mxu1 %v23406_v61 }
 0x2d9   :  { %15775 = vmatmul.mubr.f32.gmra.mrb[62].mxu0 %v20618_v28  ;;  %17040 = vmatpush3.bf16.msra.mxu1 %v23405_v51  ;;  %v23412_v51 = vld [vmem:[#allocation21_spill] sm:$0xff] }
 0x2da   :  { %15781 = vmatprep.mubr.f32.mxu0 %v23407_v41  ;;  %14975 = vmatprep.mubr.f32.mxu1 %v23309_v25 }
 0x2db   :  { %17042 = vmatprep.subr.bf16.mxu1 %v20589_v58 }
 0x2dc   :  { %14976 = vmatmul.mubr.f32.gmra.mrb[20].mxu1 %v23310_v57 }
 0x2dd   :  { %15782 = vmatmul.mubr.f32.vlgmr.msra.gmra.mrb[48].mxu0 %v23408_v0  ;;  %17044 = vmatpush3.bf16.msra.mxu1 %v20589_v58  ;;  %v23415_v58 = vld [vmem:[#allocation17_spill] sm:$0xff] }
 0x2de   :  { %17392 = vmatpush3.bf16.msra.mxu0 %v18950_v11  ;;  %15784 = vmatprep.mubr.f32.mxu0 %v23409_v59  ;;  %v23439_v0 = vld [vmem:[#allocation81_spill] sm:$0xff] }
 0x2df   :  { %17046 = vmatprep.subr.bf16.mxu1 %v20613_v22  ;;  %14978 = vmatprep.mubr.f32.mxu1 %v23410_v26 }
 0x2e0   :  { %17394 = vmatprep.subr.bf16.mxu0 %v23412_v51  ;;  %14979 = vmatmul.mubr.f32.gmra.mrb[22].mxu1 %v23413_v56 }
 0x2e1   :  { %15785 = vmatmul.mubr.f32.gmra.mrb[50].mxu0 %v23411_v36  ;;  %17048 = vmatpush3.bf16.msra.mxu1 %v20613_v22  ;;  %v23418_v22 = vld [vmem:[#allocation29_spill] sm:$0xff] }
 0x2e2   :  { %15787 = vmatprep.mubr.f32.mxu0 %v23414_v18  ;;  %14981 = vmatprep.mubr.f32.mxu1 %v23316_v29 }
 0x2e3   :  { %17050 = vmatprep.subr.bf16.mxu1 %v20633_v55 }
 0x2e4   :  { %14982 = vmatmul.mubr.f32.gmra.mrb[24].mxu1 %v23321_v42 }
 0x2e5   :  { %15788 = vmatmul.mubr.f32.gmra.mrb[52].mxu0 %v23415_v58  ;;  %17052 = vmatpush3.bf16.msra.mxu1 %v20633_v55  ;;  %v23420_v55 = vld [vmem:[#allocation74_spill] sm:$0xff] }
 0x2e6   :  { %15790 = vmatprep.mubr.f32.mxu0 %v23416_v38  ;;  %14984 = vmatprep.mubr.f32.mxu1 %v23324_v1 }
 0x2e7   :  { %17054 = vmatprep.subr.bf16.mxu1 %v20653_v46 }
 0x2e8   :  { %14985 = vmatmul.mubr.f32.gmra.mrb[26].mxu1 %v23330_v3 }
 0x2e9   :  { %15791 = vmatmul.mubr.f32.gmra.mrb[54].mxu0 %v23417_v24  ;;  %17056 = vmatpush3.bf16.msra.mxu1 %v20653_v46  ;;  %v23422_v46 = vld [vmem:[#allocation35_spill] sm:$0xff] }
 0x2ea   :  { %15793 = vmatprep.mubr.f32.mxu0 %v23418_v22  ;;  %14987 = vmatprep.mubr.f32.mxu1 %v23332_v9 }
 0x2eb   :  { %17058 = vmatprep.subr.bf16.mxu1 %v20673_v4 }
 0x2ec   :  { %14988 = vmatmul.mubr.f32.gmra.mrb[28].mxu1 %v23340_v27 }
 0x2ed   :  { %15794 = vmatmul.mubr.f32.gmra.mrb[56].mxu0 %v23419_v43  ;;  %17060 = vmatpush3.bf16.msra.mxu1 %v20673_v4  ;;  %v23427_v4 = vld [vmem:[#allocation45_spill] sm:$0xff] }
 0x2ee   :  { %15796 = vmatprep.mubr.f32.mxu0 %v23420_v55  ;;  %14990 = vmatprep.mubr.f32.mxu1 %v23343_v62 }
 0x2ef   :  { %17062 = vmatprep.subr.bf16.mxu1 %v20692_v34 }
 0x2f0   :  { %14991 = vmatmul.mubr.f32.gmra.mrb[30].mxu1 %v23347_v23 }
 0x2f1   :  { %15797 = vmatmul.mubr.f32.gmra.mrb[58].mxu0 %v23421_v52  ;;  %17064 = vmatpush3.bf16.msra.mxu1 %v20692_v34  ;;  %v23430_v34 = vand.u32 4294901760, %v23407_v41  ;;  %v23436_v41 = vld [vmem:[#allocation60_spill] sm:$0xff] }
 0x2f2   :  { %15799 = vmatprep.mubr.f32.mxu0 %v23422_v46  ;;  %15025 = vmatprep.mubr.f32.mxu1 %v23423_v19  ;;  %v23431_v19 = vld [vmem:[#allocation59_spill] sm:$0xff] }
 0x2f3   :  { %17066 = vmatprep.subr.bf16.mxu1 %v23424_v33 }
 0x2f4   :  { %15026 = vmatmul.mubr.f32.vlgmr.msra.gmra.mrb[16].mxu1 %v23426_v39  ;;  %v23432_v39 = vld [vmem:[#allocation55_spill] sm:$0xff] }
 0x2f5   :  { %15800 = vmatmul.mubr.f32.gmra.mrb[60].mxu0 %v23425_v10  ;;  %17068 = vmatpush3.bf16.msra.mxu1 %v23424_v33 }
 0x2f6   :  { %15802 = vmatprep.mubr.f32.mxu0 %v20576_v2  ;;  %15028 = vmatprep.mubr.f32.mxu1 %v23427_v4 }
 0x2f7   :  { %17070 = vmatprep.subr.bf16.mxu1 %v23428_v17 }
 0x2f8   :  { %15029 = vmatmul.mubr.f32.gmra.mrb[18].mxu1 %v23429_v35  ;;  %v23435_v35 = vand.u32 4294901760, %v23409_v59  ;;  %v23442_v59 = vld [vmem:[#allocation68_spill] sm:$0xff] }
 0x2f9   :  { %15803 = vmatmul.mubr.f32.gmra.mrb[62].mxu0 %v20640_v20  ;;  %17072 = vmatpush3.bf16.msra.mxu1 %v23428_v17 }
 0x2fa   :  { %15809 = vmatprep.mubr.f32.mxu0 %v23430_v34  ;;  %15031 = vmatprep.mubr.f32.mxu1 %v23431_v19  ;;  %v23437_v34 = vld [vmem:[#allocation79_spill] sm:$0xff]  ;;  %v23438_v19 = vand.u32 4294901760, %v23411_v36  ;;  %v23446_v36 = vld [vmem:[#allocation94_spill] sm:$0xff] }
 0x2fb   :  { %17074 = vmatprep.subr.bf16.mxu1 %v23432_v39 }
 0x2fc   :  { %15032 = vmatmul.mubr.f32.gmra.mrb[20].mxu1 %v23434_v32  ;;  %v23441_v32 = vld [vmem:[#allocation84_spill] sm:$0xff] }
 0x2fd   :  { %15810 = vmatmul.mubr.f32.vlgmr.msra.gmra.mrb[48].mxu0 %v23433_v47  ;;  %17076 = vmatpush3.bf16.msra.mxu1 %v23432_v39  ;;  %v23440_v47 = vand.u32 4294901760, %v23414_v18  ;;  %v23447_v18 = vld [vmem:[#allocation77_spill] sm:$0xff] }
 0x2fe   :  { %17396 = vmatpush3.bf16.msra.mxu0 %v23412_v51  ;;  %15812 = vmatprep.mubr.f32.mxu0 %v23435_v35  ;;  %v23443_v35 = vand.u32 4294901760, %v23415_v58  ;;  %v23451_v58 = vld [vmem:[#allocation101_spill] sm:$0xff] }
 0x2ff   :  { %17078 = vmatprep.subr.bf16.mxu1 %v23436_v41  ;;  %15034 = vmatprep.mubr.f32.mxu1 %v23437_v34  ;;  %v23444_v34 = vld [vmem:[#allocation90_spill] sm:$0xff]  ;;  %v18707_v51 = vld [vmem:[#allocation5 + $0x68] sm:$0xff] }
 0x300   :  { %17398 = vmatprep.subr.bf16.mxu0 %v18950_v11  ;;  %15035 = vmatmul.mubr.f32.gmra.mrb[22].mxu1 %v23439_v0  ;;  %v23450_v0 = vand.u32 4294901760, %v23418_v22  ;;  %v23456_v22 = vand.u32 4294901760, %v23421_v52  ;;  %v23464_v52 = vld [vmem:[#allocation48_spill] sm:$0xff] }
 0x301   :  { %15813 = vmatmul.mubr.f32.gmra.mrb[50].mxu0 %v23438_v19  ;;  %17080 = vmatpush3.bf16.msra.mxu1 %v23436_v41  ;;  %v23445_v19 = vand.u32 4294901760, %v23416_v38  ;;  %v23452_v38 = vand.u32 4294901760, %v23419_v43  ;;  %v23459_v43 = vld [vmem:[#allocation24_spill] sm:$0xff] }
 0x302   :  { %15815 = vmatprep.mubr.f32.mxu0 %v23440_v47  ;;  %15037 = vmatprep.mubr.f32.mxu1 %v23441_v32  ;;  %v23448_v47 = vand.u32 4294901760, %v23417_v24  ;;  %v23449_v32 = vld [vmem:[#allocation98_spill] sm:$0xff] }
 0x303   :  { %17082 = vmatprep.subr.bf16.mxu1 %v23442_v59  ;;  %v23455_v24 = vld [vmem:[#allocation110_spill] sm:$0xff] }
 0x304   :  { %15038 = vmatmul.mubr.f32.gmra.mrb[24].mxu1 %v23444_v34 }
 0x305   :  { %15816 = vmatmul.mubr.f32.gmra.mrb[52].mxu0 %v23443_v35  ;;  %17084 = vmatpush3.bf16.msra.mxu1 %v23442_v59  ;;  %v23453_v35 = vld [vmem:[#allocation106_spill] sm:$0xff] }
 0x306   :  { %15818 = vmatprep.mubr.f32.mxu0 %v23445_v19  ;;  %15040 = vmatprep.mubr.f32.mxu1 %v23446_v36  ;;  %v23454_v19 = vand.u32 4294901760, %v23420_v55  ;;  %v23460_v55 = vld [vmem:[#allocation39_spill] sm:$0xff] }
 0x307   :  { %17086 = vmatprep.subr.bf16.mxu1 %v23447_v18 }
 0x308   :  { %15041 = vmatmul.mubr.f32.gmra.mrb[26].mxu1 %v23449_v32 }
 0x309   :  { %15819 = vmatmul.mubr.f32.gmra.mrb[54].mxu0 %v23448_v47  ;;  %17088 = vmatpush3.bf16.msra.mxu1 %v23447_v18  ;;  %v23458_v47 = vand.u32 4294901760, %v23422_v46  ;;  %v23465_v46 = vld [vmem:[#allocation47_spill] sm:$0xff] }
 0x30a   :  { %15821 = vmatprep.mubr.f32.mxu0 %v23450_v0  ;;  %15043 = vmatprep.mubr.f32.mxu1 %v23451_v58  ;;  %v23457_v0 = vld [vmem:[#allocation113_spill] sm:$0xff] }
 0x30b   :  { %17090 = vmatprep.subr.bf16.mxu1 %v20662_v63  ;;  %v18699_v58 = vld [vmem:[#allocation5 + $0x48] sm:$0xff] }
 0x30c   :  { %15044 = vmatmul.mubr.f32.gmra.mrb[28].mxu1 %v23453_v35 }
 0x30d   :  { %15822 = vmatmul.mubr.f32.gmra.mrb[56].mxu0 %v23452_v38  ;;  %17092 = vmatpush3.bf16.msra.mxu1 %v20662_v63  ;;  %v23461_v38 = vand.u32 4294901760, %v23425_v10  ;;  %v23468_v10 = vld [vmem:[#allocation71_spill] sm:$0xff] }
 0x30e   :  { %15824 = vmatprep.mubr.f32.mxu0 %v23454_v19  ;;  %15046 = vmatprep.mubr.f32.mxu1 %v23455_v24  ;;  %v23462_v19 = vld [vmem:[#allocation42_spill] sm:$0xff]  ;;  %v23463_v24 = vand.u32 4294901760, %v20576_v2  ;;  %v23470_v2 = vld [vmem:[#allocation75_spill] sm:$0xff] }
 0x30f   :  { %17094 = vmatprep.subr.bf16.mxu1 %v20680_v30 }
 0x310   :  { %15047 = vmatmul.mubr.f32.gmra.mrb[30].mxu1 %v23457_v0  ;;  %v18694_v0 = vld [vmem:[#allocation2 + $0x38] sm:$0xff] }
 0x311   :  { %15825 = vmatmul.mubr.f32.gmra.mrb[58].mxu0 %v23456_v22  ;;  %17096 = vmatpush3.bf16.msra.mxu1 %v20680_v30  ;;  %v23466_v22 = vand.u32 4294901760, %v20640_v20  ;;  %v23471_v20 = vld [vmem:[#allocation72_spill] sm:$0xff] }
 0x312   :  { %15827 = vmatprep.mubr.f32.mxu0 %v23458_v47  ;;  %15081 = vmatprep.mubr.f32.mxu1 %v23459_v43  ;;  %v23467_v47 = vld [vmem:[#allocation57_spill] sm:$0xff]  ;;  %v23484_v43 = vld [vmem:[#allocation15_spill] sm:$0xff] }
 0x313   :  { %17098 = vmatprep.subr.bf16.mxu1 %v23460_v55 }
 0x314   :  { %15082 = vmatmul.mubr.f32.vlgmr.msra.gmra.mrb[16].mxu1 %v23462_v19 }
 0x315   :  { %15828 = vmatmul.mubr.f32.gmra.mrb[60].mxu0 %v23461_v38  ;;  %17100 = vmatpush3.bf16.msra.mxu1 %v23460_v55  ;;  %v23469_v38 = vld [vmem:[#allocation63_spill] sm:$0xff]  ;;  %v23473_v55 = vld [vmem:[#allocation89_spill] sm:$0xff] }
 0x316   :  { %15830 = vmatprep.mubr.f32.mxu0 %v23463_v24  ;;  %15084 = vmatprep.mubr.f32.mxu1 %v23464_v52  ;;  %v23472_v24 = vld [vmem:[#allocation86_spill] sm:$0xff]  ;;  %v18691_v52 = vld [vmem:[#allocation5 + $0x28] sm:$0xff] }
 0x317   :  { %17102 = vmatprep.subr.bf16.mxu1 %v23465_v46 }
 0x318   :  { %15085 = vmatmul.mubr.f32.gmra.mrb[18].mxu1 %v23467_v47  ;;  %v18690_v47 = vld [vmem:[#allocation2 + $0x28] sm:$0xff] }
 0x319   :  { %15831 = vmatmul.mubr.f32.gmra.mrb[62].mxu0 %v23466_v22  ;;  %17104 = vmatpush3.bf16.msra.mxu1 %v23465_v46  ;;  %v23474_v46 = vld [vmem:[#allocation93_spill] sm:$0xff]  ;;  %v23475_v22 = vld [vmem:[#allocation56_spill] sm:$0xff]  ;;  %v9913_v19 = vmul.f32 %v18691_v52, %v18690_v47 }
 0x31a   :  { %15837 = vmatprep.mubr.f32.mxu0 %v20342_v49  ;;  %15087 = vmatprep.mubr.f32.mxu1 %v23468_v10  ;;  %v18698_v47 = vld [vmem:[#allocation2 + $0x48] sm:$0xff] }
 0x31b   :  { %17106 = vmatprep.subr.bf16.mxu1 %v23469_v38 }
 0x31c   :  { %15088 = vmatmul.mubr.f32.gmra.mrb[20].mxu1 %v23470_v2  ;;  %v23478_v2 = vld [vmem:[#allocation61_spill] sm:$0xff] }
 0x31d   :  { %15838 = vmatmul.mubr.f32.vlgmr.msra.gmra.mrb[48].mxu0 %v20344_v60  ;;  %17108 = vmatpush3.bf16.msra.mxu1 %v23469_v38  ;;  %v23476_v38 = vld [vmem:[#allocation97_spill] sm:$0xff] }
 0x31e   :  { %17400 = vmatpush3.bf16.msra.mxu0 %v18950_v11  ;;  %15840 = vmatprep.mubr.f32.mxu0 %v20352_v5 }
 0x31f   :  { %17110 = vmatprep.subr.bf16.mxu1 %v23471_v20  ;;  %15090 = vmatprep.mubr.f32.mxu1 %v23472_v24  ;;  %v23477_v24 = vld [vmem:[#allocation100_spill] sm:$0xff] }
 0x320   :  { %17594 = vmatprep.subr.bf16.mxu0 %v18950_v11  ;;  %15091 = vmatmul.mubr.f32.gmra.mrb[22].mxu1 %v23473_v55  ;;  %v23479_v55 = vld [vmem:[#allocation105_spill] sm:$0xff] }
 0x321   :  { %15841 = vmatmul.mubr.f32.gmra.mrb[50].mxu0 %v20354_v37  ;;  %17112 = vmatpush3.bf16.msra.mxu1 %v23471_v20  ;;  %v23480_v20 = vld [vmem:[#allocation109_spill] sm:$0xff] }
 0x322   :  { %15843 = vmatprep.mubr.f32.mxu0 %v20360_v16  ;;  %15093 = vmatprep.mubr.f32.mxu1 %v23474_v46 }
 0x323   :  { %17114 = vmatprep.subr.bf16.mxu1 %v23475_v22 }
 0x324   :  { %15094 = vmatmul.mubr.f32.gmra.mrb[24].mxu1 %v23476_v38  ;;  %v23481_v38 = vld [vmem:[#allocation112_spill] sm:$0xff] }
 0x325   :  { %15844 = vmatmul.mubr.f32.gmra.mrb[52].mxu0 %v20372_v15  ;;  %17116 = vmatpush3.bf16.msra.mxu1 %v23475_v22  ;;  %v23482_v22 = vld [vmem:[#allocation115_spill] sm:$0xff] }
 0x326   :  { %15846 = vmatprep.mubr.f32.mxu0 %v20376_v40  ;;  %15096 = vmatprep.mubr.f32.mxu1 %v23477_v24  ;;  %v18687_v24 = vld [vmem:[#allocation5 + $0x18] sm:$0xff] }
 0x327   :  { %17118 = vmatprep.subr.bf16.mxu1 %v23478_v2 }
 0x328   :  { %15097 = vmatmul.mubr.f32.gmra.mrb[26].mxu1 %v23479_v55  ;;  %v23483_v55 = vld [vmem:[#allocation117_spill] sm:$0xff] }
 0x329   :  { %15847 = vmatmul.mubr.f32.gmra.mrb[54].mxu0 %v20378_v44  ;;  %17120 = vmatpush3.bf16.msra.mxu1 %v23478_v2  ;;  %v18682_v2 = vld [vmem:[#allocation2] sm:$0xff] }
 0x32a   :  { %15849 = vmatprep.mubr.f32.mxu0 %v20382_v45  ;;  %15099 = vmatprep.mubr.f32.mxu1 %v23480_v20  ;;  %v18686_v20 = vld [vmem:[#allocation2 + $0x18] sm:$0xff] }
 0x32b   :  { %17122 = vmatprep.subr.bf16.mxu1 %v20688_v7  ;;  %v9911_v46 = vmul.f32 %v18687_v24, %v18686_v20  ;;  %v18692_v24 = vld [vmem:[#allocation2 + $0x30] sm:$0xff] }
 0x32c   :  { %15100 = vmatmul.mubr.f32.gmra.mrb[28].mxu1 %v23481_v38  ;;  %v18693_v20 = vld [vmem:[#allocation5 + $0x30] sm:$0xff] }
 0x32d   :  { %15850 = vmatmul.mubr.f32.gmra.mrb[56].mxu0 %v20384_v14  ;;  %17124 = vmatpush3.bf16.msra.mxu1 %v20688_v7  ;;  %v18683_v7 = vld [vmem:[#allocation5] sm:$0xff]  ;;  %v9934_v32 = vsel %vm123_vm0, %v9911_v46, 0 }
 0x32e   :  { %15852 = vmatprep.mubr.f32.mxu0 %v23396_v13  ;;  %15102 = vmatprep.mubr.f32.mxu1 %v23482_v22  ;;  %v9908_v38 = vmul.f32 %v18683_v7, %v18682_v2  ;;  %v18688_v7 = vld [vmem:[#allocation2 + $0x20] sm:$0xff] }
 0x32f   :  { %17126 = vmatprep.subr.bf16.mxu1 %v20697_v31 }
 0x330   :  { %15103 = vmatmul.mubr.f32.gmra.mrb[30].mxu1 %v23483_v55  ;;  %v18685_v55 = vld [vmem:[#allocation5 + $0x10] sm:$0xff]  ;;  %v9925_v2 = vsel %vm123_vm0, %v9908_v38, 0 }
 0x331   :  { %15853 = vmatmul.mubr.f32.gmra.mrb[58].mxu0 %v23398_v50  ;;  %17128 = vmatpush3.bf16.msra.mxu1 %v20697_v31  ;;  %v18684_v31 = vld [vmem:[#allocation2 + $0x10] sm:$0xff] }
 0x332   :  { %15855 = vmatprep.mubr.f32.mxu0 %v23400_v21  ;;  %15137 = vmatprep.mubr.f32.mxu1 %v23401_v6  ;;  %v9910_v22 = vmul.f32 %v18685_v55, %v18684_v31  ;;  %v9928_v55 = vsel %vm123_vm0, %v23484_v43, 0  ;;  %v9914_v31 = vmul.f32 %v18693_v20, %v18692_v24  ;;  %v9917_v43 = vmul.f32 %v18699_v58, %v18698_v47 }
 0x333   :  { %17130 = vmatprep.subr.bf16.mxu1 %v23424_v33  ;;  %v20926_v24 = vand.u32 4294901760, %v9928_v55  ;;  %v20940_v20 = vand.u32 4294901760, %v9934_v32 }
 0x334   :  { %15138 = vmatmul.mubr.f32.vlgmr.msra.gmra.mrb[16].mxu1 %v23403_v8  ;;  %v9931_v38 = vsel %vm123_vm0, %v9910_v22, 0  ;;  %v9940_v22 = vsel %vm123_vm0, %v9913_v19, 0  ;;  %v9952_v19 = vsel %vm123_vm0, %v9917_v43, 0 }
 0x335   :  { %15856 = vmatmul.mubr.f32.gmra.mrb[60].mxu0 %v23402_v53  ;;  %17132 = vmatpush3.bf16.msra.mxu1 %v23424_v33  ;;  %v18689_v33 = vld [vmem:[#allocation5 + $0x20] sm:$0xff]  ;;  %v20934_v58 = vand.u32 4294901760, %v9931_v38 }
 0x336   :  { %15858 = vmatprep.mubr.f32.mxu0 %v20554_v48  ;;  %15140 = vmatprep.mubr.f32.mxu1 %v23404_v54  ;;  %v9912_v10 = vmul.f32 %v18689_v33, %v18688_v7  ;;  %v18696_v7 = vld [vmem:[#allocation2 + $0x40] sm:$0xff] }
 0x337   :  { %17134 = vmatprep.subr.bf16.mxu1 %v23428_v17  ;;  %v18697_v33 = vld [vmem:[#allocation5 + $0x40] sm:$0xff]  ;;  %v20965_v47 = vsub.f32 %v9931_v38, %v20934_v58 }
 0x338   :  { %15141 = vmatmul.mubr.f32.gmra.mrb[18].mxu1 %v23406_v61  ;;  %v9916_v52 = vmul.f32 %v18697_v33, %v18696_v7  ;;  %v18701_v7 = vld [vmem:[#allocation5 + $0x50] sm:$0xff] }
 0x339   :  { %15859 = vmatmul.mubr.f32.gmra.mrb[62].mxu0 %v20618_v28  ;;  %17136 = vmatpush3.bf16.msra.mxu1 %v23428_v17  ;;  %v20923_v17 = vand.u32 4294901760, %v9925_v2  ;;  %23488 = vst [vmem:[#allocation73_spill] sm:$0xff] %v20965_v47 }
 0x33a   :  { %15865 = vmatprep.mubr.f32.mxu0 %v20342_v49  ;;  %15143 = vmatprep.mubr.f32.mxu1 %v23309_v25  ;;  %v18695_v49 = vld [vmem:[#allocation5 + $0x38] sm:$0xff] }
 0x33b   :  { %v9915_v35 = vmul.f32 %v18695_v49, %v18694_v0  ;;  %17138 = vmatprep.subr.bf16.mxu1 %v23432_v39  ;;  %v9937_v0 = vsel %vm123_vm0, %v9912_v10, 0  ;;  %v9949_v10 = vsel %vm123_vm0, %v9916_v52, 0  ;;  %v18700_v49 = vld [vmem:[#allocation2 + $0x50] sm:$0xff]  ;;  %v20956_v52 = vsub.f32 %v9928_v55, %v20926_v24 }
 0x33c   :  { %15144 = vmatmul.mubr.f32.gmra.mrb[20].mxu1 %v23310_v57  ;;  %v9918_v33 = vmul.f32 %v18701_v7, %v18700_v49  ;;  %v20967_v43 = vand.u32 4294901760, %v9949_v10  ;;  %v20969_v49 = vand.u32 4294901760, %v9952_v19  ;;  %v18702_v7 = vld [vmem:[#allocation2 + $0x58] sm:$0xff]  ;;  %v20973_v55 = vsub.f32 %v9934_v32, %v20940_v20 }
 0x33d   :  { %15866 = vmatmul.mubr.f32.vlgmr.msra.gmra.mrb[48].mxu0 %v20344_v60  ;;  %17140 = vmatpush3.bf16.msra.mxu1 %v23432_v39  ;;  %v9943_v60 = vsel %vm123_vm0, %v9914_v31, 0  ;;  %v9946_v46 = vsel %vm123_vm0, %v9915_v35, 0  ;;  %v23486_v39 = vld [vmem:[#allocation16_spill] sm:$0xff]  ;;  %v20949_v31 = vand.u32 4294901760, %v9937_v0  ;;  %v20951_v35 = vand.u32 4294901760, %v9940_v22  ;;  %23487 = vst [vmem:[#allocation69_spill] sm:$0xff] %v20956_v52 }
 0x33e   :  { %17596 = vmatpush3.bf16.msra.mxu0 %v18950_v11  ;;  %15868 = vmatprep.mubr.f32.mxu0 %v20352_v5  ;;  %v20946_v5 = vsub.f32 %v9925_v2, %v20923_v17  ;;  %v20960_v2 = vand.u32 4294901760, %v9946_v46  ;;  %23489 = vst [vmem:[#allocation78_spill] sm:$0xff] %v20967_v43  ;;  %23490 = vst [vmem:[#allocation82_spill] sm:$0xff] %v20969_v49  ;;  %v9955_v4 = vsel %vm123_vm0, %v9918_v33, 0 }
 0x33f   :  { %17142 = vmatprep.subr.bf16.mxu1 %v23436_v41  ;;  %15146 = vmatprep.mubr.f32.mxu1 %v23410_v26  ;;  %23491 = vst [vmem:[#allocation87_spill] sm:$0xff] %v20973_v55  ;;  %v20978_v34 = vsub.f32 %v9937_v0, %v20949_v31  ;;  %v20981_v38 = vsub.f32 %v9940_v22, %v20951_v35  ;;  %v18705_v0 = vld [vmem:[#allocation5 + $0x60] sm:$0xff]  ;;  %v22907_v22 = vand.u32 4294901760, %v20965_v47 }
 0x340   :  { %23485 = vst [vmem:[#allocation64_spill] sm:$0xff] %v20946_v5  ;;  %17598 = vmatprep.subr.bf16.mxu0 %v23486_v39  ;;  %15147 = vmatmul.mubr.f32.gmra.mrb[22].mxu1 %v23413_v56  ;;  %v20997_v33 = vsub.f32 %v9949_v10, %v20967_v43 }
 0x341   :  { %15869 = vmatmul.mubr.f32.gmra.mrb[50].mxu0 %v20354_v37  ;;  %v20958_v37 = vand.u32 4294901760, %v9943_v60  ;;  %17144 = vmatpush3.bf16.msra.mxu1 %v23436_v41  ;;  %23492 = vst [vmem:[#allocation40_spill] sm:$0xff] %v20978_v34  ;;  %23493 = vst [vmem:[#allocation44_spill] sm:$0xff] %v20981_v38 }
 0x342   :  { %15871 = vmatprep.mubr.f32.mxu0 %v20360_v16  ;;  %15149 = vmatprep.mubr.f32.mxu1 %v23316_v29  ;;  %v18703_v16 = vld [vmem:[#allocation5 + $0x58] sm:$0xff]  ;;  %23496 = vst [vmem:[#allocation80_spill] sm:$0xff] %v20997_v33 }
 0x343   :  { %v9919_v36 = vmul.f32 %v18703_v16, %v18702_v7  ;;  %17146 = vmatprep.subr.bf16.mxu1 %v23442_v59  ;;  %v20988_v32 = vsub.f32 %v9943_v60, %v20958_v37  ;;  %v18704_v16 = vld [vmem:[#allocation2 + $0x60] sm:$0xff]  ;;  %v21005_v7 = vand.u32 4294901760, %v9955_v4 }
 0x344   :  { %15150 = vmatmul.mubr.f32.gmra.mrb[24].mxu1 %v23321_v42  ;;  %v9920_v41 = vmul.f32 %v18705_v0, %v18704_v16 }
 0x345   :  { %15872 = vmatmul.mubr.f32.gmra.mrb[52].mxu0 %v20372_v15  ;;  %23494 = vst [vmem:[#allocation52_spill] sm:$0xff] %v20988_v32  ;;  %v20991_v15 = vsub.f32 %v9946_v46, %v20960_v2  ;;  %17148 = vmatpush3.bf16.msra.mxu1 %v23442_v59  ;;  %v9958_v60 = vsel %vm123_vm0, %v9919_v36, 0  ;;  %23498 = vst [vmem:[#allocation85_spill] sm:$0xff] %v21005_v7  ;;  %v23499_v59 = vand.u32 4294901760, %v20946_v5  ;;  %v23505_v36 = vand.u32 4294901760, %v20981_v38 }
 0x346   :  { %15874 = vmatprep.mubr.f32.mxu0 %v20376_v40  ;;  %15152 = vmatprep.mubr.f32.mxu1 %v23324_v1  ;;  %v21000_v40 = vsub.f32 %v9952_v19, %v20969_v49  ;;  %v21019_v46 = vand.u32 4294901760, %v9958_v60  ;;  %v21043_v10 = vsub.f32 %v9955_v4, %v21005_v7 }
 0x347   :  { %23495 = vst [vmem:[#allocation54_spill] sm:$0xff] %v20991_v15  ;;  %17150 = vmatprep.subr.bf16.mxu1 %v23447_v18  ;;  %v21011_v16 = vsub.f32 %v20946_v5, %v23499_v59  ;;  %v23501_v59 = vand.u32 4294901760, %v20956_v52 }
 0x348   :  { %23497 = vst [vmem:[#allocation83_spill] sm:$0xff] %v21000_v40  ;;  %15153 = vmatmul.mubr.f32.gmra.mrb[26].mxu1 %v23330_v3  ;;  %23500 = vst [vmem:[#allocation91_spill] sm:$0xff] %v21019_v46 }
 0x349   :  { %15875 = vmatmul.mubr.f32.gmra.mrb[54].mxu0 %v20378_v44  ;;  %v9961_v44 = vsel %vm123_vm0, %v9920_v41, 0  ;;  %17152 = vmatpush3.bf16.msra.mxu1 %v23447_v18  ;;  %v21027_v19 = vsub.f32 %v20956_v52, %v23501_v59  ;;  %v23502_v18 = vand.u32 4294901760, %v20973_v55  ;;  %23503 = vst [vmem:[#allocation95_spill] sm:$0xff] %v21043_v10  ;;  %v18706_v59 = vld [vmem:[#allocation2 + $0x68] sm:$0xff] }
 0x34a   :  { %15877 = vmatprep.mubr.f32.mxu0 %v20382_v45  ;;  %15155 = vmatprep.mubr.f32.mxu1 %v23332_v9  ;;  %v21032_v45 = vsub.f32 %v20965_v47, %v22907_v22  ;;  %v9921_v52 = vmul.f32 %v18707_v51, %v18706_v59  ;;  %v23504_v22 = vand.u32 4294901760, %v20978_v34  ;;  %v21054_v47 = vsub.f32 %v20981_v38, %v23505_v36  ;;  %v18708_v51 = vld [vmem:[#allocation2 + $0x70] sm:$0xff] }
 0x34b   :  { %17154 = vmatprep.subr.bf16.mxu1 %v20662_v63  ;;  %v21040_v41 = vsub.f32 %v20973_v55, %v23502_v18  ;;  %v21056_v18 = vand.u32 4294901760, %v9961_v44  ;;  %v21072_v36 = vsub.f32 %v9958_v60, %v21019_v46  ;;  %v23510_v38 = vand.u32 4294901760, %v20997_v33 }
 0x34c   :  { %v21049_v0 = vsub.f32 %v20978_v34, %v23504_v22  ;;  %15156 = vmatmul.mubr.f32.gmra.mrb[28].mxu1 %v23340_v27  ;;  %v23508_v22 = vand.u32 4294901760, %v20991_v15  ;;  %v18709_v34 = vld [vmem:[#allocation5 + $0x70] sm:$0xff] }
 0x34d   :  { %15878 = vmatmul.mubr.f32.gmra.mrb[56].mxu0 %v20384_v14  ;;  %23506 = vst [vmem:[#allocation102_spill] sm:$0xff] %v21056_v18  ;;  %v23507_v14 = vand.u32 4294901760, %v20988_v32  ;;  %23509 = vst [vmem:[#allocation107_spill] sm:$0xff] %v21072_v36  ;;  %17156 = vmatpush3.bf16.msra.mxu1 %v20662_v63  ;;  %v9922_v55 = vmul.f32 %v18709_v34, %v18708_v51 }
 0x34e   :  { %15880 = vmatprep.mubr.f32.mxu0 %v23396_v13  ;;  %v21069_v59 = vsub.f32 %v20991_v15, %v23508_v22  ;;  %15158 = vmatprep.mubr.f32.mxu1 %v23343_v62  ;;  %v9964_v13 = vsel %vm123_vm0, %v9921_v52, 0  ;;  %v23514_v52 = vand.u32 4294901760, %v21043_v10 }
 0x34f   :  { %v21064_v4 = vsub.f32 %v20988_v32, %v23507_v14  ;;  %v21081_v14 = vsub.f32 %v20997_v33, %v23510_v38  ;;  %v23511_v32 = vand.u32 4294901760, %v21000_v40  ;;  %17158 = vmatprep.subr.bf16.mxu1 %v20680_v30  ;;  %v15363_v60 = vpop.f32.mrb[32].mxu0 }
 0x350   :  { %v6172_v5 = vand.u32 4294901760, %v15363_v60  ;;  %v6074_v38 = vpop.f32.mrb[33].mxu0  ;;  %15159 = vmatmul.mubr.f32.gmra.mrb[30].mxu1 %v23347_v23  ;;  %v21114_v34 = vsub.f32 %v21043_v10, %v23514_v52  ;;  %v23515_v52 = vand.u32 4294901760, %v21072_v36 }
 0x351   :  { %v21086_v22 = vsub.f32 %v21000_v40, %v23511_v32  ;;  %15881 = vmatmul.mubr.f32.gmra.mrb[58].mxu0 %v23398_v50  ;;  %v21096_v40 = vsub.f32 %v9961_v44, %v21056_v18  ;;  %v6169_v46 = vand.u32 4294901760, %v6074_v38  ;;  %17160 = vmatpush3.bf16.msra.mxu1 %v20680_v30  ;;  %v21107_v32 = vand.u32 4294901760, %v9964_v13  ;;  %v18710_v50 = vld [vmem:[#allocation2 + $0x78] sm:$0xff] }
 0x352   :  { %15883 = vmatprep.mubr.f32.mxu0 %v23400_v21  ;;  %v6418_v63 = vsub.f32 %v15363_v60, %v6172_v5  ;;  %15193 = vmatprep.mubr.f32.mxu1 %v23401_v6  ;;  %v9967_v60 = vsel %vm123_vm0, %v9922_v55, 0  ;;  %v18711_v18 = vld [vmem:[#allocation5 + $0x78] sm:$0xff]  ;;  %v21126_v55 = vsub.f32 %v21072_v36, %v23515_v52 }
 0x353   :  { %23512 = vst [vmem:[#allocation20_spill] sm:$0xff] %v21096_v40  ;;  %v21109_v33 = vpack.c.bf16 %v6172_v5, %v6169_v46  ;;  %v6411_v21 = vsub.f32 %v6074_v38, %v6169_v46  ;;  %v15366_v15 = vpop.f32.mrb[34].mxu0  ;;  %v21119_v5 = vmul.f32 %v18711_v18, %v18710_v50  ;;  %v21133_v18 = vsub.f32 %v9964_v13, %v21107_v32 }
 0x354   :  { %v6419_v30 = vand.u32 4294901760, %v6418_v63  ;;  %v6178_v51 = vand.u32 4294901760, %v15366_v15  ;;  %v6086_v6 = vpop.f32.mrb[35].mxu0  ;;  %15194 = vmatmul.mubr.f32.vlgmr.msra.gmra.mrb[16].mxu1 %v23403_v8  ;;  %v21135_v50 = vand.u32 4294901760, %v9967_v60  ;;  %v23519_v13 = vand.u32 4294901760, %v21096_v40 }
 0x355   :  { %23513 = vst [vmem:[#allocation30_spill] sm:$0xff] %v21109_v33  ;;  %15884 = vmatmul.mubr.f32.gmra.mrb[60].mxu0 %v23402_v53  ;;  %v6412_v46 = vand.u32 4294901760, %v6411_v21  ;;  %v6175_v38 = vand.u32 4294901760, %v6086_v6  ;;  %17186 = vmatprep.subr.bf16.mxu1 %v21109_v33  ;;  %v21128_v10 = vpack.c.bf16 %v6418_v63, %v6411_v21  ;;  %23516 = vst [vmem:[#allocation31_spill] sm:$0xff] %v21133_v18 }
 0x356   :  { %v6420_v53 = vsub.f32 %v6418_v63, %v6419_v30  ;;  %v6432_v7 = vsub.f32 %v15366_v15, %v6178_v51  ;;  %17188 = vmatpush3.bf16.msra.mxu1 %v21109_v33  ;;  %15886 = vmatprep.mubr.f32.mxu0 %v20554_v48  ;;  %v21146_v33 = vsub.f32 %v21096_v40, %v23519_v13 }
 0x357   :  { %v6413_v44 = vsub.f32 %v6411_v21, %v6412_v46  ;;  %v21137_v8 = vpack.c.bf16 %v6178_v51, %v6175_v38  ;;  %v6425_v49 = vsub.f32 %v6086_v6, %v6175_v38  ;;  %v15369_v43 = vpop.f32.mrb[36].mxu0  ;;  %15196 = vmatprep.mubr.f32.mxu1 %v23404_v54  ;;  %v21140_v52 = vpack.c.bf16 %v6419_v30, %v6412_v46 }
 0x358   :  { %v6433_v63 = vand.u32 4294901760, %v6432_v7  ;;  %v6184_v15 = vand.u32 4294901760, %v15369_v43  ;;  %v6098_v36 = vpop.f32.mrb[37].mxu0  ;;  %v6421_v48 = vand.u32 4294901760, %v6420_v53  ;;  %15197 = vmatmul.mubr.f32.gmra.mrb[18].mxu1 %v23406_v61  ;;  %v21157_v13 = vsub.f32 %v9967_v60, %v21135_v50 }
 0x359   :  { %23517 = vst [vmem:[#allocation34_spill] sm:$0xff] %v21137_v8  ;;  %23518 = vst [vmem:[#allocation36_spill] sm:$0xff] %v21140_v52  ;;  %15887 = vmatmul.mubr.f32.gmra.mrb[62].mxu0 %v20618_v28  ;;  %v6426_v21 = vand.u32 4294901760, %v6425_v49  ;;  %v6181_v51 = vand.u32 4294901760, %v6098_v36  ;;  %17190 = vmatprep.subr.bf16.mxu1 %v21137_v8  ;;  %v6414_v6 = vand.u32 4294901760, %v6413_v44  ;;  %v21150_v30 = vpack.c.bf16 %v6432_v7, %v6425_v49 }
 0x35a   :  { %v6434_v46 = vsub.f32 %v6432_v7, %v6433_v63  ;;  %v6446_v38 = vsub.f32 %v15369_v43, %v6184_v15  ;;  %17192 = vmatpush3.bf16.msra.mxu1 %v21137_v8  ;;  %v23521_v28 = vand.u32 4294901760, %v21011_v16  ;;  %23522 = vst [vmem:[#allocation53_spill] sm:$0xff] %v21157_v13  ;;  %15199 = vmatprep.mubr.f32.mxu1 %v23309_v25  ;;  %v23524_v16 = vand.u32 4294901760, %v21027_v19 }
 0x35b   :  { %23520 = vst [vmem:[#allocation43_spill] sm:$0xff] %v21150_v30  ;;  %v6427_v52 = vsub.f32 %v6425_v49, %v6426_v21  ;;  %v21159_v40 = vpack.c.bf16 %v6184_v15, %v6181_v51  ;;  %v6439_v61 = vsub.f32 %v6098_v36, %v6181_v51  ;;  %v15372_v54 = vpop.f32.mrb[38].mxu0  ;;  %v21162_v44 = vpack.c.bf16 %v6421_v48, %v6414_v6 }
 0x35c   :  { %16229 = vmatprep.mubr.f32.mxu0 %v23521_v28  ;;  %v6447_v43 = vand.u32 4294901760, %v6446_v38  ;;  %v6190_v7 = vand.u32 4294901760, %v15372_v54  ;;  %v6110_v8 = vpop.f32.mrb[39].mxu0  ;;  %v6435_v28 = vand.u32 4294901760, %v6434_v46  ;;  %v21166_v53 = vpack.c.bf16 %v6433_v63, %v6426_v21  ;;  %15200 = vmatmul.mubr.f32.gmra.mrb[20].mxu1 %v23310_v57 }
 0x35d   :  { %23523 = vst [vmem:[#allocation18_spill] sm:$0xff] %v21159_v40  ;;  %16230 = vmatmul.mubr.f32.vlgmr.msra.gmra.mrb[64].mxu0 %v23524_v16  ;;  %v6440_v60 = vand.u32 4294901760, %v6439_v61  ;;  %v6187_v30 = vand.u32 4294901760, %v6110_v8  ;;  %17194 = vmatprep.subr.bf16.mxu1 %v21159_v40  ;;  %v6428_v49 = vand.u32 4294901760, %v6427_v52  ;;  %v21170_v36 = vpack.c.bf16 %v6446_v38, %v6439_v61 }
 0x35e   :  { %23525 = vst [vmem:[#allocation58_spill] sm:$0xff] %v21166_v53  ;;  %v6448_v15 = vsub.f32 %v6446_v38, %v6447_v43  ;;  %v6460_v48 = vsub.f32 %v15372_v54, %v6190_v7  ;;  %17600 = vmatpush3.bf16.msra.mxu0 %v23486_v39  ;;  %17196 = vmatpush3.bf16.msra.mxu1 %v21159_v40  ;;  %v23526_v63 = vand.u32 4294901760, %v21133_v18  ;;  %v23528_v16 = vand.u32 4294901760, %v21032_v45 }
 0x35f   :  { %v6441_v51 = vsub.f32 %v6439_v61, %v6440_v60  ;;  %v21180_v6 = vpack.c.bf16 %v6190_v7, %v6187_v30  ;;  %v6453_v46 = vsub.f32 %v6110_v8, %v6187_v30  ;;  %v15375_v52 = vpop.f32.mrb[40].mxu0  ;;  %15202 = vmatprep.mubr.f32.mxu1 %v23410_v26  ;;  %v9970_v54 = vsel %vm123_vm0, %v21119_v5, 0  ;;  %17602 = vmatprep.subr.bf16.mxu0 %v23365_v12 }
 0x360   :  { %v21178_v21 = vsub.f32 %v21133_v18, %v23526_v63  ;;  %16232 = vmatprep.mubr.f32.mxu0 %v23528_v16  ;;  %v6461_v39 = vand.u32 4294901760, %v6460_v48  ;;  %v6196_v38 = vand.u32 4294901760, %v15375_v52  ;;  %v6122_v19 = vpop.f32.mrb[41].mxu0  ;;  %v23529_v53 = vand.u32 4294901760, %v21040_v41  ;;  %15203 = vmatmul.mubr.f32.gmra.mrb[22].mxu1 %v23413_v56 }
 0x361   :  { %23527 = vst [vmem:[#allocation67_spill] sm:$0xff] %v21180_v6  ;;  %v21189_v63 = vpack.c.bf16 %v6435_v28, %v6428_v49  ;;  %v6449_v61 = vand.u32 4294901760, %v6448_v15  ;;  %v6454_v8 = vand.u32 4294901760, %v6453_v46  ;;  %v6193_v30 = vand.u32 4294901760, %v6122_v19  ;;  %17198 = vmatprep.subr.bf16.mxu1 %v21180_v6  ;;  %15205 = vmatprep.mubr.f32.mxu1 %v23316_v29 }
 0x362   :  { %16233 = vmatmul.mubr.f32.gmra.mrb[66].mxu0 %v23529_v53  ;;  %v6442_v45 = vand.u32 4294901760, %v6441_v51  ;;  %v21194_v7 = vpack.c.bf16 %v6460_v48, %v6453_v46  ;;  %v6462_v5 = vsub.f32 %v6460_v48, %v6461_v39  ;;  %v6474_v16 = vsub.f32 %v15375_v52, %v6196_v38  ;;  %17200 = vmatpush3.bf16.msra.mxu1 %v21180_v6 }
 0x363   :  { %v23530_v41 = vand.u32 4294901760, %v21049_v0  ;;  %v21199_v53 = vand.u32 4294901760, %v9970_v54  ;;  %v21201_v28 = vpack.c.bf16 %v6447_v43, %v6440_v60  ;;  %v6455_v49 = vsub.f32 %v6453_v46, %v6454_v8  ;;  %v15378_v18 = vpop.f32.mrb[42].mxu0 }
 0x364   :  { %v21203_v15 = vpack.c.bf16 %v6196_v38, %v6193_v30  ;;  %v6467_v40 = vsub.f32 %v6122_v19, %v6193_v30  ;;  %v21206_v51 = vpack.c.bf16 %v6449_v61, %v6442_v45  ;;  %v6475_v48 = vand.u32 4294901760, %v6474_v16  ;;  %v6134_v56 = vpop.f32.mrb[43].mxu0  ;;  %15206 = vmatmul.mubr.f32.gmra.mrb[24].mxu1 %v23321_v42 }
 0x365   :  { %16235 = vmatprep.mubr.f32.mxu0 %v23530_v41  ;;  %23531 = vst [vmem:[#allocation26_spill] sm:$0xff] %v21201_v28  ;;  %v6202_v52 = vand.u32 4294901760, %v15378_v18  ;;  %v23533_v6 = vand.u32 4294901760, %v21054_v47  ;;  %v6463_v0 = vand.u32 4294901760, %v6462_v5  ;;  %v21210_v41 = vpack.c.bf16 %v6461_v39, %v6454_v8  ;;  %15208 = vmatprep.mubr.f32.mxu1 %v23324_v1 }
 0x366   :  { %23532 = vst [vmem:[#allocation27_spill] sm:$0xff] %v21203_v15  ;;  %v6468_v43 = vand.u32 4294901760, %v6467_v40  ;;  %v6199_v60 = vand.u32 4294901760, %v6134_v56  ;;  %17202 = vmatprep.subr.bf16.mxu1 %v21203_v15  ;;  %v6456_v19 = vand.u32 4294901760, %v6455_v49  ;;  %v21214_v46 = vpack.c.bf16 %v6474_v16, %v6467_v40 }
 0x367   :  { %16236 = vmatmul.mubr.f32.gmra.mrb[68].mxu0 %v23533_v6  ;;  %23534 = vst [vmem:[#allocation17_spill] sm:$0xff] %v21210_v41  ;;  %v6476_v38 = vsub.f32 %v6474_v16, %v6475_v48  ;;  %v21216_v61 = vsub.f32 %v15378_v18, %v6202_v52  ;;  %17204 = vmatpush3.bf16.msra.mxu1 %v21203_v15  ;;  %v23535_v47 = vand.u32 4294901760, %v21064_v4  ;;  %v10153_v6 = vand.u32 4294901760, %v21126_v55  ;;  %v15381_v5 = vpop.f32.mrb[44].mxu0  ;;  %v21231_v41 = vpop.f32.mrb[0].mxu1 }
 0x368   :  { %v21223_v39 = vsub.f32 %v9970_v54, %v21199_v53  ;;  %v6469_v8 = vsub.f32 %v6467_v40, %v6468_v43  ;;  %v21225_v30 = vpack.c.bf16 %v6202_v52, %v6199_v60  ;;  %v6481_v45 = vsub.f32 %v6134_v56, %v6199_v60  ;;  %23537 = vst [vmem:[#allocation28_spill] sm:$0xff] %v21231_v41  ;;  %v6146_v4 = vpop.f32.mrb[45].mxu0  ;;  %v21237_v56 = vpop.f32.mrb[1].mxu1 }
 0x369   :  { %16238 = vmatprep.mubr.f32.mxu0 %v23535_v47  ;;  %v21228_v16 = vpack.c.bf16 %v6463_v0, %v6456_v19  ;;  %v6489_v18 = vand.u32 4294901760, %v21216_v61  ;;  %v6208_v49 = vand.u32 4294901760, %v15381_v5  ;;  %v23538_v55 = vand.u32 4294901760, %v21069_v59  ;;  %23540 = vst [vmem:[#allocation70_spill] sm:$0xff] %v21237_v56  ;;  %15209 = vmatmul.mubr.f32.gmra.mrb[26].mxu1 %v23330_v3  ;;  %v21253_v28 = vpop.f32.mrb[2].mxu1 }
 0x36a   :  { %23536 = vst [vmem:[#allocation65_spill] sm:$0xff] %v21225_v30  ;;  %v6477_v54 = vand.u32 4294901760, %v6476_v38  ;;  %v21235_v47 = vpack.c.bf16 %v6475_v48, %v6468_v43  ;;  %v6482_v40 = vand.u32 4294901760, %v6481_v45  ;;  %v6205_v52 = vand.u32 4294901760, %v6146_v4  ;;  %17206 = vmatprep.subr.bf16.mxu1 %v21225_v30  ;;  %15211 = vmatprep.mubr.f32.mxu1 %v23332_v9  ;;  %23543 = vst [vmem:[#allocation32_spill] sm:$0xff] %v21253_v28 }
 0x36b   :  { %16239 = vmatmul.mubr.f32.gmra.mrb[70].mxu0 %v23538_v55  ;;  %v6470_v60 = vand.u32 4294901760, %v6469_v8  ;;  %v6490_v19 = vsub.f32 %v21216_v61, %v6489_v18  ;;  %v6502_v41 = vsub.f32 %v15381_v5, %v6208_v49  ;;  %17208 = vmatpush3.bf16.msra.mxu1 %v21225_v30  ;;  %v23541_v59 = vand.u32 4294901760, %v21081_v14 }
 0x36c   :  { %23539 = vst [vmem:[#allocation29_spill] sm:$0xff] %v21235_v47  ;;  %v10163_v48 = vand.u32 4294901760, %v21146_v33  ;;  %v6483_v38 = vsub.f32 %v6481_v45, %v6482_v40  ;;  %v21248_v55 = vpack.c.bf16 %v6208_v49, %v6205_v52  ;;  %v6495_v56 = vsub.f32 %v6146_v4, %v6205_v52  ;;  %v15384_v47 = vpop.f32.mrb[46].mxu0  ;;  %v21260_v4 = vpop.f32.mrb[3].mxu1 }
 0x36d   :  { %16241 = vmatprep.mubr.f32.mxu0 %v23541_v59  ;;  %v21251_v8 = vpack.c.bf16 %v6477_v54, %v6470_v60  ;;  %v6503_v0 = vand.u32 4294901760, %v6502_v41  ;;  %v6214_v5 = vand.u32 4294901760, %v15384_v47  ;;  %v6158_v30 = vpop.f32.mrb[47].mxu0  ;;  %v23544_v14 = vand.u32 4294901760, %v21086_v22  ;;  %23545 = vst [vmem:[#allocation35_spill] sm:$0xff] %v21260_v4  ;;  %15212 = vmatmul.mubr.f32.gmra.mrb[28].mxu1 %v23340_v27 }
 0x36e   :  { %23542 = vst [vmem:[#allocation74_spill] sm:$0xff] %v21248_v55  ;;  %v6491_v33 = vand.u32 4294901760, %v6490_v19  ;;  %v21258_v59 = vpack.c.bf16 %v21216_v61, %v6481_v45  ;;  %v6496_v49 = vand.u32 4294901760, %v6495_v56  ;;  %v6211_v43 = vand.u32 4294901760, %v6158_v30  ;;  %17210 = vmatprep.subr.bf16.mxu1 %v21248_v55  ;;  %15214 = vmatprep.mubr.f32.mxu1 %v23343_v62 }
 0x36f   :  { %16242 = vmatmul.mubr.f32.gmra.mrb[72].mxu0 %v23544_v14  ;;  %v23546_v54 = vand.u32 4294901760, %v21157_v13  ;;  %v6484_v60 = vand.u32 4294901760, %v6483_v38  ;;  %v6504_v28 = vsub.f32 %v6502_v41, %v6503_v0  ;;  %v6516_v22 = vsub.f32 %v15384_v47, %v6214_v5  ;;  %17212 = vmatpush3.bf16.msra.mxu1 %v21248_v55 }
 0x370   :  { %v23547_v61 = vand.u32 4294901760, %v21114_v34  ;;  %v10173_v45 = vand.u32 4294901760, %v21178_v21  ;;  %v23548_v19 = vand.u32 4294901760, %v21223_v39  ;;  %v6497_v4 = vsub.f32 %v6495_v56, %v6496_v49 }
 0x371   :  { %v10182_v52 = vsub.f32 %v21157_v13, %v23546_v54  ;;  %v21274_v15 = vpack.c.bf16 %v6214_v5, %v6211_v43  ;;  %v6509_v27 = vsub.f32 %v6158_v30, %v6211_v43  ;;  %v21277_v38 = vpack.c.bf16 %v6491_v33, %v6484_v60  ;;  %v21279_v54 = vpop.f32.mrb[4].mxu1  ;;  %15215 = vmatmul.mubr.f32.gmra.mrb[30].mxu1 %v23347_v23 }
 0x372   :  { %16244 = vmatprep.mubr.f32.mxu0 %v23547_v61  ;;  %v10192_v14 = vsub.f32 %v21223_v39, %v23548_v19  ;;  %v6517_v47 = vand.u32 4294901760, %v6516_v22  ;;  %v6505_v34 = vand.u32 4294901760, %v6504_v28  ;;  %v21281_v61 = vpack.c.bf16 %v6502_v41, %v6495_v56  ;;  %v21285_v13 = vpop.f32.mrb[5].mxu1  ;;  %v23558_v19 = vld [vmem:[#allocation92_spill] sm:$0xff] }
 0x373   :  { %16245 = vmatmul.mubr.f32.gmra.mrb[74].mxu0 %v10153_v6  ;;  %v21283_v21 = vpack.c.bf16 %v6489_v18, %v6482_v40  ;;  %v6510_v55 = vand.u32 4294901760, %v6509_v27  ;;  %23549 = vst [vmem:[#allocation37_spill] sm:$0xff] %v21285_v13  ;;  %17214 = vmatprep.subr.bf16.mxu1 %v21274_v15  ;;  %v10183_v30 = vand.u32 4294901760, %v10182_v52  ;;  %v6498_v43 = vand.u32 4294901760, %v6497_v4  ;;  %v23550_v6 = vld [vmem:[#allocation25_spill] sm:$0xff]  ;;  %v21298_v56 = vpop.f32.mrb[6].mxu1 }
 0x374   :  { %v21289_v5 = vpack.c.bf16 %v6516_v22, %v6509_v27  ;;  %v6518_v33 = vsub.f32 %v6516_v22, %v6517_v47  ;;  %17216 = vmatpush3.bf16.msra.mxu1 %v21274_v15  ;;  %16247 = vmatprep.mubr.f32.mxu0 %v10163_v48  ;;  %v21292_v28 = vpack.c.bf16 %v6503_v0, %v6496_v49  ;;  %v10193_v4 = vand.u32 4294901760, %v10192_v14  ;;  %v21300_v60 = vpop.f32.mrb[7].mxu1  ;;  %v23553_v22 = vld [vmem:[#allocation50_spill] sm:$0xff] }
 0x375   :  { %v6511_v41 = vsub.f32 %v6509_v27, %v6510_v55  ;;  %17218 = vmatprep.subr.bf16.mxu1 %v21162_v44  ;;  %15417 = vmatprep.mubr.f32.mxu1 %v23550_v6  ;;  %v17241_v18 = vpack.c.bf16 %v6505_v34, %v6498_v43  ;;  %v21296_v40 = vpack.c.bf16 %v6517_v47, %v6510_v55  ;;  %v23554_v27 = vld [vmem:[#allocation66_spill] sm:$0xff]  ;;  %v21306_v55 = vpop.f32.mrb[8].mxu1  ;;  %v23561_v47 = vld [vmem:[#allocation96_spill] sm:$0xff]  ;;  %v23609_v6 = vld [vmem:[#allocation51_spill] sm:$0xff] }
 0x376   :  { %23551 = vst [vmem:[#allocation38_spill] sm:$0xff] %v21298_v56  ;;  %v6519_v52 = vand.u32 4294901760, %v6518_v33  ;;  %23552 = vst [vmem:[#allocation49_spill] sm:$0xff] %v21300_v60  ;;  %v21308_v49 = vpop.f32.mrb[9].mxu1  ;;  %v23565_v43 = vld [vmem:[#allocation104_spill] sm:$0xff]  ;;  %v23608_v60 = vld [vmem:[#allocation34_spill] sm:$0xff] }
 0x377   :  { %16248 = vmatmul.mubr.f32.gmra.mrb[76].mxu0 %v10173_v45  ;;  %15418 = vmatmul.mubr.f32.vlgmr.msra.gmra.mrb[32].mxu1 %v23553_v22  ;;  %v6512_v0 = vand.u32 4294901760, %v6511_v41  ;;  %23555 = vst [vmem:[#allocation55_spill] sm:$0xff] %v21306_v55  ;;  %23556 = vst [vmem:[#allocation60_spill] sm:$0xff] %v21308_v49  ;;  %v23557_v45 = vld [vmem:[#allocation88_spill] sm:$0xff]  ;;  %v23569_v41 = vld [vmem:[#allocation111_spill] sm:$0xff] }
 0x378   :  { %16250 = vmatprep.mubr.f32.mxu0 %v10183_v30  ;;  %17220 = vmatpush3.bf16.msra.mxu1 %v21162_v44  ;;  %v23603_v49 = vld [vmem:[#allocation30_spill] sm:$0xff]  ;;  %v23604_v55 = vld [vmem:[#allocation31_spill] sm:$0xff]  ;;  %v23607_v22 = vld [vmem:[#allocation45_spill] sm:$0xff] }
 0x379   :  { %15420 = vmatprep.mubr.f32.mxu1 %v23554_v27  ;;  %17222 = vmatprep.subr.bf16.mxu1 %v21189_v63  ;;  %v17245_v48 = vpack.c.bf16 %v6519_v52, %v6512_v0  ;;  %v21315_v44 = vpop.f32.mrb[10].mxu1  ;;  %v23572_v52 = vld [vmem:[#allocation78_spill] sm:$0xff]  ;;  %v23605_v27 = vld [vmem:[#allocation19_spill] sm:$0xff] }
 0x37a   :  { %23559 = vst [vmem:[#allocation68_spill] sm:$0xff] %v21315_v44  ;;  %v21318_v14 = vpop.f32.mrb[11].mxu1  ;;  %v23573_v0 = vld [vmem:[#allocation118_spill] sm:$0xff]  ;;  %v23598_v44 = vld [vmem:[#allocation99_spill] sm:$0xff] }
 0x37b   :  { %16251 = vmatmul.mubr.f32.gmra.mrb[78].mxu0 %v10193_v4  ;;  %15421 = vmatmul.mubr.f32.gmra.mrb[34].mxu1 %v23557_v45  ;;  %23560 = vst [vmem:[#allocation77_spill] sm:$0xff] %v21318_v14  ;;  %v23570_v4 = vld [vmem:[#allocation114_spill] sm:$0xff]  ;;  %v23597_v14 = vld [vmem:[#allocation83_spill] sm:$0xff] }
 0x37c   :  { %16257 = vmatprep.mubr.f32.mxu0 %v20923_v17  ;;  %17224 = vmatpush3.bf16.msra.mxu1 %v21189_v63  ;;  %v23562_v63 = vld [vmem:[#allocation103_spill] sm:$0xff]  ;;  %v23614_v13 = vld [vmem:[#allocation62_spill] sm:$0xff] }
 0x37d   :  { %15423 = vmatprep.mubr.f32.mxu1 %v23558_v19  ;;  %17226 = vmatprep.subr.bf16.mxu1 %v21206_v51  ;;  %v21326_v34 = vpop.f32.mrb[12].mxu1  ;;  %v23600_v19 = vld [vmem:[#allocation107_spill] sm:$0xff] }
 0x37e   :  { %23563 = vst [vmem:[#allocation39_spill] sm:$0xff] %v21326_v34  ;;  %v21330_v30 = vpop.f32.mrb[13].mxu1  ;;  %v23592_v34 = vld [vmem:[#allocation40_spill] sm:$0xff]  ;;  %v23602_v45 = vld [vmem:[#allocation23_spill] sm:$0xff] }
 0x37f   :  { %16258 = vmatmul.mubr.f32.vlgmr.msra.gmra.mrb[64].mxu0 %v20926_v24  ;;  %15424 = vmatmul.mubr.f32.gmra.mrb[36].mxu1 %v23561_v47  ;;  %23564 = vst [vmem:[#allocation47_spill] sm:$0xff] %v21330_v30  ;;  %v23591_v30 = vld [vmem:[#allocation76_spill] sm:$0xff]  ;;  %v23595_v47 = vld [vmem:[#allocation54_spill] sm:$0xff] }
 0x380   :  { %17604 = vmatpush3.bf16.msra.mxu0 %v23365_v12  ;;  %17228 = vmatpush3.bf16.msra.mxu1 %v21206_v51  ;;  %v23566_v12 = vld [vmem:[#allocation108_spill] sm:$0xff] }
 0x381   :  { %16260 = vmatprep.mubr.f32.mxu0 %v20934_v58  ;;  %17230 = vmatprep.subr.bf16.mxu1 %v21228_v16  ;;  %v21337_v51 = vpop.f32.mrb[14].mxu1 }
 0x382   :  { %15426 = vmatprep.mubr.f32.mxu1 %v23562_v63  ;;  %17606 = vmatprep.subr.bf16.mxu0 %v18950_v11  ;;  %23567 = vst [vmem:[#allocation63_spill] sm:$0xff] %v21337_v51  ;;  %v21340_v33 = vpop.f32.mrb[15].mxu1  ;;  %v23578_v51 = vld [vmem:[#allocation91_spill] sm:$0xff]  ;;  %v23594_v63 = vld [vmem:[#allocation52_spill] sm:$0xff] }
 0x383   :  { %16261 = vmatmul.mubr.f32.gmra.mrb[66].mxu0 %v20940_v20  ;;  %15427 = vmatmul.mubr.f32.gmra.mrb[38].mxu1 %v23565_v43  ;;  %23568 = vst [vmem:[#allocation72_spill] sm:$0xff] %v21340_v33  ;;  %v23575_v33 = vld [vmem:[#allocation119_spill] sm:$0xff] }
 0x384   :  { %16263 = vmatprep.mubr.f32.mxu0 %v20949_v31  ;;  %17232 = vmatpush3.bf16.msra.mxu1 %v21228_v16  ;;  %v23571_v16 = vld [vmem:[#allocation116_spill] sm:$0xff]  ;;  %v23589_v43 = vld [vmem:[#allocation87_spill] sm:$0xff] }
 0x385   :  { %15429 = vmatprep.mubr.f32.mxu1 %v23566_v12  ;;  %17234 = vmatprep.subr.bf16.mxu1 %v21251_v8  ;;  %v23580_v12 = vld [vmem:[#allocation102_spill] sm:$0xff] }
 0x387   :  { %16264 = vmatmul.mubr.f32.gmra.mrb[68].mxu0 %v20951_v35  ;;  %15430 = vmatmul.mubr.f32.gmra.mrb[40].mxu1 %v23569_v41  ;;  %v23574_v41 = vld [vmem:[#allocation82_spill] sm:$0xff] }
 0x388   :  { %16266 = vmatprep.mubr.f32.mxu0 %v20958_v37  ;;  %17236 = vmatpush3.bf16.msra.mxu1 %v21251_v8  ;;  %v23576_v8 = vld [vmem:[#allocation85_spill] sm:$0xff] }
 0x389   :  { %15432 = vmatprep.mubr.f32.mxu1 %v23570_v4  ;;  %17238 = vmatprep.subr.bf16.mxu1 %v21277_v38  ;;  %v23577_v4 = vld [vmem:[#allocation120_spill] sm:$0xff] }
 0x38b   :  { %16267 = vmatmul.mubr.f32.gmra.mrb[70].mxu0 %v20960_v2  ;;  %15433 = vmatmul.mubr.f32.gmra.mrb[42].mxu1 %v23571_v16  ;;  %v23579_v16 = vld [vmem:[#allocation121_spill] sm:$0xff] }
 0x38c   :  { %16269 = vmatprep.mubr.f32.mxu0 %v23572_v52  ;;  %17240 = vmatpush3.bf16.msra.mxu1 %v21277_v38  ;;  %v23581_v38 = vld [vmem:[#allocation22_spill] sm:$0xff] }
 0x38d   :  { %15435 = vmatprep.mubr.f32.mxu1 %v23573_v0  ;;  %17242 = vmatprep.subr.bf16.mxu1 %v17241_v18  ;;  %v23587_v0 = vld [vmem:[#allocation69_spill] sm:$0xff] }
 0x38e   :  { %v23613_v56 = vand.u32 4294901760, %v23587_v0 }
 0x38f   :  { %16270 = vmatmul.mubr.f32.gmra.mrb[72].mxu0 %v23574_v41  ;;  %15436 = vmatmul.mubr.f32.gmra.mrb[44].mxu1 %v23575_v33  ;;  %v23582_v33 = vld [vmem:[#allocation33_spill] sm:$0xff] }
 0x390   :  { %16272 = vmatprep.mubr.f32.mxu0 %v23576_v8  ;;  %17244 = vmatpush3.bf16.msra.mxu1 %v17241_v18  ;;  %v23583_v18 = vld [vmem:[#allocation41_spill] sm:$0xff] }
 0x391   :  { %15438 = vmatprep.mubr.f32.mxu1 %v23577_v4  ;;  %17246 = vmatprep.subr.bf16.mxu1 %v17245_v48  ;;  %v23584_v4 = vld [vmem:[#allocation43_spill] sm:$0xff] }
 0x393   :  { %16273 = vmatmul.mubr.f32.gmra.mrb[74].mxu0 %v23578_v51  ;;  %15439 = vmatmul.mubr.f32.gmra.mrb[46].mxu1 %v23579_v16  ;;  %v23585_v16 = vld [vmem:[#allocation46_spill] sm:$0xff] }
 0x394   :  { %16275 = vmatprep.mubr.f32.mxu0 %v23580_v12  ;;  %17248 = vmatpush3.bf16.msra.mxu1 %v17245_v48  ;;  %v23586_v48 = vld [vmem:[#allocation64_spill] sm:$0xff] }
 0x395   :  { %15473 = vmatprep.mubr.f32.mxu1 %v23581_v38  ;;  %17250 = vmatprep.subr.bf16.mxu1 %v21128_v10 }
 0x397   :  { %16276 = vmatmul.mubr.f32.gmra.mrb[76].mxu0 %v21107_v32  ;;  %15474 = vmatmul.mubr.f32.vlgmr.msra.gmra.mrb[32].mxu1 %v23582_v33 }
 0x398   :  { %16278 = vmatprep.mubr.f32.mxu0 %v21135_v50  ;;  %17252 = vmatpush3.bf16.msra.mxu1 %v21128_v10  ;;  %v23588_v10 = vld [vmem:[#allocation73_spill] sm:$0xff] }
 0x399   :  { %15476 = vmatprep.mubr.f32.mxu1 %v23583_v18  ;;  %17254 = vmatprep.subr.bf16.mxu1 %v23584_v4 }
 0x39b   :  { %16279 = vmatmul.mubr.f32.gmra.mrb[78].mxu0 %v21199_v53  ;;  %15477 = vmatmul.mubr.f32.gmra.mrb[34].mxu1 %v23585_v16 }
 0x39c   :  { %16285 = vmatprep.mubr.f32.mxu0 %v23586_v48  ;;  %17256 = vmatpush3.bf16.msra.mxu1 %v23584_v4  ;;  %v23590_v4 = vld [vmem:[#allocation21_spill] sm:$0xff] }
 0x39d   :  { %15479 = vmatprep.mubr.f32.mxu1 %v23309_v25  ;;  %17258 = vmatprep.subr.bf16.mxu1 %v21170_v36 }
 0x39f   :  { %16286 = vmatmul.mubr.f32.vlgmr.msra.gmra.mrb[64].mxu0 %v23587_v0  ;;  %15480 = vmatmul.mubr.f32.gmra.mrb[36].mxu1 %v23310_v57  ;;  %v23619_v0 = vld [vmem:[#allocation81_spill] sm:$0xff] }
 0x3a0   :  { %17608 = vmatpush3.bf16.msra.mxu0 %v18950_v11  ;;  %17260 = vmatpush3.bf16.msra.mxu1 %v21170_v36  ;;  %v23593_v36 = vld [vmem:[#allocation44_spill] sm:$0xff] }
 0x3a1   :  { %16288 = vmatprep.mubr.f32.mxu0 %v23588_v10  ;;  %17262 = vmatprep.subr.bf16.mxu1 %v21194_v7 }
 0x3a2   :  { %15482 = vmatprep.mubr.f32.mxu1 %v23410_v26  ;;  %17610 = vmatprep.subr.bf16.mxu0 %v23590_v4 }
 0x3a3   :  { %16289 = vmatmul.mubr.f32.gmra.mrb[66].mxu0 %v23589_v43  ;;  %15483 = vmatmul.mubr.f32.gmra.mrb[38].mxu1 %v23591_v30 }
 0x3a4   :  { %16291 = vmatprep.mubr.f32.mxu0 %v23592_v34  ;;  %17264 = vmatpush3.bf16.msra.mxu1 %v21194_v7  ;;  %v23596_v7 = vld [vmem:[#allocation80_spill] sm:$0xff] }
 0x3a5   :  { %15485 = vmatprep.mubr.f32.mxu1 %v23316_v29  ;;  %17266 = vmatprep.subr.bf16.mxu1 %v21214_v46 }
 0x3a7   :  { %16292 = vmatmul.mubr.f32.gmra.mrb[68].mxu0 %v23593_v36  ;;  %15486 = vmatmul.mubr.f32.gmra.mrb[40].mxu1 %v23321_v42 }
 0x3a8   :  { %16294 = vmatprep.mubr.f32.mxu0 %v23594_v63  ;;  %17268 = vmatpush3.bf16.msra.mxu1 %v21214_v46  ;;  %v23599_v46 = vld [vmem:[#allocation95_spill] sm:$0xff] }
 0x3a9   :  { %15488 = vmatprep.mubr.f32.mxu1 %v23324_v1  ;;  %17270 = vmatprep.subr.bf16.mxu1 %v21258_v59 }
 0x3ab   :  { %16295 = vmatmul.mubr.f32.gmra.mrb[70].mxu0 %v23595_v47  ;;  %15489 = vmatmul.mubr.f32.gmra.mrb[42].mxu1 %v23330_v3 }
 0x3ac   :  { %16297 = vmatprep.mubr.f32.mxu0 %v23596_v7  ;;  %17272 = vmatpush3.bf16.msra.mxu1 %v21258_v59  ;;  %v23601_v59 = vld [vmem:[#allocation20_spill] sm:$0xff] }
 0x3ad   :  { %15491 = vmatprep.mubr.f32.mxu1 %v23332_v9  ;;  %17274 = vmatprep.subr.bf16.mxu1 %v21281_v61 }
 0x3af   :  { %16298 = vmatmul.mubr.f32.gmra.mrb[72].mxu0 %v23597_v14  ;;  %15492 = vmatmul.mubr.f32.gmra.mrb[44].mxu1 %v23598_v44 }
 0x3b0   :  { %16300 = vmatprep.mubr.f32.mxu0 %v23599_v46  ;;  %17276 = vmatpush3.bf16.msra.mxu1 %v21281_v61  ;;  %v23606_v61 = vld [vmem:[#allocation53_spill] sm:$0xff] }
 0x3b1   :  { %15494 = vmatprep.mubr.f32.mxu1 %v23343_v62  ;;  %17278 = vmatprep.subr.bf16.mxu1 %v21289_v5 }
 0x3b3   :  { %16301 = vmatmul.mubr.f32.gmra.mrb[74].mxu0 %v23600_v19  ;;  %15495 = vmatmul.mubr.f32.gmra.mrb[46].mxu1 %v23347_v23 }
 0x3b4   :  { %16303 = vmatprep.mubr.f32.mxu0 %v23601_v59  ;;  %17280 = vmatpush3.bf16.msra.mxu1 %v21289_v5  ;;  %v23610_v5 = vand.u32 4294901760, %v23586_v48  ;;  %v23616_v48 = vld [vmem:[#allocation67_spill] sm:$0xff] }
 0x3b5   :  { %15529 = vmatprep.mubr.f32.mxu1 %v23602_v45  ;;  %17282 = vmatprep.subr.bf16.mxu1 %v23603_v49  ;;  %v23611_v45 = vld [vmem:[#allocation59_spill] sm:$0xff] }
 0x3b7   :  { %16304 = vmatmul.mubr.f32.gmra.mrb[76].mxu0 %v23604_v55  ;;  %15530 = vmatmul.mubr.f32.vlgmr.msra.gmra.mrb[32].mxu1 %v23605_v27  ;;  %v23612_v27 = vld [vmem:[#allocation18_spill] sm:$0xff] }
 0x3b8   :  { %16306 = vmatprep.mubr.f32.mxu0 %v23606_v61  ;;  %17284 = vmatpush3.bf16.msra.mxu1 %v23603_v49 }
 0x3b9   :  { %15532 = vmatprep.mubr.f32.mxu1 %v23607_v22  ;;  %17286 = vmatprep.subr.bf16.mxu1 %v23608_v60 }
 0x3bb   :  { %16307 = vmatmul.mubr.f32.gmra.mrb[78].mxu0 %v21223_v39  ;;  %15533 = vmatmul.mubr.f32.gmra.mrb[34].mxu1 %v23609_v6  ;;  %v23615_v6 = vand.u32 4294901760, %v23588_v10  ;;  %v23622_v10 = vld [vmem:[#allocation27_spill] sm:$0xff] }
 0x3bc   :  { %16313 = vmatprep.mubr.f32.mxu0 %v23610_v5  ;;  %17288 = vmatpush3.bf16.msra.mxu1 %v23608_v60  ;;  %v23617_v5 = vld [vmem:[#allocation79_spill] sm:$0xff] }
 0x3bd   :  { %15535 = vmatprep.mubr.f32.mxu1 %v23611_v45  ;;  %17290 = vmatprep.subr.bf16.mxu1 %v23612_v27  ;;  %v23618_v45 = vand.u32 4294901760, %v23589_v43  ;;  %v23626_v43 = vld [vmem:[#allocation94_spill] sm:$0xff] }
 0x3bf   :  { %16314 = vmatmul.mubr.f32.vlgmr.msra.gmra.mrb[64].mxu0 %v23613_v56  ;;  %15536 = vmatmul.mubr.f32.gmra.mrb[36].mxu1 %v23614_v13  ;;  %v23620_v56 = vand.u32 4294901760, %v23592_v34  ;;  %v23627_v34 = vld [vmem:[#allocation65_spill] sm:$0xff] }
 0x3c0   :  { %17612 = vmatpush3.bf16.msra.mxu0 %v23590_v4  ;;  %17292 = vmatpush3.bf16.msra.mxu1 %v23612_v27  ;;  %v23621_v4 = vld [vmem:[#allocation84_spill] sm:$0xff] }
 0x3c1   :  { %16316 = vmatprep.mubr.f32.mxu0 %v23615_v6  ;;  %17294 = vmatprep.subr.bf16.mxu1 %v23616_v48  ;;  %v23623_v6 = vand.u32 4294901760, %v23593_v36  ;;  %v23631_v36 = vld [vmem:[#allocation101_spill] sm:$0xff] }
 0x3c2   :  { %15538 = vmatprep.mubr.f32.mxu1 %v23617_v5  ;;  %17614 = vmatprep.subr.bf16.mxu0 %v18950_v11  ;;  %v23624_v5 = vld [vmem:[#allocation90_spill] sm:$0xff] }
 0x3c3   :  { %16317 = vmatmul.mubr.f32.gmra.mrb[66].mxu0 %v23618_v45  ;;  %15539 = vmatmul.mubr.f32.gmra.mrb[38].mxu1 %v23619_v0  ;;  %v23625_v45 = vand.u32 4294901760, %v23594_v63  ;;  %v23630_v0 = vand.u32 4294901760, %v23596_v7  ;;  %v23632_v63 = vld [vmem:[#allocation74_spill] sm:$0xff]  ;;  %v23637_v7 = vand.u32 4294901760, %v23600_v19  ;;  %v23645_v19 = vld [vmem:[#allocation48_spill] sm:$0xff] }
 0x3c4   :  { %16319 = vmatprep.mubr.f32.mxu0 %v23620_v56  ;;  %17296 = vmatpush3.bf16.msra.mxu1 %v23616_v48  ;;  %v23628_v56 = vand.u32 4294901760, %v23595_v47  ;;  %v23636_v47 = vld [vmem:[#allocation110_spill] sm:$0xff] }
 0x3c5   :  { %15541 = vmatprep.mubr.f32.mxu1 %v23621_v4  ;;  %17298 = vmatprep.subr.bf16.mxu1 %v23622_v10  ;;  %v23629_v4 = vld [vmem:[#allocation98_spill] sm:$0xff] }
 0x3c7   :  { %16320 = vmatmul.mubr.f32.gmra.mrb[68].mxu0 %v23623_v6  ;;  %15542 = vmatmul.mubr.f32.gmra.mrb[40].mxu1 %v23624_v5  ;;  %v23633_v6 = vand.u32 4294901760, %v23597_v14  ;;  %v23640_v14 = vld [vmem:[#allocation24_spill] sm:$0xff] }
 0x3c8   :  { %16322 = vmatprep.mubr.f32.mxu0 %v23625_v45  ;;  %17300 = vmatpush3.bf16.msra.mxu1 %v23622_v10  ;;  %v23634_v45 = vld [vmem:[#allocation106_spill] sm:$0xff] }
 0x3c9   :  { %15544 = vmatprep.mubr.f32.mxu1 %v23626_v43  ;;  %17302 = vmatprep.subr.bf16.mxu1 %v23627_v34  ;;  %v23635_v43 = vand.u32 4294901760, %v23599_v46  ;;  %v23641_v46 = vld [vmem:[#allocation36_spill] sm:$0xff] }
 0x3cb   :  { %16323 = vmatmul.mubr.f32.gmra.mrb[70].mxu0 %v23628_v56  ;;  %15545 = vmatmul.mubr.f32.gmra.mrb[42].mxu1 %v23629_v4  ;;  %v23639_v56 = vand.u32 4294901760, %v23601_v59  ;;  %v23646_v59 = vld [vmem:[#allocation58_spill] sm:$0xff] }
 0x3cc   :  { %16325 = vmatprep.mubr.f32.mxu0 %v23630_v0  ;;  %17304 = vmatpush3.bf16.msra.mxu1 %v23627_v34  ;;  %v23638_v0 = vld [vmem:[#allocation113_spill] sm:$0xff] }
 0x3cd   :  { %15547 = vmatprep.mubr.f32.mxu1 %v23631_v36  ;;  %17306 = vmatprep.subr.bf16.mxu1 %v23632_v63 }
 0x3cf   :  { %16326 = vmatmul.mubr.f32.gmra.mrb[72].mxu0 %v23633_v6  ;;  %15548 = vmatmul.mubr.f32.gmra.mrb[44].mxu1 %v23634_v45  ;;  %v23643_v6 = vld [vmem:[#allocation42_spill] sm:$0xff] }
 0x3d0   :  { %16328 = vmatprep.mubr.f32.mxu0 %v23635_v43  ;;  %17308 = vmatpush3.bf16.msra.mxu1 %v23632_v63  ;;  %v23642_v43 = vand.u32 4294901760, %v23604_v55  ;;  %v23649_v55 = vld [vmem:[#allocation71_spill] sm:$0xff] }
 0x3d1   :  { %15550 = vmatprep.mubr.f32.mxu1 %v23636_v47  ;;  %17310 = vmatprep.subr.bf16.mxu1 %v21274_v15  ;;  %v23644_v47 = vand.u32 4294901760, %v23606_v61  ;;  %v23651_v61 = vld [vmem:[#allocation75_spill] sm:$0xff] }
 0x3d3   :  { %16329 = vmatmul.mubr.f32.gmra.mrb[74].mxu0 %v23637_v7  ;;  %15551 = vmatmul.mubr.f32.gmra.mrb[46].mxu1 %v23638_v0  ;;  %v23647_v7 = vand.u32 4294901760, %v21223_v39  ;;  %v23652_v39 = vld [vmem:[#allocation17_spill] sm:$0xff]  ;;  %v23680_v0 = vld [vmem:[#allocation32_spill] sm:$0xff] }
 0x3d4   :  { %16331 = vmatprep.mubr.f32.mxu0 %v23639_v56  ;;  %17312 = vmatpush3.bf16.msra.mxu1 %v21274_v15  ;;  %v23648_v56 = vld [vmem:[#allocation57_spill] sm:$0xff] }
 0x3d5   :  { %15585 = vmatprep.mubr.f32.mxu1 %v23640_v14  ;;  %17314 = vmatprep.subr.bf16.mxu1 %v23641_v46 }
 0x3d7   :  { %16332 = vmatmul.mubr.f32.gmra.mrb[76].mxu0 %v23642_v43  ;;  %15586 = vmatmul.mubr.f32.vlgmr.msra.gmra.mrb[32].mxu1 %v23643_v6  ;;  %v23650_v43 = vld [vmem:[#allocation26_spill] sm:$0xff] }
 0x3d8   :  { %16334 = vmatprep.mubr.f32.mxu0 %v23644_v47  ;;  %17316 = vmatpush3.bf16.msra.mxu1 %v23641_v46  ;;  %v23653_v47 = vld [vmem:[#allocation86_spill] sm:$0xff]  ;;  %v23654_v46 = vld [vmem:[#allocation89_spill] sm:$0xff] }
 0x3d9   :  { %15588 = vmatprep.mubr.f32.mxu1 %v23645_v19  ;;  %17318 = vmatprep.subr.bf16.mxu1 %v23646_v59 }
 0x3db   :  { %16335 = vmatmul.mubr.f32.gmra.mrb[78].mxu0 %v23647_v7  ;;  %15589 = vmatmul.mubr.f32.gmra.mrb[34].mxu1 %v23648_v56  ;;  %v23656_v7 = vld [vmem:[#allocation29_spill] sm:$0xff] }
 0x3dc   :  { %16341 = vmatprep.mubr.f32.mxu0 %v20923_v17  ;;  %17320 = vmatpush3.bf16.msra.mxu1 %v23646_v59  ;;  %v23655_v59 = vld [vmem:[#allocation93_spill] sm:$0xff] }
 0x3dd   :  { %15591 = vmatprep.mubr.f32.mxu1 %v23649_v55  ;;  %17322 = vmatprep.subr.bf16.mxu1 %v23650_v43 }
 0x3df   :  { %16342 = vmatmul.mubr.f32.vlgmr.msra.gmra.mrb[64].mxu0 %v20926_v24  ;;  %15592 = vmatmul.mubr.f32.gmra.mrb[36].mxu1 %v23651_v61 }
 0x3e0   :  { %17616 = vmatpush3.bf16.msra.mxu0 %v18950_v11  ;;  %17324 = vmatpush3.bf16.msra.mxu1 %v23650_v43  ;;  %v23657_v11 = vld [vmem:[#allocation97_spill] sm:$0xff]  ;;  %v23658_v43 = vld [vmem:[#allocation100_spill] sm:$0xff] }
 0x3e1   :  { %16344 = vmatprep.mubr.f32.mxu0 %v20934_v58  ;;  %17326 = vmatprep.subr.bf16.mxu1 %v23652_v39 }
 0x3e2   :  { %15594 = vmatprep.mubr.f32.mxu1 %v23653_v47 }
 0x3e3   :  { %16345 = vmatmul.mubr.f32.gmra.mrb[66].mxu0 %v20940_v20  ;;  %15595 = vmatmul.mubr.f32.gmra.mrb[38].mxu1 %v23654_v46  ;;  %v23659_v46 = vld [vmem:[#allocation105_spill] sm:$0xff] }
 0x3e4   :  { %16347 = vmatprep.mubr.f32.mxu0 %v20949_v31  ;;  %17328 = vmatpush3.bf16.msra.mxu1 %v23652_v39  ;;  %v23660_v39 = vld [vmem:[#allocation109_spill] sm:$0xff] }
 0x3e5   :  { %15597 = vmatprep.mubr.f32.mxu1 %v23655_v59  ;;  %17330 = vmatprep.subr.bf16.mxu1 %v23656_v7 }
 0x3e7   :  { %16348 = vmatmul.mubr.f32.gmra.mrb[68].mxu0 %v20951_v35  ;;  %15598 = vmatmul.mubr.f32.gmra.mrb[40].mxu1 %v23657_v11  ;;  %v23661_v11 = vld [vmem:[#allocation112_spill] sm:$0xff] }
 0x3e8   :  { %16350 = vmatprep.mubr.f32.mxu0 %v20958_v37  ;;  %17332 = vmatpush3.bf16.msra.mxu1 %v23656_v7  ;;  %v23662_v7 = vld [vmem:[#allocation115_spill] sm:$0xff] }
 0x3e9   :  { %15600 = vmatprep.mubr.f32.mxu1 %v23658_v43  ;;  %17334 = vmatprep.subr.bf16.mxu1 %v21283_v21 }
 0x3eb   :  { %16351 = vmatmul.mubr.f32.gmra.mrb[70].mxu0 %v20960_v2  ;;  %15601 = vmatmul.mubr.f32.gmra.mrb[42].mxu1 %v23659_v46  ;;  %v23663_v46 = vld [vmem:[#allocation117_spill] sm:$0xff] }
 0x3ec   :  { %16353 = vmatprep.mubr.f32.mxu0 %v23572_v52  ;;  %17336 = vmatpush3.bf16.msra.mxu1 %v21283_v21 }
 0x3ed   :  { %15603 = vmatprep.mubr.f32.mxu1 %v23660_v39  ;;  %17338 = vmatprep.subr.bf16.mxu1 %v21292_v28 }
 0x3ef   :  { %16354 = vmatmul.mubr.f32.gmra.mrb[72].mxu0 %v23574_v41  ;;  %15604 = vmatmul.mubr.f32.gmra.mrb[44].mxu1 %v23661_v11 }
 0x3f0   :  { %16356 = vmatprep.mubr.f32.mxu0 %v23576_v8  ;;  %17340 = vmatpush3.bf16.msra.mxu1 %v21292_v28 }
 0x3f1   :  { %15606 = vmatprep.mubr.f32.mxu1 %v23662_v7  ;;  %17342 = vmatprep.subr.bf16.mxu1 %v21296_v40 }
 0x3f3   :  { %16357 = vmatmul.mubr.f32.gmra.mrb[74].mxu0 %v23578_v51  ;;  %15607 = vmatmul.mubr.f32.gmra.mrb[46].mxu1 %v23663_v46 }
 0x3f4   :  { %16359 = vmatprep.mubr.f32.mxu0 %v23580_v12  ;;  %17344 = vmatpush3.bf16.msra.mxu1 %v21296_v40 }
 0x3f5   :  { %15641 = vmatprep.mubr.f32.mxu1 %v23581_v38  ;;  %17346 = vmatprep.subr.bf16.mxu1 %v23603_v49 }
 0x3f7   :  { %16360 = vmatmul.mubr.f32.gmra.mrb[76].mxu0 %v21107_v32  ;;  %15642 = vmatmul.mubr.f32.vlgmr.msra.gmra.mrb[32].mxu1 %v23582_v33 }
 0x3f8   :  { %16362 = vmatprep.mubr.f32.mxu0 %v21135_v50  ;;  %17348 = vmatpush3.bf16.msra.mxu1 %v23603_v49 }
 0x3f9   :  { %15644 = vmatprep.mubr.f32.mxu1 %v23583_v18  ;;  %17350 = vmatprep.subr.bf16.mxu1 %v23608_v60 }
 0x3fb   :  { %16363 = vmatmul.mubr.f32.gmra.mrb[78].mxu0 %v21199_v53  ;;  %15645 = vmatmul.mubr.f32.gmra.mrb[34].mxu1 %v23585_v16 }
 0x3fc   :  { %16369 = vmatprep.mubr.f32.mxu0 %v20923_v17  ;;  %17352 = vmatpush3.bf16.msra.mxu1 %v23608_v60 }
 0x3fd   :  { %15647 = vmatprep.mubr.f32.mxu1 %v23309_v25  ;;  %17354 = vmatprep.subr.bf16.mxu1 %v23612_v27 }
 0x3ff   :  { %16370 = vmatmul.mubr.f32.vlgmr.msra.gmra.mrb[64].mxu0 %v20926_v24  ;;  %15648 = vmatmul.mubr.f32.gmra.mrb[36].mxu1 %v23310_v57 }
 0x400   :  { %16372 = vmatprep.mubr.f32.mxu0 %v20934_v58  ;;  %17356 = vmatpush3.bf16.msra.mxu1 %v23612_v27 }
 0x401   :  { %15650 = vmatprep.mubr.f32.mxu1 %v23410_v26  ;;  %17358 = vmatprep.subr.bf16.mxu1 %v23616_v48 }
 0x403   :  { %16373 = vmatmul.mubr.f32.gmra.mrb[66].mxu0 %v20940_v20  ;;  %15651 = vmatmul.mubr.f32.gmra.mrb[38].mxu1 %v23591_v30 }
 0x404   :  { %16375 = vmatprep.mubr.f32.mxu0 %v20949_v31  ;;  %17360 = vmatpush3.bf16.msra.mxu1 %v23616_v48 }
 0x405   :  { %15653 = vmatprep.mubr.f32.mxu1 %v23316_v29  ;;  %17362 = vmatprep.subr.bf16.mxu1 %v23622_v10 }
 0x407   :  { %16376 = vmatmul.mubr.f32.gmra.mrb[68].mxu0 %v20951_v35  ;;  %15654 = vmatmul.mubr.f32.gmra.mrb[40].mxu1 %v23321_v42 }
 0x408   :  { %16378 = vmatprep.mubr.f32.mxu0 %v20958_v37  ;;  %17364 = vmatpush3.bf16.msra.mxu1 %v23622_v10 }
 0x409   :  { %15656 = vmatprep.mubr.f32.mxu1 %v23324_v1  ;;  %17366 = vmatprep.subr.bf16.mxu1 %v23627_v34 }
 0x40b   :  { %16379 = vmatmul.mubr.f32.gmra.mrb[70].mxu0 %v20960_v2  ;;  %15657 = vmatmul.mubr.f32.gmra.mrb[42].mxu1 %v23330_v3 }
 0x40c   :  { %16381 = vmatprep.mubr.f32.mxu0 %v23572_v52  ;;  %17368 = vmatpush3.bf16.msra.mxu1 %v23627_v34 }
 0x40d   :  { %15659 = vmatprep.mubr.f32.mxu1 %v23332_v9  ;;  %17370 = vmatprep.subr.bf16.mxu1 %v23632_v63 }
 0x40f   :  { %16382 = vmatmul.mubr.f32.gmra.mrb[72].mxu0 %v23574_v41  ;;  %15660 = vmatmul.mubr.f32.gmra.mrb[44].mxu1 %v23598_v44 }
 0x410   :  { %16384 = vmatprep.mubr.f32.mxu0 %v23576_v8  ;;  %17372 = vmatpush3.bf16.msra.mxu1 %v23632_v63  ;;  %v15867_v17 = vpop.f32.mrb[48].mxu0 }
 0x411   :  { %15662 = vmatprep.mubr.f32.mxu1 %v23343_v62  ;;  %17374 = vmatprep.subr.bf16.mxu1 %v21274_v15  ;;  %v8626_v24 = vand.u32 4294901760, %v15867_v17  ;;  %v8528_v58 = vpop.f32.mrb[49].mxu0 }
 0x412   :  { %v8623_v20 = vand.u32 4294901760, %v8528_v58 }
 0x413   :  { %16385 = vmatmul.mubr.f32.gmra.mrb[74].mxu0 %v23578_v51  ;;  %15663 = vmatmul.mubr.f32.gmra.mrb[46].mxu1 %v23347_v23  ;;  %v8872_v31 = vsub.f32 %v15867_v17, %v8626_v24 }
 0x414   :  { %16387 = vmatprep.mubr.f32.mxu0 %v23580_v12  ;;  %17376 = vmatpush3.bf16.msra.mxu1 %v21274_v15  ;;  %v21573_v35 = vpack.c.bf16 %v8626_v24, %v8623_v20  ;;  %v8865_v37 = vsub.f32 %v8528_v58, %v8623_v20  ;;  %v15870_v2 = vpop.f32.mrb[50].mxu0 }
 0x415   :  { %15697 = vmatprep.mubr.f32.mxu1 %v23581_v38  ;;  %v8873_v21 = vand.u32 4294901760, %v8872_v31  ;;  %v8632_v28 = vand.u32 4294901760, %v15870_v2  ;;  %v8540_v40 = vpop.f32.mrb[51].mxu0 }
 0x416   :  { %v8866_v60 = vand.u32 4294901760, %v8865_v37  ;;  %v8629_v27 = vand.u32 4294901760, %v8540_v40  ;;  %17402 = vmatprep.subr.bf16.mxu1 %v21573_v35  ;;  %v21578_v49 = vpack.c.bf16 %v8872_v31, %v8865_v37 }
 0x417   :  { %16388 = vmatmul.mubr.f32.gmra.mrb[76].mxu0 %v21107_v32  ;;  %15698 = vmatmul.mubr.f32.vlgmr.msra.gmra.mrb[32].mxu1 %v23582_v33  ;;  %v8874_v15 = vsub.f32 %v8872_v31, %v8873_v21  ;;  %v8886_v12 = vsub.f32 %v15870_v2, %v8632_v28 }
 0x418   :  { %17404 = vmatpush3.bf16.msra.mxu1 %v21573_v35  ;;  %16390 = vmatprep.mubr.f32.mxu0 %v21135_v50  ;;  %v8867_v51 = vsub.f32 %v8865_v37, %v8866_v60  ;;  %v21582_v41 = vpack.c.bf16 %v8632_v28, %v8629_v27  ;;  %v8879_v52 = vsub.f32 %v8540_v40, %v8629_v27  ;;  %v15873_v8 = vpop.f32.mrb[52].mxu0 }
 0x419   :  { %15700 = vmatprep.mubr.f32.mxu1 %v23583_v18  ;;  %v21585_v32 = vpack.c.bf16 %v8873_v21, %v8866_v60  ;;  %v8887_v48 = vand.u32 4294901760, %v8886_v12  ;;  %v8638_v10 = vand.u32 4294901760, %v15873_v8  ;;  %v8552_v34 = vpop.f32.mrb[53].mxu0  ;;  %v8875_v63 = vand.u32 4294901760, %v8874_v15 }
 0x41a   :  { %v8880_v17 = vand.u32 4294901760, %v8879_v52  ;;  %v8635_v24 = vand.u32 4294901760, %v8552_v34  ;;  %17406 = vmatprep.subr.bf16.mxu1 %v21582_v41  ;;  %v8868_v50 = vand.u32 4294901760, %v8867_v51  ;;  %v21590_v58 = vpack.c.bf16 %v8886_v12, %v8879_v52 }
 0x41b   :  { %23664 = vst [vmem:[#allocation56_spill] sm:$0xff] %v21585_v32  ;;  %16391 = vmatmul.mubr.f32.gmra.mrb[78].mxu0 %v21199_v53  ;;  %15701 = vmatmul.mubr.f32.gmra.mrb[34].mxu1 %v23585_v16  ;;  %v8888_v20 = vsub.f32 %v8886_v12, %v8887_v48  ;;  %v8900_v31 = vsub.f32 %v15873_v8, %v8638_v10 }
 0x41c   :  { %17408 = vmatpush3.bf16.msra.mxu1 %v21582_v41  ;;  %15703 = vmatprep.mubr.f32.mxu1 %v23309_v25  ;;  %v8881_v37 = vsub.f32 %v8879_v52, %v8880_v17  ;;  %v21594_v2 = vpack.c.bf16 %v8638_v10, %v8635_v24  ;;  %v8893_v53 = vsub.f32 %v8552_v34, %v8635_v24  ;;  %v15876_v21 = vpop.f32.mrb[54].mxu0 }
 0x41d   :  { %v21596_v28 = vpack.c.bf16 %v8875_v63, %v8868_v50  ;;  %16705 = vmatprep.mubr.f32.mxu0 %v23581_v38  ;;  %v8901_v40 = vand.u32 4294901760, %v8900_v31  ;;  %v8644_v60 = vand.u32 4294901760, %v15876_v21  ;;  %v8564_v27 = vpop.f32.mrb[55].mxu0  ;;  %v8889_v15 = vand.u32 4294901760, %v8888_v20 }
 0x41e   :  { %v21599_v51 = vpack.c.bf16 %v8887_v48, %v8880_v17  ;;  %v8894_v12 = vand.u32 4294901760, %v8893_v53  ;;  %v8641_v8 = vand.u32 4294901760, %v8564_v27  ;;  %17410 = vmatprep.subr.bf16.mxu1 %v21594_v2  ;;  %v8882_v52 = vand.u32 4294901760, %v8881_v37 }
 0x41f   :  { %15704 = vmatmul.mubr.f32.gmra.mrb[36].mxu1 %v23310_v57  ;;  %v21603_v10 = vpack.c.bf16 %v8900_v31, %v8893_v53  ;;  %v8902_v34 = vsub.f32 %v8900_v31, %v8901_v40  ;;  %v8914_v63 = vsub.f32 %v15876_v21, %v8644_v60 }
 0x420   :  { %23665 = vst [vmem:[#allocation61_spill] sm:$0xff] %v21599_v51  ;;  %17412 = vmatpush3.bf16.msra.mxu1 %v21594_v2  ;;  %15706 = vmatprep.mubr.f32.mxu1 %v23410_v26  ;;  %v8895_v24 = vsub.f32 %v8893_v53, %v8894_v12  ;;  %v21607_v50 = vpack.c.bf16 %v8644_v60, %v8641_v8  ;;  %v15879_v17 = vpop.f32.mrb[56].mxu0 }
 0x421   :  { %v8907_v48 = vsub.f32 %v8564_v27, %v8641_v8  ;;  %v21609_v20 = vpack.c.bf16 %v8889_v15, %v8882_v52  ;;  %v8915_v46 = vand.u32 4294901760, %v8914_v63  ;;  %v8650_v7 = vand.u32 4294901760, %v15879_v17  ;;  %v8576_v11 = vpop.f32.mrb[57].mxu0 }
 0x422   :  { %v8903_v39 = vand.u32 4294901760, %v8902_v34  ;;  %v21611_v37 = vpack.c.bf16 %v8901_v40, %v8894_v12  ;;  %v8647_v31 = vand.u32 4294901760, %v8576_v11  ;;  %17414 = vmatprep.subr.bf16.mxu1 %v21607_v50  ;;  %v8896_v21 = vand.u32 4294901760, %v8895_v24 }
 0x423   :  { %v8908_v43 = vand.u32 4294901760, %v8907_v48  ;;  %15707 = vmatmul.mubr.f32.gmra.mrb[38].mxu1 %v23591_v30  ;;  %v21615_v53 = vpack.c.bf16 %v8914_v63, %v8907_v48  ;;  %v8916_v60 = vsub.f32 %v8914_v63, %v8915_v46  ;;  %v8928_v27 = vsub.f32 %v15879_v17, %v8650_v7 }
 0x424   :  { %23666 = vst [vmem:[#allocation15_spill] sm:$0xff] %v21611_v37  ;;  %17416 = vmatpush3.bf16.msra.mxu1 %v21607_v50  ;;  %15709 = vmatprep.mubr.f32.mxu1 %v23316_v29  ;;  %v21619_v8 = vpack.c.bf16 %v8650_v7, %v8647_v31  ;;  %v8921_v40 = vsub.f32 %v8576_v11, %v8647_v31  ;;  %v15882_v12 = vpop.f32.mrb[58].mxu0 }
 0x425   :  { %v8909_v15 = vsub.f32 %v8907_v48, %v8908_v43  ;;  %v21621_v52 = vpack.c.bf16 %v8903_v39, %v8896_v21  ;;  %v8929_v34 = vand.u32 4294901760, %v8928_v27  ;;  %v8656_v59 = vand.u32 4294901760, %v15882_v12  ;;  %v8588_v47 = vpop.f32.mrb[59].mxu0 }
 0x426   :  { %v8917_v61 = vand.u32 4294901760, %v8916_v60  ;;  %v21623_v24 = vpack.c.bf16 %v8915_v46, %v8908_v43  ;;  %v8922_v37 = vand.u32 4294901760, %v8921_v40  ;;  %v8653_v63 = vand.u32 4294901760, %v8588_v47  ;;  %17418 = vmatprep.subr.bf16.mxu1 %v21619_v8  ;;  %v23670_v60 = vld [vmem:[#allocation28_spill] sm:$0xff] }
 0x427   :  { %15710 = vmatmul.mubr.f32.gmra.mrb[40].mxu1 %v23321_v42  ;;  %v8910_v17 = vand.u32 4294901760, %v8909_v15  ;;  %v21627_v48 = vpack.c.bf16 %v8928_v27, %v8921_v40  ;;  %v15195_v43 = vpop.f32.mrb[16].mxu1  ;;  %v8930_v4 = vsub.f32 %v8928_v27, %v8929_v34 }
 0x428   :  { %23667 = vst [vmem:[#allocation16_spill] sm:$0xff] %v21623_v24  ;;  %17420 = vmatpush3.bf16.msra.mxu1 %v21619_v8  ;;  %15712 = vmatprep.mubr.f32.mxu1 %v23324_v1  ;;  %v21631_v11 = vpack.c.bf16 %v8656_v59, %v8653_v63  ;;  %v15885_v39 = vpop.f32.mrb[60].mxu0  ;;  %v21635_v21 = vpack.c.bf16 %v8929_v34, %v8922_v37  ;;  %v4906_v51 = vpop.f32.mrb[17].mxu1 }
 0x429   :  { %v21633_v7 = vpack.c.bf16 %v8917_v61, %v8910_v17  ;;  %v8662_v46 = vand.u32 4294901760, %v15885_v39  ;;  %v8600_v31 = vpop.f32.mrb[61].mxu0  ;;  %v21639_v24 = vmul.f32 %v23670_v60, %v23670_v60  ;;  %v21641_v15 = vmul.f32 %v15195_v43, %v15195_v43  ;;  %v23674_v61 = vld [vmem:[#allocation70_spill] sm:$0xff] }
 0x42a   :  { %23668 = vst [vmem:[#allocation78_spill] sm:$0xff] %v21631_v11  ;;  %23669 = vst [vmem:[#allocation82_spill] sm:$0xff] %v21635_v21  ;;  %v21644_v55 = vmul.f32 %v15195_v43, %v23670_v60  ;;  %v8659_v56 = vand.u32 4294901760, %v8600_v31  ;;  %17422 = vmatprep.subr.bf16.mxu1 %v21631_v11  ;;  %v21650_v17 = vmul.f32 %v23674_v61, %v23674_v61 }
 0x42b   :  { %23671 = vst [vmem:[#allocation85_spill] sm:$0xff] %v21639_v24  ;;  %23672 = vst [vmem:[#allocation91_spill] sm:$0xff] %v21641_v15  ;;  %15713 = vmatmul.mubr.f32.gmra.mrb[42].mxu1 %v23330_v3  ;;  %v21652_v21 = vmul.f32 %v4906_v51, %v4906_v51  ;;  %v21655_v19 = vmul.f32 %v4906_v51, %v23674_v61  ;;  %v21660_v43 = vadd.f32 %v21641_v15, %v21639_v24  ;;  %v15198_v32 = vpop.f32.mrb[18].mxu1 }
 0x42c   :  { %23673 = vst [vmem:[#allocation102_spill] sm:$0xff] %v21644_v55  ;;  %23675 = vst [vmem:[#allocation22_spill] sm:$0xff] %v21650_v17  ;;  %17424 = vmatpush3.bf16.msra.mxu1 %v21631_v11  ;;  %v21662_v60 = vpack.c.bf16 %v8662_v46, %v8659_v56  ;;  %v15888_v55 = vpop.f32.mrb[62].mxu0  ;;  %15715 = vmatprep.mubr.f32.mxu1 %v23332_v9  ;;  %v21671_v51 = vmul.f32 %v23680_v0, %v23680_v0  ;;  %v4918_v15 = vpop.f32.mrb[19].mxu1 }
 0x42d   :  { %23676 = vst [vmem:[#allocation33_spill] sm:$0xff] %v21652_v21  ;;  %23677 = vst [vmem:[#allocation41_spill] sm:$0xff] %v21655_v19  ;;  %v21667_v6 = vadd.f32 %v21652_v21, %v21650_v17  ;;  %v8612_v14 = vpop.f32.mrb[63].mxu0  ;;  %v8668_v61 = vand.u32 4294901760, %v15888_v55  ;;  %v21673_v19 = vmul.f32 %v15198_v32, %v15198_v32  ;;  %v21681_v21 = vsub.f32 %v15882_v12, %v8656_v59 }
 0x42e   :  { %23678 = vst [vmem:[#allocation43_spill] sm:$0xff] %v21660_v43  ;;  %23681 = vst [vmem:[#allocation64_spill] sm:$0xff] %v21671_v51  ;;  %17426 = vmatprep.subr.bf16.mxu1 %v21662_v60  ;;  %v23683_v43 = vld [vmem:[#allocation35_spill] sm:$0xff]  ;;  %v21688_v17 = vmul.f32 %v15198_v32, %v23680_v0  ;;  %v8665_v36 = vand.u32 4294901760, %v8612_v14  ;;  %v8923_v11 = vsub.f32 %v8921_v40, %v8922_v37  ;;  %v23691_v37 = vld [vmem:[#allocation38_spill] sm:$0xff] }
 0x42f   :  { %23679 = vst [vmem:[#allocation46_spill] sm:$0xff] %v21667_v6  ;;  %23682 = vst [vmem:[#allocation69_spill] sm:$0xff] %v21673_v19  ;;  %15716 = vmatmul.mubr.f32.gmra.mrb[44].mxu1 %v23598_v44  ;;  %v21679_v24 = vmul.f32 %v23683_v43, %v23683_v43  ;;  %v21685_v6 = vsub.f32 %v8588_v47, %v8653_v63  ;;  %v21692_v45 = vadd.f32 %v21673_v19, %v21671_v51  ;;  %v15201_v12 = vpop.f32.mrb[20].mxu1  ;;  %v23690_v63 = vld [vmem:[#allocation37_spill] sm:$0xff] }
 0x430   :  { %17428 = vmatpush3.bf16.msra.mxu1 %v21662_v60  ;;  %15718 = vmatprep.mubr.f32.mxu1 %v23343_v62  ;;  %23685 = vst [vmem:[#allocation87_spill] sm:$0xff] %v21688_v17  ;;  %v21694_v5 = vmul.f32 %v4918_v15, %v4918_v15  ;;  %v21697_v59 = vmul.f32 %v4918_v15, %v23683_v43  ;;  %v4930_v27 = vpop.f32.mrb[21].mxu1 }
 0x431   :  { %23684 = vst [vmem:[#allocation73_spill] sm:$0xff] %v21679_v24  ;;  %23686 = vst [vmem:[#allocation21_spill] sm:$0xff] %v21692_v45  ;;  %v21701_v47 = vmul.f32 %v21279_v54, %v21279_v54  ;;  %v21705_v0 = vmul.f32 %v23690_v63, %v23690_v63  ;;  %v21707_v32 = vsub.f32 %v8600_v31, %v8659_v56  ;;  %v8931_v31 = vand.u32 4294901760, %v8930_v4 }
 0x432   :  { %23687 = vst [vmem:[#allocation76_spill] sm:$0xff] %v21694_v5  ;;  %23688 = vst [vmem:[#allocation40_spill] sm:$0xff] %v21697_v59  ;;  %v21709_v17 = vpack.c.bf16 %v8668_v61, %v8665_v36  ;;  %v21714_v40 = vmul.f32 %v23691_v37, %v23691_v37  ;;  %v21716_v34 = vsub.f32 %v15885_v39, %v8662_v46  ;;  %v23695_v59 = vld [vmem:[#allocation25_spill] sm:$0xff] }
 0x433   :  { %23689 = vst [vmem:[#allocation44_spill] sm:$0xff] %v21701_v47  ;;  %15719 = vmatmul.mubr.f32.gmra.mrb[46].mxu1 %v23347_v23  ;;  %v21720_v15 = vadd.f32 %v21694_v5, %v21679_v24  ;;  %v21722_v43 = vmul.f32 %v15201_v12, %v15201_v12  ;;  %v21728_v45 = vmul.f32 %v15201_v12, %v21279_v54  ;;  %v23698_v39 = vld [vmem:[#allocation49_spill] sm:$0xff]  ;;  %v15204_v56 = vpop.f32.mrb[22].mxu1  ;;  %v8924_v5 = vand.u32 4294901760, %v8923_v11 }
 0x434   :  { %23692 = vst [vmem:[#allocation52_spill] sm:$0xff] %v21714_v40  ;;  %15921 = vmatprep.mubr.f32.mxu1 %v23695_v59  ;;  %v21730_v19 = vmul.f32 %v4930_v27, %v4930_v27  ;;  %17430 = vmatprep.subr.bf16.mxu1 %v21709_v17  ;;  %v21735_v46 = vmul.f32 %v23698_v39, %v23698_v39  ;;  %v23707_v54 = vand.u32 4294901760, %v21685_v6  ;;  %v23826_v24 = vld [vmem:[#allocation25_spill] sm:$0xff] }
 0x435   :  { %23693 = vst [vmem:[#allocation54_spill] sm:$0xff] %v21720_v15  ;;  %23694 = vst [vmem:[#allocation80_spill] sm:$0xff] %v21722_v43  ;;  %v21739_v15 = vadd.f32 %v21722_v43, %v21701_v47  ;;  %17432 = vmatpush3.bf16.msra.mxu1 %v21709_v17  ;;  %v21744_v12 = vmul.f32 %v4930_v27, %v23690_v63  ;;  %v21751_v59 = vmul.f32 %v15204_v56, %v15204_v56  ;;  %v4942_v43 = vpop.f32.mrb[23].mxu1 }
 0x436   :  { %23696 = vst [vmem:[#allocation83_spill] sm:$0xff] %v21728_v45  ;;  %23697 = vst [vmem:[#allocation99_spill] sm:$0xff] %v21730_v19  ;;  %v21748_v45 = vadd.f32 %v21730_v19, %v21705_v0  ;;  %17434 = vmatprep.subr.bf16.mxu1 %v21596_v28  ;;  %v21754_v47 = vsub.f32 %v15888_v55, %v8668_v61  ;;  %v21757_v4 = vmul.f32 %v15204_v56, %v23691_v37  ;;  %v23709_v55 = vld [vmem:[#allocation50_spill] sm:$0xff] }
 0x437   :  { %23699 = vst [vmem:[#allocation95_spill] sm:$0xff] %v21735_v46  ;;  %23700 = vst [vmem:[#allocation107_spill] sm:$0xff] %v21739_v15  ;;  %v21759_v11 = vmul.f32 %v4942_v43, %v4942_v43  ;;  %v23706_v63 = vand.u32 4294901760, %v21681_v21  ;;  %v21771_v15 = vadd.f32 %v21751_v59, %v21714_v40  ;;  %v21775_v61 = vmul.f32 %v4942_v43, %v23698_v39  ;;  %v15207_v56 = vpop.f32.mrb[24].mxu1 }
 0x438   :  { %23701 = vst [vmem:[#allocation20_spill] sm:$0xff] %v21744_v12  ;;  %23702 = vst [vmem:[#allocation30_spill] sm:$0xff] %v21748_v45  ;;  %v8937_v12 = vsub.f32 %v21685_v6, %v23707_v54  ;;  %v21767_v45 = vsub.f32 %v8612_v14, %v8665_v36  ;;  %15922 = vmatmul.mubr.f32.vlgmr.msra.gmra.mrb[48].mxu1 %v23709_v55  ;;  %v21783_v36 = vpack.c.bf16 %v8931_v31, %v8924_v5  ;;  %v23713_v14 = vld [vmem:[#allocation55_spill] sm:$0xff]  ;;  %v23727_v55 = vld [vmem:[#allocation68_spill] sm:$0xff] }
 0x439   :  { %23703 = vst [vmem:[#allocation31_spill] sm:$0xff] %v21751_v59  ;;  %23704 = vst [vmem:[#allocation53_spill] sm:$0xff] %v21757_v4  ;;  %v8944_v27 = vsub.f32 %v21681_v21, %v23706_v63  ;;  %v21779_v37 = vadd.f32 %v21759_v11, %v21735_v46  ;;  %17436 = vmatpush3.bf16.msra.mxu1 %v21596_v28  ;;  %v23712_v63 = vld [vmem:[#allocation66_spill] sm:$0xff]  ;;  %v21787_v54 = vmul.f32 %v23713_v14, %v23713_v14  ;;  %v4954_v28 = vpop.f32.mrb[25].mxu1 }
 0x43a   :  { %23705 = vst [vmem:[#allocation34_spill] sm:$0xff] %v21759_v11  ;;  %23708 = vst [vmem:[#allocation18_spill] sm:$0xff] %v21771_v15  ;;  %15924 = vmatprep.mubr.f32.mxu1 %v23712_v63  ;;  %v23715_v4 = vand.u32 4294901760, %v21707_v32  ;;  %17438 = vmatprep.subr.bf16.mxu1 %v21609_v20  ;;  %v21793_v39 = vmul.f32 %v15207_v56, %v15207_v56  ;;  %v23720_v31 = vand.u32 4294901760, %v21716_v34  ;;  %v23726_v11 = vld [vmem:[#allocation92_spill] sm:$0xff] }
 0x43b   :  { %23710 = vst [vmem:[#allocation67_spill] sm:$0xff] %v21775_v61  ;;  %23711 = vst [vmem:[#allocation27_spill] sm:$0xff] %v21779_v37  ;;  %v21796_v61 = vmul.f32 %v15207_v56, %v23713_v14  ;;  %v23718_v37 = vld [vmem:[#allocation60_spill] sm:$0xff]  ;;  %v21806_v59 = vmul.f32 %v4954_v28, %v4954_v28 }
 0x43c   :  { %23714 = vst [vmem:[#allocation65_spill] sm:$0xff] %v21787_v54  ;;  %v8951_v43 = vsub.f32 %v21707_v32, %v23715_v4  ;;  %23716 = vst [vmem:[#allocation74_spill] sm:$0xff] %v21793_v39  ;;  %v21800_v5 = vmul.f32 %v23718_v37, %v23718_v37  ;;  %v8958_v15 = vsub.f32 %v21716_v34, %v23720_v31  ;;  %v23724_v14 = vld [vmem:[#allocation88_spill] sm:$0xff]  ;;  %v15210_v31 = vpop.f32.mrb[26].mxu1  ;;  %v8945_v4 = vand.u32 4294901760, %v8944_v27 }
 0x43d   :  { %23717 = vst [vmem:[#allocation36_spill] sm:$0xff] %v21796_v61  ;;  %23721 = vst [vmem:[#allocation26_spill] sm:$0xff] %v21806_v59  ;;  %v21811_v19 = vadd.f32 %v21793_v39, %v21787_v54  ;;  %v21814_v56 = vmul.f32 %v4954_v28, %v23718_v37  ;;  %15925 = vmatmul.mubr.f32.gmra.mrb[50].mxu1 %v23724_v14  ;;  %v8938_v61 = vand.u32 4294901760, %v8937_v12  ;;  %v4966_v28 = vpop.f32.mrb[27].mxu1  ;;  %v23735_v14 = vand.u32 4294901760, %v21767_v45 }
 0x43e   :  { %23719 = vst [vmem:[#allocation58_spill] sm:$0xff] %v21800_v5  ;;  %v21819_v63 = vadd.f32 %v21806_v59, %v21800_v5  ;;  %17440 = vmatpush3.bf16.msra.mxu1 %v21609_v20  ;;  %15927 = vmatprep.mubr.f32.mxu1 %v23726_v11  ;;  %v21825_v39 = vmul.f32 %v23727_v55, %v23727_v55  ;;  %v23731_v20 = vand.u32 4294901760, %v21754_v47 }
 0x43f   :  { %23722 = vst [vmem:[#allocation17_spill] sm:$0xff] %v21811_v19  ;;  %23723 = vst [vmem:[#allocation29_spill] sm:$0xff] %v21814_v56  ;;  %v23729_v19 = vld [vmem:[#allocation77_spill] sm:$0xff]  ;;  %17442 = vmatprep.subr.bf16.mxu1 %v21621_v52  ;;  %v21832_v12 = vmul.f32 %v15210_v31, %v15210_v31  ;;  %v8952_v56 = vand.u32 4294901760, %v8951_v43  ;;  %v21838_v27 = vmul.f32 %v15210_v31, %v23727_v55  ;;  %v23737_v43 = vld [vmem:[#allocation96_spill] sm:$0xff] }
 0x440   :  { %23725 = vst [vmem:[#allocation28_spill] sm:$0xff] %v21819_v63  ;;  %23728 = vst [vmem:[#allocation70_spill] sm:$0xff] %v21825_v39  ;;  %v21829_v37 = vmul.f32 %v23729_v19, %v23729_v19  ;;  %v8972_v63 = vsub.f32 %v21754_v47, %v23731_v20  ;;  %v21840_v59 = vmul.f32 %v4966_v28, %v4966_v28  ;;  %v8959_v20 = vand.u32 4294901760, %v8958_v15  ;;  %v23739_v31 = vld [vmem:[#allocation103_spill] sm:$0xff] }
 0x441   :  { %23730 = vst [vmem:[#allocation32_spill] sm:$0xff] %v21832_v12  ;;  %23732 = vst [vmem:[#allocation35_spill] sm:$0xff] %v21838_v27  ;;  %v21843_v11 = vmul.f32 %v4966_v28, %v23729_v19  ;;  %v8965_v5 = vsub.f32 %v21767_v45, %v23735_v14  ;;  %v21850_v54 = vadd.f32 %v21832_v12, %v21825_v39  ;;  %15928 = vmatmul.mubr.f32.gmra.mrb[52].mxu1 %v23737_v43  ;;  %v15213_v19 = vpop.f32.mrb[28].mxu1  ;;  %v23740_v28 = vld [vmem:[#allocation39_spill] sm:$0xff]  ;;  %v23749_v12 = vld [vmem:[#allocation104_spill] sm:$0xff] }
 0x442   :  { %23733 = vst [vmem:[#allocation37_spill] sm:$0xff] %v21840_v59  ;;  %v17453_v46 = vpack.c.bf16 %v8945_v4, %v8938_v61  ;;  %v21855_v55 = vadd.f32 %v21840_v59, %v21829_v37  ;;  %17444 = vmatpush3.bf16.msra.mxu1 %v21621_v52  ;;  %15930 = vmatprep.mubr.f32.mxu1 %v23739_v31  ;;  %v4978_v15 = vpop.f32.mrb[29].mxu1  ;;  %v23744_v27 = vld [vmem:[#allocation47_spill] sm:$0xff] }
 0x443   :  { %23734 = vst [vmem:[#allocation38_spill] sm:$0xff] %v21843_v11  ;;  %23736 = vst [vmem:[#allocation49_spill] sm:$0xff] %v21850_v54  ;;  %v21861_v14 = vmul.f32 %v23740_v28, %v23740_v28  ;;  %17446 = vmatprep.subr.bf16.mxu1 %v21633_v7  ;;  %v21864_v11 = vmul.f32 %v15213_v19, %v15213_v19  ;;  %v21867_v61 = vmul.f32 %v15213_v19, %v23740_v28  ;;  %v23751_v28 = vld [vmem:[#allocation108_spill] sm:$0xff] }
 0x444   :  { %23738 = vst [vmem:[#allocation55_spill] sm:$0xff] %v21855_v55  ;;  %v17457_v4 = vpack.c.bf16 %v8959_v20, %v8952_v56  ;;  %v21871_v55 = vmul.f32 %v23744_v27, %v23744_v27  ;;  %v21873_v52 = vmul.f32 %v4978_v15, %v4978_v15  ;;  %v21880_v59 = vmul.f32 %v4978_v15, %v23744_v27  ;;  %v15216_v20 = vpop.f32.mrb[30].mxu1  ;;  %v23752_v15 = vld [vmem:[#allocation63_spill] sm:$0xff] }
 0x445   :  { %23741 = vst [vmem:[#allocation60_spill] sm:$0xff] %v21861_v14  ;;  %23742 = vst [vmem:[#allocation68_spill] sm:$0xff] %v21864_v11  ;;  %v21877_v54 = vadd.f32 %v21864_v11, %v21861_v14  ;;  %15931 = vmatmul.mubr.f32.gmra.mrb[54].mxu1 %v23749_v12  ;;  %v8966_v31 = vand.u32 4294901760, %v8965_v5  ;;  %v8973_v19 = vand.u32 4294901760, %v8972_v63  ;;  %v17489_v27 = vpack.c.bf16 %v21716_v34, %v21707_v32  ;;  %v4990_v5 = vpop.f32.mrb[31].mxu1  ;;  %v23759_v12 = vld [vmem:[#allocation111_spill] sm:$0xff] }
 0x446   :  { %23743 = vst [vmem:[#allocation77_spill] sm:$0xff] %v21867_v61  ;;  %23745 = vst [vmem:[#allocation39_spill] sm:$0xff] %v21871_v55  ;;  %v21885_v56 = vadd.f32 %v21873_v52, %v21871_v55  ;;  %17448 = vmatpush3.bf16.msra.mxu1 %v21633_v7  ;;  %15933 = vmatprep.mubr.f32.mxu1 %v23751_v28  ;;  %v17485_v61 = vpack.c.bf16 %v21681_v21, %v21685_v6 }
 0x447   :  { %23746 = vst [vmem:[#allocation47_spill] sm:$0xff] %v21873_v52  ;;  %23747 = vst [vmem:[#allocation122_spill] sm:$0xff] %v21877_v54  ;;  %17450 = vmatprep.subr.bf16.mxu1 %v21783_v36  ;;  %v21898_v63 = vmul.f32 %v15216_v20, %v15216_v20  ;;  %v21905_v54 = vmul.f32 %v15216_v20, %v23752_v15  ;;  %v21907_v52 = vmul.f32 %v4990_v5, %v4990_v5  ;;  %v23761_v20 = vld [vmem:[#allocation114_spill] sm:$0xff] }
 0x448   :  { %23748 = vst [vmem:[#allocation123_spill] sm:$0xff] %v21880_v59  ;;  %23750 = vst [vmem:[#allocation124_spill] sm:$0xff] %v21885_v56  ;;  %v21895_v59 = vmul.f32 %v23752_v15, %v23752_v15  ;;  %v23754_v56 = vld [vmem:[#allocation72_spill] sm:$0xff]  ;;  %v17461_v55 = vpack.c.bf16 %v8973_v19, %v8966_v31  ;;  %v17493_v14 = vpack.c.bf16 %v21754_v47, %v21767_v45  ;;  %v23763_v15 = vand.u32 4294901760, %v21681_v21  ;;  %v23770_v21 = vld [vmem:[#allocation119_spill] sm:$0xff] }
 0x449   :  { %23753 = vst [vmem:[#allocation63_spill] sm:$0xff] %v21898_v63  ;;  %v21902_v7 = vmul.f32 %v23754_v56, %v23754_v56  ;;  %23755 = vst [vmem:[#allocation72_spill] sm:$0xff] %v21905_v54  ;;  %v21910_v11 = vmul.f32 %v4990_v5, %v23754_v56  ;;  %15934 = vmatmul.mubr.f32.gmra.mrb[56].mxu1 %v23759_v12  ;;  %v23762_v56 = vand.u32 4294901760, %v21685_v6  ;;  %v23764_v31 = vand.u32 4294901760, %v21707_v32  ;;  %v23769_v6 = vld [vmem:[#allocation118_spill] sm:$0xff]  ;;  %v23771_v32 = vld [vmem:[#allocation120_spill] sm:$0xff] }
 0x44a   :  { %23756 = vst [vmem:[#allocation125_spill] sm:$0xff] %v21907_v52  ;;  %v21914_v28 = vadd.f32 %v21898_v63, %v21895_v59  ;;  %17452 = vmatpush3.bf16.msra.mxu1 %v21783_v36  ;;  %15936 = vmatprep.mubr.f32.mxu1 %v23761_v20  ;;  %v23765_v19 = vand.u32 4294901760, %v21716_v34  ;;  %v23766_v54 = vand.u32 4294901760, %v21767_v45  ;;  %v23772_v34 = vld [vmem:[#allocation121_spill] sm:$0xff]  ;;  %v23773_v45 = vld [vmem:[#allocation23_spill] sm:$0xff] }
 0x44b   :  { %23757 = vst [vmem:[#allocation126_spill] sm:$0xff] %v21910_v11  ;;  %v21921_v43 = vadd.f32 %v21907_v52, %v21902_v7  ;;  %v21929_v5 = vpack.c.bf16 %v23763_v15, %v23762_v56  ;;  %17454 = vmatprep.subr.bf16.mxu1 %v17453_v46  ;;  %v23788_v56 = vld [vmem:[#allocation24_spill] sm:$0xff]  ;;  %v23792_v52 = vld [vmem:[#allocation61_spill] sm:$0xff] }
 0x44c   :  { %23758 = vst [vmem:[#allocation127_spill] sm:$0xff] %v21914_v28  ;;  %v21935_v11 = vpack.c.bf16 %v23765_v19, %v23764_v31  ;;  %v23768_v28 = vld [vmem:[#allocation116_spill] sm:$0xff]  ;;  %v23790_v31 = vld [vmem:[#allocation42_spill] sm:$0xff]  ;;  %v23793_v63 = vld [vmem:[#allocation57_spill] sm:$0xff] }
 0x44d   :  { %23760 = vst [vmem:[#allocation111_spill] sm:$0xff] %v21921_v43  ;;  %v23767_v43 = vand.u32 4294901760, %v21754_v47  ;;  %15937 = vmatmul.mubr.f32.gmra.mrb[58].mxu1 %v23768_v28  ;;  %v23779_v47 = vld [vmem:[#allocation84_spill] sm:$0xff] }
 0x44e   :  { %17456 = vmatpush3.bf16.msra.mxu1 %v17453_v46  ;;  %15939 = vmatprep.mubr.f32.mxu1 %v23769_v6  ;;  %v23780_v46 = vld [vmem:[#allocation90_spill] sm:$0xff]  ;;  %v23789_v15 = vld [vmem:[#allocation56_spill] sm:$0xff] }
 0x44f   :  { %v21941_v36 = vpack.c.bf16 %v23767_v43, %v23766_v54  ;;  %17458 = vmatprep.subr.bf16.mxu1 %v17457_v4  ;;  %v23781_v54 = vld [vmem:[#allocation94_spill] sm:$0xff]  ;;  %v23791_v19 = vld [vmem:[#allocation48_spill] sm:$0xff] }
 0x450   :  { %v23782_v43 = vld [vmem:[#allocation78_spill] sm:$0xff] }
 0x451   :  { %15940 = vmatmul.mubr.f32.gmra.mrb[60].mxu1 %v23770_v21 }
 0x452   :  { %17460 = vmatpush3.bf16.msra.mxu1 %v17457_v4  ;;  %15942 = vmatprep.mubr.f32.mxu1 %v23771_v32  ;;  %v23786_v4 = vld [vmem:[#allocation110_spill] sm:$0xff] }
 0x453   :  { %17462 = vmatprep.subr.bf16.mxu1 %v17461_v55 }
 0x455   :  { %15943 = vmatmul.mubr.f32.gmra.mrb[62].mxu1 %v23772_v34 }
 0x456   :  { %17464 = vmatpush3.bf16.msra.mxu1 %v17461_v55  ;;  %15977 = vmatprep.mubr.f32.mxu1 %v23581_v38  ;;  %v23783_v55 = vld [vmem:[#allocation98_spill] sm:$0xff] }
 0x457   :  { %17466 = vmatprep.subr.bf16.mxu1 %v21578_v49 }
 0x459   :  { %15978 = vmatmul.mubr.f32.vlgmr.msra.gmra.mrb[48].mxu1 %v23582_v33 }
 0x45a   :  { %17468 = vmatpush3.bf16.msra.mxu1 %v21578_v49  ;;  %15980 = vmatprep.mubr.f32.mxu1 %v23583_v18  ;;  %v23774_v49 = vld [vmem:[#allocation19_spill] sm:$0xff] }
 0x45b   :  { %17470 = vmatprep.subr.bf16.mxu1 %v21590_v58 }
 0x45d   :  { %15981 = vmatmul.mubr.f32.gmra.mrb[50].mxu1 %v23585_v16 }
 0x45e   :  { %17472 = vmatpush3.bf16.msra.mxu1 %v21590_v58  ;;  %15983 = vmatprep.mubr.f32.mxu1 %v23309_v25  ;;  %v23775_v58 = vld [vmem:[#allocation51_spill] sm:$0xff] }
 0x45f   :  { %17474 = vmatprep.subr.bf16.mxu1 %v21603_v10 }
 0x461   :  { %15984 = vmatmul.mubr.f32.gmra.mrb[52].mxu1 %v23310_v57 }
 0x462   :  { %17476 = vmatpush3.bf16.msra.mxu1 %v21603_v10  ;;  %15986 = vmatprep.mubr.f32.mxu1 %v23410_v26  ;;  %v23776_v10 = vld [vmem:[#allocation59_spill] sm:$0xff] }
 0x463   :  { %17478 = vmatprep.subr.bf16.mxu1 %v21615_v53 }
 0x465   :  { %15987 = vmatmul.mubr.f32.gmra.mrb[54].mxu1 %v23591_v30 }
 0x466   :  { %17480 = vmatpush3.bf16.msra.mxu1 %v21615_v53  ;;  %15989 = vmatprep.mubr.f32.mxu1 %v23316_v29  ;;  %v23777_v53 = vld [vmem:[#allocation79_spill] sm:$0xff] }
 0x467   :  { %17482 = vmatprep.subr.bf16.mxu1 %v21627_v48 }
 0x469   :  { %15990 = vmatmul.mubr.f32.gmra.mrb[56].mxu1 %v23321_v42 }
 0x46a   :  { %17484 = vmatpush3.bf16.msra.mxu1 %v21627_v48  ;;  %15992 = vmatprep.mubr.f32.mxu1 %v23324_v1  ;;  %v23778_v48 = vld [vmem:[#allocation81_spill] sm:$0xff] }
 0x46b   :  { %17486 = vmatprep.subr.bf16.mxu1 %v17485_v61 }
 0x46d   :  { %15993 = vmatmul.mubr.f32.gmra.mrb[58].mxu1 %v23330_v3 }
 0x46e   :  { %17488 = vmatpush3.bf16.msra.mxu1 %v17485_v61  ;;  %15995 = vmatprep.mubr.f32.mxu1 %v23332_v9  ;;  %v23785_v61 = vld [vmem:[#allocation106_spill] sm:$0xff] }
 0x46f   :  { %17490 = vmatprep.subr.bf16.mxu1 %v17489_v27 }
 0x471   :  { %15996 = vmatmul.mubr.f32.gmra.mrb[60].mxu1 %v23598_v44 }
 0x472   :  { %17492 = vmatpush3.bf16.msra.mxu1 %v17489_v27  ;;  %15998 = vmatprep.mubr.f32.mxu1 %v23343_v62  ;;  %v23787_v27 = vld [vmem:[#allocation113_spill] sm:$0xff] }
 0x473   :  { %17494 = vmatprep.subr.bf16.mxu1 %v17493_v14 }
 0x475   :  { %15999 = vmatmul.mubr.f32.gmra.mrb[62].mxu1 %v23347_v23 }
 0x476   :  { %17496 = vmatpush3.bf16.msra.mxu1 %v17493_v14  ;;  %16033 = vmatprep.mubr.f32.mxu1 %v23773_v45  ;;  %v23784_v14 = vld [vmem:[#allocation101_spill] sm:$0xff] }
 0x477   :  { %17498 = vmatprep.subr.bf16.mxu1 %v21573_v35 }
 0x479   :  { %16034 = vmatmul.mubr.f32.vlgmr.msra.gmra.mrb[48].mxu1 %v23774_v49 }
 0x47a   :  { %17500 = vmatpush3.bf16.msra.mxu1 %v21573_v35  ;;  %16036 = vmatprep.mubr.f32.mxu1 %v23607_v22 }
 0x47b   :  { %17502 = vmatprep.subr.bf16.mxu1 %v21582_v41 }
 0x47d   :  { %16037 = vmatmul.mubr.f32.gmra.mrb[50].mxu1 %v23775_v58 }
 0x47e   :  { %17504 = vmatpush3.bf16.msra.mxu1 %v21582_v41  ;;  %16039 = vmatprep.mubr.f32.mxu1 %v23776_v10 }
 0x47f   :  { %17506 = vmatprep.subr.bf16.mxu1 %v21594_v2 }
 0x481   :  { %16040 = vmatmul.mubr.f32.gmra.mrb[52].mxu1 %v23614_v13 }
 0x482   :  { %17508 = vmatpush3.bf16.msra.mxu1 %v21594_v2  ;;  %16042 = vmatprep.mubr.f32.mxu1 %v23777_v53 }
 0x483   :  { %17510 = vmatprep.subr.bf16.mxu1 %v21607_v50 }
 0x485   :  { %16043 = vmatmul.mubr.f32.gmra.mrb[54].mxu1 %v23778_v48 }
 0x486   :  { %17512 = vmatpush3.bf16.msra.mxu1 %v21607_v50  ;;  %16045 = vmatprep.mubr.f32.mxu1 %v23779_v47 }
 0x487   :  { %17514 = vmatprep.subr.bf16.mxu1 %v21619_v8 }
 0x489   :  { %16046 = vmatmul.mubr.f32.gmra.mrb[56].mxu1 %v23780_v46 }
 0x48a   :  { %17516 = vmatpush3.bf16.msra.mxu1 %v21619_v8  ;;  %16048 = vmatprep.mubr.f32.mxu1 %v23781_v54 }
 0x48b   :  { %17518 = vmatprep.subr.bf16.mxu1 %v23782_v43 }
 0x48d   :  { %16049 = vmatmul.mubr.f32.gmra.mrb[58].mxu1 %v23783_v55 }
 0x48e   :  { %17520 = vmatpush3.bf16.msra.mxu1 %v23782_v43  ;;  %16051 = vmatprep.mubr.f32.mxu1 %v23784_v14 }
 0x48f   :  { %17522 = vmatprep.subr.bf16.mxu1 %v21662_v60 }
 0x491   :  { %16052 = vmatmul.mubr.f32.gmra.mrb[60].mxu1 %v23785_v61  ;;  %v23796_v61 = vld [vmem:[#allocation75_spill] sm:$0xff] }
 0x492   :  { %17524 = vmatpush3.bf16.msra.mxu1 %v21662_v60  ;;  %16054 = vmatprep.mubr.f32.mxu1 %v23786_v4  ;;  %v23794_v4 = vld [vmem:[#allocation71_spill] sm:$0xff] }
 0x493   :  { %17526 = vmatprep.subr.bf16.mxu1 %v21709_v17 }
 0x495   :  { %16055 = vmatmul.mubr.f32.gmra.mrb[62].mxu1 %v23787_v27  ;;  %v23795_v27 = vld [vmem:[#allocation15_spill] sm:$0xff] }
 0x496   :  { %17528 = vmatpush3.bf16.msra.mxu1 %v21709_v17  ;;  %16089 = vmatprep.mubr.f32.mxu1 %v23788_v56  ;;  %v23797_v56 = vld [vmem:[#allocation86_spill] sm:$0xff] }
 0x497   :  { %17530 = vmatprep.subr.bf16.mxu1 %v23789_v15 }
 0x499   :  { %16090 = vmatmul.mubr.f32.vlgmr.msra.gmra.mrb[48].mxu1 %v23790_v31  ;;  %v23798_v31 = vld [vmem:[#allocation16_spill] sm:$0xff] }
 0x49a   :  { %17532 = vmatpush3.bf16.msra.mxu1 %v23789_v15  ;;  %16092 = vmatprep.mubr.f32.mxu1 %v23791_v19  ;;  %v23799_v15 = vld [vmem:[#allocation89_spill] sm:$0xff] }
 0x49b   :  { %17534 = vmatprep.subr.bf16.mxu1 %v23792_v52  ;;  %v23800_v19 = vld [vmem:[#allocation93_spill] sm:$0xff] }
 0x49d   :  { %16093 = vmatmul.mubr.f32.gmra.mrb[50].mxu1 %v23793_v63  ;;  %v23801_v63 = vld [vmem:[#allocation82_spill] sm:$0xff] }
 0x49e   :  { %17536 = vmatpush3.bf16.msra.mxu1 %v23792_v52  ;;  %16095 = vmatprep.mubr.f32.mxu1 %v23794_v4  ;;  %v23802_v52 = vld [vmem:[#allocation97_spill] sm:$0xff]  ;;  %v23803_v4 = vld [vmem:[#allocation100_spill] sm:$0xff] }
 0x49f   :  { %17538 = vmatprep.subr.bf16.mxu1 %v23795_v27 }
 0x4a1   :  { %16096 = vmatmul.mubr.f32.gmra.mrb[52].mxu1 %v23796_v61 }
 0x4a2   :  { %17540 = vmatpush3.bf16.msra.mxu1 %v23795_v27  ;;  %16098 = vmatprep.mubr.f32.mxu1 %v23797_v56  ;;  %v23804_v27 = vld [vmem:[#allocation105_spill] sm:$0xff] }
 0x4a3   :  { %17542 = vmatprep.subr.bf16.mxu1 %v23798_v31  ;;  %v23805_v56 = vld [vmem:[#allocation109_spill] sm:$0xff] }
 0x4a5   :  { %16099 = vmatmul.mubr.f32.gmra.mrb[54].mxu1 %v23799_v15 }
 0x4a6   :  { %17544 = vmatpush3.bf16.msra.mxu1 %v23798_v31  ;;  %16101 = vmatprep.mubr.f32.mxu1 %v23800_v19  ;;  %v23806_v31 = vld [vmem:[#allocation112_spill] sm:$0xff]  ;;  %v23807_v19 = vld [vmem:[#allocation115_spill] sm:$0xff] }
 0x4a7   :  { %17546 = vmatprep.subr.bf16.mxu1 %v23801_v63 }
 0x4a9   :  { %16102 = vmatmul.mubr.f32.gmra.mrb[56].mxu1 %v23802_v52 }
 0x4aa   :  { %17548 = vmatpush3.bf16.msra.mxu1 %v23801_v63  ;;  %16104 = vmatprep.mubr.f32.mxu1 %v23803_v4  ;;  %v23808_v63 = vld [vmem:[#allocation117_spill] sm:$0xff] }
 0x4ab   :  { %17550 = vmatprep.subr.bf16.mxu1 %v21929_v5 }
 0x4ad   :  { %16105 = vmatmul.mubr.f32.gmra.mrb[58].mxu1 %v23804_v27 }
 0x4ae   :  { %17552 = vmatpush3.bf16.msra.mxu1 %v21929_v5  ;;  %16107 = vmatprep.mubr.f32.mxu1 %v23805_v56 }
 0x4af   :  { %17554 = vmatprep.subr.bf16.mxu1 %v21935_v11 }
 0x4b1   :  { %16108 = vmatmul.mubr.f32.gmra.mrb[60].mxu1 %v23806_v31 }
 0x4b2   :  { %17556 = vmatpush3.bf16.msra.mxu1 %v21935_v11  ;;  %16110 = vmatprep.mubr.f32.mxu1 %v23807_v19 }
 0x4b3   :  { %17558 = vmatprep.subr.bf16.mxu1 %v21941_v36 }
 0x4b5   :  { %16111 = vmatmul.mubr.f32.gmra.mrb[62].mxu1 %v23808_v63 }
 0x4b6   :  { %17560 = vmatpush3.bf16.msra.mxu1 %v21941_v36  ;;  %16145 = vmatprep.mubr.f32.mxu1 %v23581_v38 }
 0x4b7   :  { %17562 = vmatprep.subr.bf16.mxu1 %v21573_v35 }
 0x4b9   :  { %16146 = vmatmul.mubr.f32.vlgmr.msra.gmra.mrb[48].mxu1 %v23582_v33 }
 0x4ba   :  { %17564 = vmatpush3.bf16.msra.mxu1 %v21573_v35  ;;  %16148 = vmatprep.mubr.f32.mxu1 %v23583_v18 }
 0x4bb   :  { %17566 = vmatprep.subr.bf16.mxu1 %v21582_v41 }
 0x4bd   :  { %16149 = vmatmul.mubr.f32.gmra.mrb[50].mxu1 %v23585_v16 }
 0x4be   :  { %17568 = vmatpush3.bf16.msra.mxu1 %v21582_v41  ;;  %16151 = vmatprep.mubr.f32.mxu1 %v23309_v25 }
 0x4bf   :  { %17570 = vmatprep.subr.bf16.mxu1 %v21594_v2 }
 0x4c1   :  { %16152 = vmatmul.mubr.f32.gmra.mrb[52].mxu1 %v23310_v57 }
 0x4c2   :  { %17572 = vmatpush3.bf16.msra.mxu1 %v21594_v2  ;;  %16154 = vmatprep.mubr.f32.mxu1 %v23410_v26 }
 0x4c3   :  { %17574 = vmatprep.subr.bf16.mxu1 %v21607_v50 }
 0x4c5   :  { %16155 = vmatmul.mubr.f32.gmra.mrb[54].mxu1 %v23591_v30 }
 0x4c6   :  { %17576 = vmatpush3.bf16.msra.mxu1 %v21607_v50  ;;  %16157 = vmatprep.mubr.f32.mxu1 %v23316_v29 }
 0x4c7   :  { %17578 = vmatprep.subr.bf16.mxu1 %v21619_v8 }
 0x4c9   :  { %16158 = vmatmul.mubr.f32.gmra.mrb[56].mxu1 %v23321_v42 }
 0x4ca   :  { %17580 = vmatpush3.bf16.msra.mxu1 %v21619_v8  ;;  %16160 = vmatprep.mubr.f32.mxu1 %v23324_v1 }
 0x4cb   :  { %17582 = vmatprep.subr.bf16.mxu1 %v23782_v43 }
 0x4cd   :  { %16161 = vmatmul.mubr.f32.gmra.mrb[58].mxu1 %v23330_v3 }
 0x4ce   :  { %17584 = vmatpush3.bf16.msra.mxu1 %v23782_v43  ;;  %16163 = vmatprep.mubr.f32.mxu1 %v23332_v9 }
 0x4cf   :  { %17586 = vmatprep.subr.bf16.mxu1 %v21662_v60 }
 0x4d1   :  { %16164 = vmatmul.mubr.f32.gmra.mrb[60].mxu1 %v23598_v44 }
 0x4d2   :  { %v16371_v35 = vpop.f32.mrb[64].mxu0  ;;  %17588 = vmatpush3.bf16.msra.mxu1 %v21662_v60  ;;  %16166 = vmatprep.mubr.f32.mxu1 %v23343_v62 }
 0x4d3   :  { %v11080_v41 = vand.u32 4294901760, %v16371_v35  ;;  %v10982_v2 = vpop.f32.mrb[65].mxu0  ;;  %17590 = vmatprep.subr.bf16.mxu1 %v21709_v17 }
 0x4d4   :  { %v11077_v50 = vand.u32 4294901760, %v10982_v2 }
 0x4d5   :  { %v11326_v8 = vsub.f32 %v16371_v35, %v11080_v41  ;;  %16167 = vmatmul.mubr.f32.gmra.mrb[62].mxu1 %v23347_v23 }
 0x4d6   :  { %v22068_v11 = vpack.c.bf16 %v11080_v41, %v11077_v50  ;;  %v11319_v5 = vsub.f32 %v10982_v2, %v11077_v50  ;;  %v16374_v36 = vpop.f32.mrb[66].mxu0  ;;  %17592 = vmatpush3.bf16.msra.mxu1 %v21709_v17  ;;  %16201 = vmatprep.mubr.f32.mxu1 %v23581_v38 }
 0x4d7   :  { %v11327_v43 = vand.u32 4294901760, %v11326_v8  ;;  %v11086_v63 = vand.u32 4294901760, %v16374_v36  ;;  %v10994_v60 = vpop.f32.mrb[67].mxu0 }
 0x4d8   :  { %23809 = vst [vmem:[#allocation114_spill] sm:$0xff] %v22068_v11  ;;  %v11320_v19 = vand.u32 4294901760, %v11319_v5  ;;  %v11083_v31 = vand.u32 4294901760, %v10994_v60  ;;  %17618 = vmatprep.subr.bf16.mxu1 %v22068_v11  ;;  %17778 = vmatprep.subr.bf16.mxu0 %v22068_v11  ;;  %v22075_v35 = vpack.c.bf16 %v11326_v8, %v11319_v5 }
 0x4d9   :  { %v11328_v41 = vsub.f32 %v11326_v8, %v11327_v43  ;;  %v11340_v2 = vsub.f32 %v16374_v36, %v11086_v63  ;;  %17780 = vmatpush3.bf16.msra.mxu0 %v22068_v11  ;;  %16202 = vmatmul.mubr.f32.vlgmr.msra.gmra.mrb[48].mxu1 %v23582_v33 }
 0x4da   :  { %v11321_v50 = vsub.f32 %v11319_v5, %v11320_v19  ;;  %v22078_v56 = vpack.c.bf16 %v11086_v63, %v11083_v31  ;;  %v11333_v17 = vsub.f32 %v10994_v60, %v11083_v31  ;;  %v16377_v27 = vpop.f32.mrb[68].mxu0  ;;  %v22081_v4 = vpack.c.bf16 %v11327_v43, %v11320_v19  ;;  %17620 = vmatpush3.bf16.msra.mxu1 %v22068_v11 }
 0x4db   :  { %v11341_v52 = vand.u32 4294901760, %v11340_v2  ;;  %v11092_v15 = vand.u32 4294901760, %v16377_v27  ;;  %16204 = vmatprep.mubr.f32.mxu1 %v23583_v18  ;;  %v11006_v61 = vpop.f32.mrb[69].mxu0  ;;  %v11329_v8 = vand.u32 4294901760, %v11328_v41 }
 0x4dc   :  { %23810 = vst [vmem:[#allocation116_spill] sm:$0xff] %v22078_v56  ;;  %23811 = vst [vmem:[#allocation118_spill] sm:$0xff] %v22081_v4  ;;  %v11334_v36 = vand.u32 4294901760, %v11333_v17  ;;  %v11089_v14 = vand.u32 4294901760, %v11006_v61  ;;  %17622 = vmatprep.subr.bf16.mxu1 %v22078_v56  ;;  %17782 = vmatprep.subr.bf16.mxu0 %v22078_v56  ;;  %v11322_v31 = vand.u32 4294901760, %v11321_v50  ;;  %v22087_v63 = vpack.c.bf16 %v11340_v2, %v11333_v17 }
 0x4dd   :  { %v11342_v5 = vsub.f32 %v11340_v2, %v11341_v52  ;;  %v11354_v19 = vsub.f32 %v16377_v27, %v11092_v15  ;;  %17784 = vmatpush3.bf16.msra.mxu0 %v22078_v56  ;;  %16205 = vmatmul.mubr.f32.gmra.mrb[50].mxu1 %v23585_v16 }
 0x4de   :  { %v11335_v43 = vsub.f32 %v11333_v17, %v11334_v36  ;;  %v22090_v60 = vpack.c.bf16 %v11092_v15, %v11089_v14  ;;  %v11347_v4 = vsub.f32 %v11006_v61, %v11089_v14  ;;  %v16380_v41 = vpop.f32.mrb[70].mxu0  ;;  %v22093_v55 = vpack.c.bf16 %v11329_v8, %v11322_v31  ;;  %17624 = vmatpush3.bf16.msra.mxu1 %v22078_v56 }
 0x4df   :  { %v11355_v54 = vand.u32 4294901760, %v11354_v19  ;;  %v11098_v46 = vand.u32 4294901760, %v16380_v41  ;;  %16207 = vmatprep.mubr.f32.mxu1 %v23309_v25  ;;  %v11018_v50 = vpop.f32.mrb[71].mxu0  ;;  %v11343_v2 = vand.u32 4294901760, %v11342_v5  ;;  %v22097_v27 = vpack.c.bf16 %v11341_v52, %v11334_v36 }
 0x4e0   :  { %23812 = vst [vmem:[#allocation119_spill] sm:$0xff] %v22090_v60  ;;  %v11348_v47 = vand.u32 4294901760, %v11347_v4  ;;  %v11095_v17 = vand.u32 4294901760, %v11018_v50  ;;  %17626 = vmatprep.subr.bf16.mxu1 %v22090_v60  ;;  %17786 = vmatprep.subr.bf16.mxu0 %v22090_v60  ;;  %v11336_v14 = vand.u32 4294901760, %v11335_v43  ;;  %v22101_v61 = vpack.c.bf16 %v11354_v19, %v11347_v4 }
 0x4e1   :  { %23813 = vst [vmem:[#allocation120_spill] sm:$0xff] %v22097_v27  ;;  %v11356_v15 = vsub.f32 %v11354_v19, %v11355_v54  ;;  %v11368_v8 = vsub.f32 %v16380_v41, %v11098_v46  ;;  %17788 = vmatpush3.bf16.msra.mxu0 %v22090_v60  ;;  %16208 = vmatmul.mubr.f32.gmra.mrb[52].mxu1 %v23310_v57 }
 0x4e2   :  { %v11349_v31 = vsub.f32 %v11347_v4, %v11348_v47  ;;  %v22104_v48 = vpack.c.bf16 %v11098_v46, %v11095_v17  ;;  %v11361_v53 = vsub.f32 %v11018_v50, %v11095_v17  ;;  %v16383_v52 = vpop.f32.mrb[72].mxu0  ;;  %v22107_v36 = vpack.c.bf16 %v11343_v2, %v11336_v14  ;;  %17628 = vmatpush3.bf16.msra.mxu1 %v22090_v60 }
 0x4e3   :  { %v11369_v5 = vand.u32 4294901760, %v11368_v8  ;;  %v11104_v27 = vand.u32 4294901760, %v16383_v52  ;;  %16210 = vmatprep.mubr.f32.mxu1 %v23410_v26  ;;  %v11030_v43 = vpop.f32.mrb[73].mxu0  ;;  %v11357_v19 = vand.u32 4294901760, %v11356_v15  ;;  %v22111_v41 = vpack.c.bf16 %v11355_v54, %v11348_v47 }
 0x4e4   :  { %23814 = vst [vmem:[#allocation121_spill] sm:$0xff] %v22104_v48  ;;  %v11362_v13 = vand.u32 4294901760, %v11361_v53  ;;  %v11101_v4 = vand.u32 4294901760, %v11030_v43  ;;  %17630 = vmatprep.subr.bf16.mxu1 %v22104_v48  ;;  %17790 = vmatprep.subr.bf16.mxu0 %v22104_v48  ;;  %v11350_v46 = vand.u32 4294901760, %v11349_v31  ;;  %v22115_v50 = vpack.c.bf16 %v11368_v8, %v11361_v53 }
 0x4e5   :  { %23815 = vst [vmem:[#allocation78_spill] sm:$0xff] %v22111_v41  ;;  %v11370_v2 = vsub.f32 %v11368_v8, %v11369_v5  ;;  %v11382_v17 = vsub.f32 %v16383_v52, %v11104_v27  ;;  %17792 = vmatpush3.bf16.msra.mxu0 %v22104_v48  ;;  %16211 = vmatmul.mubr.f32.gmra.mrb[54].mxu1 %v23591_v30 }
 0x4e6   :  { %v11363_v14 = vsub.f32 %v11361_v53, %v11362_v13  ;;  %v22118_v60 = vpack.c.bf16 %v11104_v27, %v11101_v4  ;;  %v11375_v10 = vsub.f32 %v11030_v43, %v11101_v4  ;;  %v16386_v47 = vpop.f32.mrb[74].mxu0  ;;  %v22121_v54 = vpack.c.bf16 %v11357_v19, %v11350_v46  ;;  %17632 = vmatpush3.bf16.msra.mxu1 %v22104_v48 }
 0x4e7   :  { %v11383_v15 = vand.u32 4294901760, %v11382_v17  ;;  %v11110_v41 = vand.u32 4294901760, %v16386_v47  ;;  %16213 = vmatprep.mubr.f32.mxu1 %v23316_v29  ;;  %v11042_v31 = vpop.f32.mrb[75].mxu0  ;;  %v11371_v8 = vand.u32 4294901760, %v11370_v2  ;;  %v22125_v52 = vpack.c.bf16 %v11369_v5, %v11362_v13 }
 0x4e8   :  { %23816 = vst [vmem:[#allocation56_spill] sm:$0xff] %v22118_v60  ;;  %v11376_v58 = vand.u32 4294901760, %v11375_v10  ;;  %v11107_v53 = vand.u32 4294901760, %v11042_v31  ;;  %17634 = vmatprep.subr.bf16.mxu1 %v22118_v60  ;;  %17794 = vmatprep.subr.bf16.mxu0 %v22118_v60  ;;  %v11364_v27 = vand.u32 4294901760, %v11363_v14  ;;  %v22129_v43 = vpack.c.bf16 %v11382_v17, %v11375_v10 }
 0x4e9   :  { %23817 = vst [vmem:[#allocation61_spill] sm:$0xff] %v22125_v52  ;;  %v11384_v19 = vsub.f32 %v11382_v17, %v11383_v15  ;;  %v11396_v4 = vsub.f32 %v16386_v47, %v11110_v41  ;;  %17796 = vmatpush3.bf16.msra.mxu0 %v22118_v60  ;;  %16214 = vmatmul.mubr.f32.gmra.mrb[56].mxu1 %v23321_v42 }
 0x4ea   :  { %v11377_v46 = vsub.f32 %v11375_v10, %v11376_v58  ;;  %v22132_v48 = vpack.c.bf16 %v11110_v41, %v11107_v53  ;;  %v11389_v56 = vsub.f32 %v11042_v31, %v11107_v53  ;;  %v16389_v13 = vpop.f32.mrb[76].mxu0  ;;  %v22135_v5 = vpack.c.bf16 %v11371_v8, %v11364_v27  ;;  %17636 = vmatpush3.bf16.msra.mxu1 %v22118_v60  ;;  %v22138_v14 = vpop.f32.mrb[32].mxu1 }
 0x4eb   :  { %v11397_v2 = vand.u32 4294901760, %v11396_v4  ;;  %v11116_v52 = vand.u32 4294901760, %v16389_v13  ;;  %23819 = vst [vmem:[#allocation16_spill] sm:$0xff] %v22138_v14  ;;  %16216 = vmatprep.mubr.f32.mxu1 %v23324_v1  ;;  %v11054_v17 = vpop.f32.mrb[77].mxu0  ;;  %v11385_v47 = vand.u32 4294901760, %v11384_v19  ;;  %v22141_v22 = vpack.c.bf16 %v11383_v15, %v11376_v58  ;;  %v22145_v49 = vpop.f32.mrb[33].mxu1 }
 0x4ec   :  { %23818 = vst [vmem:[#allocation15_spill] sm:$0xff] %v22132_v48  ;;  %v11390_v10 = vand.u32 4294901760, %v11389_v56  ;;  %v11113_v53 = vand.u32 4294901760, %v11054_v17  ;;  %23822 = vst [vmem:[#allocation128_spill] sm:$0xff] %v22145_v49  ;;  %17638 = vmatprep.subr.bf16.mxu1 %v22132_v48  ;;  %17798 = vmatprep.subr.bf16.mxu0 %v22132_v48  ;;  %v11378_v8 = vand.u32 4294901760, %v11377_v46  ;;  %v22152_v58 = vpack.c.bf16 %v11396_v4, %v11389_v56 }
 0x4ed   :  { %23820 = vst [vmem:[#allocation82_spill] sm:$0xff] %v22141_v22  ;;  %v11398_v27 = vsub.f32 %v11396_v4, %v11397_v2  ;;  %v11410_v60 = vsub.f32 %v16389_v13, %v11116_v52  ;;  %17800 = vmatpush3.bf16.msra.mxu0 %v22132_v48  ;;  %16217 = vmatmul.mubr.f32.gmra.mrb[58].mxu1 %v23330_v3 }
 0x4ee   :  { %v11391_v15 = vsub.f32 %v11389_v56, %v11390_v10  ;;  %v22154_v19 = vpack.c.bf16 %v11116_v52, %v11113_v53  ;;  %v11403_v31 = vsub.f32 %v11054_v17, %v11113_v53  ;;  %v16392_v41 = vpop.f32.mrb[78].mxu0  ;;  %v22157_v14 = vpack.c.bf16 %v11385_v47, %v11378_v8  ;;  %17640 = vmatpush3.bf16.msra.mxu1 %v22132_v48  ;;  %v22160_v13 = vpop.f32.mrb[34].mxu1 }
 0x4ef   :  { %v11411_v22 = vand.u32 4294901760, %v11410_v60  ;;  %v11122_v46 = vand.u32 4294901760, %v16392_v41  ;;  %23824 = vst [vmem:[#allocation129_spill] sm:$0xff] %v22160_v13  ;;  %16219 = vmatprep.mubr.f32.mxu1 %v23332_v9  ;;  %v11066_v45 = vpop.f32.mrb[79].mxu0  ;;  %v11399_v4 = vand.u32 4294901760, %v11398_v27  ;;  %v22163_v11 = vpack.c.bf16 %v11397_v2, %v11390_v10  ;;  %v22167_v53 = vpop.f32.mrb[35].mxu1 }
 0x4f0   :  { %v11404_v56 = vand.u32 4294901760, %v11403_v31  ;;  %v11119_v17 = vand.u32 4294901760, %v11066_v45  ;;  %17642 = vmatprep.subr.bf16.mxu1 %v22154_v19  ;;  %17802 = vmatprep.subr.bf16.mxu0 %v22154_v19  ;;  %v11392_v47 = vand.u32 4294901760, %v11391_v15  ;;  %v22174_v2 = vpack.c.bf16 %v11410_v60, %v11403_v31 }
 0x4f1   :  { %v11412_v8 = vsub.f32 %v11410_v60, %v11411_v22  ;;  %v11424_v49 = vsub.f32 %v16392_v41, %v11122_v46  ;;  %17804 = vmatpush3.bf16.msra.mxu0 %v22154_v19  ;;  %16220 = vmatmul.mubr.f32.gmra.mrb[60].mxu1 %v23598_v44 }
 0x4f2   :  { %v11405_v10 = vsub.f32 %v11403_v31, %v11404_v56  ;;  %v22176_v27 = vpack.c.bf16 %v11122_v46, %v11119_v17  ;;  %v11417_v52 = vsub.f32 %v11066_v45, %v11119_v17  ;;  %v22179_v51 = vpack.c.bf16 %v11399_v4, %v11392_v47  ;;  %17644 = vmatpush3.bf16.msra.mxu1 %v22154_v19  ;;  %v22182_v15 = vpop.f32.mrb[36].mxu1 }
 0x4f3   :  { %v11425_v13 = vand.u32 4294901760, %v11424_v49  ;;  %16222 = vmatprep.mubr.f32.mxu1 %v23343_v62  ;;  %v11413_v41 = vand.u32 4294901760, %v11412_v8  ;;  %v22185_v48 = vpack.c.bf16 %v11411_v22, %v11404_v56  ;;  %v22189_v46 = vpop.f32.mrb[37].mxu1 }
 0x4f4   :  { %v11418_v60 = vand.u32 4294901760, %v11417_v52  ;;  %17646 = vmatprep.subr.bf16.mxu1 %v22176_v27  ;;  %17806 = vmatprep.subr.bf16.mxu0 %v22176_v27  ;;  %v11406_v45 = vand.u32 4294901760, %v11405_v10  ;;  %v22193_v4 = vpack.c.bf16 %v11424_v49, %v11417_v52 }
 0x4f5   :  { %v11426_v17 = vsub.f32 %v11424_v49, %v11425_v13  ;;  %17808 = vmatpush3.bf16.msra.mxu0 %v22176_v27  ;;  %16223 = vmatmul.mubr.f32.gmra.mrb[62].mxu1 %v23347_v23  ;;  %v23830_v49 = vld [vmem:[#allocation65_spill] sm:$0xff] }
 0x4f6   :  { %v11419_v22 = vsub.f32 %v11417_v52, %v11418_v60  ;;  %v17673_v56 = vpack.c.bf16 %v11413_v41, %v11406_v45  ;;  %v22199_v8 = vpack.c.bf16 %v11425_v13, %v11418_v60  ;;  %17648 = vmatpush3.bf16.msra.mxu1 %v22176_v27  ;;  %v22202_v31 = vpop.f32.mrb[38].mxu1  ;;  %16425 = vmatprep.mubr.f32.mxu1 %v23826_v24  ;;  %v23828_v60 = vld [vmem:[#allocation50_spill] sm:$0xff] }
 0x4f7   :  { %v11427_v10 = vand.u32 4294901760, %v11426_v17  ;;  %17650 = vmatprep.subr.bf16.mxu1 %v22093_v55  ;;  %v22208_v47 = vpop.f32.mrb[39].mxu1  ;;  %v23829_v17 = vld [vmem:[#allocation66_spill] sm:$0xff] }
 0x4f8   :  { %v11420_v52 = vand.u32 4294901760, %v11419_v22  ;;  %16706 = vmatmul.mubr.f32.vlgmr.msra.gmra.mrb[80].mxu0 %v23582_v33  ;;  %v23836_v22 = vld [vmem:[#allocation96_spill] sm:$0xff] }
 0x4f9   :  { %16708 = vmatprep.mubr.f32.mxu0 %v23583_v18  ;;  %16426 = vmatmul.mubr.f32.vlgmr.msra.gmra.mrb[64].mxu1 %v23828_v60 }
 0x4fa   :  { %v17677_v45 = vpack.c.bf16 %v11427_v10, %v11420_v52  ;;  %17652 = vmatpush3.bf16.msra.mxu1 %v22093_v55  ;;  %v22216_v24 = vpop.f32.mrb[40].mxu1  ;;  %16428 = vmatprep.mubr.f32.mxu1 %v23829_v17  ;;  %v23833_v10 = vld [vmem:[#allocation88_spill] sm:$0xff] }
 0x4fb   :  { %17654 = vmatprep.subr.bf16.mxu1 %v22107_v36  ;;  %v22222_v40 = vpop.f32.mrb[41].mxu1  ;;  %v23835_v52 = vld [vmem:[#allocation92_spill] sm:$0xff] }
 0x4fc   :  { %23831 = vst [vmem:[#allocation25_spill] sm:$0xff] %v22222_v40  ;;  %16709 = vmatmul.mubr.f32.gmra.mrb[82].mxu0 %v23585_v16  ;;  %v23840_v40 = vld [vmem:[#allocation104_spill] sm:$0xff] }
 0x4fd   :  { %16711 = vmatprep.mubr.f32.mxu0 %v23309_v25  ;;  %16429 = vmatmul.mubr.f32.gmra.mrb[66].mxu1 %v23833_v10  ;;  %v23837_v10 = vld [vmem:[#allocation103_spill] sm:$0xff] }
 0x4fe   :  { %17656 = vmatpush3.bf16.msra.mxu1 %v22107_v36  ;;  %v22230_v55 = vpop.f32.mrb[42].mxu1  ;;  %16431 = vmatprep.mubr.f32.mxu1 %v23835_v52  ;;  %v23838_v52 = vld [vmem:[#allocation60_spill] sm:$0xff] }
 0x4ff   :  { %23834 = vst [vmem:[#allocation50_spill] sm:$0xff] %v22230_v55  ;;  %17658 = vmatprep.subr.bf16.mxu1 %v22121_v54  ;;  %v22236_v17 = vpop.f32.mrb[43].mxu1  ;;  %v23839_v55 = vld [vmem:[#allocation39_spill] sm:$0xff] }
 0x500   :  { %16712 = vmatmul.mubr.f32.gmra.mrb[84].mxu0 %v23310_v57 }
 0x501   :  { %16432 = vmatmul.mubr.f32.gmra.mrb[68].mxu1 %v23836_v22 }
 0x502   :  { %17660 = vmatpush3.bf16.msra.mxu1 %v22121_v54  ;;  %v22243_v36 = vpop.f32.mrb[44].mxu1  ;;  %16434 = vmatprep.mubr.f32.mxu1 %v23837_v10  ;;  %v23841_v54 = vld [vmem:[#allocation108_spill] sm:$0xff] }
 0x503   :  { %17662 = vmatprep.subr.bf16.mxu1 %v22135_v5  ;;  %v22249_v39 = vpop.f32.mrb[45].mxu1 }
 0x504   :  { %v12422_v13 = vsub.f32 %v22249_v39, %v23839_v55 }
 0x505   :  { %16435 = vmatmul.mubr.f32.gmra.mrb[70].mxu1 %v23840_v40  ;;  %v23843_v40 = vld [vmem:[#allocation114_spill] sm:$0xff] }
 0x506   :  { %17664 = vmatpush3.bf16.msra.mxu1 %v22135_v5  ;;  %v22255_v22 = vpop.f32.mrb[46].mxu1  ;;  %16437 = vmatprep.mubr.f32.mxu1 %v23841_v54  ;;  %v23856_v5 = vld [vmem:[#allocation90_spill] sm:$0xff]  ;;  %v23863_v54 = vld [vmem:[#allocation113_spill] sm:$0xff] }
 0x507   :  { %17666 = vmatprep.subr.bf16.mxu1 %v22157_v14  ;;  %v12425_v10 = vsub.f32 %v22255_v22, %v21895_v59  ;;  %v22261_v41 = vpop.f32.mrb[47].mxu1 }
 0x508   :  { %v12424_v60 = vsub.f32 %v22261_v41, %v21902_v7 }
 0x509   :  { %16438 = vmatmul.mubr.f32.gmra.mrb[72].mxu1 %v23759_v12  ;;  %v23844_v12 = vld [vmem:[#allocation19_spill] sm:$0xff] }
 0x50a   :  { %17668 = vmatpush3.bf16.msra.mxu1 %v22157_v14  ;;  %16440 = vmatprep.mubr.f32.mxu1 %v23761_v20  ;;  %v23846_v20 = vld [vmem:[#allocation116_spill] sm:$0xff]  ;;  %v23857_v14 = vld [vmem:[#allocation94_spill] sm:$0xff] }
 0x50b   :  { %17670 = vmatprep.subr.bf16.mxu1 %v22179_v51 }
 0x50d   :  { %16441 = vmatmul.mubr.f32.gmra.mrb[74].mxu1 %v23768_v28  ;;  %v23845_v28 = vld [vmem:[#allocation45_spill] sm:$0xff] }
 0x50e   :  { %17672 = vmatpush3.bf16.msra.mxu1 %v22179_v51  ;;  %16443 = vmatprep.mubr.f32.mxu1 %v23769_v6  ;;  %v23842_v51 = vld [vmem:[#allocation23_spill] sm:$0xff] }
 0x50f   :  { %17674 = vmatprep.subr.bf16.mxu1 %v17673_v56  ;;  %v23847_v6 = vld [vmem:[#allocation51_spill] sm:$0xff] }
 0x511   :  { %16444 = vmatmul.mubr.f32.gmra.mrb[76].mxu1 %v23770_v21  ;;  %v23848_v21 = vld [vmem:[#allocation59_spill] sm:$0xff] }
 0x512   :  { %17676 = vmatpush3.bf16.msra.mxu1 %v17673_v56  ;;  %16446 = vmatprep.mubr.f32.mxu1 %v23771_v32  ;;  %v23849_v32 = vld [vmem:[#allocation119_spill] sm:$0xff]  ;;  %v23861_v56 = vld [vmem:[#allocation106_spill] sm:$0xff] }
 0x513   :  { %17678 = vmatprep.subr.bf16.mxu1 %v17677_v45 }
 0x515   :  { %16447 = vmatmul.mubr.f32.gmra.mrb[78].mxu1 %v23772_v34  ;;  %v23850_v34 = vld [vmem:[#allocation62_spill] sm:$0xff] }
 0x516   :  { %17680 = vmatpush3.bf16.msra.mxu1 %v17677_v45  ;;  %16481 = vmatprep.mubr.f32.mxu1 %v23581_v38  ;;  %v23862_v45 = vld [vmem:[#allocation110_spill] sm:$0xff] }
 0x517   :  { %17682 = vmatprep.subr.bf16.mxu1 %v22075_v35 }
 0x519   :  { %16482 = vmatmul.mubr.f32.vlgmr.msra.gmra.mrb[64].mxu1 %v23582_v33 }
 0x51a   :  { %17684 = vmatpush3.bf16.msra.mxu1 %v22075_v35  ;;  %16484 = vmatprep.mubr.f32.mxu1 %v23583_v18  ;;  %v23851_v35 = vld [vmem:[#allocation79_spill] sm:$0xff] }
 0x51b   :  { %17686 = vmatprep.subr.bf16.mxu1 %v22087_v63 }
 0x51d   :  { %16485 = vmatmul.mubr.f32.gmra.mrb[66].mxu1 %v23585_v16 }
 0x51e   :  { %17688 = vmatpush3.bf16.msra.mxu1 %v22087_v63  ;;  %16487 = vmatprep.mubr.f32.mxu1 %v23309_v25  ;;  %v23852_v63 = vld [vmem:[#allocation121_spill] sm:$0xff] }
 0x51f   :  { %17690 = vmatprep.subr.bf16.mxu1 %v22101_v61 }
 0x521   :  { %16488 = vmatmul.mubr.f32.gmra.mrb[68].mxu1 %v23310_v57 }
 0x522   :  { %17692 = vmatpush3.bf16.msra.mxu1 %v22101_v61  ;;  %16490 = vmatprep.mubr.f32.mxu1 %v23410_v26  ;;  %v23853_v61 = vld [vmem:[#allocation81_spill] sm:$0xff] }
 0x523   :  { %17694 = vmatprep.subr.bf16.mxu1 %v22115_v50 }
 0x525   :  { %16491 = vmatmul.mubr.f32.gmra.mrb[70].mxu1 %v23591_v30 }
 0x526   :  { %17696 = vmatpush3.bf16.msra.mxu1 %v22115_v50  ;;  %16493 = vmatprep.mubr.f32.mxu1 %v23316_v29  ;;  %v23854_v50 = vld [vmem:[#allocation84_spill] sm:$0xff] }
 0x527   :  { %17698 = vmatprep.subr.bf16.mxu1 %v22129_v43 }
 0x529   :  { %16494 = vmatmul.mubr.f32.gmra.mrb[72].mxu1 %v23321_v42 }
 0x52a   :  { %17700 = vmatpush3.bf16.msra.mxu1 %v22129_v43  ;;  %16496 = vmatprep.mubr.f32.mxu1 %v23324_v1  ;;  %v23855_v43 = vld [vmem:[#allocation56_spill] sm:$0xff] }
 0x52b   :  { %17702 = vmatprep.subr.bf16.mxu1 %v22152_v58 }
 0x52d   :  { %16497 = vmatmul.mubr.f32.gmra.mrb[74].mxu1 %v23330_v3 }
 0x52e   :  { %17704 = vmatpush3.bf16.msra.mxu1 %v22152_v58  ;;  %16499 = vmatprep.mubr.f32.mxu1 %v23332_v9  ;;  %v23858_v58 = vld [vmem:[#allocation15_spill] sm:$0xff] }
 0x52f   :  { %17706 = vmatprep.subr.bf16.mxu1 %v22174_v2 }
 0x531   :  { %16500 = vmatmul.mubr.f32.gmra.mrb[76].mxu1 %v23598_v44 }
 0x532   :  { %17708 = vmatpush3.bf16.msra.mxu1 %v22174_v2  ;;  %16502 = vmatprep.mubr.f32.mxu1 %v23343_v62  ;;  %v23859_v2 = vld [vmem:[#allocation98_spill] sm:$0xff] }
 0x533   :  { %17710 = vmatprep.subr.bf16.mxu1 %v22193_v4 }
 0x535   :  { %16503 = vmatmul.mubr.f32.gmra.mrb[78].mxu1 %v23347_v23 }
 0x536   :  { %17712 = vmatpush3.bf16.msra.mxu1 %v22193_v4  ;;  %16537 = vmatprep.mubr.f32.mxu1 %v23842_v51  ;;  %v23860_v4 = vld [vmem:[#allocation101_spill] sm:$0xff]  ;;  %v23864_v51 = vld [vmem:[#allocation24_spill] sm:$0xff] }
 0x537   :  { %17714 = vmatprep.subr.bf16.mxu1 %v23843_v40 }
 0x539   :  { %16538 = vmatmul.mubr.f32.vlgmr.msra.gmra.mrb[64].mxu1 %v23844_v12  ;;  %v23865_v12 = vld [vmem:[#allocation118_spill] sm:$0xff] }
 0x53a   :  { %17716 = vmatpush3.bf16.msra.mxu1 %v23843_v40  ;;  %16540 = vmatprep.mubr.f32.mxu1 %v23845_v28  ;;  %v23866_v28 = vld [vmem:[#allocation42_spill] sm:$0xff] }
 0x53b   :  { %17718 = vmatprep.subr.bf16.mxu1 %v23846_v20 }
 0x53d   :  { %16541 = vmatmul.mubr.f32.gmra.mrb[66].mxu1 %v23847_v6  ;;  %v23867_v6 = vld [vmem:[#allocation48_spill] sm:$0xff] }
 0x53e   :  { %17720 = vmatpush3.bf16.msra.mxu1 %v23846_v20  ;;  %16543 = vmatprep.mubr.f32.mxu1 %v23848_v21  ;;  %v23868_v21 = vld [vmem:[#allocation120_spill] sm:$0xff] }
 0x53f   :  { %17722 = vmatprep.subr.bf16.mxu1 %v23849_v32 }
 0x541   :  { %16544 = vmatmul.mubr.f32.gmra.mrb[68].mxu1 %v23850_v34  ;;  %v23869_v34 = vld [vmem:[#allocation57_spill] sm:$0xff] }
 0x542   :  { %17724 = vmatpush3.bf16.msra.mxu1 %v23849_v32  ;;  %16546 = vmatprep.mubr.f32.mxu1 %v23851_v35  ;;  %v23870_v35 = vld [vmem:[#allocation71_spill] sm:$0xff] }
 0x543   :  { %17726 = vmatprep.subr.bf16.mxu1 %v23852_v63 }
 0x545   :  { %16547 = vmatmul.mubr.f32.gmra.mrb[70].mxu1 %v23853_v61  ;;  %v23871_v61 = vld [vmem:[#allocation78_spill] sm:$0xff] }
 0x546   :  { %17728 = vmatpush3.bf16.msra.mxu1 %v23852_v63  ;;  %16549 = vmatprep.mubr.f32.mxu1 %v23854_v50  ;;  %v23872_v50 = vld [vmem:[#allocation75_spill] sm:$0xff] }
 0x547   :  { %17730 = vmatprep.subr.bf16.mxu1 %v23855_v43 }
 0x549   :  { %16550 = vmatmul.mubr.f32.gmra.mrb[72].mxu1 %v23856_v5  ;;  %v23873_v5 = vld [vmem:[#allocation86_spill] sm:$0xff] }
 0x54a   :  { %17732 = vmatpush3.bf16.msra.mxu1 %v23855_v43  ;;  %16552 = vmatprep.mubr.f32.mxu1 %v23857_v14  ;;  %v23874_v14 = vld [vmem:[#allocation61_spill] sm:$0xff] }
 0x54b   :  { %17734 = vmatprep.subr.bf16.mxu1 %v23858_v58 }
 0x54d   :  { %16553 = vmatmul.mubr.f32.gmra.mrb[74].mxu1 %v23859_v2  ;;  %v23875_v2 = vld [vmem:[#allocation89_spill] sm:$0xff] }
 0x54e   :  { %17736 = vmatpush3.bf16.msra.mxu1 %v23858_v58  ;;  %16555 = vmatprep.mubr.f32.mxu1 %v23860_v4  ;;  %v23876_v4 = vld [vmem:[#allocation93_spill] sm:$0xff] }
 0x54f   :  { %17738 = vmatprep.subr.bf16.mxu1 %v22154_v19 }
 0x551   :  { %16556 = vmatmul.mubr.f32.gmra.mrb[76].mxu1 %v23861_v56  ;;  %v23877_v56 = vld [vmem:[#allocation82_spill] sm:$0xff] }
 0x552   :  { %17740 = vmatpush3.bf16.msra.mxu1 %v22154_v19  ;;  %16558 = vmatprep.mubr.f32.mxu1 %v23862_v45  ;;  %v23878_v45 = vld [vmem:[#allocation97_spill] sm:$0xff] }
 0x553   :  { %17742 = vmatprep.subr.bf16.mxu1 %v22176_v27 }
 0x555   :  { %16559 = vmatmul.mubr.f32.gmra.mrb[78].mxu1 %v23863_v54  ;;  %v23879_v54 = vld [vmem:[#allocation100_spill] sm:$0xff] }
 0x556   :  { %17744 = vmatpush3.bf16.msra.mxu1 %v22176_v27  ;;  %16593 = vmatprep.mubr.f32.mxu1 %v23864_v51  ;;  %v23880_v51 = vld [vmem:[#allocation105_spill] sm:$0xff] }
 0x557   :  { %17746 = vmatprep.subr.bf16.mxu1 %v23865_v12 }
 0x559   :  { %16594 = vmatmul.mubr.f32.vlgmr.msra.gmra.mrb[64].mxu1 %v23866_v28  ;;  %v23882_v28 = vld [vmem:[#allocation112_spill] sm:$0xff] }
 0x55a   :  { %17748 = vmatpush3.bf16.msra.mxu1 %v23865_v12  ;;  %16596 = vmatprep.mubr.f32.mxu1 %v23867_v6  ;;  %v23881_v12 = vld [vmem:[#allocation109_spill] sm:$0xff]  ;;  %v23883_v6 = vld [vmem:[#allocation115_spill] sm:$0xff] }
 0x55b   :  { %17750 = vmatprep.subr.bf16.mxu1 %v23868_v21 }
 0x55d   :  { %16597 = vmatmul.mubr.f32.gmra.mrb[66].mxu1 %v23869_v34  ;;  %v23897_v34 = vld [vmem:[#allocation129_spill] sm:$0xff] }
 0x55e   :  { %17752 = vmatpush3.bf16.msra.mxu1 %v23868_v21  ;;  %16599 = vmatprep.mubr.f32.mxu1 %v23870_v35  ;;  %v23884_v21 = vld [vmem:[#allocation117_spill] sm:$0xff]  ;;  %v23898_v35 = vld [vmem:[#allocation64_spill] sm:$0xff] }
 0x55f   :  { %17754 = vmatprep.subr.bf16.mxu1 %v23871_v61 }
 0x561   :  { %16600 = vmatmul.mubr.f32.gmra.mrb[68].mxu1 %v23872_v50 }
 0x562   :  { %17756 = vmatpush3.bf16.msra.mxu1 %v23871_v61  ;;  %16602 = vmatprep.mubr.f32.mxu1 %v23873_v5  ;;  %v23899_v61 = vsub.f32 %v23897_v34, %v23898_v35 }
 0x563   :  { %17758 = vmatprep.subr.bf16.mxu1 %v23874_v14 }
 0x565   :  { %16603 = vmatmul.mubr.f32.gmra.mrb[70].mxu1 %v23875_v2 }
 0x566   :  { %17760 = vmatpush3.bf16.msra.mxu1 %v23874_v14  ;;  %16605 = vmatprep.mubr.f32.mxu1 %v23876_v4  ;;  %v23900_v14 = vld [vmem:[#allocation73_spill] sm:$0xff] }
 0x567   :  { %17762 = vmatprep.subr.bf16.mxu1 %v23877_v56  ;;  %v23901_v2 = vsub.f32 %v22167_v53, %v23900_v14 }
 0x569   :  { %16606 = vmatmul.mubr.f32.gmra.mrb[72].mxu1 %v23878_v45  ;;  %v23902_v45 = vld [vmem:[#allocation21_spill] sm:$0xff] }
 0x56a   :  { %17764 = vmatpush3.bf16.msra.mxu1 %v23877_v56  ;;  %16608 = vmatprep.mubr.f32.mxu1 %v23879_v54  ;;  %v12557_v54 = vadd.f32 0.0001, %v23902_v45  ;;  %v23919_v45 = vld [vmem:[#allocation27_spill] sm:$0xff] }
 0x56b   :  { %17766 = vmatprep.subr.bf16.mxu1 %v22163_v11 }
 0x56d   :  { %16609 = vmatmul.mubr.f32.gmra.mrb[74].mxu1 %v23880_v51 }
 0x56e   :  { %17768 = vmatpush3.bf16.msra.mxu1 %v22163_v11  ;;  %16611 = vmatprep.mubr.f32.mxu1 %v23881_v12  ;;  %v23903_v12 = vld [vmem:[#allocation80_spill] sm:$0xff] }
 0x56f   :  { %17770 = vmatprep.subr.bf16.mxu1 %v22185_v48 }
 0x571   :  { %16612 = vmatmul.mubr.f32.gmra.mrb[76].mxu1 %v23882_v28 }
 0x572   :  { %17772 = vmatpush3.bf16.msra.mxu1 %v22185_v48  ;;  %16614 = vmatprep.mubr.f32.mxu1 %v23883_v6 }
 0x573   :  { %17774 = vmatprep.subr.bf16.mxu1 %v22199_v8 }
 0x575   :  { %16615 = vmatmul.mubr.f32.gmra.mrb[78].mxu1 %v23884_v21  ;;  %v23904_v21 = vld [vmem:[#allocation54_spill] sm:$0xff] }
 0x576   :  { %17776 = vmatpush3.bf16.msra.mxu1 %v22199_v8  ;;  %16649 = vmatprep.mubr.f32.mxu1 %v23581_v38 }
 0x577   :  { %17809 = vmatprep.subr.bf16.mxu1 %v23843_v40 }
 0x579   :  { %16650 = vmatmul.mubr.f32.vlgmr.msra.gmra.mrb[64].mxu1 %v23582_v33  ;;  %v23886_v33 = vld [vmem:[#allocation33_spill] sm:$0xff] }
 0x57a   :  { %17817 = vmatpush3.bf16.msra.mxu1 %v23843_v40  ;;  %16652 = vmatprep.mubr.f32.mxu1 %v23583_v18  ;;  %v23890_v18 = vld [vmem:[#allocation128_spill] sm:$0xff]  ;;  %v23895_v40 = vld [vmem:[#allocation46_spill] sm:$0xff] }
 0x57b   :  { %17810 = vmatprep.subr.bf16.mxu1 %v23846_v20 }
 0x57d   :  { %16653 = vmatmul.mubr.f32.gmra.mrb[66].mxu1 %v23585_v16  ;;  %v23887_v16 = vld [vmem:[#allocation16_spill] sm:$0xff] }
 0x57e   :  { %17818 = vmatpush3.bf16.msra.mxu1 %v23846_v20  ;;  %16655 = vmatprep.mubr.f32.mxu1 %v23309_v25  ;;  %v12554_v20 = vadd.f32 0.0001, %v23895_v40 }
 0x57f   :  { %17811 = vmatprep.subr.bf16.mxu1 %v23849_v32 }
 0x581   :  { %16656 = vmatmul.mubr.f32.gmra.mrb[68].mxu1 %v23310_v57  ;;  %v23885_v57 = vld [vmem:[#allocation91_spill] sm:$0xff] }
 0x582   :  { %17819 = vmatpush3.bf16.msra.mxu1 %v23849_v32  ;;  %16658 = vmatprep.mubr.f32.mxu1 %v23410_v26 }
 0x583   :  { %17812 = vmatprep.subr.bf16.mxu1 %v23852_v63 }
 0x585   :  { %16659 = vmatmul.mubr.f32.gmra.mrb[70].mxu1 %v23591_v30 }
 0x586   :  { %17820 = vmatpush3.bf16.msra.mxu1 %v23852_v63  ;;  %16661 = vmatprep.mubr.f32.mxu1 %v23316_v29  ;;  %v23896_v63 = vld [vmem:[#allocation76_spill] sm:$0xff] }
 0x587   :  { %17813 = vmatprep.subr.bf16.mxu1 %v23855_v43 }
 0x589   :  { %16662 = vmatmul.mubr.f32.gmra.mrb[72].mxu1 %v23321_v42 }
 0x58a   :  { %17821 = vmatpush3.bf16.msra.mxu1 %v23855_v43  ;;  %16664 = vmatprep.mubr.f32.mxu1 %v23324_v1 }
 0x58b   :  { %17814 = vmatprep.subr.bf16.mxu1 %v23858_v58 }
 0x58d   :  { %16665 = vmatmul.mubr.f32.gmra.mrb[74].mxu1 %v23330_v3 }
 0x58e   :  { %17822 = vmatpush3.bf16.msra.mxu1 %v23858_v58  ;;  %16667 = vmatprep.mubr.f32.mxu1 %v23332_v9 }
 0x58f   :  { %17815 = vmatprep.subr.bf16.mxu1 %v22154_v19 }
 0x591   :  { %16668 = vmatmul.mubr.f32.gmra.mrb[76].mxu1 %v23598_v44 }
 0x592   :  { %17823 = vmatpush3.bf16.msra.mxu1 %v22154_v19  ;;  %16670 = vmatprep.mubr.f32.mxu1 %v23343_v62 }
 0x593   :  { %17816 = vmatprep.subr.bf16.mxu1 %v22176_v27 }
 0x595   :  { %16671 = vmatmul.mubr.f32.gmra.mrb[78].mxu1 %v23347_v23 }
 0x596   :  { %17824 = vmatpush3.bf16.msra.mxu1 %v22176_v27  ;;  %16714 = vmatprep.mubr.f32.mxu1 %v23410_v26  ;;  %v23894_v27 = vld [vmem:[#allocation69_spill] sm:$0xff] }
 0x599   :  { %16715 = vmatmul.mubr.f32.vlgmr.msra.gmra.mrb[70].mxu1 %v23591_v30 }
 0x59a   :  { %16717 = vmatprep.mubr.f32.mxu1 %v23316_v29 }
 0x59d   :  { %16718 = vmatmul.mubr.f32.gmra.mrb[72].mxu1 %v23321_v42  ;;  %v23888_v42 = vld [vmem:[#allocation85_spill] sm:$0xff] }
 0x59e   :  { %16720 = vmatprep.mubr.f32.mxu1 %v23324_v1  ;;  %v23889_v38 = vsub.f32 %v23887_v16, %v23888_v42 }
 0x5a1   :  { %16721 = vmatmul.mubr.f32.gmra.mrb[74].mxu1 %v23330_v3  ;;  %v23891_v3 = vld [vmem:[#allocation22_spill] sm:$0xff] }
 0x5a2   :  { %16723 = vmatprep.mubr.f32.mxu1 %v23332_v9  ;;  %v23892_v48 = vsub.f32 %v23890_v18, %v23891_v3  ;;  %v23909_v3 = vld [vmem:[#allocation107_spill] sm:$0xff] }
 0x5a5   :  { %16724 = vmatmul.mubr.f32.gmra.mrb[76].mxu1 %v23598_v44  ;;  %v23893_v44 = vld [vmem:[#allocation43_spill] sm:$0xff] }
 0x5a6   :  { %16726 = vmatprep.mubr.f32.mxu1 %v23343_v62  ;;  %v12555_v19 = vadd.f32 0.0001, %v23893_v44 }
 0x5a9   :  { %16727 = vmatmul.mubr.f32.gmra.mrb[78].mxu1 %v23347_v23 }
 0x5ac   :  { %v16203_v25 = vpop.f32.mrb[48].mxu1 }
 0x5ad   :  { %v12427_v26 = vsub.f32 %v16203_v25, %v23885_v57  ;;  %v9814_v30 = vpop.f32.mrb[49].mxu1  ;;  %v12556_v25 = vadd.f32 0.0001, %v23904_v21 }
 0x5ae   :  { %v12426_v29 = vsub.f32 %v9814_v30, %v23886_v33 }
 0x5af   :  { %v12571_v1 = vadd.f32 %v12427_v26, %v23889_v38  ;;  %v23905_v26 = vld [vmem:[#allocation99_spill] sm:$0xff]  ;;  %v23908_v38 = vsub.f32 %v22189_v46, %v21705_v0 }
 0x5b0   :  { %v12570_v9 = vadd.f32 %v12426_v29, %v23892_v48  ;;  %v16206_v11 = vpop.f32.mrb[50].mxu1  ;;  %v23906_v29 = vld [vmem:[#allocation44_spill] sm:$0xff]  ;;  %v12559_v48 = vadd.f32 0.0001, %v23909_v3  ;;  %v23915_v46 = vld [vmem:[#allocation95_spill] sm:$0xff] }
 0x5b1   :  { %v12587_v62 = vadd.f32 0.0009, %v12571_v1  ;;  %v12429_v23 = vsub.f32 %v16206_v11, %v23894_v27  ;;  %v9826_v8 = vpop.f32.mrb[51].mxu1  ;;  %v23907_v16 = vsub.f32 %v22182_v15, %v23906_v29  ;;  %v23910_v11 = vld [vmem:[#allocation31_spill] sm:$0xff] }
 0x5b2   :  { %v12586_v32 = vadd.f32 0.0009, %v12570_v9  ;;  %v12428_v43 = vsub.f32 %v9826_v8, %v23896_v63  ;;  %v23912_v8 = vld [vmem:[#allocation34_spill] sm:$0xff] }
 0x5b3   :  { %v22425_v58 = vmul.f32 %v12587_v62, %v12555_v19  ;;  %v12573_v50 = vadd.f32 %v12429_v23, %v23899_v61  ;;  %v23911_v62 = vld [vmem:[#allocation30_spill] sm:$0xff] }
 0x5b4   :  { %v22430_v5 = vmul.f32 %v12586_v32, %v12554_v20  ;;  %v12572_v4 = vadd.f32 %v12428_v43, %v23901_v2  ;;  %v16209_v56 = vpop.f32.mrb[52].mxu1  ;;  %v12558_v27 = vadd.f32 0.0001, %v23911_v62  ;;  %v23913_v20 = vld [vmem:[#allocation52_spill] sm:$0xff]  ;;  %v23916_v43 = vsub.f32 %v22208_v47, %v23915_v46  ;;  %v23917_v61 = vld [vmem:[#allocation18_spill] sm:$0xff] }
 0x5b5   :  { %v12589_v51 = vadd.f32 0.0009, %v12573_v50  ;;  %v12431_v28 = vsub.f32 %v16209_v56, %v23903_v12  ;;  %v9838_v6 = vpop.f32.mrb[53].mxu1  ;;  %v23914_v32 = vsub.f32 %v22202_v31, %v23913_v20  ;;  %v12561_v50 = vadd.f32 0.0001, %v23917_v61  ;;  %v23918_v2 = vld [vmem:[#allocation74_spill] sm:$0xff] }
 0x5b6   :  { %v12588_v57 = vadd.f32 0.0009, %v12572_v4  ;;  %v12430_v30 = vsub.f32 %v9838_v6, %v23905_v26  ;;  %v23920_v12 = vld [vmem:[#allocation26_spill] sm:$0xff]  ;;  %v23921_v6 = vsub.f32 %v22216_v24, %v23830_v49  ;;  %18634 = vrcp.f32 %v22425_v58 }
 0x5b7   :  { %v22439_v33 = vmul.f32 %v12589_v51, %v12557_v54  ;;  %v12575_v42 = vadd.f32 %v12431_v28, %v23907_v16  ;;  %v12560_v54 = vadd.f32 0.0001, %v23919_v45  ;;  %v23925_v16 = vld [vmem:[#allocation17_spill] sm:$0xff]  ;;  %v23929_v24 = vld [vmem:[#allocation50_spill] sm:$0xff]  ;;  %18636 = vrcp.f32 %v22430_v5 }
 0x5b8   :  { %v22444_v53 = vmul.f32 %v12588_v57, %v12556_v25  ;;  %v12574_v1 = vadd.f32 %v12430_v30, %v23908_v38  ;;  %v16212_v18 = vpop.f32.mrb[54].mxu1  ;;  %v23922_v25 = vld [vmem:[#allocation25_spill] sm:$0xff]  ;;  %v23923_v57 = vld [vmem:[#allocation58_spill] sm:$0xff] }
 0x5b9   :  { %v12591_v9 = vadd.f32 0.0009, %v12575_v42  ;;  %v12433_v44 = vsub.f32 %v16212_v18, %v23910_v11  ;;  %v9850_v19 = vpop.f32.mrb[55].mxu1  ;;  %v23924_v26 = vsub.f32 %v23922_v25, %v23923_v57  ;;  %v12563_v42 = vadd.f32 0.0001, %v23925_v16  ;;  %v23930_v62 = vld [vmem:[#allocation70_spill] sm:$0xff] }
 0x5ba   :  { %v12590_v23 = vadd.f32 0.0009, %v12574_v1  ;;  %v12432_v40 = vsub.f32 %v9850_v19, %v23912_v8  ;;  %v23926_v1 = vld [vmem:[#allocation32_spill] sm:$0xff]  ;;  %v23939_v25 = vld [vmem:[#allocation63_spill] sm:$0xff]  ;;  %18638 = vrcp.f32 %v22439_v33 }
 0x5bb   :  { %v22453_v15 = vmul.f32 %v12591_v9, %v12559_v48  ;;  %v12577_v63 = vadd.f32 %v12433_v44, %v23914_v32  ;;  %v23927_v48 = vld [vmem:[#allocation28_spill] sm:$0xff]  ;;  %v23928_v44 = vld [vmem:[#allocation37_spill] sm:$0xff]  ;;  %18640 = vrcp.f32 %v22444_v53 }
 0x5bc   :  { %v22458_v0 = vmul.f32 %v12590_v23, %v12558_v27  ;;  %v12576_v34 = vadd.f32 %v12432_v40, %v23916_v43  ;;  %v16215_v35 = vpop.f32.mrb[56].mxu1  ;;  %v12562_v9 = vadd.f32 0.0001, %v23927_v48  ;;  %v23931_v27 = vsub.f32 %v23929_v24, %v23930_v62  ;;  %v23943_v48 = vld [vmem:[#allocation111_spill] sm:$0xff] }
 0x5bd   :  { %v12593_v14 = vadd.f32 0.0009, %v12577_v63  ;;  %v12435_v4 = vsub.f32 %v16215_v35, %v23918_v2  ;;  %v9862_v56 = vpop.f32.mrb[57].mxu1  ;;  %v23932_v40 = vsub.f32 %v22236_v17, %v21829_v37  ;;  %v23933_v63 = vld [vmem:[#allocation49_spill] sm:$0xff]  ;;  %18642 = vrcp.f32 %v22453_v15 }
 0x5be   :  { %v12592_v51 = vadd.f32 0.0009, %v12576_v34  ;;  %v12434_v28 = vsub.f32 %v9862_v56, %v23920_v12  ;;  %v12565_v46 = vadd.f32 0.0001, %v23933_v63  ;;  %v23934_v34 = vld [vmem:[#allocation68_spill] sm:$0xff]  ;;  %18644 = vrcp.f32 %v22458_v0 }
 0x5bf   :  { %v22467_v31 = vmul.f32 %v12593_v14, %v12561_v50  ;;  %v12579_v21 = vadd.f32 %v12435_v4, %v23921_v6  ;;  %v23935_v50 = vld [vmem:[#allocation55_spill] sm:$0xff] }
 0x5c0   :  { %v22472_v47 = vmul.f32 %v12592_v51, %v12560_v54  ;;  %v12578_v30 = vadd.f32 %v12434_v28, %v23924_v26  ;;  %v16218_v29 = vpop.f32.mrb[58].mxu1  ;;  %v12564_v14 = vadd.f32 0.0001, %v23935_v50  ;;  %v23936_v4 = vld [vmem:[#allocation47_spill] sm:$0xff]  ;;  %v23937_v54 = vsub.f32 %v22243_v36, %v23838_v52  ;;  %v23938_v28 = vld [vmem:[#allocation122_spill] sm:$0xff]  ;;  %v23947_v50 = vld [vmem:[#allocation40_spill] sm:$0xff] }
 0x5c1   :  { %v12595_v38 = vadd.f32 0.0009, %v12579_v21  ;;  %v12437_v18 = vsub.f32 %v16218_v29, %v23926_v1  ;;  %v9874_v3 = vpop.f32.mrb[59].mxu1  ;;  %v12567_v6 = vadd.f32 0.0001, %v23938_v28  ;;  %v23942_v1 = vld [vmem:[#allocation127_spill] sm:$0xff]  ;;  %18646 = vrcp.f32 %v22467_v31 }
 0x5c2   :  { %v12594_v11 = vadd.f32 0.0009, %v12578_v30  ;;  %v12436_v19 = vsub.f32 %v9874_v3, %v23928_v44  ;;  %v23940_v30 = vld [vmem:[#allocation124_spill] sm:$0xff]  ;;  %18648 = vrcp.f32 %v22472_v47  ;;  %v23954_v31 = vld [vmem:[#allocation35_spill] sm:$0xff] }
 0x5c3   :  { %v22481_v49 = vmul.f32 %v12595_v38, %v12563_v42  ;;  %v12581_v23 = vadd.f32 %v12437_v18, %v23931_v27  ;;  %v12566_v29 = vadd.f32 0.0001, %v23940_v30  ;;  %v23941_v42 = vld [vmem:[#allocation125_spill] sm:$0xff]  ;;  %v12569_v18 = vadd.f32 0.0001, %v23942_v1 }
 0x5c4   :  { %v22486_v8 = vmul.f32 %v12594_v11, %v12562_v9  ;;  %v12580_v20 = vadd.f32 %v12436_v19, %v23932_v40  ;;  %v16221_v32 = vpop.f32.mrb[60].mxu1  ;;  %v12568_v9 = vadd.f32 0.0001, %v23943_v48 }
 0x5c5   :  { %v12597_v43 = vadd.f32 0.0009, %v12581_v23  ;;  %v12439_v35 = vsub.f32 %v16221_v32, %v23934_v34  ;;  %v9886_v61 = vpop.f32.mrb[61].mxu1  ;;  %v23944_v23 = vld [vmem:[#allocation102_spill] sm:$0xff]  ;;  %18650 = vrcp.f32 %v22481_v49 }
 0x5c6   :  { %v12596_v2 = vadd.f32 0.0009, %v12580_v20  ;;  %v12438_v56 = vsub.f32 %v9886_v61, %v23936_v4  ;;  %v12459_v40 = vmul.f32 2.0, %v23944_v23  ;;  %v23945_v20 = vld [vmem:[#allocation41_spill] sm:$0xff]  ;;  %18652 = vrcp.f32 %v22486_v8 }
 0x5c7   :  { %v22495_v45 = vmul.f32 %v12597_v43, %v12565_v46  ;;  %v12583_v51 = vadd.f32 %v12439_v35, %v23937_v54  ;;  %v12458_v32 = vmul.f32 2.0, %v23945_v20  ;;  %v23946_v46 = vld [vmem:[#allocation87_spill] sm:$0xff] }
 0x5c8   :  { %v22500_v37 = vmul.f32 %v12596_v2, %v12564_v14  ;;  %v12582_v17 = vadd.f32 %v12438_v56, %v12422_v13  ;;  %v16224_v12 = vpop.f32.mrb[62].mxu1  ;;  %v12461_v43 = vmul.f32 2.0, %v23946_v46  ;;  %v12460_v14 = vmul.f32 2.0, %v23947_v50 }
 0x5c9   :  { %v12599_v21 = vadd.f32 0.0009, %v12583_v51  ;;  %v12441_v57 = vsub.f32 %v16224_v12, %v23939_v25  ;;  %v9898_v26 = vpop.f32.mrb[63].mxu1  ;;  %v12475_v56 = vadd.f32 0.0001, %v12459_v40  ;;  %18654 = vrcp.f32 %v22495_v45 }
 0x5ca   :  { %v12598_v16 = vadd.f32 0.0009, %v12582_v17  ;;  %v12440_v38 = vsub.f32 %v9898_v26, %v23941_v42  ;;  %v12474_v54 = vadd.f32 0.0001, %v12458_v32  ;;  %v12477_v12 = vadd.f32 0.0001, %v12461_v43  ;;  %v18635_v26 = vpop.eup %18634 }
 0x5cb   :  { %v22509_v36 = vmul.f32 %v12599_v21, %v12567_v6  ;;  %v12585_v52 = vadd.f32 %v12441_v57, %v12425_v10  ;;  %v16707_v55 = vpop.f32.mrb[80].mxu0  ;;  %v12476_v30 = vadd.f32 0.0001, %v12460_v14  ;;  %18656 = vrcp.f32 %v22500_v37 }
 0x5cc   :  { %v22514_v39 = vmul.f32 %v12598_v16, %v12566_v29  ;;  %v12584_v13 = vadd.f32 %v12440_v38, %v12424_v60  ;;  %v12268_v24 = vpop.f32.mrb[81].mxu0  ;;  %v18637_v38 = vpop.eup %18636 }
 0x5cd   :  { %v12601_v3 = vadd.f32 0.0009, %v12585_v52  ;;  %v23948_v52 = vld [vmem:[#allocation83_spill] sm:$0xff]  ;;  %18658 = vrcp.f32 %v22509_v36 }
 0x5ce   :  { %v12600_v11 = vadd.f32 0.0009, %v12584_v13  ;;  %v12463_v13 = vmul.f32 2.0, %v23948_v52  ;;  %18660 = vrcp.f32 %v22514_v39 }
 0x5cf   :  { %v22521_v44 = vmul.f32 %v12601_v3, %v12569_v18  ;;  %v16710_v59 = vpop.f32.mrb[82].mxu0  ;;  %v23949_v18 = vld [vmem:[#allocation20_spill] sm:$0xff] }
 0x5d0   :  { %v22523_v19 = vmul.f32 %v12600_v11, %v12568_v9  ;;  %v12280_v22 = vpop.f32.mrb[83].mxu0  ;;  %v12462_v3 = vmul.f32 2.0, %v23949_v18 }
 0x5d1   :  { %18662 = vrcp.f32 %v22521_v44 }
 0x5d2   :  { %18664 = vrcp.f32 %v22523_v19 }
 0x5d3   :  { %v16713_v10 = vpop.f32.mrb[84].mxu0 }
 0x5d4   :  { %v12292_v62 = vpop.f32.mrb[85].mxu0 }
 0x64c   :  { %v16651_v7 = vpop.f32.mrb[64].mxu1 }
 0x64d   :  { %v17825_v41 = vadd.f32 %v16707_v55, %v16651_v7  ;;  %v12091_v60 = vpop.f32.mrb[65].mxu1 }
 0x64e   :  { %v17826_v27 = vadd.f32 %v12268_v24, %v12091_v60  ;;  %v12479_v60 = vadd.f32 0.0001, %v12463_v13 }
 0x64f   :  { %v12443_v63 = vsub.f32 %v17825_v41, %v23944_v23 }
 0x650   :  { %v12442_v34 = vsub.f32 %v17826_v27, %v23945_v20  ;;  %v16654_v35 = vpop.f32.mrb[66].mxu1  ;;  %v12478_v20 = vadd.f32 0.0001, %v12462_v3 }
 0x651   :  { %v12491_v58 = vmul.f32 2.0, %v12443_v63  ;;  %v17827_v5 = vadd.f32 %v16710_v59, %v16654_v35  ;;  %v12103_v61 = vpop.f32.mrb[67].mxu1 }
 0x652   :  { %v12490_v2 = vmul.f32 2.0, %v12442_v34  ;;  %v17828_v4 = vadd.f32 %v12280_v22, %v12103_v61  ;;  %v18639_v22 = vpop.eup %18638 }
 0x653   :  { %v12507_v51 = vadd.f32 0.0009, %v12491_v58  ;;  %v12445_v17 = vsub.f32 %v17827_v5, %v23946_v46  ;;  %v18641_v41 = vpop.eup %18640 }
 0x654   :  { %v12506_v33 = vadd.f32 0.0009, %v12490_v2  ;;  %v12444_v28 = vsub.f32 %v17828_v4, %v23947_v50  ;;  %v16657_v6 = vpop.f32.mrb[68].mxu1  ;;  %v18643_v43 = vpop.eup %18642 }
 0x655   :  { %v12523_v53 = vmul.f32 %v12507_v51, %v12475_v56  ;;  %v12493_v21 = vmul.f32 2.0, %v12445_v17  ;;  %v17829_v25 = vadd.f32 %v16713_v10, %v16657_v6  ;;  %v12115_v57 = vpop.f32.mrb[69].mxu1  ;;  %v18645_v58 = vpop.eup %18644  ;;  %v23950_v17 = vld [vmem:[#allocation53_spill] sm:$0xff] }
 0x656   :  { %v12522_v29 = vmul.f32 %v12506_v33, %v12474_v54  ;;  %v12492_v16 = vmul.f32 2.0, %v12444_v28  ;;  %v17830_v42 = vadd.f32 %v12292_v62, %v12115_v57  ;;  %v23951_v33 = vld [vmem:[#allocation67_spill] sm:$0xff] }
 0x657   :  { %v12621_v55 = vmul.f32 %v18635_v26, %v12523_v53  ;;  %v12509_v15 = vadd.f32 0.0009, %v12493_v21  ;;  %v12447_v1 = vsub.f32 %v17829_v25, %v23948_v52  ;;  %v12464_v28 = vmul.f32 2.0, %v23951_v33  ;;  %v23952_v53 = vld [vmem:[#allocation36_spill] sm:$0xff]  ;;  %v23953_v26 = vld [vmem:[#allocation29_spill] sm:$0xff]  ;;  %v23955_v52 = vld [vmem:[#allocation38_spill] sm:$0xff] }
 0x658   :  { %v12619_v48 = vmul.f32 %v18637_v38, %v12522_v29  ;;  %v12508_v0 = vadd.f32 0.0009, %v12492_v16  ;;  %v12446_v9 = vsub.f32 %v17830_v42, %v23949_v18  ;;  %v12467_v21 = vmul.f32 2.0, %v23952_v53 }
 0x659   :  { %v12651_v11 = vsel %vm123_vm0, %v12621_v55, 0.0  ;;  %v12525_v24 = vmul.f32 %v12509_v15, %v12477_v12  ;;  %v12495_v59 = vmul.f32 2.0, %v12447_v1  ;;  %v12465_v12 = vmul.f32 2.0, %v23950_v17  ;;  %v23956_v55 = vld [vmem:[#allocation77_spill] sm:$0xff] }
 0x65a   :  { %v12650_v10 = vsel %vm123_vm0, %v12619_v48, 0.0  ;;  %v12524_v62 = vmul.f32 %v12508_v0, %v12476_v30  ;;  %v12494_v7 = vmul.f32 2.0, %v12446_v9  ;;  %v12466_v30 = vmul.f32 2.0, %v23953_v26  ;;  %v23957_v48 = vld [vmem:[#allocation123_spill] sm:$0xff] }
 0x65b   :  { %v12652_v27 = vadd.f32 %v12651_v11, %v12650_v10  ;;  %v12625_v23 = vmul.f32 %v18639_v22, %v12525_v24  ;;  %v12511_v40 = vadd.f32 0.0009, %v12495_v59  ;;  %v12481_v16 = vadd.f32 0.0001, %v12465_v12 }
 0x65c   :  { %v12623_v32 = vmul.f32 %v18641_v41, %v12524_v62  ;;  %v12510_v63 = vadd.f32 0.0009, %v12494_v7  ;;  %v12469_v42 = vmul.f32 2.0, %v23954_v31  ;;  %v12480_v38 = vadd.f32 0.0001, %v12464_v28  ;;  %v18647_v7 = vpop.eup %18646 }
 0x65d   :  { %v12527_v46 = vmul.f32 %v12511_v40, %v12479_v60  ;;  %v12655_v50 = vsel %vm123_vm0, %v12625_v23, 0.0  ;;  %v12468_v13 = vmul.f32 2.0, %v23955_v52  ;;  %v12471_v15 = vmul.f32 2.0, %v23956_v55 }
 0x65e   :  { %v12653_v34 = vsel %vm123_vm0, %v12623_v32, 0.0  ;;  %v12526_v35 = vmul.f32 %v12510_v63, %v12478_v20  ;;  %v12483_v3 = vadd.f32 0.0001, %v12467_v21  ;;  %v12470_v0 = vmul.f32 2.0, %v23957_v48  ;;  %v18649_v20 = vpop.eup %18648 }
 0x65f   :  { %v12654_v5 = vadd.f32 %v12653_v34, %v12652_v27  ;;  %v12629_v61 = vmul.f32 %v18643_v43, %v12527_v46  ;;  %v12482_v24 = vadd.f32 0.0001, %v12466_v30  ;;  %v12485_v22 = vadd.f32 0.0001, %v12469_v42 }
 0x660   :  { %v12627_v14 = vmul.f32 %v18645_v58, %v12526_v35  ;;  %v12484_v41 = vadd.f32 0.0001, %v12468_v13  ;;  %v12487_v60 = vadd.f32 0.0001, %v12471_v15  ;;  %v12486_v32 = vadd.f32 0.0001, %v12470_v0 }
 0x661   :  { %v12656_v2 = vadd.f32 %v12655_v50, %v12654_v5  ;;  %v12659_v54 = vsel %vm123_vm0, %v12629_v61, 0.0  ;;  %v23958_v58 = vld [vmem:[#allocation72_spill] sm:$0xff] }
 0x662   :  { %v12657_v4 = vsel %vm123_vm0, %v12627_v14, 0.0  ;;  %v12473_v5 = vmul.f32 2.0, %v23958_v58  ;;  %v18651_v14 = vpop.eup %18650 }
 0x663   :  { %v12658_v56 = vadd.f32 %v12657_v4, %v12656_v2 }
 0x665   :  { %v12660_v51 = vadd.f32 %v12659_v54, %v12658_v56 }
 0x66c   :  { %v16716_v6 = vpop.f32.mrb[70].mxu1 }
 0x66d   :  { %v12449_v25 = vsub.f32 %v16716_v6, %v23950_v17  ;;  %v12304_v57 = vpop.f32.mrb[71].mxu1  ;;  %v18653_v17 = vpop.eup %18652 }
 0x66e   :  { %v12448_v29 = vsub.f32 %v12304_v57, %v23951_v33  ;;  %v18655_v30 = vpop.eup %18654 }
 0x66f   :  { %v12497_v47 = vmul.f32 2.0, %v12449_v25 }
 0x670   :  { %v12496_v1 = vmul.f32 2.0, %v12448_v29  ;;  %v16719_v18 = vpop.f32.mrb[72].mxu1  ;;  %v23959_v29 = vld [vmem:[#allocation126_spill] sm:$0xff] }
 0x671   :  { %v12513_v9 = vadd.f32 0.0009, %v12497_v47  ;;  %v12451_v49 = vsub.f32 %v16719_v18, %v23952_v53  ;;  %v12316_v11 = vpop.f32.mrb[73].mxu1 }
 0x672   :  { %v12512_v59 = vadd.f32 0.0009, %v12496_v1  ;;  %v12450_v8 = vsub.f32 %v12316_v11, %v23953_v26 }
 0x673   :  { %v12529_v10 = vmul.f32 %v12513_v9, %v12481_v16  ;;  %v12499_v62 = vmul.f32 2.0, %v12451_v49  ;;  %v12472_v16 = vmul.f32 2.0, %v23959_v29 }
 0x674   :  { %v12528_v27 = vmul.f32 %v12512_v59, %v12480_v38  ;;  %v12498_v23 = vmul.f32 2.0, %v12450_v8  ;;  %v16722_v40 = vpop.f32.mrb[74].mxu1  ;;  %v18657_v38 = vpop.eup %18656 }
 0x675   :  { %v12633_v63 = vmul.f32 %v18647_v7, %v12529_v10  ;;  %v12515_v46 = vadd.f32 0.0009, %v12499_v62  ;;  %v12453_v45 = vsub.f32 %v16722_v40, %v23954_v31  ;;  %v12328_v43 = vpop.f32.mrb[75].mxu1  ;;  %v18659_v11 = vpop.eup %18658  ;;  %v12489_v10 = vadd.f32 0.0001, %v12473_v5 }
 0x676   :  { %v12631_v34 = vmul.f32 %v18649_v20, %v12528_v27  ;;  %v12514_v35 = vadd.f32 0.0009, %v12498_v23  ;;  %v12452_v37 = vsub.f32 %v12328_v43, %v23955_v52  ;;  %v12488_v23 = vadd.f32 0.0001, %v12472_v16 }
 0x677   :  { %v12531_v61 = vmul.f32 %v12515_v46, %v12483_v3  ;;  %v12501_v50 = vmul.f32 2.0, %v12453_v45  ;;  %v12663_v53 = vsel %vm123_vm0, %v12633_v63, 0.0 }
 0x678   :  { %v12661_v2 = vsel %vm123_vm0, %v12631_v34, 0.0  ;;  %v12530_v4 = vmul.f32 %v12514_v35, %v12482_v24  ;;  %v12500_v56 = vmul.f32 2.0, %v12452_v37  ;;  %v16725_v54 = vpop.f32.mrb[76].mxu1 }
 0x679   :  { %v12662_v36 = vadd.f32 %v12661_v2, %v12660_v51  ;;  %v12637_v12 = vmul.f32 %v18651_v14, %v12531_v61  ;;  %v12517_v33 = vadd.f32 0.0009, %v12501_v50  ;;  %v12455_v28 = vsub.f32 %v16725_v54, %v23956_v55  ;;  %v12340_v6 = vpop.f32.mrb[77].mxu1 }
 0x67a   :  { %v12635_v39 = vmul.f32 %v18653_v17, %v12530_v4  ;;  %v12516_v21 = vadd.f32 0.0009, %v12500_v56  ;;  %v12454_v25 = vsub.f32 %v12340_v6, %v23957_v48 }
 0x67b   :  { %v12664_v44 = vadd.f32 %v12663_v53, %v12662_v36  ;;  %v12533_v57 = vmul.f32 %v12517_v33, %v12485_v22  ;;  %v12503_v26 = vmul.f32 2.0, %v12455_v28  ;;  %v12667_v19 = vsel %vm123_vm0, %v12637_v12, 0.0  ;;  %v18661_v22 = vpop.eup %18660 }
 0x67c   :  { %v12665_v51 = vsel %vm123_vm0, %v12635_v39, 0.0  ;;  %v12532_v31 = vmul.f32 %v12516_v21, %v12484_v41  ;;  %v12502_v42 = vmul.f32 2.0, %v12454_v25  ;;  %v16728_v47 = vpop.f32.mrb[78].mxu1  ;;  %v18663_v27 = vpop.eup %18662 }
 0x67d   :  { %v12666_v52 = vadd.f32 %v12665_v51, %v12664_v44  ;;  %v12641_v13 = vmul.f32 %v18655_v30, %v12533_v57  ;;  %v12519_v55 = vadd.f32 0.0009, %v12503_v26  ;;  %v12457_v15 = vsub.f32 %v16728_v47, %v23958_v58  ;;  %v12352_v1 = vpop.f32.mrb[79].mxu1  ;;  %v18665_v34 = vpop.eup %18664 }
 0x67e   :  { %v12639_v18 = vmul.f32 %v18657_v38, %v12532_v31  ;;  %v12518_v3 = vadd.f32 0.0009, %v12502_v42  ;;  %v12456_v48 = vsub.f32 %v12352_v1, %v23959_v29 }
 0x67f   :  { %v12668_v0 = vadd.f32 %v12667_v19, %v12666_v52  ;;  %v12535_v9 = vmul.f32 %v12519_v55, %v12487_v60  ;;  %v12505_v49 = vmul.f32 2.0, %v12457_v15  ;;  %v12671_v40 = vsel %vm123_vm0, %v12641_v13, 0.0 }
 0x680   :  { %v12669_v24 = vsel %vm123_vm0, %v12639_v18, 0.0  ;;  %v12534_v59 = vmul.f32 %v12518_v3, %v12486_v32  ;;  %v12504_v8 = vmul.f32 2.0, %v12456_v48 }
 0x681   :  { %v12670_v62 = vadd.f32 %v12669_v24, %v12668_v0  ;;  %v12645_v7 = vmul.f32 %v18659_v11, %v12535_v9  ;;  %v12521_v41 = vadd.f32 0.0009, %v12505_v49 }
 0x682   :  { %v12643_v20 = vmul.f32 %v18661_v22, %v12534_v59  ;;  %v12520_v63 = vadd.f32 0.0009, %v12504_v8 }
 0x683   :  { %v12537_v46 = vmul.f32 %v12521_v41, %v12489_v10  ;;  %v12672_v45 = vadd.f32 %v12671_v40, %v12670_v62  ;;  %v12675_v58 = vsel %vm123_vm0, %v12645_v7, 0.0 }
 0x684   :  { %v12536_v60 = vmul.f32 %v12520_v63, %v12488_v23  ;;  %v12673_v43 = vsel %vm123_vm0, %v12643_v20, 0.0 }
 0x685   :  { %v12649_v35 = vmul.f32 %v18663_v27, %v12537_v46  ;;  %v12674_v32 = vadd.f32 %v12673_v43, %v12672_v45 }
 0x686   :  { %v12647_v37 = vmul.f32 %v18665_v34, %v12536_v60 }
 0x687   :  { %v12676_v5 = vadd.f32 %v12675_v58, %v12674_v32  ;;  %v12679_v14 = vsel %vm123_vm0, %v12649_v35, 0.0 }
 0x688   :  { %v12677_v61 = vsel %vm123_vm0, %v12647_v37, 0.0 }
 0x689   :  { %v12678_v50 = vadd.f32 %v12677_v61, %v12676_v5 }
 0x68b   :  { %v12680_v2 = vadd.f32 %v12679_v14, %v12678_v50 }
 0x68d   :  { %12681 = vadd.xlane.f32.xlu0 %v12680_v2 }
 0x71a   :  { %v12682_v4 = vpop.xlane.xlu0 %12681 }
 0x71b   :  { %v12683_v56 = vrot.slane %v12682_v4, 4 }
 0x71d   :  { %v12684_v54 = vadd.f32 %v12683_v56, %v12682_v4 }
 0x71f   :  { %v12685_v17 = vrot.slane %v12684_v54, 2 }
 0x721   :  { %v12686_v36 = vadd.f32 %v12685_v17, %v12684_v54 }
 0x723   :  { %v12687_v12 = vrot.slane %v12686_v36, 1 }
 0x725   :  { %v12688_v33 = vadd.f32 %v12687_v12, %v12686_v36 }
 0x727   :  { %18625 = vpush %v12688_v33 }
 0x758   :  { %s18626_s28 = spop %18625 }
 0x759   :  { %v12690_v28 = vstv %s18626_s28 }
 0x75a   :  { %12691 = vst [vmem:[#allocation10] sm:$0xff] %v12690_v28 }
 0x75b   :  { %18811 = shalt.err (!%p18808_p8)
}
 0x75c   :  { %s18812_s14 = scalar_lea.hbm %s22605_s4, 128 }
 0x75d   :  { %p18813_p9 = scmp.ne.s32.totalorder %s22605_s4, %s18812_s14  ;;  %p18816_p10 = scmp.lt.u32.totalorder %s18812_s14, %s22605_s4 }
 0x75f   :  { %p18818_p11 = pnand %p18816_p10, %p18813_p9 }
 0x761   :  { %18821 = shalt.err (!%p18818_p11)
}
 0x762   :  { %12701 = dma.vmem_to_hbm [thread:$0]  %s12699_s27, 128, %s22605_s4, [#allocation4]  }
 0x763   :  { %18828 = dma.done.wait [#allocation4], 128  }
 0x764   :  { %18829 = vsyncadd [#allocation4], 4294967168 }
 0x765   :  { %12705 = vsyncpa [#allocation3], 1 }
 0x766   :  { %12706 = vsyncpa [#allocation6], 1 }
 0x767   :  { %12707 = vsyncpa [#allocation9], 1 }
 0x768   :  { %12708 = vsyncpa [#allocation4], 1 }

</bundles_post_ra>
